<compile_context>
chip_gen: v6e
topology: v6e:2x2x1
jax: 0.10.0
libtpu: 0.0.40
codegen_flags: <defaults>
</compile_context>

<pallas_src>
import jax
import jax.numpy as jnp
from jax.experimental import pallas as pl
from jax.experimental.pallas import tpu as pltpu

# ----------------------------- static shapes --------------------------------
E = 3                                   # electrodes (conv1 kernel height)
W_IN = 400                              # time samples per segment
KH, KW = 3, 9                           # conv1 kernel
C1 = 8                                  # conv1 out channels
POOL = 10                               # AvgPool2d((1,10), stride (1,10))
W_CONV = W_IN - KW + 1                  # 392
W_POOL = (W_CONV - POOL) // POOL + 1    # 39
FEAT = C1 * W_POOL                      # 312  (matches Attention2(312,256) / Linear(312,..))
HID_ATT = 256
T = 2                                   # the two segments / ConvGRU time steps
GRU_HID = 8
GRU_LAYERS = 2
GRU_K = 7                               # ConvGRU kernel (1,7), padding (0,3)
PAD = GRU_K // 2                        # 3
N_STEPS = GRU_LAYERS * T                # 4 attention steps after torch.cat(x, dim=1)
N_CLASSES = 2
COMB_ROWS = 56                          # ConvGRU staging buffer rows (8-aligned data start)
COMB_OFF = 8                            # data rows live at [8, 8+39); pad rows stay zero


def _vpu_matmul(a, w):
    """Tiny (K <= 6) matmul kept on the VPU (far too small for the MXU)."""
    out = a[:, 0:1] * w[0:1, :]
    for k in range(1, w.shape[0]):
        out = out + a[:, k:k + 1] * w[k:k + 1, :]
    return out


# ============ kernel 1: SE + conv1 + BN + ELU + pool + ConvGRU ===============
def features_kernel(x_ref, pm_ref, sew1_ref, seb1_ref, sew2_ref, seb2_ref,
                    cw_ref, cb_ref, wx_ref, wgh_ref, wch_ref, bg_ref, bc_ref,
                    steps_ref, comb_ref):
    nb = x_ref.shape[0]                                           # samples per grid step

    # ConvGRU im2col staging buffer: pad rows must read as zero.  Data rows are fully
    # rewritten before every read, so one cheap whole-buffer zero per grid step is
    # enough (and megacore-safe, unlike a pl.when(program_id==0) init under "parallel").
    comb_ref[...] = jnp.zeros((COMB_ROWS, GRU_HID), jnp.float32)

    x3 = x_ref[...]                                               # (nb, 400, 6)

    # ---- SELayer(3) per segment, vectorized over samples & segments ---------
    means = jnp.concatenate(
        [jnp.mean(x3[s], axis=0, keepdims=True) for s in range(nb)], axis=0)  # (nb, 6)
    g = jnp.maximum(_vpu_matmul(means, sew1_ref[...]) + seb1_ref[...], 0.0)
    g = jax.nn.sigmoid(_vpu_matmul(g, sew2_ref[...]) + seb2_ref[...])         # (nb, 6)
    xs = (x3 * g[:, None, :]).reshape(nb * W_IN, T * E)           # (nb*400, 6)

    # ---- conv1(3x9, valid) + folded BN + ELU: ONE matmul over all samples/segments ----
    # Sample s occupies rows [s*400, s*400+400); valid conv rows are [s*400, s*400+392),
    # so the 9-tap shifted slices of the whole block never bleed across samples for
    # rows the pool actually consumes.
    L = nb * W_IN - (KW - 1)
    col = jnp.concatenate([xs[kw:kw + L, :] for kw in range(KW)], axis=1)     # (L, 54)
    y = jnp.dot(col.astype(jnp.bfloat16), cw_ref[...],
                preferred_element_type=jnp.float32) + cb_ref[...]             # (L, 16)
    y = jnp.where(y > 0, y, jnp.exp(jnp.minimum(y, 0.0)) - 1.0)               # ELU (safe exp)
    y = y.astype(jnp.bfloat16)

    pm = pm_ref[...]                                              # (39, 392) bf16, resident

    def col7(v):
        # 7-tap "same" im2col via the pre-zeroed, 8-aligned staging buffer:
        # one (39,56) operand instead of seven K=8 dots / in-kernel zero concats.
        comb_ref[COMB_OFF:COMB_OFF + W_POOL, :] = v
        cp = comb_ref[...]
        return jnp.concatenate(
            [cp[COMB_OFF - PAD + k:COMB_OFF - PAD + k + W_POOL, :]
             for k in range(GRU_K)], axis=1).astype(jnp.bfloat16)             # (39, 56)

    for s in range(nb):
        # AvgPool(1,10) as a matmul; lanes 0..7 = segment 0, lanes 8..15 = segment 1
        pooled = jnp.dot(pm, y[s * W_IN:s * W_IN + W_CONV, :],
                         preferred_element_type=jnp.float32)                  # (39, 16)
        seq = [pooled[:, :GRU_HID], pooled[:, GRU_HID:]]

        # ---- ConvGRU(8, 8, [(1,7),(1,7)], 2) ---------------------------------
        outs = []
        for layer in range(GRU_LAYERS):
            wx = wx_ref[layer]                                    # (56, 24) bf16 [gate_x|cand_x]
            wgh = wgh_ref[layer]                                  # (56, 16) bf16 gate_h
            wch = wch_ref[layer]                                  # (56, 8)  bf16 cand_h
            bg = bg_ref[layer]                                    # (1, 16)
            bc = bc_ref[layer]                                    # (1, 8)
            h = jnp.zeros((W_POOL, GRU_HID), jnp.float32)
            lay = []
            for t in range(T):
                # x-half of the im2col built once and shared by gate & candidate convs
                xc = jnp.dot(col7(seq[t]), wx,
                             preferred_element_type=jnp.float32)              # (39, 24)
                if t == 0:                                        # h == 0: skip the h-convs
                    gates = xc[:, :2 * GRU_HID] + bg
                else:
                    gates = (xc[:, :2 * GRU_HID] + bg
                             + jnp.dot(col7(h), wgh, preferred_element_type=jnp.float32))
                z = jax.nn.sigmoid(gates[:, :GRU_HID])            # update gate
                r = jax.nn.sigmoid(gates[:, GRU_HID:])            # reset gate
                if t == 0:
                    n = jnp.tanh(xc[:, 2 * GRU_HID:] + bc)
                    h = z * n
                else:
                    n = jnp.tanh(xc[:, 2 * GRU_HID:] + bc
                                 + jnp.dot(col7(r * h), wch,
                                           preferred_element_type=jnp.float32))
                    # TODO(synk): ConvGRU source not provided; h' = (1-z)*h + z*n follows
                    # the common ConvGRU-pytorch convention (torch.nn.GRU is mirrored).
                    h = (1.0 - z) * h + z * n
                lay.append(h)
            outs.extend(lay)                                      # layer-major, then time
            seq = lay
        # one contiguous (4,39,8) writeback per sample instead of four tiny stores
        steps_ref[s] = jnp.stack(outs, axis=0)


def demix_features(x4, w, b_blk):
    b_pad = x4.shape[0]
    c2 = lambda b: (0, 0)
    c3 = lambda b: (0, 0, 0)
    return pl.pallas_call(
        features_kernel,
        out_shape=jax.ShapeDtypeStruct((b_pad, N_STEPS, W_POOL, GRU_HID), jnp.float32),
        grid=(b_pad // b_blk,),
        in_specs=[
            pl.BlockSpec((b_blk, W_IN, T * E), lambda b: (b, 0, 0)),
            pl.BlockSpec((W_POOL, W_CONV), c2),                   # pool matrix (DMA'd once)
            pl.BlockSpec((T * E, T * E), c2),                     # SE W1 (block-diag)
            pl.BlockSpec((1, T * E), c2),
            pl.BlockSpec((T * E, T * E), c2),                     # SE W2 (block-diag)
            pl.BlockSpec((1, T * E), c2),
            pl.BlockSpec((KW * T * E, T * C1), c2),               # conv1 block-diag (54,16)
            pl.BlockSpec((1, T * C1), c2),
            pl.BlockSpec((GRU_LAYERS, GRU_K * GRU_HID, 3 * GRU_HID), c3),   # x-half weights
            pl.BlockSpec((GRU_LAYERS, GRU_K * GRU_HID, 2 * GRU_HID), c3),   # gate h-half
            pl.BlockSpec((GRU_LAYERS, GRU_K * GRU_HID, GRU_HID), c3),       # cand h-half
            pl.BlockSpec((GRU_LAYERS, 1, 2 * GRU_HID), c3),
            pl.BlockSpec((GRU_LAYERS, 1, GRU_HID), c3),
        ],
        out_specs=pl.BlockSpec((b_blk, N_STEPS, W_POOL, GRU_HID),
                               lambda b: (b, 0, 0, 0)),
        scratch_shapes=[pltpu.VMEM((COMB_ROWS, GRU_HID), jnp.float32)],
        compiler_params=pltpu.CompilerParams(dimension_semantics=("parallel",)),
    )(x4, w["pm"], w["se_w1"], w["se_b1"], w["se_w2"], w["se_b2"],
      w["conv_w"], w["conv_b"], w["gru_wx"], w["gru_wgh"], w["gru_wch"],
      w["gru_bg"], w["gru_bc"])


# ================= kernel 2: Attention2(312,256) + classifier ================
def attn_cls_kernel(steps_ref, gs_ref, wa_ref, ba_ref, ua_ref,
                    w1_ref, b1_ref, w2_ref, b2_ref, out_ref):
    steps = steps_ref[...]                                        # (nb*4, 312) f32
    # additive-attention projection for all (sample, step) rows at once (bf16 MXU, f32 acc)
    hid = jnp.tanh(jnp.dot(steps.astype(jnp.bfloat16), wa_ref[...],
                           preferred_element_type=jnp.float32) + ba_ref[...])  # (rows, 256)
    scores = jnp.dot(hid, ua_ref[...], preferred_element_type=jnp.float32)     # (rows, 1)
    # Softmax over each sample's 4 steps, fully vectorized (no per-sample Python loop):
    # a global max shift is valid per group (softmax is shift-invariant) and safe here
    # because scores = u . tanh(.) are tightly bounded; the 0/1 group-sum matrix turns
    # the per-sample reductions into two matmuls on the otherwise-idle MXU.
    e = jnp.exp(scores - jnp.max(scores))                         # (rows, 1)
    gs = gs_ref[...]                                              # (nb, rows)
    den = jnp.dot(gs, e, preferred_element_type=jnp.float32)      # (nb, 1)
    num = jnp.dot(gs, e * steps, preferred_element_type=jnp.float32)           # (nb, 312)
    ctx = num * pl.reciprocal(den)                                # (nb, 312)
    # classifier: Linear(312,312) + ReLU (+ Dropout = identity in eval) + Linear(312,2)
    h1 = jnp.maximum(jnp.dot(ctx.astype(jnp.bfloat16), w1_ref[...],
                             preferred_element_type=jnp.float32) + b1_ref[...], 0.0)
    out_ref[...] = jnp.dot(h1, w2_ref[...],
                           preferred_element_type=jnp.float32) + b2_ref[...]


def _pick_cls_block(b_pad):
    # Batch block for the attention/classifier kernel; multiples of 8 keep the
    # (rows, FEAT) / (b_blk, 2) block shapes legal, the fallback relies on the
    # full-dim exception to the (8,128) tiling rule (single block).
    for cand in (128, 64, 32, 16, 8):
        if b_pad % cand == 0 and b_pad // cand >= 2:
            return cand
    return b_pad


def attn_classifier(steps_flat, w, b_pad):
    b_blk = _pick_cls_block(b_pad)
    rows = b_blk * N_STEPS
    # 0/1 group-sum matrix: gs[i, j] = 1 iff row j belongs to sample i of the block
    gs = (jnp.arange(rows)[None, :] // N_STEPS
          == jnp.arange(b_blk)[:, None]).astype(jnp.float32)
    c2 = lambda i: (0, 0)
    return pl.pallas_call(
        attn_cls_kernel,
        out_shape=jax.ShapeDtypeStruct((b_pad, N_CLASSES), jnp.float32),
        grid=(b_pad // b_blk,),
        in_specs=[
            pl.BlockSpec((rows, FEAT), lambda i: (i, 0)),
            pl.BlockSpec((b_blk, rows), c2),
            pl.BlockSpec((FEAT, HID_ATT), c2),
            pl.BlockSpec((1, HID_ATT), c2),
            pl.BlockSpec((HID_ATT, 1), c2),
            pl.BlockSpec((FEAT, FEAT), c2),
            pl.BlockSpec((1, FEAT), c2),
            pl.BlockSpec((FEAT, N_CLASSES), c2),
            pl.BlockSpec((1, N_CLASSES), c2),
        ],
        out_specs=pl.BlockSpec((b_blk, N_CLASSES), lambda i: (i, 0)),
        compiler_params=pltpu.CompilerParams(dimension_semantics=("parallel",)),
    )(steps_flat, gs, w["attn_w"], w["attn_b"], w["attn_u"],
      w["cls_w1"], w["cls_b1"], w["cls_w2"], w["cls_b2"])


# ========================= host-side weight preparation ======================
def _prepare_weights(p):
    """One-time (jit-fused) rearrangement of torch-style params into kernel layouts."""
    # BatchNorm2d(8), eval mode, folded into conv1 (conv1 has bias=False):
    # scale = gamma * rsqrt(var + eps), bias = beta - mean * scale.
    scale = p["bn_gamma"] * jax.lax.rsqrt(p["bn_var"] + 1e-5)        # (1, 8)
    bias = p["bn_beta"] - p["bn_mean"] * scale                       # (1, 8)
    w9 = (p["conv1_w"] * scale).reshape(KW, E, C1)                   # (9, 3, 8)
    wbd = jnp.zeros((KW, T * E, T * C1), jnp.float32)
    wbd = wbd.at[:, :E, :C1].set(w9).at[:, E:, C1:].set(w9)          # block-diag over segments
    conv_wbd = wbd.reshape(KW * T * E, T * C1).astype(jnp.bfloat16)  # (54, 16)
    conv_b2 = jnp.concatenate([bias, bias], axis=1)                  # (1, 16)

    # SELayer(3): the same 3x3 MLP applied independently per segment -> block-diag (6,6)
    def blockdiag2(wm):
        out = jnp.zeros((T * E, T * E), jnp.float32)
        return out.at[:E, :E].set(wm).at[E:, E:].set(wm)
    se_w1 = blockdiag2(p["se_w1"])
    se_w2 = blockdiag2(p["se_w2"])
    se_b1 = jnp.tile(p["se_b1"], (1, T))
    se_b2 = jnp.tile(p["se_b2"], (1, T))

    # AvgPool2d((1,10)) as a (39, 392) matrix, bf16, resident via constant index_map
    ri = jnp.arange(W_POOL)[:, None]
    ci = jnp.arange(W_CONV)[None, :]
    pm = jnp.where((ci >= ri * POOL) & (ci < ri * POOL + POOL),
                   1.0 / POOL, 0.0).astype(jnp.bfloat16)

    # ConvGRU weights split into x-half / h-half so the x im2col is built once per step
    wg = p["gru_wg"].reshape(GRU_LAYERS, GRU_K, 2 * GRU_HID, 2 * GRU_HID)
    wc = p["gru_wc"].reshape(GRU_LAYERS, GRU_K, 2 * GRU_HID, GRU_HID)
    gru_wx = jnp.concatenate(
        [wg[:, :, :GRU_HID, :].reshape(GRU_LAYERS, GRU_K * GRU_HID, 2 * GRU_HID),
         wc[:, :, :GRU_HID, :].reshape(GRU_LAYERS, GRU_K * GRU_HID, GRU_HID)],
        axis=2).astype(jnp.bfloat16)                                 # (2, 56, 24)
    gru_wgh = wg[:, :, GRU_HID:, :].reshape(
        GRU_LAYERS, GRU_K * GRU_HID, 2 * GRU_HID).astype(jnp.bfloat16)   # (2, 56, 16)
    gru_wch = wc[:, :, GRU_HID:, :].reshape(
        GRU_LAYERS, GRU_K * GRU_HID, GRU_HID).astype(jnp.bfloat16)       # (2, 56, 8)

    return {
        "pm": pm, "se_w1": se_w1, "se_b1": se_b1, "se_w2": se_w2, "se_b2": se_b2,
        "conv_w": conv_wbd, "conv_b": conv_b2,
        "gru_wx": gru_wx, "gru_wgh": gru_wgh, "gru_wch": gru_wch,
        "gru_bg": p["gru_bg"], "gru_bc": p["gru_bc"],
        "attn_w": p["attn_w"].astype(jnp.bfloat16),   # consumed at bf16 on the MXU
        "attn_b": p["attn_b"], "attn_u": p["attn_u"],
        "cls_w1": p["cls_w1"].astype(jnp.bfloat16),
        "cls_b1": p["cls_b1"], "cls_w2": p["cls_w2"], "cls_b2": p["cls_b2"],
    }


# ================================ glue (JAX) =================================
def demix_gru_forward(x, params):
    B = x.shape[0]
    w = _prepare_weights(params)
    # x: (B, 2, 3, 400, 1); torch permute(0,1,4,2,3)+reshape becomes a per-sample
    # time-major layout (B, 400, seg*3 + electrode) for kernel 1.
    x4 = jnp.transpose(x[..., 0], (0, 3, 1, 2)).reshape(B, W_IN, T * E)

    # kernel 1: batch b_blk samples per grid step (amortize per-step pipeline overhead,
    # fill the MXU M dimension); keep grid length >= 2 when possible (v7x megacore).
    b_blk = 8 if B >= 16 else max(1, B // 2)
    b_pad = -(-B // b_blk) * b_blk
    if b_pad != B:
        x4 = jnp.pad(x4, ((0, b_pad - B), (0, 0), (0, 0)))
    steps = demix_features(x4, w, b_blk)                          # (b_pad, 4, 39, 8)

    # Free reshape (trailing dims merge contiguously): feature index = w*8 + c.
    # TODO(synk): a PyTorch checkpoint flattens as c*39 + w, so attn_w / cls_w1 rows
    #             must be permuted once on the host when porting torch weights.
    steps_flat = steps.reshape(b_pad * N_STEPS, FEAT)             # (b_pad*4, 312)
    logits = attn_classifier(steps_flat, w, b_pad)                # (b_pad, 2)
    return logits[:B], 0


# ============================== parameter init ===============================
def init_params(key):
    ks = jax.random.split(key, 20)
    nrm = lambda k, shp, sc=0.1: sc * jax.random.normal(k, shp, jnp.float32)
    return {
        "se_w1": nrm(ks[0], (E, E)), "se_b1": nrm(ks[1], (1, E)),
        "se_w2": nrm(ks[2], (E, E)), "se_b2": nrm(ks[3], (1, E)),
        # conv1: torch (8,1,3,9) stored as (27, 8) with row index kw*3 + electrode
        "conv1_w": nrm(ks[4], (KH * KW, C1)),
        "bn_gamma": 1.0 + nrm(ks[5], (1, C1)),
        "bn_beta": nrm(ks[6], (1, C1)),
        "bn_mean": nrm(ks[7], (1, C1)),
        "bn_var": 1.0 + 0.1 * jax.random.uniform(ks[8], (1, C1), jnp.float32),
        # ConvGRU weights with the 7 taps flattened: row index = k*16 + cin ([x | h])
        "gru_wg": nrm(ks[9], (GRU_LAYERS, GRU_K * 2 * GRU_HID, 2 * GRU_HID)),
        "gru_bg": nrm(ks[10], (GRU_LAYERS, 1, 2 * GRU_HID)),
        "gru_wc": nrm(ks[11], (GRU_LAYERS, GRU_K * 2 * GRU_HID, GRU_HID)),
        "gru_bc": nrm(ks[12], (GRU_LAYERS, 1, GRU_HID)),
        "attn_w": nrm(ks[13], (FEAT, HID_ATT)),
        "attn_b": nrm(ks[14], (1, HID_ATT)),
        "attn_u": nrm(ks[15], (HID_ATT, 1)),
        "cls_w1": nrm(ks[16], (FEAT, FEAT), 0.05),
        "cls_b1": nrm(ks[17], (1, FEAT)),
        "cls_w2": nrm(ks[18], (FEAT, N_CLASSES), 0.05),
        "cls_b2": nrm(ks[19], (1, N_CLASSES)),
    }


# =================================== main ====================================
if __name__ == "__main__":
    key = jax.random.PRNGKey(0)
    k_x, k_p = jax.random.split(key)
    B = 2
    x = jax.random.normal(k_x, (B, T, E, W_IN, 1), jnp.float32)
    params = init_params(k_p)

    fwd = jax.jit(demix_gru_forward)
    logits, _ = fwd(x, params)
    logits = jax.block_until_ready(logits)
    assert logits.shape == (B, N_CLASSES)
    assert bool(jnp.all(jnp.isfinite(logits)))
    print("KERNEL_OK")
</pallas_src>

<mosaic_0001>
module attributes {stable_mosaic.version = 11 : i64} {
  func.func @features_kernel(%arg0: i32, %arg1: memref<1x400x6xf32, #tpu.memory_space<vmem>>, %arg2: memref<39x392xbf16, #tpu.memory_space<vmem>>, %arg3: memref<6x6xf32, #tpu.memory_space<vmem>>, %arg4: memref<1x6xf32, #tpu.memory_space<vmem>>, %arg5: memref<6x6xf32, #tpu.memory_space<vmem>>, %arg6: memref<1x6xf32, #tpu.memory_space<vmem>>, %arg7: memref<54x16xbf16, #tpu.memory_space<vmem>>, %arg8: memref<1x16xf32, #tpu.memory_space<vmem>>, %arg9: memref<2x56x24xbf16, #tpu.memory_space<vmem>>, %arg10: memref<2x56x16xbf16, #tpu.memory_space<vmem>>, %arg11: memref<2x56x8xbf16, #tpu.memory_space<vmem>>, %arg12: memref<2x1x16xf32, #tpu.memory_space<vmem>>, %arg13: memref<2x1x8xf32, #tpu.memory_space<vmem>>, %arg14: memref<1x4x39x8xf32, #tpu.memory_space<vmem>>, %arg15: memref<56x8xf32, #tpu.memory_space<vmem>>) attributes {dimension_semantics = [#tpu.dimension_semantics<parallel>], iteration_bounds = array<i64: 2>, scalar_prefetch = 0 : i64, scratch_operands = 1 : i64, tpu.core_type = #tpu.core_type<tc>, window_params = [{transform_indices = @transform_0, window_bounds = array<i64: 1, 400, 6>}, {pipeline_mode = #tpu.pipeline_mode<synchronous>, transform_indices = @transform_1, window_bounds = array<i64: 39, 392>}, {pipeline_mode = #tpu.pipeline_mode<synchronous>, transform_indices = @transform_2, window_bounds = array<i64: 6, 6>}, {pipeline_mode = #tpu.pipeline_mode<synchronous>, transform_indices = @transform_3, window_bounds = array<i64: 1, 6>}, {pipeline_mode = #tpu.pipeline_mode<synchronous>, transform_indices = @transform_4, window_bounds = array<i64: 6, 6>}, {pipeline_mode = #tpu.pipeline_mode<synchronous>, transform_indices = @transform_5, window_bounds = array<i64: 1, 6>}, {pipeline_mode = #tpu.pipeline_mode<synchronous>, transform_indices = @transform_6, window_bounds = array<i64: 54, 16>}, {pipeline_mode = #tpu.pipeline_mode<synchronous>, transform_indices = @transform_7, window_bounds = array<i64: 1, 16>}, {pipeline_mode = #tpu.pipeline_mode<synchronous>, transform_indices = @transform_8, window_bounds = array<i64: 2, 56, 24>}, {pipeline_mode = #tpu.pipeline_mode<synchronous>, transform_indices = @transform_9, window_bounds = array<i64: 2, 56, 16>}, {pipeline_mode = #tpu.pipeline_mode<synchronous>, transform_indices = @transform_10, window_bounds = array<i64: 2, 56, 8>}, {pipeline_mode = #tpu.pipeline_mode<synchronous>, transform_indices = @transform_11, window_bounds = array<i64: 2, 1, 16>}, {pipeline_mode = #tpu.pipeline_mode<synchronous>, transform_indices = @transform_12, window_bounds = array<i64: 2, 1, 8>}, {transform_indices = @transform_13, window_bounds = array<i64: 1, 4, 39, 8>}]} {
    %cst = arith.constant 0.000000e+00 : f32
    %0 = vector.broadcast %cst : f32 to vector<56x8xf32>
    %c0 = arith.constant 0 : index
    %c0_0 = arith.constant 0 : index
    %1 = vector.load %arg15[%c0, %c0_0] : memref<56x8xf32, #tpu.memory_space<vmem>>, vector<56x8xf32>
    tpu.vector_store %arg15[%c0, %c0_0], %0 {strides = array<i32>} : memref<56x8xf32, #tpu.memory_space<vmem>>, vector<56x8xf32>,
    %c0_1 = arith.constant 0 : index
    %c0_2 = arith.constant 0 : index
    %c0_3 = arith.constant 0 : index
    %2 = vector.load %arg1[%c0_1, %c0_2, %c0_3] : memref<1x400x6xf32, #tpu.memory_space<vmem>>, vector<1x400x6xf32>
    %3 = vector.shape_cast %2 : vector<1x400x6xf32> to vector<400x6xf32>
    %cst_4 = arith.constant dense<0.000000e+00> : vector<6xf32>
    %4 = vector.multi_reduction <add>, %3, %cst_4 [0] : vector<400x6xf32> to vector<6xf32>
    %5 = vector.shape_cast %4 : vector<6xf32> to vector<1x6xf32>
    %cst_5 = arith.constant 4.000000e+02 : f32
    %6 = vector.broadcast %cst_5 : f32 to vector<1x6xf32>
    %7 = arith.divf %5, %6 : vector<1x6xf32>
    %c0_6 = arith.constant 0 : index
    %c0_7 = arith.constant 0 : index
    %8 = vector.load %arg3[%c0_6, %c0_7] : memref<6x6xf32, #tpu.memory_space<vmem>>, vector<6x6xf32>
    %9 = vector.extract_strided_slice %7 {offsets = [0, 0], sizes = [1, 1], strides = [1, 1]} : vector<1x6xf32> to vector<1x1xf32>
    %10 = vector.extract_strided_slice %8 {offsets = [0, 0], sizes = [1, 6], strides = [1, 1]} : vector<6x6xf32> to vector<1x6xf32>
    %11 = vector.broadcast %9 : vector<1x1xf32> to vector<1x6xf32>
    %12 = arith.mulf %11, %10 : vector<1x6xf32>
    %13 = vector.extract_strided_slice %7 {offsets = [0, 1], sizes = [1, 1], strides = [1, 1]} : vector<1x6xf32> to vector<1x1xf32>
    %14 = vector.extract_strided_slice %8 {offsets = [1, 0], sizes = [1, 6], strides = [1, 1]} : vector<6x6xf32> to vector<1x6xf32>
    %15 = vector.broadcast %13 : vector<1x1xf32> to vector<1x6xf32>
    %16 = arith.mulf %15, %14 : vector<1x6xf32>
    %17 = arith.addf %12, %16 : vector<1x6xf32>
    %18 = vector.extract_strided_slice %7 {offsets = [0, 2], sizes = [1, 1], strides = [1, 1]} : vector<1x6xf32> to vector<1x1xf32>
    %19 = vector.extract_strided_slice %8 {offsets = [2, 0], sizes = [1, 6], strides = [1, 1]} : vector<6x6xf32> to vector<1x6xf32>
    %20 = vector.broadcast %18 : vector<1x1xf32> to vector<1x6xf32>
    %21 = arith.mulf %20, %19 : vector<1x6xf32>
    %22 = arith.addf %17, %21 : vector<1x6xf32>
    %23 = vector.extract_strided_slice %7 {offsets = [0, 3], sizes = [1, 1], strides = [1, 1]} : vector<1x6xf32> to vector<1x1xf32>
    %24 = vector.extract_strided_slice %8 {offsets = [3, 0], sizes = [1, 6], strides = [1, 1]} : vector<6x6xf32> to vector<1x6xf32>
    %25 = vector.broadcast %23 : vector<1x1xf32> to vector<1x6xf32>
    %26 = arith.mulf %25, %24 : vector<1x6xf32>
    %27 = arith.addf %22, %26 : vector<1x6xf32>
    %28 = vector.extract_strided_slice %7 {offsets = [0, 4], sizes = [1, 1], strides = [1, 1]} : vector<1x6xf32> to vector<1x1xf32>
    %29 = vector.extract_strided_slice %8 {offsets = [4, 0], sizes = [1, 6], strides = [1, 1]} : vector<6x6xf32> to vector<1x6xf32>
    %30 = vector.broadcast %28 : vector<1x1xf32> to vector<1x6xf32>
    %31 = arith.mulf %30, %29 : vector<1x6xf32>
    %32 = arith.addf %27, %31 : vector<1x6xf32>
    %33 = vector.extract_strided_slice %7 {offsets = [0, 5], sizes = [1, 1], strides = [1, 1]} : vector<1x6xf32> to vector<1x1xf32>
    %34 = vector.extract_strided_slice %8 {offsets = [5, 0], sizes = [1, 6], strides = [1, 1]} : vector<6x6xf32> to vector<1x6xf32>
    %35 = vector.broadcast %33 : vector<1x1xf32> to vector<1x6xf32>
    %36 = arith.mulf %35, %34 : vector<1x6xf32>
    %37 = arith.addf %32, %36 : vector<1x6xf32>
    %c0_8 = arith.constant 0 : index
    %c0_9 = arith.constant 0 : index
    %38 = vector.load %arg4[%c0_8, %c0_9] : memref<1x6xf32, #tpu.memory_space<vmem>>, vector<1x6xf32>
    %39 = arith.addf %37, %38 : vector<1x6xf32>
    %cst_10 = arith.constant 0.000000e+00 : f32
    %40 = vector.broadcast %cst_10 : f32 to vector<1x6xf32>
    %41 = arith.maximumf %39, %40 : vector<1x6xf32>
    %c0_11 = arith.constant 0 : index
    %c0_12 = arith.constant 0 : index
    %42 = vector.load %arg5[%c0_11, %c0_12] : memref<6x6xf32, #tpu.memory_space<vmem>>, vector<6x6xf32>
    %43 = vector.extract_strided_slice %41 {offsets = [0, 0], sizes = [1, 1], strides = [1, 1]} : vector<1x6xf32> to vector<1x1xf32>
    %44 = vector.extract_strided_slice %42 {offsets = [0, 0], sizes = [1, 6], strides = [1, 1]} : vector<6x6xf32> to vector<1x6xf32>
    %45 = vector.broadcast %43 : vector<1x1xf32> to vector<1x6xf32>
    %46 = arith.mulf %45, %44 : vector<1x6xf32>
    %47 = vector.extract_strided_slice %41 {offsets = [0, 1], sizes = [1, 1], strides = [1, 1]} : vector<1x6xf32> to vector<1x1xf32>
    %48 = vector.extract_strided_slice %42 {offsets = [1, 0], sizes = [1, 6], strides = [1, 1]} : vector<6x6xf32> to vector<1x6xf32>
    %49 = vector.broadcast %47 : vector<1x1xf32> to vector<1x6xf32>
    %50 = arith.mulf %49, %48 : vector<1x6xf32>
    %51 = arith.addf %46, %50 : vector<1x6xf32>
    %52 = vector.extract_strided_slice %41 {offsets = [0, 2], sizes = [1, 1], strides = [1, 1]} : vector<1x6xf32> to vector<1x1xf32>
    %53 = vector.extract_strided_slice %42 {offsets = [2, 0], sizes = [1, 6], strides = [1, 1]} : vector<6x6xf32> to vector<1x6xf32>
    %54 = vector.broadcast %52 : vector<1x1xf32> to vector<1x6xf32>
    %55 = arith.mulf %54, %53 : vector<1x6xf32>
    %56 = arith.addf %51, %55 : vector<1x6xf32>
    %57 = vector.extract_strided_slice %41 {offsets = [0, 3], sizes = [1, 1], strides = [1, 1]} : vector<1x6xf32> to vector<1x1xf32>
    %58 = vector.extract_strided_slice %42 {offsets = [3, 0], sizes = [1, 6], strides = [1, 1]} : vector<6x6xf32> to vector<1x6xf32>
    %59 = vector.broadcast %57 : vector<1x1xf32> to vector<1x6xf32>
    %60 = arith.mulf %59, %58 : vector<1x6xf32>
    %61 = arith.addf %56, %60 : vector<1x6xf32>
    %62 = vector.extract_strided_slice %41 {offsets = [0, 4], sizes = [1, 1], strides = [1, 1]} : vector<1x6xf32> to vector<1x1xf32>
    %63 = vector.extract_strided_slice %42 {offsets = [4, 0], sizes = [1, 6], strides = [1, 1]} : vector<6x6xf32> to vector<1x6xf32>
    %64 = vector.broadcast %62 : vector<1x1xf32> to vector<1x6xf32>
    %65 = arith.mulf %64, %63 : vector<1x6xf32>
    %66 = arith.addf %61, %65 : vector<1x6xf32>
    %67 = vector.extract_strided_slice %41 {offsets = [0, 5], sizes = [1, 1], strides = [1, 1]} : vector<1x6xf32> to vector<1x1xf32>
    %68 = vector.extract_strided_slice %42 {offsets = [5, 0], sizes = [1, 6], strides = [1, 1]} : vector<6x6xf32> to vector<1x6xf32>
    %69 = vector.broadcast %67 : vector<1x1xf32> to vector<1x6xf32>
    %70 = arith.mulf %69, %68 : vector<1x6xf32>
    %71 = arith.addf %66, %70 : vector<1x6xf32>
    %c0_13 = arith.constant 0 : index
    %c0_14 = arith.constant 0 : index
    %72 = vector.load %arg6[%c0_13, %c0_14] : memref<1x6xf32, #tpu.memory_space<vmem>>, vector<1x6xf32>
    %73 = arith.addf %71, %72 : vector<1x6xf32>
    %74 = arith.negf %73 : vector<1x6xf32>
    %75 = math.exp %74 : vector<1x6xf32>
    %cst_15 = arith.constant 1.000000e+00 : f32
    %76 = vector.broadcast %cst_15 : f32 to vector<1x6xf32>
    %77 = arith.addf %76, %75 : vector<1x6xf32>
    %78 = arith.divf %76, %77 : vector<1x6xf32>
    %79 = vector.shape_cast %78 : vector<1x6xf32> to vector<1x1x6xf32>
    %80 = vector.broadcast %79 : vector<1x1x6xf32> to vector<1x400x6xf32>
    %81 = arith.mulf %2, %80 : vector<1x400x6xf32>
    %82 = vector.shape_cast %81 : vector<1x400x6xf32> to vector<400x6xf32>
    %83 = vector.extract_strided_slice %82 {offsets = [0, 0], sizes = [392, 6], strides = [1, 1]} : vector<400x6xf32> to vector<392x6xf32>
    %84 = vector.extract_strided_slice %82 {offsets = [1, 0], sizes = [392, 6], strides = [1, 1]} : vector<400x6xf32> to vector<392x6xf32>
    %85 = vector.extract_strided_slice %82 {offsets = [2, 0], sizes = [392, 6], strides = [1, 1]} : vector<400x6xf32> to vector<392x6xf32>
    %86 = vector.extract_strided_slice %82 {offsets = [3, 0], sizes = [392, 6], strides = [1, 1]} : vector<400x6xf32> to vector<392x6xf32>
    %87 = vector.extract_strided_slice %82 {offsets = [4, 0], sizes = [392, 6], strides = [1, 1]} : vector<400x6xf32> to vector<392x6xf32>
    %88 = vector.extract_strided_slice %82 {offsets = [5, 0], sizes = [392, 6], strides = [1, 1]} : vector<400x6xf32> to vector<392x6xf32>
    %89 = vector.extract_strided_slice %82 {offsets = [6, 0], sizes = [392, 6], strides = [1, 1]} : vector<400x6xf32> to vector<392x6xf32>
    %90 = vector.extract_strided_slice %82 {offsets = [7, 0], sizes = [392, 6], strides = [1, 1]} : vector<400x6xf32> to vector<392x6xf32>
    %91 = vector.extract_strided_slice %82 {offsets = [8, 0], sizes = [392, 6], strides = [1, 1]} : vector<400x6xf32> to vector<392x6xf32>
    %92 = tpu.concatenate %83, %84, %85, %86, %87, %88, %89, %90, %91 in 1 : vector<392x6xf32>, vector<392x6xf32>, vector<392x6xf32>, vector<392x6xf32>, vector<392x6xf32>, vector<392x6xf32>, vector<392x6xf32>, vector<392x6xf32>, vector<392x6xf32> -> vector<392x54xf32>
    %93 = arith.truncf %92 : vector<392x54xf32> to vector<392x54xbf16>
    %c0_16 = arith.constant 0 : index
    %c0_17 = arith.constant 0 : index
    %94 = vector.load %arg7[%c0_16, %c0_17] : memref<54x16xbf16, #tpu.memory_space<vmem>>, vector<54x16xbf16>
    %cst_18 = arith.constant dense<0.000000e+00> : vector<392x16xf32>
    %95 = tpu.matmul %93, %94, %cst_18 {dimension_numbers = #tpu.dot_dimension_numbers<[1], [0], [0], [1], [0, 0, 1, 1], [], []>} : vector<392x54xbf16>, vector<54x16xbf16>, vector<392x16xf32> -> vector<392x16xf32>
    %c0_19 = arith.constant 0 : index
    %c0_20 = arith.constant 0 : index
    %96 = vector.load %arg8[%c0_19, %c0_20] : memref<1x16xf32, #tpu.memory_space<vmem>>, vector<1x16xf32>
    %97 = vector.broadcast %96 : vector<1x16xf32> to vector<392x16xf32>
    %98 = arith.addf %95, %97 : vector<392x16xf32>
    %cst_21 = arith.constant 0.000000e+00 : f32
    %99 = vector.broadcast %cst_21 : f32 to vector<392x16xf32>
    %100 = arith.cmpf ogt, %98, %99 : vector<392x16xf32>
    %cst_22 = arith.constant 0.000000e+00 : f32
    %101 = vector.broadcast %cst_22 : f32 to vector<392x16xf32>
    %102 = arith.minimumf %98, %101 : vector<392x16xf32>
    %103 = math.exp %102 : vector<392x16xf32>
    %cst_23 = arith.constant 1.000000e+00 : f32
    %104 = vector.broadcast %cst_23 : f32 to vector<392x16xf32>
    %105 = arith.subf %103, %104 : vector<392x16xf32>
    %106 = arith.select %100, %98, %105 : vector<392x16xi1>, vector<392x16xf32>
    %107 = arith.truncf %106 : vector<392x16xf32> to vector<392x16xbf16>
    %c0_24 = arith.constant 0 : index
    %c0_25 = arith.constant 0 : index
    %108 = vector.load %arg2[%c0_24, %c0_25] : memref<39x392xbf16, #tpu.memory_space<vmem>>, vector<39x392xbf16>
    %cst_26 = arith.constant dense<0.000000e+00> : vector<39x16xf32>
    %109 = tpu.matmul %108, %107, %cst_26 {dimension_numbers = #tpu.dot_dimension_numbers<[1], [0], [0], [1], [0, 0, 1, 1], [], []>} : vector<39x392xbf16>, vector<392x16xbf16>, vector<39x16xf32> -> vector<39x16xf32>
    %110 = vector.extract_strided_slice %109 {offsets = [0, 0], sizes = [39, 8], strides = [1, 1]} : vector<39x16xf32> to vector<39x8xf32>
    %111 = vector.extract_strided_slice %109 {offsets = [0, 8], sizes = [39, 8], strides = [1, 1]} : vector<39x16xf32> to vector<39x8xf32>
    %c0_27 = arith.constant 0 : index
    %c0_28 = arith.constant 0 : index
    %c0_29 = arith.constant 0 : index
    %112 = vector.load %arg9[%c0_27, %c0_28, %c0_29] : memref<2x56x24xbf16, #tpu.memory_space<vmem>>, vector<1x56x24xbf16>
    %113 = vector.shape_cast %112 : vector<1x56x24xbf16> to vector<56x24xbf16>
    %c0_30 = arith.constant 0 : index
    %c0_31 = arith.constant 0 : index
    %c0_32 = arith.constant 0 : index
    %114 = vector.load %arg10[%c0_30, %c0_31, %c0_32] : memref<2x56x16xbf16, #tpu.memory_space<vmem>>, vector<1x56x16xbf16>
    %115 = vector.shape_cast %114 : vector<1x56x16xbf16> to vector<56x16xbf16>
    %c0_33 = arith.constant 0 : index
    %c0_34 = arith.constant 0 : index
    %c0_35 = arith.constant 0 : index
    %116 = vector.load %arg11[%c0_33, %c0_34, %c0_35] : memref<2x56x8xbf16, #tpu.memory_space<vmem>>, vector<1x56x8xbf16>
    %117 = vector.shape_cast %116 : vector<1x56x8xbf16> to vector<56x8xbf16>
    %c0_36 = arith.constant 0 : index
    %c0_37 = arith.constant 0 : index
    %c0_38 = arith.constant 0 : index
    %118 = vector.load %arg12[%c0_36, %c0_37, %c0_38] : memref<2x1x16xf32, #tpu.memory_space<vmem>>, vector<1x1x16xf32>
    %119 = vector.shape_cast %118 : vector<1x1x16xf32> to vector<1x16xf32>
    %c0_39 = arith.constant 0 : index
    %c0_40 = arith.constant 0 : index
    %c0_41 = arith.constant 0 : index
    %120 = vector.load %arg13[%c0_39, %c0_40, %c0_41] : memref<2x1x8xf32, #tpu.memory_space<vmem>>, vector<1x1x8xf32>
    %121 = vector.shape_cast %120 : vector<1x1x8xf32> to vector<1x8xf32>
    %c8 = arith.constant 8 : index
    %c0_42 = arith.constant 0 : index
    %122 = vector.load %arg15[%c8, %c0_42] : memref<56x8xf32, #tpu.memory_space<vmem>>, vector<39x8xf32>
    tpu.vector_store %arg15[%c8, %c0_42], %110 {strides = array<i32>} : memref<56x8xf32, #tpu.memory_space<vmem>>, vector<39x8xf32>,
    %c0_43 = arith.constant 0 : index
    %c0_44 = arith.constant 0 : index
    %123 = vector.load %arg15[%c0_43, %c0_44] : memref<56x8xf32, #tpu.memory_space<vmem>>, vector<56x8xf32>
    %124 = vector.extract_strided_slice %123 {offsets = [5, 0], sizes = [39, 8], strides = [1, 1]} : vector<56x8xf32> to vector<39x8xf32>
    %125 = vector.extract_strided_slice %123 {offsets = [6, 0], sizes = [39, 8], strides = [1, 1]} : vector<56x8xf32> to vector<39x8xf32>
    %126 = vector.extract_strided_slice %123 {offsets = [7, 0], sizes = [39, 8], strides = [1, 1]} : vector<56x8xf32> to vector<39x8xf32>
    %127 = vector.extract_strided_slice %123 {offsets = [8, 0], sizes = [39, 8], strides = [1, 1]} : vector<56x8xf32> to vector<39x8xf32>
    %128 = vector.extract_strided_slice %123 {offsets = [9, 0], sizes = [39, 8], strides = [1, 1]} : vector<56x8xf32> to vector<39x8xf32>
    %129 = vector.extract_strided_slice %123 {offsets = [10, 0], sizes = [39, 8], strides = [1, 1]} : vector<56x8xf32> to vector<39x8xf32>
    %130 = vector.extract_strided_slice %123 {offsets = [11, 0], sizes = [39, 8], strides = [1, 1]} : vector<56x8xf32> to vector<39x8xf32>
    %131 = tpu.concatenate %124, %125, %126, %127, %128, %129, %130 in 1 : vector<39x8xf32>, vector<39x8xf32>, vector<39x8xf32>, vector<39x8xf32>, vector<39x8xf32>, vector<39x8xf32>, vector<39x8xf32> -> vector<39x56xf32>
    %132 = arith.truncf %131 : vector<39x56xf32> to vector<39x56xbf16>
    %cst_45 = arith.constant dense<0.000000e+00> : vector<39x24xf32>
    %133 = tpu.matmul %132, %113, %cst_45 {dimension_numbers = #tpu.dot_dimension_numbers<[1], [0], [0], [1], [0, 0, 1, 1], [], []>} : vector<39x56xbf16>, vector<56x24xbf16>, vector<39x24xf32> -> vector<39x24xf32>
    %134 = vector.extract_strided_slice %133 {offsets = [0, 0], sizes = [39, 16], strides = [1, 1]} : vector<39x24xf32> to vector<39x16xf32>
    %135 = vector.broadcast %119 : vector<1x16xf32> to vector<39x16xf32>
    %136 = arith.addf %134, %135 : vector<39x16xf32>
    %137 = vector.extract_strided_slice %136 {offsets = [0, 0], sizes = [39, 8], strides = [1, 1]} : vector<39x16xf32> to vector<39x8xf32>
    %138 = arith.negf %137 : vector<39x8xf32>
    %139 = math.exp %138 : vector<39x8xf32>
    %cst_46 = arith.constant 1.000000e+00 : f32
    %140 = vector.broadcast %cst_46 : f32 to vector<39x8xf32>
    %141 = arith.addf %140, %139 : vector<39x8xf32>
    %142 = arith.divf %140, %141 : vector<39x8xf32>
    %143 = vector.extract_strided_slice %133 {offsets = [0, 16], sizes = [39, 8], strides = [1, 1]} : vector<39x24xf32> to vector<39x8xf32>
    %144 = vector.broadcast %121 : vector<1x8xf32> to vector<39x8xf32>
    %145 = arith.addf %143, %144 : vector<39x8xf32>
    %146 = math.tanh %145 : vector<39x8xf32>
    %147 = arith.mulf %142, %146 : vector<39x8xf32>
    %c8_47 = arith.constant 8 : index
    %c0_48 = arith.constant 0 : index
    %148 = vector.load %arg15[%c8_47, %c0_48] : memref<56x8xf32, #tpu.memory_space<vmem>>, vector<39x8xf32>
    tpu.vector_store %arg15[%c8_47, %c0_48], %111 {strides = array<i32>} : memref<56x8xf32, #tpu.memory_space<vmem>>, vector<39x8xf32>,
    %c0_49 = arith.constant 0 : index
    %c0_50 = arith.constant 0 : index
    %149 = vector.load %arg15[%c0_49, %c0_50] : memref<56x8xf32, #tpu.memory_space<vmem>>, vector<56x8xf32>
    %150 = vector.extract_strided_slice %149 {offsets = [5, 0], sizes = [39, 8], strides = [1, 1]} : vector<56x8xf32> to vector<39x8xf32>
    %151 = vector.extract_strided_slice %149 {offsets = [6, 0], sizes = [39, 8], strides = [1, 1]} : vector<56x8xf32> to vector<39x8xf32>
    %152 = vector.extract_strided_slice %149 {offsets = [7, 0], sizes = [39, 8], strides = [1, 1]} : vector<56x8xf32> to vector<39x8xf32>
    %153 = vector.extract_strided_slice %149 {offsets = [8, 0], sizes = [39, 8], strides = [1, 1]} : vector<56x8xf32> to vector<39x8xf32>
    %154 = vector.extract_strided_slice %149 {offsets = [9, 0], sizes = [39, 8], strides = [1, 1]} : vector<56x8xf32> to vector<39x8xf32>
    %155 = vector.extract_strided_slice %149 {offsets = [10, 0], sizes = [39, 8], strides = [1, 1]} : vector<56x8xf32> to vector<39x8xf32>
    %156 = vector.extract_strided_slice %149 {offsets = [11, 0], sizes = [39, 8], strides = [1, 1]} : vector<56x8xf32> to vector<39x8xf32>
    %157 = tpu.concatenate %150, %151, %152, %153, %154, %155, %156 in 1 : vector<39x8xf32>, vector<39x8xf32>, vector<39x8xf32>, vector<39x8xf32>, vector<39x8xf32>, vector<39x8xf32>, vector<39x8xf32> -> vector<39x56xf32>
    %158 = arith.truncf %157 : vector<39x56xf32> to vector<39x56xbf16>
    %cst_51 = arith.constant dense<0.000000e+00> : vector<39x24xf32>
    %159 = tpu.matmul %158, %113, %cst_51 {dimension_numbers = #tpu.dot_dimension_numbers<[1], [0], [0], [1], [0, 0, 1, 1], [], []>} : vector<39x56xbf16>, vector<56x24xbf16>, vector<39x24xf32> -> vector<39x24xf32>
    %160 = vector.extract_strided_slice %159 {offsets = [0, 0], sizes = [39, 16], strides = [1, 1]} : vector<39x24xf32> to vector<39x16xf32>
    %161 = vector.broadcast %119 : vector<1x16xf32> to vector<39x16xf32>
    %162 = arith.addf %160, %161 : vector<39x16xf32>
    %c8_52 = arith.constant 8 : index
    %c0_53 = arith.constant 0 : index
    %163 = vector.load %arg15[%c8_52, %c0_53] : memref<56x8xf32, #tpu.memory_space<vmem>>, vector<39x8xf32>
    tpu.vector_store %arg15[%c8_52, %c0_53], %147 {strides = array<i32>} : memref<56x8xf32, #tpu.memory_space<vmem>>, vector<39x8xf32>,
    %c0_54 = arith.constant 0 : index
    %c0_55 = arith.constant 0 : index
    %164 = vector.load %arg15[%c0_54, %c0_55] : memref<56x8xf32, #tpu.memory_space<vmem>>, vector<56x8xf32>
    %165 = vector.extract_strided_slice %164 {offsets = [5, 0], sizes = [39, 8], strides = [1, 1]} : vector<56x8xf32> to vector<39x8xf32>
    %166 = vector.extract_strided_slice %164 {offsets = [6, 0], sizes = [39, 8], strides = [1, 1]} : vector<56x8xf32> to vector<39x8xf32>
    %167 = vector.extract_strided_slice %164 {offsets = [7, 0], sizes = [39, 8], strides = [1, 1]} : vector<56x8xf32> to vector<39x8xf32>
    %168 = vector.extract_strided_slice %164 {offsets = [8, 0], sizes = [39, 8], strides = [1, 1]} : vector<56x8xf32> to vector<39x8xf32>
    %169 = vector.extract_strided_slice %164 {offsets = [9, 0], sizes = [39, 8], strides = [1, 1]} : vector<56x8xf32> to vector<39x8xf32>
    %170 = vector.extract_strided_slice %164 {offsets = [10, 0], sizes = [39, 8], strides = [1, 1]} : vector<56x8xf32> to vector<39x8xf32>
    %171 = vector.extract_strided_slice %164 {offsets = [11, 0], sizes = [39, 8], strides = [1, 1]} : vector<56x8xf32> to vector<39x8xf32>
    %172 = tpu.concatenate %165, %166, %167, %168, %169, %170, %171 in 1 : vector<39x8xf32>, vector<39x8xf32>, vector<39x8xf32>, vector<39x8xf32>, vector<39x8xf32>, vector<39x8xf32>, vector<39x8xf32> -> vector<39x56xf32>
    %173 = arith.truncf %172 : vector<39x56xf32> to vector<39x56xbf16>
    %cst_56 = arith.constant dense<0.000000e+00> : vector<39x16xf32>
    %174 = tpu.matmul %173, %115, %cst_56 {dimension_numbers = #tpu.dot_dimension_numbers<[1], [0], [0], [1], [0, 0, 1, 1], [], []>} : vector<39x56xbf16>, vector<56x16xbf16>, vector<39x16xf32> -> vector<39x16xf32>
    %175 = arith.addf %162, %174 : vector<39x16xf32>
    %176 = vector.extract_strided_slice %175 {offsets = [0, 0], sizes = [39, 8], strides = [1, 1]} : vector<39x16xf32> to vector<39x8xf32>
    %177 = arith.negf %176 : vector<39x8xf32>
    %178 = math.exp %177 : vector<39x8xf32>
    %cst_57 = arith.constant 1.000000e+00 : f32
    %179 = vector.broadcast %cst_57 : f32 to vector<39x8xf32>
    %180 = arith.addf %179, %178 : vector<39x8xf32>
    %181 = arith.divf %179, %180 : vector<39x8xf32>
    %182 = vector.extract_strided_slice %175 {offsets = [0, 8], sizes = [39, 8], strides = [1, 1]} : vector<39x16xf32> to vector<39x8xf32>
    %183 = arith.negf %182 : vector<39x8xf32>
    %184 = math.exp %183 : vector<39x8xf32>
    %cst_58 = arith.constant 1.000000e+00 : f32
    %185 = vector.broadcast %cst_58 : f32 to vector<39x8xf32>
    %186 = arith.addf %185, %184 : vector<39x8xf32>
    %187 = arith.divf %185, %186 : vector<39x8xf32>
    %188 = vector.extract_strided_slice %159 {offsets = [0, 16], sizes = [39, 8], strides = [1, 1]} : vector<39x24xf32> to vector<39x8xf32>
    %189 = vector.broadcast %121 : vector<1x8xf32> to vector<39x8xf32>
    %190 = arith.addf %188, %189 : vector<39x8xf32>
    %191 = arith.mulf %187, %147 : vector<39x8xf32>
    %c8_59 = arith.constant 8 : index
    %c0_60 = arith.constant 0 : index
    %192 = vector.load %arg15[%c8_59, %c0_60] : memref<56x8xf32, #tpu.memory_space<vmem>>, vector<39x8xf32>
    tpu.vector_store %arg15[%c8_59, %c0_60], %191 {strides = array<i32>} : memref<56x8xf32, #tpu.memory_space<vmem>>, vector<39x8xf32>,
    %c0_61 = arith.constant 0 : index
    %c0_62 = arith.constant 0 : index
    %193 = vector.load %arg15[%c0_61, %c0_62] : memref<56x8xf32, #tpu.memory_space<vmem>>, vector<56x8xf32>
    %194 = vector.extract_strided_slice %193 {offsets = [5, 0], sizes = [39, 8], strides = [1, 1]} : vector<56x8xf32> to vector<39x8xf32>
    %195 = vector.extract_strided_slice %193 {offsets = [6, 0], sizes = [39, 8], strides = [1, 1]} : vector<56x8xf32> to vector<39x8xf32>
    %196 = vector.extract_strided_slice %193 {offsets = [7, 0], sizes = [39, 8], strides = [1, 1]} : vector<56x8xf32> to vector<39x8xf32>
    %197 = vector.extract_strided_slice %193 {offsets = [8, 0], sizes = [39, 8], strides = [1, 1]} : vector<56x8xf32> to vector<39x8xf32>
    %198 = vector.extract_strided_slice %193 {offsets = [9, 0], sizes = [39, 8], strides = [1, 1]} : vector<56x8xf32> to vector<39x8xf32>
    %199 = vector.extract_strided_slice %193 {offsets = [10, 0], sizes = [39, 8], strides = [1, 1]} : vector<56x8xf32> to vector<39x8xf32>
    %200 = vector.extract_strided_slice %193 {offsets = [11, 0], sizes = [39, 8], strides = [1, 1]} : vector<56x8xf32> to vector<39x8xf32>
    %201 = tpu.concatenate %194, %195, %196, %197, %198, %199, %200 in 1 : vector<39x8xf32>, vector<39x8xf32>, vector<39x8xf32>, vector<39x8xf32>, vector<39x8xf32>, vector<39x8xf32>, vector<39x8xf32> -> vector<39x56xf32>
    %202 = arith.truncf %201 : vector<39x56xf32> to vector<39x56xbf16>
    %cst_63 = arith.constant dense<0.000000e+00> : vector<39x8xf32>
    %203 = tpu.matmul %202, %117, %cst_63 {dimension_numbers = #tpu.dot_dimension_numbers<[1], [0], [0], [1], [0, 0, 1, 1], [], []>} : vector<39x56xbf16>, vector<56x8xbf16>, vector<39x8xf32> -> vector<39x8xf32>
    %204 = arith.addf %190, %203 : vector<39x8xf32>
    %205 = math.tanh %204 : vector<39x8xf32>
    %cst_64 = arith.constant 1.000000e+00 : f32
    %206 = vector.broadcast %cst_64 : f32 to vector<39x8xf32>
    %207 = arith.subf %206, %181 : vector<39x8xf32>
    %208 = arith.mulf %207, %147 : vector<39x8xf32>
    %209 = arith.mulf %181, %205 : vector<39x8xf32>
    %210 = arith.addf %208, %209 : vector<39x8xf32>
    %c1 = arith.constant 1 : index
    %c0_65 = arith.constant 0 : index
    %c0_66 = arith.constant 0 : index
    %211 = vector.load %arg9[%c1, %c0_65, %c0_66] : memref<2x56x24xbf16, #tpu.memory_space<vmem>>, vector<1x56x24xbf16>
    %212 = vector.shape_cast %211 : vector<1x56x24xbf16> to vector<56x24xbf16>
    %c1_67 = arith.constant 1 : index
    %c0_68 = arith.constant 0 : index
    %c0_69 = arith.constant 0 : index
    %213 = vector.load %arg10[%c1_67, %c0_68, %c0_69] : memref<2x56x16xbf16, #tpu.memory_space<vmem>>, vector<1x56x16xbf16>
    %214 = vector.shape_cast %213 : vector<1x56x16xbf16> to vector<56x16xbf16>
    %c1_70 = arith.constant 1 : index
    %c0_71 = arith.constant 0 : index
    %c0_72 = arith.constant 0 : index
    %215 = vector.load %arg11[%c1_70, %c0_71, %c0_72] : memref<2x56x8xbf16, #tpu.memory_space<vmem>>, vector<1x56x8xbf16>
    %216 = vector.shape_cast %215 : vector<1x56x8xbf16> to vector<56x8xbf16>
    %c1_73 = arith.constant 1 : index
    %c0_74 = arith.constant 0 : index
    %c0_75 = arith.constant 0 : index
    %217 = vector.load %arg12[%c1_73, %c0_74, %c0_75] : memref<2x1x16xf32, #tpu.memory_space<vmem>>, vector<1x1x16xf32>
    %218 = vector.shape_cast %217 : vector<1x1x16xf32> to vector<1x16xf32>
    %c1_76 = arith.constant 1 : index
    %c0_77 = arith.constant 0 : index
    %c0_78 = arith.constant 0 : index
    %219 = vector.load %arg13[%c1_76, %c0_77, %c0_78] : memref<2x1x8xf32, #tpu.memory_space<vmem>>, vector<1x1x8xf32>
    %220 = vector.shape_cast %219 : vector<1x1x8xf32> to vector<1x8xf32>
    %c8_79 = arith.constant 8 : index
    %c0_80 = arith.constant 0 : index
    %221 = vector.load %arg15[%c8_79, %c0_80] : memref<56x8xf32, #tpu.memory_space<vmem>>, vector<39x8xf32>
    tpu.vector_store %arg15[%c8_79, %c0_80], %147 {strides = array<i32>} : memref<56x8xf32, #tpu.memory_space<vmem>>, vector<39x8xf32>,
    %c0_81 = arith.constant 0 : index
    %c0_82 = arith.constant 0 : index
    %222 = vector.load %arg15[%c0_81, %c0_82] : memref<56x8xf32, #tpu.memory_space<vmem>>, vector<56x8xf32>
    %223 = vector.extract_strided_slice %222 {offsets = [5, 0], sizes = [39, 8], strides = [1, 1]} : vector<56x8xf32> to vector<39x8xf32>
    %224 = vector.extract_strided_slice %222 {offsets = [6, 0], sizes = [39, 8], strides = [1, 1]} : vector<56x8xf32> to vector<39x8xf32>
    %225 = vector.extract_strided_slice %222 {offsets = [7, 0], sizes = [39, 8], strides = [1, 1]} : vector<56x8xf32> to vector<39x8xf32>
    %226 = vector.extract_strided_slice %222 {offsets = [8, 0], sizes = [39, 8], strides = [1, 1]} : vector<56x8xf32> to vector<39x8xf32>
    %227 = vector.extract_strided_slice %222 {offsets = [9, 0], sizes = [39, 8], strides = [1, 1]} : vector<56x8xf32> to vector<39x8xf32>
    %228 = vector.extract_strided_slice %222 {offsets = [10, 0], sizes = [39, 8], strides = [1, 1]} : vector<56x8xf32> to vector<39x8xf32>
    %229 = vector.extract_strided_slice %222 {offsets = [11, 0], sizes = [39, 8], strides = [1, 1]} : vector<56x8xf32> to vector<39x8xf32>
    %230 = tpu.concatenate %223, %224, %225, %226, %227, %228, %229 in 1 : vector<39x8xf32>, vector<39x8xf32>, vector<39x8xf32>, vector<39x8xf32>, vector<39x8xf32>, vector<39x8xf32>, vector<39x8xf32> -> vector<39x56xf32>
    %231 = arith.truncf %230 : vector<39x56xf32> to vector<39x56xbf16>
    %cst_83 = arith.constant dense<0.000000e+00> : vector<39x24xf32>
    %232 = tpu.matmul %231, %212, %cst_83 {dimension_numbers = #tpu.dot_dimension_numbers<[1], [0], [0], [1], [0, 0, 1, 1], [], []>} : vector<39x56xbf16>, vector<56x24xbf16>, vector<39x24xf32> -> vector<39x24xf32>
    %233 = vector.extract_strided_slice %232 {offsets = [0, 0], sizes = [39, 16], strides = [1, 1]} : vector<39x24xf32> to vector<39x16xf32>
    %234 = vector.broadcast %218 : vector<1x16xf32> to vector<39x16xf32>
    %235 = arith.addf %233, %234 : vector<39x16xf32>
    %236 = vector.extract_strided_slice %235 {offsets = [0, 0], sizes = [39, 8], strides = [1, 1]} : vector<39x16xf32> to vector<39x8xf32>
    %237 = arith.negf %236 : vector<39x8xf32>
    %238 = math.exp %237 : vector<39x8xf32>
    %cst_84 = arith.constant 1.000000e+00 : f32
    %239 = vector.broadcast %cst_84 : f32 to vector<39x8xf32>
    %240 = arith.addf %239, %238 : vector<39x8xf32>
    %241 = arith.divf %239, %240 : vector<39x8xf32>
    %242 = vector.extract_strided_slice %232 {offsets = [0, 16], sizes = [39, 8], strides = [1, 1]} : vector<39x24xf32> to vector<39x8xf32>
    %243 = vector.broadcast %220 : vector<1x8xf32> to vector<39x8xf32>
    %244 = arith.addf %242, %243 : vector<39x8xf32>
    %245 = math.tanh %244 : vector<39x8xf32>
    %246 = arith.mulf %241, %245 : vector<39x8xf32>
    %c8_85 = arith.constant 8 : index
    %c0_86 = arith.constant 0 : index
    %247 = vector.load %arg15[%c8_85, %c0_86] : memref<56x8xf32, #tpu.memory_space<vmem>>, vector<39x8xf32>
    tpu.vector_store %arg15[%c8_85, %c0_86], %210 {strides = array<i32>} : memref<56x8xf32, #tpu.memory_space<vmem>>, vector<39x8xf32>,
    %c0_87 = arith.constant 0 : index
    %c0_88 = arith.constant 0 : index
    %248 = vector.load %arg15[%c0_87, %c0_88] : memref<56x8xf32, #tpu.memory_space<vmem>>, vector<56x8xf32>
    %249 = vector.extract_strided_slice %248 {offsets = [5, 0], sizes = [39, 8], strides = [1, 1]} : vector<56x8xf32> to vector<39x8xf32>
    %250 = vector.extract_strided_slice %248 {offsets = [6, 0], sizes = [39, 8], strides = [1, 1]} : vector<56x8xf32> to vector<39x8xf32>
    %251 = vector.extract_strided_slice %248 {offsets = [7, 0], sizes = [39, 8], strides = [1, 1]} : vector<56x8xf32> to vector<39x8xf32>
    %252 = vector.extract_strided_slice %248 {offsets = [8, 0], sizes = [39, 8], strides = [1, 1]} : vector<56x8xf32> to vector<39x8xf32>
    %253 = vector.extract_strided_slice %248 {offsets = [9, 0], sizes = [39, 8], strides = [1, 1]} : vector<56x8xf32> to vector<39x8xf32>
    %254 = vector.extract_strided_slice %248 {offsets = [10, 0], sizes = [39, 8], strides = [1, 1]} : vector<56x8xf32> to vector<39x8xf32>
    %255 = vector.extract_strided_slice %248 {offsets = [11, 0], sizes = [39, 8], strides = [1, 1]} : vector<56x8xf32> to vector<39x8xf32>
    %256 = tpu.concatenate %249, %250, %251, %252, %253, %254, %255 in 1 : vector<39x8xf32>, vector<39x8xf32>, vector<39x8xf32>, vector<39x8xf32>, vector<39x8xf32>, vector<39x8xf32>, vector<39x8xf32> -> vector<39x56xf32>
    %257 = arith.truncf %256 : vector<39x56xf32> to vector<39x56xbf16>
    %cst_89 = arith.constant dense<0.000000e+00> : vector<39x24xf32>
    %258 = tpu.matmul %257, %212, %cst_89 {dimension_numbers = #tpu.dot_dimension_numbers<[1], [0], [0], [1], [0, 0, 1, 1], [], []>} : vector<39x56xbf16>, vector<56x24xbf16>, vector<39x24xf32> -> vector<39x24xf32>
    %259 = vector.extract_strided_slice %258 {offsets = [0, 0], sizes = [39, 16], strides = [1, 1]} : vector<39x24xf32> to vector<39x16xf32>
    %260 = vector.broadcast %218 : vector<1x16xf32> to vector<39x16xf32>
    %261 = arith.addf %259, %260 : vector<39x16xf32>
    %c8_90 = arith.constant 8 : index
    %c0_91 = arith.constant 0 : index
    %262 = vector.load %arg15[%c8_90, %c0_91] : memref<56x8xf32, #tpu.memory_space<vmem>>, vector<39x8xf32>
    tpu.vector_store %arg15[%c8_90, %c0_91], %246 {strides = array<i32>} : memref<56x8xf32, #tpu.memory_space<vmem>>, vector<39x8xf32>,
    %c0_92 = arith.constant 0 : index
    %c0_93 = arith.constant 0 : index
    %263 = vector.load %arg15[%c0_92, %c0_93] : memref<56x8xf32, #tpu.memory_space<vmem>>, vector<56x8xf32>
    %264 = vector.extract_strided_slice %263 {offsets = [5, 0], sizes = [39, 8], strides = [1, 1]} : vector<56x8xf32> to vector<39x8xf32>
    %265 = vector.extract_strided_slice %263 {offsets = [6, 0], sizes = [39, 8], strides = [1, 1]} : vector<56x8xf32> to vector<39x8xf32>
    %266 = vector.extract_strided_slice %263 {offsets = [7, 0], sizes = [39, 8], strides = [1, 1]} : vector<56x8xf32> to vector<39x8xf32>
    %267 = vector.extract_strided_slice %263 {offsets = [8, 0], sizes = [39, 8], strides = [1, 1]} : vector<56x8xf32> to vector<39x8xf32>
    %268 = vector.extract_strided_slice %263 {offsets = [9, 0], sizes = [39, 8], strides = [1, 1]} : vector<56x8xf32> to vector<39x8xf32>
    %269 = vector.extract_strided_slice %263 {offsets = [10, 0], sizes = [39, 8], strides = [1, 1]} : vector<56x8xf32> to vector<39x8xf32>
    %270 = vector.extract_strided_slice %263 {offsets = [11, 0], sizes = [39, 8], strides = [1, 1]} : vector<56x8xf32> to vector<39x8xf32>
    %271 = tpu.concatenate %264, %265, %266, %267, %268, %269, %270 in 1 : vector<39x8xf32>, vector<39x8xf32>, vector<39x8xf32>, vector<39x8xf32>, vector<39x8xf32>, vector<39x8xf32>, vector<39x8xf32> -> vector<39x56xf32>
    %272 = arith.truncf %271 : vector<39x56xf32> to vector<39x56xbf16>
    %cst_94 = arith.constant dense<0.000000e+00> : vector<39x16xf32>
    %273 = tpu.matmul %272, %214, %cst_94 {dimension_numbers = #tpu.dot_dimension_numbers<[1], [0], [0], [1], [0, 0, 1, 1], [], []>} : vector<39x56xbf16>, vector<56x16xbf16>, vector<39x16xf32> -> vector<39x16xf32>
    %274 = arith.addf %261, %273 : vector<39x16xf32>
    %275 = vector.extract_strided_slice %274 {offsets = [0, 0], sizes = [39, 8], strides = [1, 1]} : vector<39x16xf32> to vector<39x8xf32>
    %276 = arith.negf %275 : vector<39x8xf32>
    %277 = math.exp %276 : vector<39x8xf32>
    %cst_95 = arith.constant 1.000000e+00 : f32
    %278 = vector.broadcast %cst_95 : f32 to vector<39x8xf32>
    %279 = arith.addf %278, %277 : vector<39x8xf32>
    %280 = arith.divf %278, %279 : vector<39x8xf32>
    %281 = vector.extract_strided_slice %274 {offsets = [0, 8], sizes = [39, 8], strides = [1, 1]} : vector<39x16xf32> to vector<39x8xf32>
    %282 = arith.negf %281 : vector<39x8xf32>
    %283 = math.exp %282 : vector<39x8xf32>
    %cst_96 = arith.constant 1.000000e+00 : f32
    %284 = vector.broadcast %cst_96 : f32 to vector<39x8xf32>
    %285 = arith.addf %284, %283 : vector<39x8xf32>
    %286 = arith.divf %284, %285 : vector<39x8xf32>
    %287 = vector.extract_strided_slice %258 {offsets = [0, 16], sizes = [39, 8], strides = [1, 1]} : vector<39x24xf32> to vector<39x8xf32>
    %288 = vector.broadcast %220 : vector<1x8xf32> to vector<39x8xf32>
    %289 = arith.addf %287, %288 : vector<39x8xf32>
    %290 = arith.mulf %286, %246 : vector<39x8xf32>
    %c8_97 = arith.constant 8 : index
    %c0_98 = arith.constant 0 : index
    %291 = vector.load %arg15[%c8_97, %c0_98] : memref<56x8xf32, #tpu.memory_space<vmem>>, vector<39x8xf32>
    tpu.vector_store %arg15[%c8_97, %c0_98], %290 {strides = array<i32>} : memref<56x8xf32, #tpu.memory_space<vmem>>, vector<39x8xf32>,
    %c0_99 = arith.constant 0 : index
    %c0_100 = arith.constant 0 : index
    %292 = vector.load %arg15[%c0_99, %c0_100] : memref<56x8xf32, #tpu.memory_space<vmem>>, vector<56x8xf32>
    %293 = vector.extract_strided_slice %292 {offsets = [5, 0], sizes = [39, 8], strides = [1, 1]} : vector<56x8xf32> to vector<39x8xf32>
    %294 = vector.extract_strided_slice %292 {offsets = [6, 0], sizes = [39, 8], strides = [1, 1]} : vector<56x8xf32> to vector<39x8xf32>
    %295 = vector.extract_strided_slice %292 {offsets = [7, 0], sizes = [39, 8], strides = [1, 1]} : vector<56x8xf32> to vector<39x8xf32>
    %296 = vector.extract_strided_slice %292 {offsets = [8, 0], sizes = [39, 8], strides = [1, 1]} : vector<56x8xf32> to vector<39x8xf32>
    %297 = vector.extract_strided_slice %292 {offsets = [9, 0], sizes = [39, 8], strides = [1, 1]} : vector<56x8xf32> to vector<39x8xf32>
    %298 = vector.extract_strided_slice %292 {offsets = [10, 0], sizes = [39, 8], strides = [1, 1]} : vector<56x8xf32> to vector<39x8xf32>
    %299 = vector.extract_strided_slice %292 {offsets = [11, 0], sizes = [39, 8], strides = [1, 1]} : vector<56x8xf32> to vector<39x8xf32>
    %300 = tpu.concatenate %293, %294, %295, %296, %297, %298, %299 in 1 : vector<39x8xf32>, vector<39x8xf32>, vector<39x8xf32>, vector<39x8xf32>, vector<39x8xf32>, vector<39x8xf32>, vector<39x8xf32> -> vector<39x56xf32>
    %301 = arith.truncf %300 : vector<39x56xf32> to vector<39x56xbf16>
    %cst_101 = arith.constant dense<0.000000e+00> : vector<39x8xf32>
    %302 = tpu.matmul %301, %216, %cst_101 {dimension_numbers = #tpu.dot_dimension_numbers<[1], [0], [0], [1], [0, 0, 1, 1], [], []>} : vector<39x56xbf16>, vector<56x8xbf16>, vector<39x8xf32> -> vector<39x8xf32>
    %303 = arith.addf %289, %302 : vector<39x8xf32>
    %304 = math.tanh %303 : vector<39x8xf32>
    %cst_102 = arith.constant 1.000000e+00 : f32
    %305 = vector.broadcast %cst_102 : f32 to vector<39x8xf32>
    %306 = arith.subf %305, %280 : vector<39x8xf32>
    %307 = arith.mulf %306, %246 : vector<39x8xf32>
    %308 = arith.mulf %280, %304 : vector<39x8xf32>
    %309 = arith.addf %307, %308 : vector<39x8xf32>
    %310 = vector.shape_cast %147 : vector<39x8xf32> to vector<1x39x8xf32>
    %311 = vector.shape_cast %210 : vector<39x8xf32> to vector<1x39x8xf32>
    %312 = vector.shape_cast %246 : vector<39x8xf32> to vector<1x39x8xf32>
    %313 = vector.shape_cast %309 : vector<39x8xf32> to vector<1x39x8xf32>
    %314 = tpu.concatenate %310, %311, %312, %313 in 0 : vector<1x39x8xf32>, vector<1x39x8xf32>, vector<1x39x8xf32>, vector<1x39x8xf32> -> vector<4x39x8xf32>
    %c0_103 = arith.constant 0 : index
    %c0_104 = arith.constant 0 : index
    %c0_105 = arith.constant 0 : index
    %c0_106 = arith.constant 0 : index
    %315 = vector.load %arg14[%c0_103, %c0_104, %c0_105, %c0_106] : memref<1x4x39x8xf32, #tpu.memory_space<vmem>>, vector<1x4x39x8xf32>
    %316 = vector.shape_cast %315 : vector<1x4x39x8xf32> to vector<4x39x8xf32>
    %317 = vector.shape_cast %314 : vector<4x39x8xf32> to vector<1x4x39x8xf32>
    tpu.vector_store %arg14[%c0_103, %c0_104, %c0_105, %c0_106], %317 {strides = array<i32>} : memref<1x4x39x8xf32, #tpu.memory_space<vmem>>, vector<1x4x39x8xf32>,
    return
  }
  func.func @transform_0(%arg0: i32) -> (i32, i32, i32) {
    %c0_i32 = arith.constant 0 : i32
    %c0_i32_0 = arith.constant 0 : i32
    %c0_i32_1 = arith.constant 0 : i32
    return %arg0, %c0_i32, %c0_i32_0 : i32, i32, i32
  }
  func.func @transform_1(%arg0: i32) -> (i32, i32) {
    %c0_i32 = arith.constant 0 : i32
    %c0_i32_0 = arith.constant 0 : i32
    %c0_i32_1 = arith.constant 0 : i32
    return %c0_i32, %c0_i32_0 : i32, i32
  }
  func.func @transform_2(%arg0: i32) -> (i32, i32) {
    %c0_i32 = arith.constant 0 : i32
    %c0_i32_0 = arith.constant 0 : i32
    %c0_i32_1 = arith.constant 0 : i32
    return %c0_i32, %c0_i32_0 : i32, i32
  }
  func.func @transform_3(%arg0: i32) -> (i32, i32) {
    %c0_i32 = arith.constant 0 : i32
    %c0_i32_0 = arith.constant 0 : i32
    %c0_i32_1 = arith.constant 0 : i32
    return %c0_i32, %c0_i32_0 : i32, i32
  }
  func.func @transform_4(%arg0: i32) -> (i32, i32) {
    %c0_i32 = arith.constant 0 : i32
    %c0_i32_0 = arith.constant 0 : i32
    %c0_i32_1 = arith.constant 0 : i32
    return %c0_i32, %c0_i32_0 : i32, i32
  }
  func.func @transform_5(%arg0: i32) -> (i32, i32) {
    %c0_i32 = arith.constant 0 : i32
    %c0_i32_0 = arith.constant 0 : i32
    %c0_i32_1 = arith.constant 0 : i32
    return %c0_i32, %c0_i32_0 : i32, i32
  }
  func.func @transform_6(%arg0: i32) -> (i32, i32) {
    %c0_i32 = arith.constant 0 : i32
    %c0_i32_0 = arith.constant 0 : i32
    %c0_i32_1 = arith.constant 0 : i32
    return %c0_i32, %c0_i32_0 : i32, i32
  }
  func.func @transform_7(%arg0: i32) -> (i32, i32) {
    %c0_i32 = arith.constant 0 : i32
    %c0_i32_0 = arith.constant 0 : i32
    %c0_i32_1 = arith.constant 0 : i32
    return %c0_i32, %c0_i32_0 : i32, i32
  }
  func.func @transform_8(%arg0: i32) -> (i32, i32, i32) {
    %c0_i32 = arith.constant 0 : i32
    %c0_i32_0 = arith.constant 0 : i32
    %c0_i32_1 = arith.constant 0 : i32
    %c0_i32_2 = arith.constant 0 : i32
    return %c0_i32, %c0_i32_0, %c0_i32_1 : i32, i32, i32
  }
  func.func @transform_9(%arg0: i32) -> (i32, i32, i32) {
    %c0_i32 = arith.constant 0 : i32
    %c0_i32_0 = arith.constant 0 : i32
    %c0_i32_1 = arith.constant 0 : i32
    %c0_i32_2 = arith.constant 0 : i32
    return %c0_i32, %c0_i32_0, %c0_i32_1 : i32, i32, i32
  }
  func.func @transform_10(%arg0: i32) -> (i32, i32, i32) {
    %c0_i32 = arith.constant 0 : i32
    %c0_i32_0 = arith.constant 0 : i32
    %c0_i32_1 = arith.constant 0 : i32
    %c0_i32_2 = arith.constant 0 : i32
    return %c0_i32, %c0_i32_0, %c0_i32_1 : i32, i32, i32
  }
  func.func @transform_11(%arg0: i32) -> (i32, i32, i32) {
    %c0_i32 = arith.constant 0 : i32
    %c0_i32_0 = arith.constant 0 : i32
    %c0_i32_1 = arith.constant 0 : i32
    %c0_i32_2 = arith.constant 0 : i32
    return %c0_i32, %c0_i32_0, %c0_i32_1 : i32, i32, i32
  }
  func.func @transform_12(%arg0: i32) -> (i32, i32, i32) {
    %c0_i32 = arith.constant 0 : i32
    %c0_i32_0 = arith.constant 0 : i32
    %c0_i32_1 = arith.constant 0 : i32
    %c0_i32_2 = arith.constant 0 : i32
    return %c0_i32, %c0_i32_0, %c0_i32_1 : i32, i32, i32
  }
  func.func @transform_13(%arg0: i32) -> (i32, i32, i32, i32) {
    %c0_i32 = arith.constant 0 : i32
    %c0_i32_0 = arith.constant 0 : i32
    %c0_i32_1 = arith.constant 0 : i32
    %c0_i32_2 = arith.constant 0 : i32
    return %arg0, %c0_i32, %c0_i32_0, %c0_i32_1 : i32, i32, i32, i32
  }
}

module attributes {stable_mosaic.version = 11 : i64} {
  func.func @attn_cls_kernel(%arg0: i32, %arg1: memref<8x312xf32, #tpu.memory_space<vmem>>, %arg2: memref<2x8xf32, #tpu.memory_space<vmem>>, %arg3: memref<312x256xbf16, #tpu.memory_space<vmem>>, %arg4: memref<1x256xf32, #tpu.memory_space<vmem>>, %arg5: memref<256x1xf32, #tpu.memory_space<vmem>>, %arg6: memref<312x312xbf16, #tpu.memory_space<vmem>>, %arg7: memref<1x312xf32, #tpu.memory_space<vmem>>, %arg8: memref<312x2xf32, #tpu.memory_space<vmem>>, %arg9: memref<1x2xf32, #tpu.memory_space<vmem>>, %arg10: memref<2x2xf32, #tpu.memory_space<vmem>>) attributes {dimension_semantics = [#tpu.dimension_semantics<parallel>], iteration_bounds = array<i64: 1>, scalar_prefetch = 0 : i64, scratch_operands = 0 : i64, tpu.core_type = #tpu.core_type<tc>, window_params = [{transform_indices = @transform_0, window_bounds = array<i64: 8, 312>}, {pipeline_mode = #tpu.pipeline_mode<synchronous>, transform_indices = @transform_1, window_bounds = array<i64: 2, 8>}, {pipeline_mode = #tpu.pipeline_mode<synchronous>, transform_indices = @transform_2, window_bounds = array<i64: 312, 256>}, {pipeline_mode = #tpu.pipeline_mode<synchronous>, transform_indices = @transform_3, window_bounds = array<i64: 1, 256>}, {pipeline_mode = #tpu.pipeline_mode<synchronous>, transform_indices = @transform_4, window_bounds = array<i64: 256, 1>}, {pipeline_mode = #tpu.pipeline_mode<synchronous>, transform_indices = @transform_5, window_bounds = array<i64: 312, 312>}, {pipeline_mode = #tpu.pipeline_mode<synchronous>, transform_indices = @transform_6, window_bounds = array<i64: 1, 312>}, {pipeline_mode = #tpu.pipeline_mode<synchronous>, transform_indices = @transform_7, window_bounds = array<i64: 312, 2>}, {pipeline_mode = #tpu.pipeline_mode<synchronous>, transform_indices = @transform_8, window_bounds = array<i64: 1, 2>}, {transform_indices = @transform_9, window_bounds = array<i64: 2, 2>}]} {
    %c0 = arith.constant 0 : index
    %c0_0 = arith.constant 0 : index
    %0 = vector.load %arg1[%c0, %c0_0] : memref<8x312xf32, #tpu.memory_space<vmem>>, vector<8x312xf32>
    %1 = arith.truncf %0 : vector<8x312xf32> to vector<8x312xbf16>
    %c0_1 = arith.constant 0 : index
    %c0_2 = arith.constant 0 : index
    %2 = vector.load %arg3[%c0_1, %c0_2] : memref<312x256xbf16, #tpu.memory_space<vmem>>, vector<312x256xbf16>
    %cst = arith.constant dense<0.000000e+00> : vector<8x256xf32>
    %3 = tpu.matmul %1, %2, %cst {dimension_numbers = #tpu.dot_dimension_numbers<[1], [0], [0], [1], [0, 0, 1, 1], [], []>} : vector<8x312xbf16>, vector<312x256xbf16>, vector<8x256xf32> -> vector<8x256xf32>
    %c0_3 = arith.constant 0 : index
    %c0_4 = arith.constant 0 : index
    %4 = vector.load %arg4[%c0_3, %c0_4] : memref<1x256xf32, #tpu.memory_space<vmem>>, vector<1x256xf32>
    %5 = vector.broadcast %4 : vector<1x256xf32> to vector<8x256xf32>
    %6 = arith.addf %3, %5 : vector<8x256xf32>
    %7 = math.tanh %6 : vector<8x256xf32>
    %c0_5 = arith.constant 0 : index
    %c0_6 = arith.constant 0 : index
    %8 = vector.load %arg5[%c0_5, %c0_6] : memref<256x1xf32, #tpu.memory_space<vmem>>, vector<256x1xf32>
    %cst_7 = arith.constant dense<0.000000e+00> : vector<8x1xf32>
    %9 = tpu.matmul %7, %8, %cst_7 {dimension_numbers = #tpu.dot_dimension_numbers<[1], [0], [0], [1], [0, 0, 1, 1], [], []>} : vector<8x256xf32>, vector<256x1xf32>, vector<8x1xf32> -> vector<8x1xf32>
    %10 = vector.shape_cast %9 : vector<8x1xf32> to vector<1x8x1xf32>
    %cst_8 = arith.constant dense<0xFF800000> : vector<1xf32>
    %11 = vector.multi_reduction <maximumf>, %10, %cst_8 [1, 2] : vector<1x8x1xf32> to vector<1xf32>
    %12 = vector.shape_cast %11 : vector<1xf32> to vector<1x1x1xf32>
    %13 = vector.extract %12[0, 0, 0] : f32 from vector<1x1x1xf32>
    %14 = vector.broadcast %13 : f32 to vector<8x1xf32>
    %15 = arith.subf %9, %14 : vector<8x1xf32>
    %16 = math.exp %15 : vector<8x1xf32>
    %c0_9 = arith.constant 0 : index
    %c0_10 = arith.constant 0 : index
    %17 = vector.load %arg2[%c0_9, %c0_10] : memref<2x8xf32, #tpu.memory_space<vmem>>, vector<2x8xf32>
    %cst_11 = arith.constant dense<0.000000e+00> : vector<2x1xf32>
    %18 = tpu.matmul %17, %16, %cst_11 {dimension_numbers = #tpu.dot_dimension_numbers<[1], [0], [0], [1], [0, 0, 1, 1], [], []>} : vector<2x8xf32>, vector<8x1xf32>, vector<2x1xf32> -> vector<2x1xf32>
    %19 = vector.broadcast %16 : vector<8x1xf32> to vector<8x312xf32>
    %20 = arith.mulf %19, %0 : vector<8x312xf32>
    %cst_12 = arith.constant dense<0.000000e+00> : vector<2x312xf32>
    %21 = tpu.matmul %17, %20, %cst_12 {dimension_numbers = #tpu.dot_dimension_numbers<[1], [0], [0], [1], [0, 0, 1, 1], [], []>} : vector<2x8xf32>, vector<8x312xf32>, vector<2x312xf32> -> vector<2x312xf32>
    %22 = tpu.reciprocal %18 : vector<2x1xf32> -> vector<2x1xf32>
    %23 = vector.broadcast %22 : vector<2x1xf32> to vector<2x312xf32>
    %24 = arith.mulf %21, %23 : vector<2x312xf32>
    %25 = arith.truncf %24 : vector<2x312xf32> to vector<2x312xbf16>
    %c0_13 = arith.constant 0 : index
    %c0_14 = arith.constant 0 : index
    %26 = vector.load %arg6[%c0_13, %c0_14] : memref<312x312xbf16, #tpu.memory_space<vmem>>, vector<312x312xbf16>
    %cst_15 = arith.constant dense<0.000000e+00> : vector<2x312xf32>
    %27 = tpu.matmul %25, %26, %cst_15 {dimension_numbers = #tpu.dot_dimension_numbers<[1], [0], [0], [1], [0, 0, 1, 1], [], []>} : vector<2x312xbf16>, vector<312x312xbf16>, vector<2x312xf32> -> vector<2x312xf32>
    %c0_16 = arith.constant 0 : index
    %c0_17 = arith.constant 0 : index
    %28 = vector.load %arg7[%c0_16, %c0_17] : memref<1x312xf32, #tpu.memory_space<vmem>>, vector<1x312xf32>
    %29 = vector.broadcast %28 : vector<1x312xf32> to vector<2x312xf32>
    %30 = arith.addf %27, %29 : vector<2x312xf32>
    %cst_18 = arith.constant 0.000000e+00 : f32
    %31 = vector.broadcast %cst_18 : f32 to vector<2x312xf32>
    %32 = arith.maximumf %30, %31 : vector<2x312xf32>
    %c0_19 = arith.constant 0 : index
    %c0_20 = arith.constant 0 : index
    %33 = vector.load %arg8[%c0_19, %c0_20] : memref<312x2xf32, #tpu.memory_space<vmem>>, vector<312x2xf32>
    %cst_21 = arith.constant dense<0.000000e+00> : vector<2x2xf32>
    %34 = tpu.matmul %32, %33, %cst_21 {dimension_numbers = #tpu.dot_dimension_numbers<[1], [0], [0], [1], [0, 0, 1, 1], [], []>} : vector<2x312xf32>, vector<312x2xf32>, vector<2x2xf32> -> vector<2x2xf32>
    %c0_22 = arith.constant 0 : index
    %c0_23 = arith.constant 0 : index
    %35 = vector.load %arg9[%c0_22, %c0_23] : memref<1x2xf32, #tpu.memory_space<vmem>>, vector<1x2xf32>
    %36 = vector.broadcast %35 : vector<1x2xf32> to vector<2x2xf32>
    %37 = arith.addf %34, %36 : vector<2x2xf32>
    %c0_24 = arith.constant 0 : index
    %c0_25 = arith.constant 0 : index
    %38 = vector.load %arg10[%c0_24, %c0_25] : memref<2x2xf32, #tpu.memory_space<vmem>>, vector<2x2xf32>
    tpu.vector_store %arg10[%c0_24, %c0_25], %37 {strides = array<i32>} : memref<2x2xf32, #tpu.memory_space<vmem>>, vector<2x2xf32>,
    return
  }
  func.func @transform_0(%arg0: i32) -> (i32, i32) {
    %c0_i32 = arith.constant 0 : i32
    %c0_i32_0 = arith.constant 0 : i32
    return %arg0, %c0_i32 : i32, i32
  }
  func.func @transform_1(%arg0: i32) -> (i32, i32) {
    %c0_i32 = arith.constant 0 : i32
    %c0_i32_0 = arith.constant 0 : i32
    %c0_i32_1 = arith.constant 0 : i32
    return %c0_i32, %c0_i32_0 : i32, i32
  }
  func.func @transform_2(%arg0: i32) -> (i32, i32) {
    %c0_i32 = arith.constant 0 : i32
    %c0_i32_0 = arith.constant 0 : i32
    %c0_i32_1 = arith.constant 0 : i32
    return %c0_i32, %c0_i32_0 : i32, i32
  }
  func.func @transform_3(%arg0: i32) -> (i32, i32) {
    %c0_i32 = arith.constant 0 : i32
    %c0_i32_0 = arith.constant 0 : i32
    %c0_i32_1 = arith.constant 0 : i32
    return %c0_i32, %c0_i32_0 : i32, i32
  }
  func.func @transform_4(%arg0: i32) -> (i32, i32) {
    %c0_i32 = arith.constant 0 : i32
    %c0_i32_0 = arith.constant 0 : i32
    %c0_i32_1 = arith.constant 0 : i32
    return %c0_i32, %c0_i32_0 : i32, i32
  }
  func.func @transform_5(%arg0: i32) -> (i32, i32) {
    %c0_i32 = arith.constant 0 : i32
    %c0_i32_0 = arith.constant 0 : i32
    %c0_i32_1 = arith.constant 0 : i32
    return %c0_i32, %c0_i32_0 : i32, i32
  }
  func.func @transform_6(%arg0: i32) -> (i32, i32) {
    %c0_i32 = arith.constant 0 : i32
    %c0_i32_0 = arith.constant 0 : i32
    %c0_i32_1 = arith.constant 0 : i32
    return %c0_i32, %c0_i32_0 : i32, i32
  }
  func.func @transform_7(%arg0: i32) -> (i32, i32) {
    %c0_i32 = arith.constant 0 : i32
    %c0_i32_0 = arith.constant 0 : i32
    %c0_i32_1 = arith.constant 0 : i32
    return %c0_i32, %c0_i32_0 : i32, i32
  }
  func.func @transform_8(%arg0: i32) -> (i32, i32) {
    %c0_i32 = arith.constant 0 : i32
    %c0_i32_0 = arith.constant 0 : i32
    %c0_i32_1 = arith.constant 0 : i32
    return %c0_i32, %c0_i32_0 : i32, i32
  }
  func.func @transform_9(%arg0: i32) -> (i32, i32) {
    %c0_i32 = arith.constant 0 : i32
    %c0_i32_0 = arith.constant 0 : i32
    return %arg0, %c0_i32 : i32, i32
  }
}

</mosaic_0001>

<bundles_post_ra>
// kernel: demix_gru_forward.3
= control target key start
LH: loop header
LB: loop body
LE: loop exit
PB: predicated region body
PF: predicated region fallthrough
CT: control target
= control target key end

     0   :  { %v1957_v2 = vmov 0   ;;  %vm290_vm0 = vcmask 1043456   ;;  %vm286_vm1 = vcmask 457728   ;;  %s2616_s0 = inlined_call_operand.vmem [shape: f32[8,312], index: 0, kind: input, shape index: {}]   ;;  %s2617_s1 = inlined_call_operand.vmem [shape: f32[2,8], index: 1, kind: input, shape index: {}]   ;;  %s2618_s2 = inlined_call_operand.vmem [shape: bf16[312,256], index: 2, kind: input, shape index: {}]   ;;  %s2619_s3 = inlined_call_operand.vmem [shape: f32[1,256], index: 3, kind: input, shape index: {}]   ;;  %s2620_s4 = inlined_call_operand.vmem [shape: f32[256,1], index: 4, kind: input, shape index: {}]   ;;  %s2621_s5 = inlined_call_operand.vmem [shape: bf16[312,312], index: 5, kind: input, shape index: {}]   ;;  %s2622_s6 = inlined_call_operand.vmem [shape: f32[1,312], index: 6, kind: input, shape index: {}]   ;;  %s2623_s7 = inlined_call_operand.vmem [shape: f32[312,2], index: 7, kind: input, shape index: {}]   ;;  %s2624_s8 = inlined_call_operand.vmem [shape: f32[1,2], index: 8, kind: input, shape index: {}]   ;;  %s2625_s9 = inlined_call_operand.hbm [shape: f32[2,2], index: 9, kind: output, shape index: {}]  }
   0x1   :  { %v1789_v0 = vld [vmem:[%s2618_s2 + $0x74] ss:$8 sps:$4 sm:$0xff]   ;;  %v1791_v1 = vld [vmem:[%s2618_s2 + $0x70] ss:$8 sps:$4 sm:$0xff]   ;;  %370 = vmatprep.mubr.bf16.mxu1 %v1957_v2  ;;  %1787 = vset.pattern.permute.xlu0 %v1957_v2  ;;  %v1792_v3 = vld [vmem:[%s2618_s2 + $0x64] ss:$8 sps:$4 sm:$0xff]  }
   0x2   :  { %297 = vmatprep.subr.bf16.mxu0 %v1789_v0  ;;  %1788 = vset.pattern.permute.xlu1 %v1957_v2  ;;  %v1794_v4 = vld [vmem:[%s2618_s2 + $0x60] ss:$8 sps:$4 sm:$0xff]   ;;  %v1795_v5 = vld [vmem:[%s2618_s2 + $0x54] ss:$8 sps:$4 sm:$0xff]   ;;  %v1797_v6 = vld [vmem:[%s2618_s2 + $0x50] ss:$8 sps:$4 sm:$0xff]  }
   0x3   :  { %298 = vmatpush1.bf16.msra.mxu0 %v1791_v1  ;;  %v1798_v7 = vld [vmem:[%s2618_s2 + $0x44] ss:$8 sps:$4 sm:$0xff]   ;;  %v1800_v8 = vld [vmem:[%s2618_s2 + $0x40] ss:$8 sps:$4 sm:$0xff]   ;;  %v1801_v9 = vld [vmem:[%s2618_s2 + $0x34] ss:$8 sps:$4 sm:$0xff]  }
   0x4   :  { %299 = vmatprep.subr.bf16.mxu0 %v1792_v3  ;;  %v1803_v10 = vld [vmem:[%s2618_s2 + $0x30] ss:$8 sps:$4 sm:$0xff]   ;;  %v1804_v12 = vld [vmem:[%s2618_s2 + $0x24] ss:$8 sps:$4 sm:$0xff]   ;;  %v1806_v15 = vld [vmem:[%s2618_s2 + $0x20] ss:$8 sps:$4 sm:$0xff]  }
   0x5   :  { %v78_v11 = vld [vmem:[%s2618_s2 + $0x130] sm:$0xff]  ;;  %v1829_v17 = vld [vmem:[%s2618_s2 + $0x124] ss:$8 sps:$4 sm:$0xff]   ;;  %v1832_v19 = vld [vmem:[%s2618_s2 + $0x120] ss:$8 sps:$4 sm:$0xff]  }
   0x6   :  { %v1562_v13 = vcombine.high %v78_v11, %v78_v11  ;;  %v1561_v14 = vcombine.low %v78_v11, %v78_v11  ;;  %v1807_v18 = vld [vmem:[%s2618_s2 + $0x14] ss:$8 sps:$4 sm:$0xff]   ;;  %v1809_v21 = vld [vmem:[%s2618_s2 + $0x10] ss:$8 sps:$4 sm:$0xff]   ;;  %v1810_v22 = vld [vmem:[%s2618_s2 + $0x4] ss:$8 sps:$4 sm:$0xff]  }
   0x7   :  { %300 = vmatpush1.bf16.msra.mxu0 %v1794_v4  ;;  %v1835_v20 = vld [vmem:[%s2618_s2 + $0x114] ss:$8 sps:$4 sm:$0xff]   ;;  %v1838_v23 = vld [vmem:[%s2618_s2 + $0x110] ss:$8 sps:$4 sm:$0xff]   ;;  %v1841_v24 = vld [vmem:[%s2618_s2 + $0x104] ss:$8 sps:$4 sm:$0xff]  }
   0x8   :  { %301 = vmatprep.subr.bf16.mxu0 %v1795_v5  ;;  %1563 = vmatprep.subr.msk.bf16.mxu1 %vm290_vm0, %v1562_v13  ;;  %v292_v16 = vsel %vm290_vm0, %v1561_v14, 0  ;;  %v2082_v25 = vld [vmem:[%s2616_s0 + $0x8] sm:$0xff]  ;;  %v2093_v28 = vld [vmem:[%s2616_s0 + $0x10] sm:$0xff]  ;;  %v412_v31 = vld [vmem:[%s2620_s4 + $0xf8] sm:$0xff] }
   0x9   :  { %347 = vmatpush1.bf16.msra.mxu1 %v292_v16  ;;  %v1812_v26 = vld [vmem:[%s2618_s2] ss:$8 sps:$4 sm:$0xff]   ;;  %v38_v29 = vpack.c.bf16 %v2082_v25, %v2082_v25  ;;  %v1813_v30 = vld [vmem:[%s2618_s2 + $0xf4] ss:$8 sps:$4 sm:$0xff]   ;;  %v1815_v32 = vld [vmem:[%s2618_s2 + $0xf0] ss:$8 sps:$4 sm:$0xff]   ;;  %v39_v34 = vpack.c.bf16 %v2093_v28, %v2093_v28 }
   0xa   :  { %348 = vmatprep.subr.bf16.mxu1 %v1829_v17  ;;  %v1844_v27 = vld [vmem:[%s2618_s2 + $0x100] ss:$8 sps:$4 sm:$0xff]   ;;  %v1816_v33 = vld [vmem:[%s2618_s2 + $0xe4] ss:$8 sps:$4 sm:$0xff]   ;;  %v396_v35 = vld [vmem:[%s2620_s4 + $0x78] sm:$0xff] }
   0xb   :  { %302 = vmatpush1.bf16.msra.mxu0 %v1797_v6  ;;  %329 = vmatprep.mubr.bf16.mxu0 %v38_v29  ;;  %v411_v36 = vld [vmem:[%s2620_s4 + $0xf0] sm:$0xff]  ;;  %v1818_v38 = vld [vmem:[%s2618_s2 + $0xe0] ss:$8 sps:$4 sm:$0xff]   ;;  %v1822_v43 = vld [vmem:[%s2618_s2 + $0xc4] ss:$8 sps:$4 sm:$0xff]  }
   0xc   :  { %303 = vmatprep.subr.bf16.mxu0 %v1798_v7  ;;  %v395_v37 = vld [vmem:[%s2620_s4 + $0x70] sm:$0xff]  ;;  %v410_v39 = vld [vmem:[%s2620_s4 + $0xe8] sm:$0xff] }
   0xd   :  { %349 = vmatpush1.bf16.msra.mxu1 %v1832_v19  ;;  %v1819_v40 = vld [vmem:[%s2618_s2 + $0xd4] ss:$8 sps:$4 sm:$0xff]   ;;  %v394_v41 = vld [vmem:[%s2620_s4 + $0x68] sm:$0xff]  ;;  %v1821_v42 = vld [vmem:[%s2618_s2 + $0xd0] ss:$8 sps:$4 sm:$0xff]  }
   0xe   :  { %350 = vmatprep.subr.bf16.mxu1 %v1835_v20  ;;  %v1825_v44 = vld [vmem:[%s2618_s2 + $0xc0] ss:$8 sps:$4 sm:$0xff]   ;;  %v1827_v45 = vld [vmem:[%s2618_s2 + $0xb4] ss:$8 sps:$4 sm:$0xff]   ;;  %v1831_v46 = vld [vmem:[%s2618_s2 + $0xb0] ss:$8 sps:$4 sm:$0xff]  }
   0xf   :  { %304 = vmatpush1.bf16.msra.mxu0 %v1800_v8  ;;  %v1833_v47 = vld [vmem:[%s2618_s2 + $0xa4] ss:$8 sps:$4 sm:$0xff]   ;;  %v1837_v48 = vld [vmem:[%s2618_s2 + $0xa0] ss:$8 sps:$4 sm:$0xff]   ;;  %v1839_v49 = vld [vmem:[%s2618_s2 + $0x94] ss:$8 sps:$4 sm:$0xff]  }
  0x10   :  { %305 = vmatprep.subr.bf16.mxu0 %v1801_v9 }
  0x11   :  { %351 = vmatpush1.bf16.msra.mxu1 %v1838_v23 }
  0x12   :  { %352 = vmatprep.subr.bf16.mxu1 %v1841_v24 }
  0x13   :  { %306 = vmatpush1.bf16.msra.mxu0 %v1803_v10 }
  0x14   :  { %307 = vmatprep.subr.bf16.mxu0 %v1804_v12 }
  0x15   :  { %353 = vmatpush1.bf16.msra.mxu1 %v1844_v27 }
  0x16   :  { %1633 = vmatprep.subr.mxu1 %v412_v31 }
  0x17   :  { %308 = vmatpush1.bf16.msra.mxu0 %v1806_v15 }
  0x18   :  { %309 = vmatprep.subr.bf16.mxu0 %v1807_v18  ;;  %1564 = vmatmul.mubr.msk.bf16.vlgmr.msra.gmra.mxu1 %vm286_vm1, %v39_v34 }
  0x19   :  { %1634 = vmatpush3.msra.mxu1 %v396_v35 }
  0x1a   :  { %1635 = vmatprep.subr.mxu1 %v411_v36 }
  0x1b   :  { %310 = vmatpush1.bf16.msra.mxu0 %v1809_v21  ;;  %1636 = vmatpush3.msra.mxu1 %v395_v37 }
  0x1c   :  { %311 = vmatprep.subr.bf16.mxu0 %v1810_v22  ;;  %1637 = vmatprep.subr.mxu1 %v410_v39 }
  0x1d   :  { %1638 = vmatpush3.msra.mxu1 %v394_v41 }
  0x1f   :  { %312 = vmatpush1.bf16.msra.mxu0 %v1812_v26 }
  0x20   :  { %313 = vmatprep.subr.bf16.mxu0 %v1813_v30 }
  0x23   :  { %314 = vmatpush2.bf16.msra.mxu0 %v1815_v32 }
  0x24   :  { %315 = vmatprep.subr.bf16.mxu0 %v1816_v33 }
  0x27   :  { %316 = vmatpush2.bf16.msra.mxu0 %v1818_v38 }
  0x28   :  { %317 = vmatprep.subr.bf16.mxu0 %v1819_v40 }
  0x2b   :  { %318 = vmatpush2.bf16.msra.mxu0 %v1821_v42 }
  0x2c   :  { %319 = vmatprep.subr.bf16.mxu0 %v1822_v43 }
  0x2f   :  { %320 = vmatpush2.bf16.msra.mxu0 %v1825_v44 }
  0x30   :  { %321 = vmatprep.subr.bf16.mxu0 %v1827_v45 }
  0x33   :  { %322 = vmatpush2.bf16.msra.mxu0 %v1831_v46 }
  0x34   :  { %323 = vmatprep.subr.bf16.mxu0 %v1833_v47 }
  0x35   :  { %14 = vsyncpa [#allocation3], 0  ;;  %v1843_v50 = vld [vmem:[%s2618_s2 + $0x90] ss:$8 sps:$4 sm:$0xff]   ;;  %v1845_v51 = vld [vmem:[%s2618_s2 + $0x84] ss:$8 sps:$4 sm:$0xff]   ;;  %v81_v22 = vlaneseq }
  0x36   :  { %v1847_v52 = vld [vmem:[%s2618_s2 + $0x80] ss:$8 sps:$4 sm:$0xff]   ;;  %v408_v57 = vld [vmem:[%s2620_s4 + $0xd8] sm:$0xff]  ;;  %v407_v59 = vld [vmem:[%s2620_s4 + $0xd0] sm:$0xff]  ;;  %vm483_vm2 = vcmask 7168   ;;  %v1958_v45 = vmov 0.0  }
  0x37   :  { %324 = vmatpush2.bf16.msra.mxu0 %v1837_v48  ;;  %v2169_v53 = vld [vmem:[%s2616_s0] sm:$0xff]  ;;  %v392_v58 = vld [vmem:[%s2620_s4 + $0x58] sm:$0xff]  ;;  %v391_v60 = vld [vmem:[%s2620_s4 + $0x50] sm:$0xff]  ;;  %v2251_v23 = vshrl.u32 %v81_v22, 7  ;;  %vm1959_vm3 = vmmov 0   ;;  %vm499_vm4 = vcmask 64512  }
  0x38   :  { %325 = vmatprep.subr.bf16.mxu0 %v1839_v49  ;;  %v37_v54 = vpack.c.bf16 %v2169_v53, %v2169_v53  ;;  %v409_v55 = vld [vmem:[%s2620_s4 + $0xe0] sm:$0xff]  ;;  %v406_v61 = vld [vmem:[%s2620_s4 + $0xc8] sm:$0xff]  ;;  %v404_v1 = vld [vmem:[%s2620_s4 + $0xb8] sm:$0xff]  ;;  %s1960_s20 = smov [#allocation2]   ;;  %vm1507_vm5 = vcmask 9216  }
  0x39   :  { %v393_v56 = vld [vmem:[%s2620_s4 + $0x60] sm:$0xff]  ;;  %1639 = vmatprep.subr.mxu1 %v409_v55  ;;  %v390_v62 = vld [vmem:[%s2620_s4 + $0x48] sm:$0xff]  ;;  %v388_v3 = vld [vmem:[%s2620_s4 + $0x38] sm:$0xff]  ;;  %v83_v24 = vsub.s32 0, %v2251_v23  ;;  %v87_v27 = vsub.s32 1, %v2251_v23  ;;  %s1515_s21 = sshll.u32 %s1960_s20, 4  ;;  %s1516_s21 = int_to_ptr.vmem [resolvable:$true] %s1515_s21 }
  0x3a   :  { %1640 = vmatpush3.msra.mxu1 %v393_v56  ;;  %v405_v63 = vld [vmem:[%s2620_s4 + $0xc0] sm:$0xff]  ;;  %v403_v4 = vld [vmem:[%s2620_s4 + $0xb0] sm:$0xff]  ;;  %v402_v6 = vld [vmem:[%s2620_s4 + $0xa8] sm:$0xff]  ;;  %s1935_s22 = scalar_lea.vmem %s1516_s21, 32  ;;  %p1940_p1 = scmp.lt.s32.totalorder %s1516_s21, %s1516_s21 }
  0x3b   :  { %326 = vmatpush2.bf16.msra.mxu0 %v1843_v50  ;;  %1641 = vmatprep.subr.mxu1 %v408_v57  ;;  %v389_v0 = vld [vmem:[%s2620_s4 + $0x40] sm:$0xff]  ;;  %v387_v5 = vld [vmem:[%s2620_s4 + $0x30] sm:$0xff]  ;;  %v386_v7 = vld [vmem:[%s2620_s4 + $0x28] sm:$0xff]  ;;  %p1936_p0 = scmp.ne.s32.totalorder %s1516_s21, %s1935_s22  ;;  %p1941_p2 = scmp.lt.s32.totalorder %s1935_s22, %s1935_s22 }
  0x3c   :  { %327 = vmatprep.subr.bf16.mxu0 %v1845_v51  ;;  %1642 = vmatpush3.msra.mxu1 %v392_v58  ;;  %v401_v8 = vld [vmem:[%s2620_s4 + $0xa0] sm:$0xff]  ;;  %v400_v10 = vld [vmem:[%s2620_s4 + $0x98] sm:$0xff]  ;;  %v399_v12 = vld [vmem:[%s2620_s4 + $0x90] sm:$0xff] }
  0x3d   :  { %1643 = vmatprep.subr.mxu1 %v407_v59  ;;  %v385_v9 = vld [vmem:[%s2620_s4 + $0x20] sm:$0xff]  ;;  %v384_v11 = vld [vmem:[%s2620_s4 + $0x18] sm:$0xff]  ;;  %v383_v13 = vld [vmem:[%s2620_s4 + $0x10] sm:$0xff]  ;;  %p1942_p3 = por %p1941_p2, %p1940_p1 }
  0x3e   :  { %1644 = vmatpush3.msra.mxu1 %v391_v60  ;;  %v398_v14 = vld [vmem:[%s2620_s4 + $0x88] sm:$0xff]  ;;  %v397_v16 = vld [vmem:[%s2620_s4 + $0x80] sm:$0xff] }
  0x3f   :  { %328 = vmatpush2.bf16.msra.mxu0 %v1847_v52  ;;  %1645 = vmatprep.subr.mxu1 %v406_v61  ;;  %v382_v15 = vld [vmem:[%s2620_s4 + $0x8] sm:$0xff]  ;;  %v381_v17 = vld [vmem:[%s2620_s4] sm:$0xff]  ;;  %p1943_p4 = pnand %p1942_p3, %p1936_p0 }
  0x40   :  { %1646 = vmatpush3.msra.mxu1 %v390_v62  ;;  %v79_v26 = vld [vmem:[%s2619_s3] sm:$0x3]  ;;  %1742 = vmatprep.subr.mxu0 %v1958_v45  ;;  %v810_v59 = vld [vmem:[%s2621_s5 + $0x1c8] sm:$0xff] }
  0x41   :  { %1647 = vmatprep.subr.mxu1 %v405_v63  ;;  %v84_v29 = vrot.slane %v79_v26, %v83_v24  ;;  %v88_v30 = vrot.slane %v79_v26, %v87_v27  ;;  %v498_v57 = vld [vmem:[%s2617_s1] sm:$0x3]  ;;  %v1626_v60 = vcombine.high %v810_v59, %v810_v59  ;;  %v1625_v61 = vcombine.low %v810_v59, %v810_v59  ;;  %v1880_v22 = vld [vmem:[%s2621_s5 + $0x13c] ss:$12 sps:$4 sm:$0xff]   ;;  %v1878_v26 = vld [vmem:[%s2621_s5 + $0x138] ss:$12 sps:$4 sm:$0xff]  }
  0x42   :  { %330 = vmatmul.mubr.bf16.vlgmr.msra.gmra.mxu0 %v37_v54  ;;  %1648 = vmatpush3.msra.mxu1 %v389_v0  ;;  %v1891_v62 = vld [vmem:[%s2621_s5 + $0x1b4] ss:$12 sps:$4 sm:$0xff]   ;;  %v1889_v0 = vld [vmem:[%s2621_s5 + $0x1b0] ss:$12 sps:$4 sm:$0xff]  }
  0x43   :  { %1649 = vmatprep.subr.mxu1 %v404_v1  ;;  %1744 = vmatprep.mubr.msk.f32.mxu0 %vm1959_vm3, %v1958_v45  ;;  %v1145_v63 = vsel %vm290_vm0, %v1625_v61, 0 }
  0x44   :  { %1650 = vmatpush3.msra.mxu1 %v388_v3 }
  0x45   :  { %1651 = vmatprep.subr.mxu1 %v403_v4  ;;  %v1850_v4 = vld [vmem:[%s2621_s5 + $0xac] ss:$12 sps:$4 sm:$0xff]  }
  0x46   :  { %1652 = vmatpush3.msra.mxu1 %v387_v5 }
  0x47   :  { %1653 = vmatprep.subr.mxu1 %v402_v6  ;;  %v1856_v6 = vld [vmem:[%s2621_s5 + $0x7c] ss:$12 sps:$4 sm:$0xff]  }
  0x48   :  { %1654 = vmatpush3.msra.mxu1 %v386_v7  ;;  %v1854_v7 = vld [vmem:[%s2621_s5 + $0x78] ss:$12 sps:$4 sm:$0xff]  }
  0x49   :  { %1655 = vmatprep.subr.mxu1 %v401_v8  ;;  %v1859_v8 = vld [vmem:[%s2621_s5 + $0x64] ss:$12 sps:$4 sm:$0xff]  }
  0x4a   :  { %1656 = vmatpush3.msra.mxu1 %v385_v9  ;;  %v1857_v9 = vld [vmem:[%s2621_s5 + $0x60] ss:$12 sps:$4 sm:$0xff]  }
  0x4b   :  { %1657 = vmatprep.subr.mxu1 %v400_v10  ;;  %v1862_v10 = vld [vmem:[%s2621_s5 + $0x4c] ss:$12 sps:$4 sm:$0xff]  }
  0x4c   :  { %1658 = vmatpush3.msra.mxu1 %v384_v11  ;;  %v1860_v11 = vld [vmem:[%s2621_s5 + $0x48] ss:$12 sps:$4 sm:$0xff]  }
  0x4d   :  { %1659 = vmatprep.subr.mxu1 %v399_v12  ;;  %v1865_v12 = vld [vmem:[%s2621_s5 + $0x34] ss:$12 sps:$4 sm:$0xff]  }
  0x4e   :  { %1660 = vmatpush3.msra.mxu1 %v383_v13  ;;  %v1863_v13 = vld [vmem:[%s2621_s5 + $0x30] ss:$12 sps:$4 sm:$0xff]  }
  0x4f   :  { %1661 = vmatprep.subr.mxu1 %v398_v14  ;;  %v1868_v14 = vld [vmem:[%s2621_s5 + $0x1c] ss:$12 sps:$4 sm:$0xff]  }
  0x50   :  { %1662 = vmatpush3.msra.mxu1 %v382_v15  ;;  %v1866_v15 = vld [vmem:[%s2621_s5 + $0x18] ss:$12 sps:$4 sm:$0xff]  }
  0x51   :  { %1663 = vmatprep.subr.mxu1 %v397_v16  ;;  %v1871_v16 = vld [vmem:[%s2621_s5 + $0x4] ss:$12 sps:$4 sm:$0xff]  }
  0x52   :  { %1664 = vmatpush3.msra.mxu1 %v381_v17  ;;  %v1869_v17 = vld [vmem:[%s2621_s5] ss:$12 sps:$4 sm:$0xff]  }
  0xd8   :  { %v372_v18 = vpop.f32.mrf.mxu1 }
  0xda   :  { %v374_v19 = vpop.f32.mrf.mxu1 }
  0xdc   :  { %v376_v20 = vpop.f32.mrf.mxu1 }
  0xdd   :  { %v1877_v20 = vld [vmem:[%s2621_s5 + $0x154] ss:$12 sps:$4 sm:$0xff]  }
  0xde   :  { %v377_v21 = vpop.f32.mrf.mxu1 }
  0xdf   :  { %v1875_v21 = vld [vmem:[%s2621_s5 + $0x150] ss:$12 sps:$4 sm:$0xff]  }
 0x102   :  { %v331_v31 = vpop.f32.mrf.mxu0 }
 0x103   :  { %v332_v32 = vadd.f32 %v331_v31, %v84_v29  ;;  %v1883_v29 = vld [vmem:[%s2621_s5 + $0x124] ss:$12 sps:$4 sm:$0xff]   ;;  %v1888_v31 = vld [vmem:[%s2621_s5 + $0x10c] ss:$12 sps:$4 sm:$0xff]  }
 0x104   :  { %v333_v33 = vpop.f32.mrf.mxu0 }
 0x105   :  { %v334_v34 = vadd.f32 %v333_v33, %v88_v30  ;;  %v373_v35 = vadd.f32 %v372_v18, %v332_v32  ;;  %v1874_v18 = vld [vmem:[%s2621_s5 + $0x16c] ss:$12 sps:$4 sm:$0xff]   ;;  %v1886_v32 = vld [vmem:[%s2621_s5 + $0x108] ss:$12 sps:$4 sm:$0xff]  }
 0x106   :  { %v335_v36 = vpop.f32.mrf.mxu0  ;;  %v1881_v30 = vld [vmem:[%s2621_s5 + $0x120] ss:$12 sps:$4 sm:$0xff]  }
 0x107   :  { %v375_v37 = vadd.f32 %v374_v19, %v334_v34  ;;  %v1872_v19 = vld [vmem:[%s2621_s5 + $0x168] ss:$12 sps:$4 sm:$0xff]   ;;  %v1892_v34 = vld [vmem:[%s2621_s5 + $0xf0] ss:$12 sps:$4 sm:$0xff]  }
 0x108   :  { %v336_v38 = vpop.f32.mrf.mxu0  ;;  %v1894_v33 = vld [vmem:[%s2621_s5 + $0xf4] ss:$12 sps:$4 sm:$0xff]   ;;  %v1897_v36 = vld [vmem:[%s2621_s5 + $0x19c] ss:$12 sps:$4 sm:$0xff]  }
 0x109   :  { %1927 = vtanh.f32 %v375_v37  ;;  %v1898_v38 = vld [vmem:[%s2621_s5 + $0xd8] ss:$12 sps:$4 sm:$0xff]  }
 0x10a   :  { %1929 = vtanh.f32 %v373_v35  ;;  %v1895_v35 = vld [vmem:[%s2621_s5 + $0x198] ss:$12 sps:$4 sm:$0xff]  }
 0x116   :  { %v1928_v39 = vpop.eup %1927 }
 0x117   :  { %v1930_v40 = vpop.eup %1929  ;;  %477 = vmatprep.mubr.f32.mxu1 %v1928_v39  ;;  %v1900_v39 = vld [vmem:[%s2621_s5 + $0xdc] ss:$12 sps:$4 sm:$0xff]  }
 0x118   :  { %478 = vmatmul.mubr.f32.vlgmr.msra.gmra.mxu1 %v1930_v40 }
 0x119   :  { %645 = vmatprep.mubr.f32.mxu1 %v1958_v45 }
 0x1d8   :  { %v1665_v41 = vpop.f32.mrf.mxu1 }
 0x1da   :  { %v1666_v42 = vpop.f32.mrf.mxu1 }
 0x1db   :  { %v1667_v43 = vadd.f32 %v1666_v42, %v1665_v41  ;;  %v1901_v41 = vld [vmem:[%s2621_s5 + $0x180] ss:$12 sps:$4 sm:$0xff]   ;;  %v1903_v42 = vld [vmem:[%s2621_s5 + $0x184] ss:$12 sps:$4 sm:$0xff]  }
 0x1dd   :  { %v484_v44 = vsel %vm483_vm2, %v1667_v43, -inf }
 0x1de   :  { %485 = vmax.xlane.f32.xlu0 %v484_v44  ;;  %v1904_v44 = vld [vmem:[%s2621_s5 + $0xc0] ss:$12 sps:$4 sm:$0xff]  }
 0x267   :  { %v486_v46 = vpop.xlane.xlu0 %485 }
 0x268   :  { %v487_v47 = vrot.slane %v486_v46, 4 }
 0x26a   :  { %v488_v48 = vmax.f32 %v486_v46, %v487_v47  ;;  %v1907_v46 = vld [vmem:[%s2621_s5 + $0x170] ss:$12 sps:$4 sm:$0xff]  }
 0x26c   :  { %v489_v49 = vrot.slane %v488_v48, 2 }
 0x26e   :  { %v490_v50 = vmax.f32 %v488_v48, %v489_v49  ;;  %v1349_v48 = vld [vmem:[%s2623_s7 + $0xf8] sm:$0xff] }
 0x270   :  { %v491_v51 = vrot.slane %v490_v50, 1 }
 0x272   :  { %v492_v52 = vmax.f32 %v490_v50, %v491_v51 }
 0x274   :  { %1781 = vpush %v492_v52 }
 0x2a5   :  { %s1782_s3 = spop %1781 }
 0x2a6   :  { %v494_v54 = vstv %s1782_s3 }
 0x2a7   :  { %v495_v55 = vsub.f32 %v1667_v43, %v494_v54  ;;  %v1906_v43 = vld [vmem:[%s2621_s5 + $0xc4] ss:$12 sps:$4 sm:$0xff]  }
 0x2a9   :  { %v496_v56 = vmul.f32 1.442695, %v495_v55 }
 0x2ab   :  { %1931 = vpow2.f32 %v496_v56 }
 0x2b8   :  { %v1932_v58 = vpop.eup %1931 }
 0x2b9   :  { %575 = vperm.xlu0 %1787, %v1932_v58   ;;  %1743 = vmatpush3.msra.mxu0 %v1932_v58  ;;  %v1908_v58 = vld [vmem:[%s2621_s5 + $0xb0] ss:$12 sps:$4 sm:$0xff]  }
 0x2ba   :  { %1745 = vmatmul.mubr.msk.f32.vlgmr.msra.gmra.mxu0 %vm499_vm4, %v498_v57  ;;  %1628 = vmatprep.subr.msk.bf16.mxu0 %vm290_vm0, %v1626_v60 }
 0x2bb   :  { %1226 = vmatprep.mubr.bf16.mxu0 %v1957_v2  ;;  %1203 = vmatpush1.bf16.msra.mxu0 %v1145_v63  ;;  %v1333_v63 = vld [vmem:[%s2623_s7 + $0x78] sm:$0xff] }
 0x2bc   :  { %1204 = vmatprep.subr.bf16.mxu0 %v1891_v62  ;;  %v1909_v62 = vld [vmem:[%s2621_s5 + $0x158] ss:$12 sps:$4 sm:$0xff]  }
 0x2bf   :  { %1205 = vmatpush1.bf16.msra.mxu0 %v1889_v0  ;;  %v1910_v0 = vld [vmem:[%s2621_s5 + $0x98] ss:$12 sps:$4 sm:$0xff]  }
 0x2c0   :  { %1206 = vmatprep.subr.bf16.mxu0 %v1897_v36 }
 0x2c3   :  { %1207 = vmatpush1.bf16.msra.mxu0 %v1895_v35  ;;  %v1923_v35 = vld [vmem:[%s2621_s5 + $0x1d0] ss:$0 sps:$4 sm:$0xff]  }
 0x2c4   :  { %1208 = vmatprep.subr.bf16.mxu0 %v1903_v42  ;;  %v1151_v36 = vsel %vm290_vm0, %v1923_v35, 0  ;;  %v1337_v42 = vld [vmem:[%s2623_s7 + $0x98] sm:$0xff] }
 0x2c7   :  { %1209 = vmatpush1.bf16.msra.mxu0 %v1901_v41  ;;  %v1322_v41 = vld [vmem:[%s2623_s7 + $0x20] sm:$0xff] }
 0x2c8   :  { %1672 = vmatprep.subr.bf16.mxu0 %v1907_v46  ;;  %v1320_v46 = vld [vmem:[%s2623_s7 + $0x10] sm:$0xff] }
 0x334   :  { %v576_v2 = vpop.permute.xlu0 %575 }
 0x335   :  { %v578_v1 = vmul.f32 %v576_v2, %v2169_v53  ;;  %v579_v3 = vmul.f32 %v576_v2, %v2082_v25  ;;  %v580_v5 = vmul.f32 %v576_v2, %v2093_v28  ;;  %v1848_v25 = vld [vmem:[%s2621_s5 + $0xa8] ss:$12 sps:$4 sm:$0xff]   ;;  %v1851_v28 = vld [vmem:[%s2621_s5 + $0x90] ss:$12 sps:$4 sm:$0xff]  }
 0x336   :  { %v1853_v53 = vld [vmem:[%s2621_s5 + $0x94] ss:$12 sps:$4 sm:$0xff]  }
 0x337   :  { %611 = vmatprep.subr.mxu1 %v579_v3  ;;  %v1348_v2 = vld [vmem:[%s2623_s7 + $0xf0] sm:$0xff] }
 0x338   :  { %612 = vmatpush1.msra.mxu1 %v578_v1  ;;  %v1911_v1 = vld [vmem:[%s2621_s5 + $0x140] ss:$12 sps:$4 sm:$0xff]   ;;  %v1332_v3 = vld [vmem:[%s2623_s7 + $0x70] sm:$0xff] }
 0x339   :  { %1747 = vmatprep.subr.mxu1 %v1958_v45  ;;  %1566 = vmatmul.mubr.msk.f32.vlgmr.msra.gmra.mxu1 %vm499_vm4, %v498_v57 }
 0x33a   :  { %1748 = vmatpush3.msra.mxu1 %v580_v5  ;;  %1749 = vmatprep.mubr.msk.f32.mxu1 %vm1959_vm3, %v1958_v45  ;;  %v1331_v5 = vld [vmem:[%s2623_s7 + $0x68] sm:$0xff] }
 0x33b   :  { %1153 = vmatprep.subr.bf16.mxu1 %v1850_v4  ;;  %v1347_v4 = vld [vmem:[%s2623_s7 + $0xe8] sm:$0xff] }
 0x33d   :  { %1750 = vmatmul.mubr.msk.f32.vlgmr.msra.gmra.mxu1 %vm499_vm4, %v498_v57 }
 0x33e   :  { %1154 = vmatpush1.bf16.msra.mxu1 %v1848_v25  ;;  %v1912_v25 = vld [vmem:[%s2621_s5 + $0x80] ss:$12 sps:$4 sm:$0xff]  }
 0x33f   :  { %1155 = vmatprep.subr.bf16.mxu1 %v1853_v53  ;;  %v1346_v53 = vld [vmem:[%s2623_s7 + $0xe0] sm:$0xff] }
 0x342   :  { %1156 = vmatpush1.bf16.msra.mxu1 %v1851_v28  ;;  %v1913_v28 = vld [vmem:[%s2621_s5 + $0x128] ss:$12 sps:$4 sm:$0xff]  }
 0x343   :  { %1157 = vmatprep.subr.bf16.mxu1 %v1856_v6  ;;  %v1330_v6 = vld [vmem:[%s2623_s7 + $0x60] sm:$0xff] }
 0x346   :  { %1158 = vmatpush1.bf16.msra.mxu1 %v1854_v7  ;;  %v1345_v7 = vld [vmem:[%s2623_s7 + $0xd8] sm:$0xff] }
 0x347   :  { %1159 = vmatprep.subr.bf16.mxu1 %v1859_v8  ;;  %v1329_v8 = vld [vmem:[%s2623_s7 + $0x58] sm:$0xff] }
 0x34a   :  { %1160 = vmatpush1.bf16.msra.mxu1 %v1857_v9  ;;  %v1914_v9 = vld [vmem:[%s2621_s5 + $0x68] ss:$12 sps:$4 sm:$0xff]  }
 0x34b   :  { %1161 = vmatprep.subr.bf16.mxu1 %v1862_v10  ;;  %v1344_v10 = vld [vmem:[%s2623_s7 + $0xd0] sm:$0xff] }
 0x34e   :  { %1162 = vmatpush1.bf16.msra.mxu1 %v1860_v11  ;;  %v1915_v11 = vld [vmem:[%s2621_s5 + $0x110] ss:$12 sps:$4 sm:$0xff]  }
 0x34f   :  { %1163 = vmatprep.subr.bf16.mxu1 %v1865_v12  ;;  %v1328_v12 = vld [vmem:[%s2623_s7 + $0x50] sm:$0xff] }
 0x352   :  { %1164 = vmatpush1.bf16.msra.mxu1 %v1863_v13  ;;  %v1343_v13 = vld [vmem:[%s2623_s7 + $0xc8] sm:$0xff] }
 0x353   :  { %1165 = vmatprep.subr.bf16.mxu1 %v1868_v14  ;;  %v1327_v14 = vld [vmem:[%s2623_s7 + $0x48] sm:$0xff] }
 0x356   :  { %1166 = vmatpush1.bf16.msra.mxu1 %v1866_v15  ;;  %v1916_v15 = vld [vmem:[%s2621_s5 + $0x50] ss:$12 sps:$4 sm:$0xff]  }
 0x357   :  { %1167 = vmatprep.subr.bf16.mxu1 %v1871_v16  ;;  %v1342_v16 = vld [vmem:[%s2623_s7 + $0xc0] sm:$0xff] }
 0x35a   :  { %1168 = vmatpush1.bf16.msra.mxu1 %v1869_v17  ;;  %v1917_v17 = vld [vmem:[%s2621_s5 + $0xf8] ss:$12 sps:$4 sm:$0xff]  }
 0x35b   :  { %1169 = vmatprep.subr.bf16.mxu1 %v1874_v18  ;;  %v1326_v18 = vld [vmem:[%s2623_s7 + $0x40] sm:$0xff] }
 0x35e   :  { %1170 = vmatpush2.bf16.msra.mxu1 %v1872_v19  ;;  %v1341_v19 = vld [vmem:[%s2623_s7 + $0xb8] sm:$0xff] }
 0x35f   :  { %1171 = vmatprep.subr.bf16.mxu1 %v1877_v20  ;;  %v1325_v20 = vld [vmem:[%s2623_s7 + $0x38] sm:$0xff] }
 0x362   :  { %1172 = vmatpush2.bf16.msra.mxu1 %v1875_v21  ;;  %v1918_v21 = vld [vmem:[%s2621_s5 + $0x38] ss:$12 sps:$4 sm:$0xff]  }
 0x363   :  { %1173 = vmatprep.subr.bf16.mxu1 %v1880_v22  ;;  %v1340_v22 = vld [vmem:[%s2623_s7 + $0xb0] sm:$0xff] }
 0x366   :  { %1174 = vmatpush2.bf16.msra.mxu1 %v1878_v26  ;;  %v1919_v26 = vld [vmem:[%s2621_s5 + $0xe0] ss:$12 sps:$4 sm:$0xff]  }
 0x367   :  { %1175 = vmatprep.subr.bf16.mxu1 %v1883_v29  ;;  %v1324_v29 = vld [vmem:[%s2623_s7 + $0x30] sm:$0xff] }
 0x36a   :  { %1176 = vmatpush2.bf16.msra.mxu1 %v1881_v30  ;;  %v1339_v30 = vld [vmem:[%s2623_s7 + $0xa8] sm:$0xff] }
 0x36b   :  { %1177 = vmatprep.subr.bf16.mxu1 %v1888_v31  ;;  %v1323_v31 = vld [vmem:[%s2623_s7 + $0x28] sm:$0xff] }
 0x36e   :  { %1178 = vmatpush2.bf16.msra.mxu1 %v1886_v32  ;;  %v1920_v32 = vld [vmem:[%s2621_s5 + $0x20] ss:$12 sps:$4 sm:$0xff]  }
 0x36f   :  { %1179 = vmatprep.subr.bf16.mxu1 %v1894_v33  ;;  %v1921_v33 = vld [vmem:[%s2621_s5 + $0xc8] ss:$12 sps:$4 sm:$0xff]  }
 0x372   :  { %1180 = vmatpush2.bf16.msra.mxu1 %v1892_v34  ;;  %v1922_v34 = vld [vmem:[%s2621_s5 + $0x8] ss:$12 sps:$4 sm:$0xff]  }
 0x373   :  { %1181 = vmatprep.subr.bf16.mxu1 %v1900_v39  ;;  %v1926_v39 = vld [vmem:[%s2621_s5 + $0x188] ss:$12 sps:$4 sm:$0xff]  }
 0x376   :  { %1182 = vmatpush2.bf16.msra.mxu1 %v1898_v38  ;;  %v1925_v38 = vld [vmem:[%s2621_s5 + $0x1a0] ss:$12 sps:$4 sm:$0xff]  }
 0x377   :  { %1183 = vmatprep.subr.bf16.mxu1 %v1906_v43  ;;  %v1321_v43 = vld [vmem:[%s2623_s7 + $0x18] sm:$0xff] }
 0x37a   :  { %v569_v37 = vpop.f32.mrf.mxu0  ;;  %1184 = vmatpush2.bf16.msra.mxu1 %v1904_v44  ;;  %v1336_v44 = vld [vmem:[%s2623_s7 + $0x90] sm:$0xff] }
 0x37b   :  { %1933 = vrcp.f32 %v569_v37  ;;  %1699 = vmatprep.subr.mxu1 %v1349_v48  ;;  %v1924_v37 = vld [vmem:[%s2621_s5 + $0x1b8] ss:$12 sps:$4 sm:$0xff]   ;;  %v1319_v48 = vld [vmem:[%s2623_s7 + $0x8] sm:$0xff] }
 0x37c   :  { %v1746_v40 = vpop.f32.mrf.mxu0 }
 0x37d   :  { %v1338_v40 = vld [vmem:[%s2623_s7 + $0xa0] sm:$0xff] }
 0x388   :  { %v1934_v47 = vpop.eup %1933 }
 0x389   :  { %725 = vperm.xlu1 %1788, %v1934_v47   ;;  %v1335_v47 = vld [vmem:[%s2623_s7 + $0x88] sm:$0xff] }
 0x3f9   :  { %v647_v49 = vpop.f32.mrf.mxu1 }
 0x3fb   :  { %v649_v50 = vpop.f32.mrf.mxu1 }
 0x3fd   :  { %v718_v51 = vpop.f32.mrf.mxu1 }
 0x3ff   :  { %v1751_v52 = vpop.f32.mrf.mxu1 }
 0x400   :  { %v1355_v52 = vld [vmem:[%s2623_s7 + $0x128] sm:$0xff] }
 0x404   :  { %v726_v54 = vpop.permute.xlu1 %725 }
 0x405   :  { %v728_v55 = vmul.f32 %v726_v54, %v647_v49  ;;  %v729_v56 = vmul.f32 %v726_v54, %v649_v50  ;;  %v730_v57 = vmul.f32 %v726_v54, %v718_v51  ;;  %v1334_v49 = vld [vmem:[%s2623_s7 + $0x80] sm:$0xff]  ;;  %v1356_v51 = vld [vmem:[%s2623_s7 + $0x130] sm:$0xff] }
 0x406   :  { %v1318_v50 = vld [vmem:[%s2623_s7] sm:$0xff] }
 0x407   :  { %v2407_v59 = vpack.c.bf16 %v728_v55, %v728_v55  ;;  %v732_v60 = vpack.c.bf16 %v729_v56, %v729_v56  ;;  %v2409_v61 = vpack.c.bf16 %v730_v57, %v730_v57  ;;  %v1354_v54 = vld [vmem:[%s2623_s7 + $0x120] sm:$0xff]  ;;  %v1353_v55 = vld [vmem:[%s2623_s7 + $0x118] sm:$0xff]  ;;  %v1352_v56 = vld [vmem:[%s2623_s7 + $0x110] sm:$0xff] }
 0x408   :  { %v1351_v57 = vld [vmem:[%s2623_s7 + $0x108] sm:$0xff] }
 0x409   :  { %1185 = vmatprep.mubr.bf16.mxu1 %v732_v60  ;;  %1629 = vmatmul.mubr.msk.bf16.vlgmr.msra.gmra.mxu0 %vm286_vm1, %v2409_v61 }
 0x40a   :  { %1673 = vmatpush3.bf16.msra.mxu0 %v1908_v58  ;;  %1186 = vmatmul.mubr.bf16.vlgmr.msra.gmra.mxu1 %v2407_v59  ;;  %v1350_v58 = vld [vmem:[%s2623_s7 + $0x100] sm:$0xff] }
 0x40b   :  { %1674 = vmatprep.subr.bf16.mxu0 %v1909_v62  ;;  %1267 = vmatprep.mubr.bf16.mxu0 %v732_v60 }
 0x40c   :  { %1700 = vmatpush3.msra.mxu1 %v1333_v63 }
 0x40d   :  { %1701 = vmatprep.subr.mxu1 %v1348_v2 }
 0x40e   :  { %1675 = vmatpush3.bf16.msra.mxu0 %v1910_v0  ;;  %1702 = vmatpush3.msra.mxu1 %v1332_v3 }
 0x40f   :  { %1676 = vmatprep.subr.bf16.mxu0 %v1911_v1  ;;  %1703 = vmatprep.subr.mxu1 %v1347_v4 }
 0x410   :  { %1704 = vmatpush3.msra.mxu1 %v1331_v5 }
 0x411   :  { %1705 = vmatprep.subr.mxu1 %v1346_v53 }
 0x412   :  { %1677 = vmatpush3.bf16.msra.mxu0 %v1912_v25  ;;  %1706 = vmatpush3.msra.mxu1 %v1330_v6 }
 0x413   :  { %1678 = vmatprep.subr.bf16.mxu0 %v1913_v28  ;;  %1707 = vmatprep.subr.mxu1 %v1345_v7 }
 0x414   :  { %1708 = vmatpush3.msra.mxu1 %v1329_v8 }
 0x415   :  { %1709 = vmatprep.subr.mxu1 %v1344_v10 }
 0x416   :  { %1679 = vmatpush3.bf16.msra.mxu0 %v1914_v9  ;;  %1710 = vmatpush3.msra.mxu1 %v1328_v12 }
 0x417   :  { %1680 = vmatprep.subr.bf16.mxu0 %v1915_v11  ;;  %1711 = vmatprep.subr.mxu1 %v1343_v13 }
 0x418   :  { %1712 = vmatpush3.msra.mxu1 %v1327_v14 }
 0x419   :  { %1713 = vmatprep.subr.mxu1 %v1342_v16 }
 0x41a   :  { %1681 = vmatpush3.bf16.msra.mxu0 %v1916_v15  ;;  %1714 = vmatpush3.msra.mxu1 %v1326_v18 }
 0x41b   :  { %1682 = vmatprep.subr.bf16.mxu0 %v1917_v17  ;;  %1715 = vmatprep.subr.mxu1 %v1341_v19 }
 0x41c   :  { %1716 = vmatpush3.msra.mxu1 %v1325_v20 }
 0x41d   :  { %1717 = vmatprep.subr.mxu1 %v1340_v22 }
 0x41e   :  { %1683 = vmatpush3.bf16.msra.mxu0 %v1918_v21  ;;  %1718 = vmatpush3.msra.mxu1 %v1324_v29 }
 0x41f   :  { %1684 = vmatprep.subr.bf16.mxu0 %v1919_v26  ;;  %1719 = vmatprep.subr.mxu1 %v1339_v30  ;;  %v1631_v26 = vld [vmem:[%s2624_s8] ss:$0 sm:$0xff] }
 0x420   :  { %1720 = vmatpush3.msra.mxu1 %v1323_v31 }
 0x421   :  { %1721 = vmatprep.subr.mxu1 %v1338_v40 }
 0x422   :  { %1685 = vmatpush3.bf16.msra.mxu0 %v1920_v32  ;;  %1722 = vmatpush3.msra.mxu1 %v1322_v41 }
 0x423   :  { %1686 = vmatprep.subr.bf16.mxu0 %v1921_v33  ;;  %1723 = vmatprep.subr.mxu1 %v1337_v42 }
 0x424   :  { %1724 = vmatpush3.msra.mxu1 %v1321_v43 }
 0x425   :  { %1725 = vmatprep.subr.mxu1 %v1336_v44 }
 0x426   :  { %1687 = vmatpush3.bf16.msra.mxu0 %v1922_v34  ;;  %1726 = vmatpush3.msra.mxu1 %v1320_v46 }
 0x427   :  { %1752 = vmatprep.subr.bf16.mxu0 %v1958_v45  ;;  %1727 = vmatprep.subr.mxu1 %v1335_v47 }
 0x428   :  { %1728 = vmatpush3.msra.mxu1 %v1319_v48 }
 0x429   :  { %1268 = vmatmul.mubr.bf16.vlgmr.msra.gmra.mxu0 %v2407_v59  ;;  %1729 = vmatprep.subr.mxu1 %v1334_v49  ;;  %v812_v59 = vld [vmem:[%s2622_s6] sm:$0x7] }
 0x42a   :  { %1753 = vmatpush3.bf16.msra.mxu0 %v1151_v36  ;;  %1760 = vmatprep.mubr.msk.bf16.mxu0 %vm1959_vm3, %v1958_v45  ;;  %v817_v60 = vrot.slane %v812_v59, %v83_v24  ;;  %v821_v62 = vrot.slane %v812_v59, %v87_v27  ;;  %v824_v27 = vsub.s32 2, %v2251_v23 }
 0x42b   :  { %1754 = vmatprep.subr.bf16.mxu0 %v1958_v45  ;;  %1730 = vmatpush3.msra.mxu1 %v1318_v50 }
 0x42c   :  { %v825_v12 = vrot.slane %v812_v59, %v824_v27 }
 0x42e   :  { %1755 = vmatpush3.bf16.msra.mxu0 %v1924_v37 }
 0x42f   :  { %1756 = vmatprep.subr.bf16.mxu0 %v1958_v45 }
 0x432   :  { %1757 = vmatpush3.bf16.msra.mxu0 %v1925_v38 }
 0x433   :  { %1758 = vmatprep.subr.bf16.mxu0 %v1958_v45 }
 0x436   :  { %1759 = vmatpush3.bf16.msra.mxu0 %v1926_v39 }
 0x437   :  { %1764 = vmatprep.subr.mxu0 %v1958_v45 }
 0x439   :  { %1761 = vmatmul.mubr.msk.bf16.vlgmr.msra.gmra.mxu0 %vm286_vm1, %v2409_v61 }
 0x43a   :  { %1778 = vmatprep.mubr.msk.f32.mxu0 %vm1959_vm3, %v1958_v45  ;;  %1765 = vmatpush3.msra.mxu0 %v1356_v51 }
 0x43b   :  { %1766 = vmatprep.subr.mxu0 %v1958_v45 }
 0x43c   :  { %1767 = vmatpush3.msra.mxu0 %v1355_v52 }
 0x43d   :  { %1768 = vmatprep.subr.mxu0 %v1958_v45 }
 0x43e   :  { %1769 = vmatpush3.msra.mxu0 %v1354_v54 }
 0x43f   :  { %1770 = vmatprep.subr.mxu0 %v1958_v45 }
 0x440   :  { %1771 = vmatpush3.msra.mxu0 %v1353_v55 }
 0x441   :  { %1772 = vmatprep.subr.mxu0 %v1958_v45 }
 0x442   :  { %1773 = vmatpush3.msra.mxu0 %v1352_v56 }
 0x443   :  { %1774 = vmatprep.subr.mxu0 %v1958_v45 }
 0x444   :  { %1775 = vmatpush3.msra.mxu0 %v1351_v57 }
 0x445   :  { %1776 = vmatprep.subr.mxu0 %v1958_v45 }
 0x446   :  { %1777 = vmatpush3.msra.mxu0 %v1350_v58 }
 0x4c9   :  { %v1228_v61 = vpop.f32.mrf.mxu0 }
 0x4ca   :  { %v1187_v63 = vpop.f32.mrf.mxu1 }
 0x4cb   :  { %v1188_v0 = vadd.f32 %v1187_v63, %v817_v60  ;;  %v1230_v2 = vpop.f32.mrf.mxu0 }
 0x4cc   :  { %v1189_v45 = vpop.f32.mrf.mxu1 }
 0x4cd   :  { %v1190_v1 = vadd.f32 %v1189_v45, %v821_v62  ;;  %v1232_v3 = vpop.f32.mrf.mxu0  ;;  %v1229_v4 = vadd.f32 %v1228_v61, %v1188_v0 }
 0x4ce   :  { %v1191_v5 = vpop.f32.mrf.mxu1 }
 0x4cf   :  { %v1231_v25 = vadd.f32 %v1230_v2, %v1190_v1  ;;  %v1233_v53 = vpop.f32.mrf.mxu0  ;;  %v1315_v7 = vmax.f32 %v1229_v4, 0.0 }
 0x4d0   :  { %v1192_v28 = vpop.f32.mrf.mxu1 }
 0x4d1   :  { %v1316_v6 = vmax.f32 %v1231_v25, 0.0 }
 0x4d3   :  { %1431 = vmatprep.mubr.f32.mxu1 %v1316_v6 }
 0x4d4   :  { %1432 = vmatmul.mubr.f32.vlgmr.msra.gmra.mxu1 %v1315_v7 }
 0x4e9   :  { %v1688_v24 = vpop.f32.mrf.mxu0 }
 0x4eb   :  { %v1689_v8 = vpop.f32.mrf.mxu0 }
 0x4ec   :  { %v1690_v11 = vadd.f32 %v1689_v8, %v1688_v24 }
 0x4ed   :  { %v1691_v9 = vpop.f32.mrf.mxu0 }
 0x4ee   :  { %v1270_v13 = vadd.f32 %v1690_v11, %v825_v12 }
 0x4ef   :  { %v1692_v10 = vpop.f32.mrf.mxu0 }
 0x4f9   :  { %v1309_v14 = vpop.f32.mrf.mxu0 }
 0x4fa   :  { %v1310_v15 = vadd.f32 %v1309_v14, %v1270_v13 }
 0x4fb   :  { %v1762_v16 = vpop.f32.mrf.mxu0 }
 0x4fc   :  { %v1317_v17 = vmax.f32 %v1310_v15, 0.0 }
 0x4fd   :  { %v1312_v18 = vpop.f32.mrf.mxu0 }
 0x4fe   :  { %1779 = vmatmul.mubr.msk.f32.vlgmr.msra.gmra.mxu0 %vm286_vm1, %v1317_v17 }
 0x4ff   :  { %v1763_v19 = vpop.f32.mrf.mxu0 }
 0x594   :  { %v1731_v20 = vpop.f32.mrf.mxu1 }
 0x596   :  { %v1732_v21 = vpop.f32.mrf.mxu1 }
 0x597   :  { %v1733_v22 = vadd.f32 %v1732_v21, %v1731_v20 }
 0x599   :  { %v1434_v23 = vadd.f32 %v1733_v22, %v1631_v26 }
 0x5be   :  { %v1503_v29 = vpop.f32.mrf.mxu0 }
 0x5bf   :  { %v1504_v30 = vadd.f32 %v1503_v29, %v1434_v23 }
 0x5c0   :  { %v1780_v31 = vpop.f32.mrf.mxu0 }
 0x5c1   :  { %1508 = vst.msk [vmem:[#allocation2] sm:$0x3] %vm1507_vm5, %v1504_v30 }
 0x5c2   :  { %1946 = shalt.err (!%p1943_p4)
}
 0x5c3   :  { %1518 = dma.vmem_to_hbm [thread:$0]  %s1516_s21, 32, %s2625_s9, [#allocation3]  }
 0x5c4   :  { %1955 = dma.done.wait [#allocation3], 32  }
 0x5c5   :  { %1956 = vsyncadd [#allocation3], 4294967264 }
 0x5c6   :  { %1522 = vsyncpa [#allocation3], 1 }

// kernel: demix_gru_forward.2
= control target key start
LH: loop header
LB: loop body
LE: loop exit
PB: predicated region body
PF: predicated region fallthrough
CT: control target
= control target key end

     0   :  { %s9996_s25 = smov 0   ;;  %s16658_s0 = inlined_call_operand.vmem [shape: f32[2,400,6], index: 0, kind: input, shape index: {}]   ;;  %s16659_s1 = inlined_call_operand.vmem [shape: bf16[39,392], index: 1, kind: input, shape index: {}]   ;;  %s16660_s2 = inlined_call_operand.vmem [shape: f32[6,6], index: 2, kind: input, shape index: {}]   ;;  %s16661_s3 = inlined_call_operand.vmem [shape: f32[1,6], index: 3, kind: input, shape index: {}]   ;;  %s16662_s4 = inlined_call_operand.vmem [shape: f32[6,6], index: 4, kind: input, shape index: {}]   ;;  %s16663_s5 = inlined_call_operand.vmem [shape: f32[1,6], index: 5, kind: input, shape index: {}]   ;;  %s16664_s6 = inlined_call_operand.vmem [shape: bf16[54,16], index: 6, kind: input, shape index: {}]   ;;  %s16665_s7 = inlined_call_operand.vmem [shape: f32[1,16], index: 7, kind: input, shape index: {}]   ;;  %s16666_s8 = inlined_call_operand.vmem [shape: bf16[2,56,24], index: 8, kind: input, shape index: {}]   ;;  %s16667_s9 = inlined_call_operand.vmem [shape: bf16[2,56,16], index: 9, kind: input, shape index: {}]   ;;  %s16668_s10 = inlined_call_operand.vmem [shape: bf16[2,56,8], index: 10, kind: input, shape index: {}]   ;;  %s16669_s11 = inlined_call_operand.vmem [shape: f32[2,1,16], index: 11, kind: input, shape index: {}]   ;;  %s16670_s12 = inlined_call_operand.vmem [shape: f32[2,1,8], index: 12, kind: input, shape index: {}]   ;;  %s16671_s13 = inlined_call_operand.vmem [shape: f32[2,4,39,8], index: 13, kind: output, shape index: {}]  }
   0x1 LB: > { %s7309_s26 = sadd.s32 4294967295, %s9902_s25   ;;  %p7313_p0 = scmp.ge.s32.totalorder %s9902_s25, 1  ;;  %s9902_s25 = sphi %s9996_s25, %s23_s25  }
   0x2   : > { %p387_p1 = scmp.lt.s32.totalorder %s9902_s25, 3 }
   0x4   : > { %p388_p2 = pnand %p7313_p0, %p387_p1 }
   0x6   : > { %391 = sbr.rel (%p388_p2) target bundleno = 4311 (0x10d7), region = 72 }
   0xb   : > { %p431_p3 = scmp.lt.s32.totalorder %s7309_s26, 1  ;;  %v16673_v0 = vmov 2   ;;  %v16672_v1 = vmov 1   ;;  %vm16906_vm0 = vcmask 48128   ;;  %vm1317_vm1 = vcmask 1044480   ;;  %s9910_s22 = smov 48  }
   0xc   : > { %7937 = vset.pattern.permute.xlu1 %v16673_v0  ;;  %7935 = vset.pattern.permute.xlu0 %v16672_v1  ;;  %vm1811_vm2 = vcmask 1042432   ;;  %vm16904_vm3 = vcmask 1040384   ;;  %s9911_s23 = smov 18   ;;  %s9912_s24 = smov 30   ;;  %vm16885_vm4 = vcmask 1046528   ;;  %vm1070_vm5 = vcmask 1045504  }
   0xd   : > { %s17947_s26 = smov (!%p431_p3, %s7309_s26), 1  ;;  %s9914_s28 = smov 6   ;;  %vm1564_vm6 = vcmask 1043456   ;;  %vm16956_vm7 = vcmask 1041408   ;;  %vm16957_vm8 = vmmov 0   ;;  %vm2748_vm9 = vcmask 97280  }
   0xe   : > { %s7903_s27 = smul.u32 400, %s17947_s26  ;;  %s9915_s29 = smov 12   ;;  %vm2798_vm10 = vcmask 146432   ;;  %vm2848_vm11 = vcmask 195584   ;;  %vm2898_vm12 = vcmask 244736   ;;  %vm2948_vm13 = vcmask 293888  }
   0xf   : > { %s9917_s14 = smov 36   ;;  %vm2998_vm14 = vcmask 343040   ;;  %vm3048_vm15 = vcmask 392192   ;;  %s9920_s21 = smov 8  }
  0x10   : > { %s10012_s30 = scalar_lea.vmem %s16658_s0, %s7903_s27  ;;  %s9913_s27 = smov 42  }
  0x11   : > { %v10015_v2 = vld [vmem:[%s10012_s30] sm:$0xff]  ;;  %v10018_v3 = vld [vmem:[%s10012_s30 + $0x8] sm:$0xff]  ;;  %v10021_v4 = vld [vmem:[%s10012_s30 + $0x10] sm:$0xff]  ;;  %s9921_s15 = smov 16   ;;  %s7904_s17 = smul.u32 160, %s17947_s26 }
  0x12   : > { %v10024_v5 = vld [vmem:[%s10012_s30 + $0x18] sm:$0xff]  ;;  %v501_v6 = vsel %vm16906_vm0, %v10015_v2, 0.0  ;;  %v502_v7 = vsel %vm16906_vm0, %v10018_v3, 0.0  ;;  %v504_v8 = vsel %vm16906_vm0, %v10021_v4, 0.0  ;;  %v10033_v9 = vld [vmem:[%s10012_s30 + $0x20] sm:$0xff]  ;;  %v10038_v12 = vld [vmem:[%s10012_s30 + $0x28] sm:$0xff] }
  0x13   : > { %v503_v10 = vadd.f32 %v502_v7, %v501_v6  ;;  %v506_v11 = vsel %vm16906_vm0, %v10024_v5, 0.0  ;;  %v508_v14 = vsel %vm16906_vm0, %v10033_v9, 0.0  ;;  %v10043_v15 = vld [vmem:[%s10012_s30 + $0x30] sm:$0xff]  ;;  %v510_v17 = vsel %vm16906_vm0, %v10038_v12, 0.0  ;;  %v10048_v18 = vld [vmem:[%s10012_s30 + $0x38] sm:$0xff]  ;;  %v10053_v21 = vld [vmem:[%s10012_s30 + $0x40] sm:$0xff]  ;;  %s15131_s20 = scalar_lea.vmem %s16671_s13, %s7904_s17 }
  0x14   : > { %v512_v20 = vsel %vm16906_vm0, %v10043_v15, 0.0  ;;  %v514_v23 = vsel %vm16906_vm0, %v10048_v18, 0.0  ;;  %v10058_v24 = vld [vmem:[%s10012_s30 + $0x48] sm:$0xff]  ;;  %v10061_v25 = vld [vmem:[%s10012_s30 + $0x50] sm:$0xff]  ;;  %v10064_v26 = vld [vmem:[%s10012_s30 + $0x58] sm:$0xff]  ;;  %v516_v31 = vsel %vm16906_vm0, %v10053_v21, 0.0 }
  0x15   : > { %v505_v13 = vadd.f32 %v504_v8, %v503_v10  ;;  %v10067_v28 = vld [vmem:[%s10012_s30 + $0x60] sm:$0xff]  ;;  %v10070_v29 = vld [vmem:[%s10012_s30 + $0x68] sm:$0xff]  ;;  %v10073_v30 = vld [vmem:[%s10012_s30 + $0x70] sm:$0xff]  ;;  %v518_v35 = vsel %vm16906_vm0, %v10058_v24, 0.0  ;;  %v520_v36 = vsel %vm16906_vm0, %v10061_v25, 0.0  ;;  %v522_v37 = vsel %vm16906_vm0, %v10064_v26, 0.0 }
  0x16   : > { %v10078_v32 = vld [vmem:[%s10012_s30 + $0x78] sm:$0xff]  ;;  %v10081_v33 = vld [vmem:[%s10012_s30 + $0x80] sm:$0xff]  ;;  %v524_v39 = vsel %vm16906_vm0, %v10067_v28, 0.0  ;;  %v526_v40 = vsel %vm16906_vm0, %v10070_v29, 0.0  ;;  %v528_v41 = vsel %vm16906_vm0, %v10073_v30, 0.0  ;;  %v10100_v48 = vld [vmem:[%s10012_s30 + $0x88] sm:$0xff] }
  0x17   : > { %v507_v16 = vadd.f32 %v506_v11, %v505_v13  ;;  %v530_v42 = vsel %vm16906_vm0, %v10078_v32, 0.0  ;;  %v532_v43 = vsel %vm16906_vm0, %v10081_v33, 0.0  ;;  %v10103_v51 = vld [vmem:[%s10012_s30 + $0x90] sm:$0xff]  ;;  %v534_v53 = vsel %vm16906_vm0, %v10100_v48, 0.0  ;;  %v10108_v54 = vld [vmem:[%s10012_s30 + $0x98] sm:$0xff]  ;;  %v10113_v57 = vld [vmem:[%s10012_s30 + $0xa0] sm:$0xff] }
  0x18   : > { %v536_v56 = vsel %vm16906_vm0, %v10103_v51, 0.0  ;;  %v538_v59 = vsel %vm16906_vm0, %v10108_v54, 0.0  ;;  %v10118_v60 = vld [vmem:[%s10012_s30 + $0xa8] sm:$0xff]  ;;  %v540_v62 = vsel %vm16906_vm0, %v10113_v57, 0.0  ;;  %v10123_v63 = vld [vmem:[%s10012_s30 + $0xb0] sm:$0xff]  ;;  %v10128_v8 = vld [vmem:[%s10012_s30 + $0xb8] sm:$0xff] }
  0x19   : > { %v509_v19 = vadd.f32 %v508_v14, %v507_v16  ;;  %v542_v7 = vsel %vm16906_vm0, %v10118_v60, 0.0  ;;  %v544_v11 = vsel %vm16906_vm0, %v10123_v63, 0.0  ;;  %v10133_v13 = vld [vmem:[%s10012_s30 + $0xc0] sm:$0xff]  ;;  %v546_v16 = vsel %vm16906_vm0, %v10128_v8, 0.0 }
  0x1b   : > { %v511_v22 = vadd.f32 %v510_v17, %v509_v19  ;;  %v10138_v17 = vld [vmem:[%s10012_s30 + $0xc8] sm:$0xff] }
  0x1d   : > { %v513_v27 = vadd.f32 %v512_v20, %v511_v22  ;;  %v548_v20 = vsel %vm16906_vm0, %v10133_v13, 0.0  ;;  %v10143_v22 = vld [vmem:[%s10012_s30 + $0xd0] sm:$0xff] }
  0x1f   : > { %v515_v34 = vadd.f32 %v514_v23, %v513_v27  ;;  %v550_v27 = vsel %vm16906_vm0, %v10138_v17, 0.0 }
  0x21   : > { %v517_v38 = vadd.f32 %v516_v31, %v515_v34  ;;  %v10148_v31 = vld [vmem:[%s10012_s30 + $0xd8] sm:$0xff] }
  0x23   : > { %v519_v44 = vadd.f32 %v518_v35, %v517_v38  ;;  %v552_v35 = vsel %vm16906_vm0, %v10143_v22, 0.0  ;;  %v554_v38 = vsel %vm16906_vm0, %v10148_v31, 0.0 }
  0x25   : > { %v521_v45 = vadd.f32 %v520_v36, %v519_v44  ;;  %v10153_v36 = vld [vmem:[%s10012_s30 + $0xe0] sm:$0xff] }
  0x27   : > { %v523_v46 = vadd.f32 %v522_v37, %v521_v45  ;;  %v10168_v45 = vld [vmem:[%s10012_s30 + $0xf8] sm:$0xff] }
  0x29   : > { %v525_v47 = vadd.f32 %v524_v39, %v523_v46  ;;  %v10158_v39 = vld [vmem:[%s10012_s30 + $0xe8] sm:$0xff] }
  0x2a   : > { %v558_v44 = vsel %vm16906_vm0, %v10158_v39, 0.0 }
  0x2b   : > { %v527_v49 = vadd.f32 %v526_v40, %v525_v47 }
  0x2d   : > { %v529_v50 = vadd.f32 %v528_v41, %v527_v49  ;;  %v556_v41 = vsel %vm16906_vm0, %v10153_v36, 0.0  ;;  %v10173_v49 = vld [vmem:[%s10012_s30 + $0x100] sm:$0xff] }
  0x2f   : > { %v531_v52 = vadd.f32 %v530_v42, %v529_v50  ;;  %v10163_v42 = vld [vmem:[%s10012_s30 + $0xf0] sm:$0xff] }
  0x30   : > { %v560_v47 = vsel %vm16906_vm0, %v10163_v42, 0.0 }
  0x31   : > { %v533_v55 = vadd.f32 %v532_v43, %v531_v52  ;;  %v562_v52 = vsel %vm16906_vm0, %v10168_v45, 0.0 }
  0x33   : > { %v535_v58 = vadd.f32 %v534_v53, %v533_v55  ;;  %v10178_v53 = vld [vmem:[%s10012_s30 + $0x108] sm:$0xff] }
  0x35   : > { %v537_v61 = vadd.f32 %v536_v56, %v535_v58  ;;  %v564_v56 = vsel %vm16906_vm0, %v10173_v49, 0.0  ;;  %v10183_v58 = vld [vmem:[%s10012_s30 + $0x110] sm:$0xff] }
  0x37   : > { %v539_v6 = vadd.f32 %v538_v59, %v537_v61  ;;  %v566_v61 = vsel %vm16906_vm0, %v10178_v53, 0.0 }
  0x39   : > { %v541_v10 = vadd.f32 %v540_v62, %v539_v6  ;;  %v10188_v62 = vld [vmem:[%s10012_s30 + $0x118] sm:$0xff] }
  0x3b   : > { %v543_v14 = vadd.f32 %v542_v7, %v541_v10  ;;  %v568_v7 = vsel %vm16906_vm0, %v10183_v58, 0.0  ;;  %v10193_v10 = vld [vmem:[%s10012_s30 + $0x120] sm:$0xff] }
  0x3d   : > { %v545_v19 = vadd.f32 %v544_v11, %v543_v14  ;;  %v570_v14 = vsel %vm16906_vm0, %v10188_v62, 0.0 }
  0x3f   : > { %v547_v23 = vadd.f32 %v546_v16, %v545_v19  ;;  %v10198_v16 = vld [vmem:[%s10012_s30 + $0x128] sm:$0xff] }
  0x41   : > { %v549_v34 = vadd.f32 %v548_v20, %v547_v23  ;;  %v572_v20 = vsel %vm16906_vm0, %v10193_v10, 0.0  ;;  %v10203_v23 = vld [vmem:[%s10012_s30 + $0x130] sm:$0xff] }
  0x43   : > { %v551_v37 = vadd.f32 %v550_v27, %v549_v34  ;;  %v574_v34 = vsel %vm16906_vm0, %v10198_v16, 0.0 }
  0x45   : > { %v553_v40 = vadd.f32 %v552_v35, %v551_v37  ;;  %v10208_v35 = vld [vmem:[%s10012_s30 + $0x138] sm:$0xff] }
  0x46   : > { %16961 = vst [vmem:[#allocation3_spill] sm:$0xff] %v10208_v35 }
  0x47   : > { %v555_v43 = vadd.f32 %v554_v38, %v553_v40  ;;  %v576_v38 = vsel %vm16906_vm0, %v10203_v23, 0.0  ;;  %v10213_v40 = vld [vmem:[%s10012_s30 + $0x140] sm:$0xff] }
  0x48   : > { %16962 = vst [vmem:[#allocation4_spill] sm:$0xff] %v10213_v40 }
  0x49   : > { %v557_v46 = vadd.f32 %v556_v41, %v555_v43  ;;  %v578_v43 = vsel %vm16906_vm0, %v10208_v35, 0.0 }
  0x4b   : > { %v559_v50 = vadd.f32 %v558_v44, %v557_v46  ;;  %v10218_v44 = vld [vmem:[%s10012_s30 + $0x148] sm:$0xff] }
  0x4c   : > { %16963 = vst [vmem:[#allocation5_spill] sm:$0xff] %v10218_v44 }
  0x4d   : > { %v561_v55 = vadd.f32 %v560_v47, %v559_v50  ;;  %v580_v47 = vsel %vm16906_vm0, %v10213_v40, 0.0  ;;  %v10223_v50 = vld [vmem:[%s10012_s30 + $0x150] sm:$0xff] }
  0x4e   : > { %16964 = vst [vmem:[#allocation6_spill] sm:$0xff] %v10223_v50 }
  0x4f   : > { %v563_v59 = vadd.f32 %v562_v52, %v561_v55  ;;  %v582_v55 = vsel %vm16906_vm0, %v10218_v44, 0.0 }
  0x51   : > { %v565_v6 = vadd.f32 %v564_v56, %v563_v59  ;;  %v10228_v56 = vld [vmem:[%s10012_s30 + $0x158] sm:$0xff] }
  0x52   : > { %16965 = vst [vmem:[#allocation7_spill] sm:$0xff] %v10228_v56 }
  0x53   : > { %v567_v11 = vadd.f32 %v566_v61, %v565_v6  ;;  %v584_v61 = vsel %vm16906_vm0, %v10223_v50, 0.0  ;;  %v10233_v6 = vld [vmem:[%s10012_s30 + $0x160] sm:$0xff] }
  0x54   : > { %16966 = vst [vmem:[#allocation8_spill] sm:$0xff] %v10233_v6 }
  0x55   : > { %v569_v19 = vadd.f32 %v568_v7, %v567_v11  ;;  %v586_v11 = vsel %vm16906_vm0, %v10228_v56, 0.0 }
  0x57   : > { %v571_v27 = vadd.f32 %v570_v14, %v569_v19  ;;  %v10238_v14 = vld [vmem:[%s10012_s30 + $0x168] sm:$0xff] }
  0x58   : > { %16967 = vst [vmem:[#allocation9_spill] sm:$0xff] %v10238_v14 }
  0x59   : > { %v573_v37 = vadd.f32 %v572_v20, %v571_v27  ;;  %v588_v20 = vsel %vm16906_vm0, %v10233_v6, 0.0  ;;  %v10243_v27 = vld [vmem:[%s10012_s30 + $0x170] sm:$0xff] }
  0x5a   : > { %16968 = vst [vmem:[#allocation10_spill] sm:$0xff] %v10243_v27 }
  0x5b   : > { %v575_v41 = vadd.f32 %v574_v34, %v573_v37  ;;  %v590_v37 = vsel %vm16906_vm0, %v10238_v14, 0.0 }
  0x5d   : > { %v577_v46 = vadd.f32 %v576_v38, %v575_v41  ;;  %v10248_v38 = vld [vmem:[%s10012_s30 + $0x178] sm:$0xff] }
  0x5e   : > { %16969 = vst [vmem:[#allocation11_spill] sm:$0xff] %v10248_v38 }
  0x5f   : > { %v579_v52 = vadd.f32 %v578_v43, %v577_v46  ;;  %v592_v43 = vsel %vm16906_vm0, %v10243_v27, 0.0  ;;  %v10253_v46 = vld [vmem:[%s10012_s30 + $0x180] sm:$0xff] }
  0x60   : > { %16970 = vst [vmem:[#allocation12_spill] sm:$0xff] %v10253_v46 }
  0x61   : > { %v581_v59 = vadd.f32 %v580_v47, %v579_v52  ;;  %v594_v52 = vsel %vm16906_vm0, %v10248_v38, 0.0  ;;  %v9906_v38 = vmov 3  }
  0x63   : > { %v583_v7 = vadd.f32 %v582_v55, %v581_v59  ;;  %v10258_v55 = vld [vmem:[%s10012_s30 + $0x188] sm:$0xff]  ;;  %s9916_s30 = smov 24  }
  0x64   : > { %16971 = vst [vmem:[#allocation13_spill] sm:$0xff] %v10258_v55 }
  0x65   : > { %v585_v19 = vadd.f32 %v584_v61, %v583_v7  ;;  %v596_v61 = vsel %vm16906_vm0, %v10253_v46, 0.0 }
  0x67   : > { %v587_v34 = vadd.f32 %v586_v11, %v585_v19  ;;  %v598_v11 = vsel %vm16906_vm0, %v10258_v55, 0.0 }
  0x69   : > { %v589_v41 = vadd.f32 %v588_v20, %v587_v34 }
  0x6b   : > { %v591_v47 = vadd.f32 %v590_v37, %v589_v41 }
  0x6d   : > { %v593_v59 = vadd.f32 %v592_v43, %v591_v47  ;;  %v16679_v43 = vmov 0   ;;  %v9908_v47 = vmov 4  }
  0x6f   : > { %v595_v7 = vadd.f32 %v594_v52, %v593_v59  ;;  %v9909_v52 = vmov 5  }
  0x71   : > { %v597_v19 = vadd.f32 %v596_v61, %v595_v7 }
  0x73   : > { %v599_v20 = vadd.f32 %v598_v11, %v597_v19 }
  0x75   : > { %v600_v34 = vrot.slane %v599_v20, 4 }
  0x77   : > { %v601_v1 = vadd.f32 %v600_v34, %v599_v20 }
  0x79   : > { %v602_v0 = vrot.slane %v601_v1, 2 }
  0x7b   : > { %v603_v27 = vadd.f32 %v602_v0, %v601_v1  ;;  %v16972_v0 = vmov 2   ;;  %v608_v1 = vld [vmem:[%s16660_s2] sm:$0x3f] }
  0x7d   : > { %v604_v37 = vrot.slane %v603_v27, 1 }
  0x7f   : > { %v605_v41 = vadd.f32 %v604_v37, %v603_v27 }
  0x81   : > { %v607_v14 = vmul.f32 0.0025, %v605_v41 }
  0x83   : > { %625 = vperm.xlu1 %7937, %v607_v14   ;;  %616 = vperm.xlu0 %7935, %v607_v14  }
  0x87   : > { %7938 = vset.pattern.permute.xlu1 %v9906_v38  ;;  %7936 = vset.pattern.permute.xlu0 %v16679_v43 }
  0x88   : > { %634 = vperm.xlu1 %7938, %v607_v14   ;;  %611 = vperm.xlu0 %7936, %v607_v14  }
  0x8c   : > { %7939 = vset.pattern.permute.xlu1 %v9908_v47  ;;  %7940 = vset.pattern.permute.xlu0 %v9909_v52 }
  0x8d   : > { %643 = vperm.xlu1 %7939, %v607_v14   ;;  %652 = vperm.xlu0 %7940, %v607_v14  }
  0x91   : > { %7941 = vset.pattern.permute.xlu1 %v16679_v43  ;;  %7943 = vset.pattern.permute.xlu0 %v16972_v0 }
  0xfe   : > { %v626_v27 = vpop.permute.xlu1 %625  ;;  %v617_v59 = vpop.permute.xlu0 %616 }
  0xff   : > { %v619_v61 = vmul.f32 %v617_v59, %v608_v1  ;;  %v628_v7 = vmul.f32 %v626_v27, %v608_v1  ;;  %v660_v27 = vld [vmem:[%s16661_s3] sm:$0x1] }
 0x101   : > { %v621_v20 = vrot.slane %v619_v61, 1  ;;  %v630_v41 = vrot.slane %v628_v7, 2  ;;  %v16973_v7 = vmov 1  }
 0x103   : > { %v635_v11 = vpop.permute.xlu1 %634  ;;  %v612_v19 = vpop.permute.xlu0 %611 }
 0x104   : > { %v637_v34 = vmul.f32 %v635_v11, %v608_v1  ;;  %v614_v37 = vmul.f32 %v612_v19, %v608_v1 }
 0x106   : > { %v623_v55 = vadd.f32 %v621_v20, %v614_v37  ;;  %v639_v14 = vrot.slane %v637_v34, 3 }
 0x108   : > { %v632_v46 = vadd.f32 %v630_v41, %v623_v55  ;;  %v644_v43 = vpop.permute.xlu1 %643  ;;  %v653_v6 = vpop.permute.xlu0 %652 }
 0x109   : > { %v646_v0 = vmul.f32 %v644_v43, %v608_v1  ;;  %v655_v56 = vmul.f32 %v653_v6, %v608_v1 }
 0x10a   : > { %v641_v50 = vadd.f32 %v639_v14, %v632_v46 }
 0x10b   : > { %v648_v44 = vrot.slane %v646_v0, 4  ;;  %v657_v40 = vrot.slane %v655_v56, 5 }
 0x10d   : > { %v650_v35 = vadd.f32 %v648_v44, %v641_v50  ;;  %v663_v44 = vld [vmem:[%s16662_s4] sm:$0x3f] }
 0x10e   : > { %v675_v50 = vrot.slane %v663_v44, 1  ;;  %v699_v34 = vrot.slane %v663_v44, 4 }
 0x10f   : > { %v659_v59 = vadd.f32 %v657_v40, %v650_v35  ;;  %v683_v40 = vrot.slane %v663_v44, 2 }
 0x111   : > { %v661_v61 = vadd.f32 %v660_v27, %v659_v59 }
 0x113   : > { %v662_v11 = vmax.f32 %v661_v61, 0.0  ;;  %v711_v61 = vld [vmem:[%s16663_s5] sm:$0x1] }
 0x115   : > { %680 = vperm.xlu0 %7943, %v662_v11   ;;  %666 = vperm.xlu1 %7941, %v662_v11  }
 0x119   : > { %7946 = vset.pattern.permute.xlu0 %v9909_v52  ;;  %7942 = vset.pattern.permute.xlu1 %v16973_v7  ;;  %v691_v52 = vrot.slane %v663_v44, 3 }
 0x11a   : > { %704 = vperm.xlu0 %7946, %v662_v11   ;;  %671 = vperm.xlu1 %7942, %v662_v11  }
 0x11e   : > { %7944 = vset.pattern.permute.xlu1 %v9906_v38 }
 0x11f   : > { %688 = vperm.xlu1 %7944, %v662_v11  }
 0x123   : > { %7945 = vset.pattern.permute.xlu1 %v9908_v47  ;;  %v707_v47 = vrot.slane %v663_v44, 5 }
 0x124   : > { %696 = vperm.xlu1 %7945, %v662_v11  }
 0x190   : > { %v667_v56 = vpop.permute.xlu1 %666  ;;  %v681_v55 = vpop.permute.xlu0 %680 }
 0x191   : > { %v669_v6 = vmul.f32 %v667_v56, %v663_v44  ;;  %v685_v1 = vmul.f32 %v683_v40, %v681_v55  ;;  %v719_v40 = vlaneseq }
 0x195   : > { %v672_v35 = vpop.permute.xlu1 %671  ;;  %v705_v37 = vpop.permute.xlu0 %704 }
 0x196   : > { %v677_v46 = vmul.f32 %v675_v50, %v672_v35  ;;  %v709_v27 = vmul.f32 %v707_v47, %v705_v37 }
 0x198   : > { %v678_v43 = vadd.f32 %v677_v46, %v669_v6  ;;  %v720_v6 = vshrl.u32 %v719_v40, 7 }
 0x19a   : > { %v689_v19 = vpop.permute.xlu1 %688  ;;  %v686_v20 = vadd.f32 %v685_v1, %v678_v43  ;;  %v721_v44 = vsub.s32 0, %v720_v6 }
 0x19b   : > { %v693_v38 = vmul.f32 %v691_v52, %v689_v19 }
 0x19d   : > { %v694_v14 = vadd.f32 %v693_v38, %v686_v20 }
 0x19f   : > { %v697_v41 = vpop.permute.xlu1 %696 }
 0x1a0   : > { %v701_v0 = vmul.f32 %v699_v34, %v697_v41 }
 0x1a2   : > { %v702_v59 = vadd.f32 %v701_v0, %v694_v14 }
 0x1a4   : > { %v710_v11 = vadd.f32 %v709_v27, %v702_v59 }
 0x1a6   : > { %v712_v7 = vadd.f32 %v711_v61, %v710_v11 }
 0x1a8   : > { %v7316_v56 = vmul.f32 -1.442695, %v712_v7 }
 0x1aa   : > { %9671 = vpow2.f32 %v7316_v56 }
 0x1b7   : > { %v9672_v50 = vpop.eup %9671 }
 0x1b8   : > { %v716_v35 = vadd.f32 1.0, %v9672_v50 }
 0x1ba   : > { %9673 = vrcp.f32 %v716_v35 }
 0x1c7   : > { %v9674_v46 = vpop.eup %9673 }
 0x1c8   : > { %v10280_v55 = vrot.slane %v9674_v46, %v721_v44 }
 0x1ca   : > { %v10284_v43 = vmul.f32 %v10280_v55, %v10018_v3  ;;  %v10288_v52 = vmul.f32 %v10280_v55, %v10021_v4  ;;  %v10292_v1 = vmul.f32 %v10280_v55, %v10015_v2  ;;  %v10296_v19 = vmul.f32 %v10280_v55, %v10024_v5 }
 0x1cb   : > { %v10300_v20 = vmul.f32 %v10280_v55, %v10033_v9  ;;  %v10315_v41 = vmul.f32 %v10280_v55, %v10038_v12  ;;  %v10319_v14 = vmul.f32 %v10280_v55, %v10043_v15  ;;  %v10335_v35 = vmul.f32 %v10280_v55, %v10048_v18 }
 0x1cc   : > { %16974 = vst [vmem:[#allocation14_spill] sm:$0xff] %v10284_v43  ;;  %16975 = vst [vmem:[#allocation15_spill] sm:$0xff] %v10288_v52  ;;  %v7947_v3 = vpack.i.bf16 %v10288_v52, %v10284_v43  ;;  %v1318_v38 = vrot.slane %v10292_v1, 3  ;;  %v1319_v4 = vrot.slane %v10284_v43, 3  ;;  %v1321_v34 = vrot.slane %v10288_v52, 3 }
 0x1cd   : > { %16976 = vst [vmem:[#allocation16_spill] sm:$0xff] %v10292_v1  ;;  %16977 = vst [vmem:[#allocation17_spill] sm:$0xff] %v10296_v19  ;;  %v1812_v2 = vrot.slane %v10292_v1, 5  ;;  %v1813_v47 = vrot.slane %v10284_v43, 5  ;;  %v1815_v5 = vrot.slane %v10288_v52, 5  ;;  %v2306_v27 = vrot.slane %v10292_v1, 7 }
 0x1ce   : > { %16978 = vst [vmem:[#allocation18_spill] sm:$0xff] %v10300_v20  ;;  %7948 = vrot.lane.b32.xlu1 %v7947_v3, %s9910_s22  ;;  %v1320_v9 = vsel %vm1317_vm1, %v1318_v38, %v1319_v4  ;;  %v1322_v37 = vsel %vm1317_vm1, %v1319_v4, %v1321_v34  ;;  %16979 = vst [vmem:[#allocation19_spill] sm:$0xff] %v10315_v41  ;;  %v2307_v59 = vrot.slane %v10284_v43, 7  ;;  %v2309_v12 = vrot.slane %v10288_v52, 7 }
 0x1cf   : > { %16980 = vst [vmem:[#allocation20_spill] sm:$0xff] %v10319_v14  ;;  %v8072_v0 = vpack.i.bf16 %v1322_v37, %v1320_v9  ;;  %v7952_v61 = vpack.i.bf16 %v10300_v20, %v10296_v19  ;;  %v1814_v11 = vsel %vm1811_vm2, %v1812_v2, %v1813_v47  ;;  %v1816_v7 = vsel %vm1811_vm2, %v1813_v47, %v1815_v5 }
 0x1d0   : > { %v7957_v15 = vpack.i.bf16 %v10319_v14, %v10315_v41  ;;  %v8082_v56 = vpack.i.bf16 %v1816_v7, %v1814_v11  ;;  %v2308_v50 = vsel %vm16904_vm3, %v2306_v27, %v2307_v59  ;;  %16981 = vst [vmem:[#allocation21_spill] sm:$0xff] %v10335_v35  ;;  %v10339_v40 = vmul.f32 %v10280_v55, %v10053_v21 }
 0x1d1   : > { %8073 = vrot.lane.b32.xlu0 %v8072_v0, %s9911_s23  ;;  %v2310_v6 = vsel %vm16904_vm3, %v2307_v59, %v2309_v12  ;;  %v16688_v44 = vrot.slane %v10288_v52, 1  ;;  %v829_v46 = vrot.slane %v10296_v19, 1  ;;  %v831_v3 = vrot.slane %v10300_v20, 1 }
 0x1d2   : > { %7953 = vrot.lane.b32.xlu1 %v7952_v61, %s9910_s22  ;;  %16982 = vst [vmem:[#allocation22_spill] sm:$0xff] %v10339_v40  ;;  %v8092_v18 = vpack.i.bf16 %v2310_v6, %v2308_v50  ;;  %v10349_v38 = vmul.f32 %v10280_v55, %v10058_v24  ;;  %v10353_v21 = vmul.f32 %v10280_v55, %v10061_v25  ;;  %v1323_v4 = vrot.slane %v10296_v19, 3 }
 0x1d3   : > { %v7962_v2 = vpack.i.bf16 %v10339_v40, %v10335_v35  ;;  %v830_v47 = vsel %vm16885_vm4, %v16688_v44, %v829_v46  ;;  %v832_v9 = vsel %vm16885_vm4, %v829_v46, %v831_v3  ;;  %v1325_v37 = vrot.slane %v10300_v20, 3 }
 0x1d4   : > { %16983 = vst [vmem:[#allocation23_spill] sm:$0xff] %v10349_v38  ;;  %16984 = vst [vmem:[#allocation24_spill] sm:$0xff] %v10353_v21  ;;  %v8097_v24 = vpack.i.bf16 %v832_v9, %v830_v47  ;;  %v7967_v25 = vpack.i.bf16 %v10353_v21, %v10349_v38  ;;  %v1324_v0 = vsel %vm1317_vm1, %v1321_v34, %v1323_v4  ;;  %v1817_v11 = vrot.slane %v10296_v19, 5 }
 0x1d5   : > { %8083 = vrot.lane.b32.xlu0 %v8082_v56, %s9912_s24  ;;  %v10370_v27 = vmul.f32 %v10280_v55, %v10064_v26  ;;  %v1326_v59 = vsel %vm1317_vm1, %v1323_v4, %v1325_v37  ;;  %v10375_v61 = vmul.f32 %v10280_v55, %v10067_v28  ;;  %v1819_v7 = vrot.slane %v10300_v20, 5 }
 0x1d6   : > { %7958 = vrot.lane.b32.xlu1 %v7957_v15, %s9910_s22  ;;  %v8107_v34 = vpack.i.bf16 %v1326_v59, %v1324_v0  ;;  %v10383_v26 = vmul.f32 %v10280_v55, %v10070_v29  ;;  %v10387_v15 = vmul.f32 %v10280_v55, %v10073_v30  ;;  %v2311_v28 = vrot.slane %v10296_v19, 7 }
 0x1d7   : > { %16985 = vst [vmem:[#allocation25_spill] sm:$0xff] %v10370_v27  ;;  %16986 = vst [vmem:[#allocation26_spill] sm:$0xff] %v10375_v61  ;;  %v7972_v56 = vpack.i.bf16 %v10375_v61, %v10370_v27  ;;  %v1818_v50 = vsel %vm1811_vm2, %v1815_v5, %v1817_v11  ;;  %v1820_v6 = vsel %vm1811_vm2, %v1817_v11, %v1819_v7  ;;  %v2313_v46 = vrot.slane %v10300_v20, 7 }
 0x1d8   : > { %16987 = vst [vmem:[#allocation27_spill] sm:$0xff] %v10383_v26  ;;  %16988 = vst [vmem:[#allocation28_spill] sm:$0xff] %v10387_v15  ;;  %v8117_v29 = vpack.i.bf16 %v1820_v6, %v1818_v50  ;;  %v7977_v30 = vpack.i.bf16 %v10387_v15, %v10383_v26  ;;  %v10402_v4 = vmul.f32 %v10280_v55, %v10078_v32  ;;  %v833_v47 = vrot.slane %v10315_v41, 1 }
 0x1d9   : > { %8093 = vrot.lane.b32.xlu0 %v8092_v18, %s9913_s27  ;;  %v2312_v18 = vsel %vm16904_vm3, %v2309_v12, %v2311_v28  ;;  %v2314_v5 = vsel %vm16904_vm3, %v2311_v28, %v2313_v46  ;;  %v835_v9 = vrot.slane %v10319_v14, 1  ;;  %v10415_v12 = vmul.f32 %v10280_v55, %v10100_v48 }
 0x1da   : > { %7963 = vrot.lane.b32.xlu1 %v7962_v2, %s9910_s22  ;;  %16989 = vst [vmem:[#allocation29_spill] sm:$0xff] %v10402_v4  ;;  %v10407_v2 = vmul.f32 %v10280_v55, %v10081_v33  ;;  %v10419_v32 = vmul.f32 %v10280_v55, %v10103_v51  ;;  %v1327_v33 = vrot.slane %v10315_v41, 3  ;;  %v834_v0 = vsel %vm16885_vm4, %v831_v3, %v833_v47 }
 0x1db   : > { %16991 = vst [vmem:[#allocation31_spill] sm:$0xff] %v10415_v12  ;;  %v836_v59 = vsel %vm16885_vm4, %v833_v47, %v835_v9  ;;  %v1329_v11 = vrot.slane %v10319_v14, 3  ;;  %v10434_v28 = vmul.f32 %v10280_v55, %v10108_v54  ;;  %v1821_v50 = vrot.slane %v10315_v41, 5 }
 0x1dc   : > { %16990 = vst [vmem:[#allocation30_spill] sm:$0xff] %v10407_v2  ;;  %16992 = vst [vmem:[#allocation32_spill] sm:$0xff] %v10419_v32  ;;  %v8132_v48 = vpack.i.bf16 %v836_v59, %v834_v0  ;;  %v7987_v51 = vpack.i.bf16 %v10419_v32, %v10415_v12  ;;  %v1823_v6 = vrot.slane %v10319_v14, 5  ;;  %v10451_v54 = vmul.f32 %v10280_v55, %v10123_v63 }
 0x1dd   : > { %8098 = vrot.lane.b32.xlu0 %v8097_v24, %s9914_s28  ;;  %v8127_v24 = vpack.i.bf16 %v2314_v5, %v2312_v18  ;;  %16993 = vst [vmem:[#allocation33_spill] sm:$0xff] %v10434_v28  ;;  %v1330_v3 = vsel %vm1317_vm1, %v1327_v33, %v1329_v11  ;;  %v1822_v18 = vsel %vm1811_vm2, %v1819_v7, %v1821_v50  ;;  %v2317_v47 = vrot.slane %v10319_v14, 7 }
 0x1de   : > { %7968 = vrot.lane.b32.xlu1 %v7967_v25, %s9910_s22  ;;  %v7982_v25 = vpack.i.bf16 %v10407_v2, %v10402_v4  ;;  %16996 = vst [vmem:[#allocation36_spill] sm:$0xff] %v10451_v54  ;;  %v1824_v5 = vsel %vm1811_vm2, %v1821_v50, %v1823_v6  ;;  %v837_v0 = vrot.slane %v10335_v35, 1  ;;  %v839_v59 = vrot.slane %v10339_v40, 1 }
 0x1df   : > { %v1333_v50 = vrot.slane %v10339_v40, 3 }
 0x1e1   : > { %8108 = vrot.lane.b32.xlu0 %v8107_v34, %s9911_s23  ;;  %v1328_v34 = vsel %vm1317_vm1, %v1325_v37, %v1327_v33  ;;  %v10447_v37 = vmul.f32 %v10280_v55, %v10118_v60  ;;  %v8152_v60 = vpack.i.bf16 %v1824_v5, %v1822_v18  ;;  %v10466_v33 = vmul.f32 %v10280_v55, %v10128_v8 }
 0x1e2   : > { %7973 = vrot.lane.b32.xlu1 %v7972_v56, %s9910_s22  ;;  %v10439_v56 = vmul.f32 %v10280_v55, %v10113_v57  ;;  %v2315_v57 = vrot.slane %v10315_v41, 7  ;;  %v10483_v8 = vmul.f32 %v10280_v55, %v10143_v22  ;;  %v1825_v18 = vrot.slane %v10335_v35, 5 }
 0x1e3   : > { %16995 = vst [vmem:[#allocation35_spill] sm:$0xff] %v10447_v37  ;;  %v7997_v63 = vpack.i.bf16 %v10451_v54, %v10447_v37  ;;  %16997 = vst [vmem:[#allocation37_spill] sm:$0xff] %v10466_v33  ;;  %v1827_v5 = vrot.slane %v10339_v40, 5 }
 0x1e4   : > { %16994 = vst [vmem:[#allocation34_spill] sm:$0xff] %v10439_v56  ;;  %v2318_v7 = vsel %vm16904_vm3, %v2315_v57, %v2317_v47  ;;  %17000 = vst [vmem:[#allocation40_spill] sm:$0xff] %v10483_v8 }
 0x1e5   : > { %8118 = vrot.lane.b32.xlu0 %v8117_v29, %s9912_s24  ;;  %v8142_v29 = vpack.i.bf16 %v1330_v3, %v1328_v34  ;;  %v838_v34 = vsel %vm16885_vm4, %v835_v9, %v837_v0  ;;  %v840_v3 = vsel %vm16885_vm4, %v837_v0, %v839_v59  ;;  %v2321_v0 = vrot.slane %v10339_v40, 7 }
 0x1e6   : > { %7978 = vrot.lane.b32.xlu1 %v7977_v30, %s9910_s22  ;;  %v7992_v30 = vpack.i.bf16 %v10439_v56, %v10434_v28 }
 0x1e9   : > { %8128 = vrot.lane.b32.xlu0 %v8127_v24, %s9913_s27  ;;  %v2316_v24 = vsel %vm16904_vm3, %v2313_v46, %v2315_v57  ;;  %v10479_v46 = vmul.f32 %v10280_v55, %v10138_v17  ;;  %v8167_v17 = vpack.i.bf16 %v840_v3, %v838_v34  ;;  %v10498_v57 = vmul.f32 %v10280_v55, %v10148_v31 }
 0x1ea   : > { %7983 = vrot.lane.b32.xlu1 %v7982_v25, %s9910_s22  ;;  %v10471_v25 = vmul.f32 %v10280_v55, %v10133_v13  ;;  %v1331_v13 = vrot.slane %v10335_v35, 3  ;;  %v10515_v31 = vmul.f32 %v10280_v55, %v10163_v42  ;;  %v841_v34 = vrot.slane %v10349_v38, 1 }
 0x1eb   : > { %16999 = vst [vmem:[#allocation39_spill] sm:$0xff] %v10479_v46  ;;  %v8007_v22 = vpack.i.bf16 %v10483_v8, %v10479_v46  ;;  %17001 = vst [vmem:[#allocation41_spill] sm:$0xff] %v10498_v57  ;;  %v843_v3 = vrot.slane %v10353_v21, 1 }
 0x1ec   : > { %16998 = vst [vmem:[#allocation38_spill] sm:$0xff] %v10471_v25  ;;  %v1334_v9 = vsel %vm1317_vm1, %v1331_v13, %v1333_v50  ;;  %17004 = vst [vmem:[#allocation44_spill] sm:$0xff] %v10515_v31 }
 0x1ed   : > { %8133 = vrot.lane.b32.xlu0 %v8132_v48, %s9914_s28  ;;  %v8162_v48 = vpack.i.bf16 %v2318_v7, %v2316_v24  ;;  %v1826_v24 = vsel %vm1811_vm2, %v1823_v6, %v1825_v18  ;;  %v1828_v7 = vsel %vm1811_vm2, %v1825_v18, %v1827_v5  ;;  %v1337_v18 = vrot.slane %v10353_v21, 3 }
 0x1ee   : > { %7988 = vrot.lane.b32.xlu1 %v7987_v51, %s9910_s22  ;;  %v8002_v51 = vpack.i.bf16 %v10471_v25, %v10466_v33 }
 0x1f1   : > { %8143 = vrot.lane.b32.xlu0 %v8142_v29, %s9911_s23  ;;  %v1332_v29 = vsel %vm1317_vm1, %v1329_v11, %v1331_v13  ;;  %v10511_v11 = vmul.f32 %v10280_v55, %v10158_v39  ;;  %v8187_v39 = vpack.i.bf16 %v1828_v7, %v1826_v24  ;;  %v10530_v13 = vmul.f32 %v10280_v55, %v10168_v45 }
 0x1f2   : > { %7993 = vrot.lane.b32.xlu1 %v7992_v30, %s9910_s22  ;;  %v10503_v30 = vmul.f32 %v10280_v55, %v10153_v36  ;;  %v2319_v36 = vrot.slane %v10335_v35, 7  ;;  %v10547_v45 = vmul.f32 %v10280_v55, %v10183_v58  ;;  %v10565_v24 = vmul.f32 %v10280_v55, %v10188_v62 }
 0x1f3   : > { %17003 = vst [vmem:[#allocation43_spill] sm:$0xff] %v10511_v11  ;;  %v8017_v42 = vpack.i.bf16 %v10515_v31, %v10511_v11  ;;  %17005 = vst [vmem:[#allocation45_spill] sm:$0xff] %v10530_v13  ;;  %v10569_v7 = vmul.f32 %v10280_v55, %v10193_v10  ;;  %v10581_v10 = vmul.f32 %v10280_v55, %v10198_v16  ;;  %v17052_v31 = vrot.slane %v10319_v14, 2 }
 0x1f4   : > { %17002 = vst [vmem:[#allocation42_spill] sm:$0xff] %v10503_v30  ;;  %v2322_v6 = vsel %vm16904_vm3, %v2319_v36, %v2321_v0  ;;  %17008 = vst [vmem:[#allocation48_spill] sm:$0xff] %v10547_v45 }
 0x1f5   : > { %8153 = vrot.lane.b32.xlu0 %v8152_v60, %s9912_s24  ;;  %v8177_v60 = vpack.i.bf16 %v1334_v9, %v1332_v29  ;;  %v842_v29 = vsel %vm16885_vm4, %v839_v59, %v841_v34  ;;  %v844_v9 = vsel %vm16885_vm4, %v841_v34, %v843_v3  ;;  %17009 = vst [vmem:[#allocation49_spill] sm:$0xff] %v10565_v24  ;;  %17010 = vst [vmem:[#allocation50_spill] sm:$0xff] %v10569_v7 }
 0x1f6   : > { %7998 = vrot.lane.b32.xlu1 %v7997_v63, %s9910_s22  ;;  %v8012_v63 = vpack.i.bf16 %v10503_v30, %v10498_v57  ;;  %v8032_v62 = vpack.i.bf16 %v10569_v7, %v10565_v24  ;;  %17011 = vst [vmem:[#allocation51_spill] sm:$0xff] %v10581_v10  ;;  %v10585_v34 = vmul.f32 %v10280_v55, %v10203_v23 }
 0x1f8   : > { %17012 = vst [vmem:[#allocation52_spill] sm:$0xff] %v10585_v34  ;;  %v8037_v16 = vpack.i.bf16 %v10585_v34, %v10581_v10 }
 0x1f9   : > { %8163 = vrot.lane.b32.xlu0 %v8162_v48, %s9913_s27  ;;  %v2320_v48 = vsel %vm16904_vm3, %v2317_v47, %v2319_v36  ;;  %v10543_v47 = vmul.f32 %v10280_v55, %v10178_v53  ;;  %v8202_v53 = vpack.i.bf16 %v844_v9, %v842_v29  ;;  %v1831_v36 = vrot.slane %v10353_v21, 5  ;;  %v17013_v9 = vld [vmem:[#allocation3_spill] sm:$0xff] }
 0x1fa   : > { %8003 = vrot.lane.b32.xlu1 %v8002_v51, %s9910_s22  ;;  %v10535_v51 = vmul.f32 %v10280_v55, %v10173_v49  ;;  %v1335_v49 = vrot.slane %v10349_v38, 3  ;;  %v16687_v29 = vrot.slane %v10375_v61, 1  ;;  %v10597_v23 = vmul.f32 %v10280_v55, %v17013_v9 }
 0x1fb   : > { %17007 = vst [vmem:[#allocation47_spill] sm:$0xff] %v10543_v47  ;;  %v8027_v58 = vpack.i.bf16 %v10547_v45, %v10543_v47  ;;  %v17047_v47 = vrot.slane %v10407_v2, 5 }
 0x1fc   : > { %17006 = vst [vmem:[#allocation46_spill] sm:$0xff] %v10535_v51  ;;  %v1338_v59 = vsel %vm1317_vm1, %v1335_v49, %v1337_v18  ;;  %17014 = vst [vmem:[#allocation3_spill] sm:$0xff] %v10597_v23 }
 0x1fd   : > { %8168 = vrot.lane.b32.xlu0 %v8167_v17, %s9914_s28  ;;  %v8197_v17 = vpack.i.bf16 %v2322_v6, %v2320_v48  ;;  %v2325_v6 = vrot.slane %v10353_v21, 7 }
 0x1fe   : > { %8008 = vrot.lane.b32.xlu1 %v8007_v22, %s9910_s22  ;;  %v8022_v22 = vpack.i.bf16 %v10535_v51, %v10530_v13 }
 0x201   : > { %8178 = vrot.lane.b32.xlu0 %v8177_v60, %s9911_s23  ;;  %v1829_v60 = vrot.slane %v10349_v38, 5 }
 0x202   : > { %8013 = vrot.lane.b32.xlu1 %v8012_v63, %s9910_s22  ;;  %v1336_v63 = vsel %vm1317_vm1, %v1333_v50, %v1335_v49 }
 0x203   : > { %v1830_v48 = vsel %vm1811_vm2, %v1827_v5, %v1829_v60  ;;  %v1832_v50 = vsel %vm1811_vm2, %v1829_v60, %v1831_v36 }
 0x204   : > { %v8222_v5 = vpack.i.bf16 %v1832_v50, %v1830_v48  ;;  %v1833_v50 = vrot.slane %v10370_v27, 5 }
 0x205   : > { %8188 = vrot.lane.b32.xlu0 %v8187_v39, %s9912_s24  ;;  %v2323_v39 = vrot.slane %v10349_v38, 7 }
 0x206   : > { %8018 = vrot.lane.b32.xlu1 %v8017_v42, %s9910_s22  ;;  %v8212_v42 = vpack.i.bf16 %v1338_v59, %v1336_v63  ;;  %v1339_v59 = vrot.slane %v10370_v27, 3 }
 0x207   : > { %v2326_v49 = vsel %vm16904_vm3, %v2323_v39, %v2325_v6 }
 0x209   : > { %8198 = vrot.lane.b32.xlu0 %v8197_v17, %s9913_s27  ;;  %v2324_v17 = vsel %vm16904_vm3, %v2321_v0, %v2323_v39  ;;  %v17017_v0 = vld [vmem:[#allocation5_spill] sm:$0xff]  ;;  %v16693_v39 = vrot.slane %v10375_v61, 3 }
 0x20a   : > { %8023 = vrot.lane.b32.xlu1 %v8022_v22, %s9910_s22  ;;  %v845_v22 = vrot.slane %v10370_v27, 1  ;;  %v10606_v60 = vmul.f32 %v10280_v55, %v17017_v0  ;;  %v8232_v63 = vpack.i.bf16 %v2326_v49, %v2324_v17  ;;  %v2327_v49 = vrot.slane %v10370_v27, 7 }
 0x20c   : > { %17018 = vst [vmem:[#allocation5_spill] sm:$0xff] %v10606_v60  ;;  %v848_v48 = vsel %vm16885_vm4, %v845_v22, %v16687_v29  ;;  %v17025_v29 = vld [vmem:[#allocation9_spill] sm:$0xff] }
 0x20d   : > { %8203 = vrot.lane.b32.xlu0 %v8202_v53, %s9914_s28  ;;  %v17015_v53 = vld [vmem:[#allocation4_spill] sm:$0xff]  ;;  %v10635_v44 = vmul.f32 %v10280_v55, %v17025_v29  ;;  %v1834_v29 = vsel %vm1811_vm2, %v1831_v36, %v1833_v50  ;;  %v17032_v36 = vrot.slane %v10375_v61, 7 }
 0x20e   : > { %8028 = vrot.lane.b32.xlu1 %v8027_v58, %s9910_s22  ;;  %v10601_v58 = vmul.f32 %v10280_v55, %v17015_v53 }
 0x20f   : > { %17026 = vst [vmem:[#allocation9_spill] sm:$0xff] %v10635_v44 }
 0x210   : > { %17016 = vst [vmem:[#allocation4_spill] sm:$0xff] %v10601_v58  ;;  %v8042_v17 = vpack.i.bf16 %v10601_v58, %v10597_v23  ;;  %v17029_v58 = vrot.slane %v10375_v61, 5  ;;  %v824_v23 = vrot.slane %v10292_v1, 1 }
 0x211   : > { %8213 = vrot.lane.b32.xlu0 %v8212_v42, %s9911_s23  ;;  %v846_v42 = vsel %vm16885_vm4, %v843_v3, %v845_v22  ;;  %v17021_v3 = vld [vmem:[#allocation7_spill] sm:$0xff]  ;;  %v17023_v22 = vld [vmem:[#allocation8_spill] sm:$0xff] }
 0x212   : > { %8033 = vrot.lane.b32.xlu1 %v8032_v62, %s9910_s22  ;;  %v10627_v53 = vmul.f32 %v10280_v55, %v17021_v3  ;;  %v10631_v0 = vmul.f32 %v10280_v55, %v17023_v22  ;;  %v1340_v3 = vsel %vm1317_vm1, %v1337_v18, %v1339_v59  ;;  %v1342_v22 = vsel %vm1317_vm1, %v1339_v59, %v16693_v39  ;;  %v17033_v39 = vld [vmem:[#allocation12_spill] sm:$0xff] }
 0x213   : > { %v2328_v59 = vsel %vm16904_vm3, %v2325_v6, %v2327_v49 }
 0x214   : > { %17022 = vst [vmem:[#allocation7_spill] sm:$0xff] %v10627_v53  ;;  %17024 = vst [vmem:[#allocation8_spill] sm:$0xff] %v10631_v0 }
 0x215   : > { %8223 = vrot.lane.b32.xlu0 %v8222_v5, %s9912_s24  ;;  %v17019_v5 = vld [vmem:[#allocation6_spill] sm:$0xff] }
 0x216   : > { %8038 = vrot.lane.b32.xlu1 %v8037_v16, %s9910_s22  ;;  %v10619_v9 = vmul.f32 %v10280_v55, %v17019_v5  ;;  %v17027_v5 = vld [vmem:[#allocation10_spill] sm:$0xff]  ;;  %v8237_v16 = vpack.i.bf16 %v848_v48, %v846_v42  ;;  %v2330_v48 = vsel %vm16904_vm3, %v2327_v49, %v17032_v36  ;;  %v849_v36 = vrot.slane %v10383_v26, 1 }
 0x217   : > { %v10640_v62 = vmul.f32 %v10280_v55, %v17027_v5  ;;  %v825_v5 = vrot.slane %v10284_v43, 1 }
 0x218   : > { %17020 = vst [vmem:[#allocation6_spill] sm:$0xff] %v10619_v9  ;;  %v8047_v18 = vpack.i.bf16 %v10619_v9, %v10606_v60  ;;  %v17039_v60 = vrot.slane %v10375_v61, 3  ;;  %v17041_v9 = vrot.slane %v10375_v61, 5 }
 0x219   : > { %8233 = vrot.lane.b32.xlu0 %v8232_v63, %s9913_s27  ;;  %17028 = vst [vmem:[#allocation10_spill] sm:$0xff] %v10640_v62  ;;  %v1836_v63 = vsel %vm1811_vm2, %v1833_v50, %v17029_v58  ;;  %v10665_v58 = vmul.f32 %v10280_v55, %v17033_v39  ;;  %v17035_v50 = vld [vmem:[#allocation13_spill] sm:$0xff]  ;;  %v8057_v49 = vpack.i.bf16 %v10640_v62, %v10635_v44  ;;  %v851_v39 = vrot.slane %v10387_v15, 1 }
 0x21a   : > { %8043 = vrot.lane.b32.xlu1 %v8042_v17, %s9910_s22  ;;  %v17030_v17 = vld [vmem:[#allocation11_spill] sm:$0xff]  ;;  %v10669_v34 = vmul.f32 %v10280_v55, %v17035_v50  ;;  %v8257_v6 = vpack.i.bf16 %v1836_v63, %v1834_v29  ;;  %v17037_v50 = vrot.slane %v10288_v52, 1  ;;  %v1074_v29 = vrot.slane %v10288_v52, 2 }
 0x21b   : > { %v10655_v42 = vmul.f32 %v10280_v55, %v17030_v17  ;;  %17034 = vst [vmem:[#allocation12_spill] sm:$0xff] %v10665_v58  ;;  %v8247_v17 = vpack.i.bf16 %v1342_v22, %v1340_v3  ;;  %v8267_v58 = vpack.i.bf16 %v2330_v48, %v2328_v59  ;;  %v826_v55 = vsel %vm16885_vm4, %v824_v23, %v825_v5 }
 0x21c   : > { %17036 = vst [vmem:[#allocation13_spill] sm:$0xff] %v10669_v34  ;;  %v1071_v3 = vrot.slane %v10292_v1, 2  ;;  %v1072_v22 = vrot.slane %v10284_v43, 2  ;;  %v1343_v63 = vrot.slane %v10383_v26, 3  ;;  %v1565_v59 = vrot.slane %v10292_v1, 4 }
 0x21d   : > { %17031 = vst [vmem:[#allocation11_spill] sm:$0xff] %v10655_v42  ;;  %8238 = vrot.lane.b32.xlu0 %v8237_v16, %s9914_s28  ;;  %v8052_v42 = vpack.i.bf16 %v10631_v0, %v10627_v53  ;;  %v828_v16 = vsel %vm16885_vm4, %v825_v5, %v17037_v50  ;;  %v1566_v23 = vrot.slane %v10284_v43, 4  ;;  %v1568_v48 = vrot.slane %v10288_v52, 4 }
 0x21e   : > { %8048 = vrot.lane.b32.xlu1 %v8047_v18, %s9910_s22  ;;  %v1837_v5 = vrot.slane %v10383_v26, 5  ;;  %v2059_v34 = vrot.slane %v10292_v1, 6  ;;  %v2060_v62 = vrot.slane %v10284_v43, 6  ;;  %v2062_v18 = vrot.slane %v10288_v52, 6 }
 0x21f   : > { %v852_v0 = vsel %vm16885_vm4, %v849_v36, %v851_v39  ;;  %v2331_v53 = vrot.slane %v10383_v26, 7  ;;  %v1075_v50 = vsel %vm1070_vm5, %v1072_v22, %v1074_v29  ;;  %v1344_v10 = vsel %vm1317_vm1, %v17039_v60, %v1343_v63 }
 0x220   : > { %v17040_v1 = vrot.slane %v10387_v15, 3  ;;  %v17042_v60 = vrot.slane %v10387_v15, 5 }
 0x221   : > { %8248 = vrot.lane.b32.xlu0 %v8247_v17, %s9911_s23  ;;  %v17038_v17 = vrot.slane %v10375_v61, 1 }
 0x222   : > { %8053 = vrot.lane.b32.xlu1 %v8052_v42, %s9910_s22  ;;  %v1073_v42 = vsel %vm1070_vm5, %v1071_v3, %v1072_v22  ;;  %v1346_v43 = vsel %vm1317_vm1, %v1343_v63, %v17040_v1  ;;  %v10718_v3 = vsel %vm1811_vm2, %v17041_v9, %v1837_v5  ;;  %v1076_v22 = vrot.slane %v10296_v19, 2 }
 0x223   : > { %v850_v44 = vsel %vm16885_vm4, %v17038_v17, %v849_v36  ;;  %v1567_v36 = vsel %vm1564_vm6, %v1565_v59, %v1566_v23  ;;  %v1569_v17 = vsel %vm1564_vm6, %v1566_v23, %v1568_v48  ;;  %v10725_v7 = vsel %vm1811_vm2, %v1837_v5, %v17042_v60 }
 0x224   : > { %v10728_v1 = vsel %vm16956_vm7, %v2059_v34, %v2060_v62  ;;  %v1078_v63 = vrot.slane %v10300_v20, 2  ;;  %v8062_v59 = vpack.i.bf16 %v828_v16, %v826_v55  ;;  %v8272_v9 = vpack.i.bf16 %v852_v0, %v850_v44 }
 0x225   : > { %8258 = vrot.lane.b32.xlu0 %v8257_v6, %s9912_s24  ;;  %v10731_v6 = vsel %vm16956_vm7, %v2060_v62, %v2062_v18  ;;  %v17043_v23 = vrot.slane %v10375_v61, 7  ;;  %v8067_v60 = vpack.i.bf16 %v1075_v50, %v1073_v42  ;;  %v8282_v34 = vpack.i.bf16 %v1346_v43, %v1344_v10 }
 0x226   : > { %8058 = vrot.lane.b32.xlu1 %v8057_v49, %s9910_s22  ;;  %v17044_v49 = vrot.slane %v10387_v15, 7  ;;  %v8077_v45 = vpack.i.bf16 %v1569_v17, %v1567_v36  ;;  %v853_v62 = vrot.slane %v10402_v4, 1  ;;  %v8292_v44 = vpack.i.bf16 %v10725_v7, %v10718_v3 }
 0x227   : > { %v10737_v24 = vsel %vm16904_vm3, %v17043_v23, %v2331_v53  ;;  %v8087_v0 = vpack.i.bf16 %v10731_v6, %v10728_v1  ;;  %v10751_v55 = vsel %vm1070_vm5, %v1074_v29, %v1076_v22  ;;  %v855_v16 = vrot.slane %v10407_v2, 1 }
 0x228   : > { %v10742_v5 = vsel %vm16904_vm3, %v2331_v53, %v17044_v49  ;;  %v10758_v10 = vsel %vm1070_vm5, %v1076_v22, %v1078_v63  ;;  %v1570_v53 = vrot.slane %v10296_v19, 4  ;;  %v1572_v7 = vrot.slane %v10300_v20, 4 }
 0x229   : > { %8268 = vrot.lane.b32.xlu0 %v8267_v58, %s9913_s27  ;;  %v1347_v58 = vrot.slane %v10402_v4, 3  ;;  %v1349_v50 = vrot.slane %v10407_v2, 3  ;;  %v2064_v29 = vrot.slane %v10296_v19, 6  ;;  %v2066_v42 = vrot.slane %v10300_v20, 6 }
 0x22a   : > { %8063 = vrot.lane.b32.xlu1 %v8062_v59, %s9914_s28  ;;  %v10767_v36 = vsel %vm16885_vm4, %v851_v39, %v853_v62  ;;  %v1841_v17 = vrot.slane %v10402_v4, 5  ;;  %v1080_v22 = vrot.slane %v10315_v41, 2  ;;  %v10774_v1 = vsel %vm16885_vm4, %v853_v62, %v855_v16 }
 0x22b   : > { %v2335_v59 = vrot.slane %v10402_v4, 7  ;;  %v10781_v39 = vsel %vm1564_vm6, %v1568_v48, %v1570_v53  ;;  %v10784_v49 = vsel %vm1564_vm6, %v1570_v53, %v1572_v7  ;;  %v1576_v62 = vrot.slane %v10319_v14, 4 }
 0x22c   : > { %v17045_v43 = vrot.slane %v10387_v15, 3  ;;  %v10794_v23 = vsel %vm1317_vm1, %v1347_v58, %v1349_v50  ;;  %v10800_v48 = vsel %vm16956_vm7, %v2064_v29, %v2066_v42  ;;  %v17046_v53 = vrot.slane %v10387_v15, 5 }
 0x22d   : > { %8273 = vrot.lane.b32.xlu0 %v8272_v9, %s9914_s28  ;;  %v1574_v9 = vrot.slane %v10315_v41, 4  ;;  %v10810_v20 = vsel %vm1811_vm2, %v1841_v17, %v17047_v47  ;;  %v17050_v47 = vrot.slane %v10407_v2, 7  ;;  %v8102_v13 = vpack.i.bf16 %v10758_v10, %v10751_v55 }
 0x22e   : > { %8068 = vrot.lane.b32.xlu1 %v8067_v60, %s9915_s29  ;;  %v10791_v6 = vsel %vm1317_vm1, %v17045_v43, %v1347_v58  ;;  %v10797_v60 = vsel %vm16956_vm7, %v2062_v18, %v2064_v29  ;;  %v10805_v3 = vsel %vm1811_vm2, %v17046_v53, %v1841_v17  ;;  %v10813_v43 = vsel %vm1070_vm5, %v1078_v63, %v1080_v22 }
 0x22f   : > { %v857_v58 = vrot.slane %v10415_v12, 1  ;;  %v17048_v18 = vrot.slane %v10319_v14, 2  ;;  %v17049_v53 = vrot.slane %v10387_v15, 7  ;;  %v10830_v17 = vsel %vm16904_vm3, %v2335_v59, %v17050_v47 }
 0x230   : > { %v859_v63 = vrot.slane %v10419_v32, 1  ;;  %v8112_v47 = vpack.i.bf16 %v10784_v49, %v10781_v39  ;;  %v1351_v55 = vrot.slane %v10415_v12, 3  ;;  %v1353_v10 = vrot.slane %v10419_v32, 3 }
 0x231   : > { %8283 = vrot.lane.b32.xlu0 %v8282_v34, %s9911_s23  ;;  %v10820_v29 = vsel %vm1070_vm5, %v1080_v22, %v17048_v18  ;;  %v10825_v51 = vsel %vm16904_vm3, %v17049_v53, %v2335_v59  ;;  %v10835_v34 = vsel %vm1564_vm6, %v1572_v7, %v1574_v9  ;;  %v10838_v22 = vsel %vm1564_vm6, %v1574_v9, %v1576_v62 }
 0x232   : > { %8078 = vrot.lane.b32.xlu1 %v8077_v45, %s9916_s30  ;;  %v2068_v18 = vrot.slane %v10315_v41, 6  ;;  %v2070_v53 = vrot.slane %v10319_v14, 6  ;;  %v8307_v59 = vpack.i.bf16 %v10774_v1, %v10767_v36  ;;  %v10863_v1 = vsel %vm16885_vm4, %v855_v16, %v857_v58 }
 0x233   : > { %v10866_v39 = vsel %vm16885_vm4, %v857_v58, %v859_v63  ;;  %v1084_v41 = vrot.slane %v10335_v35, 2  ;;  %v1086_v36 = vrot.slane %v10339_v40, 2  ;;  %v1845_v16 = vrot.slane %v10415_v12, 5 }
 0x234   : > { %v10870_v49 = vsel %vm16956_vm7, %v2066_v42, %v2068_v18  ;;  %v1578_v9 = vrot.slane %v10335_v35, 4  ;;  %v10884_v42 = vsel %vm1317_vm1, %v1349_v50, %v1351_v55  ;;  %v2339_v7 = vrot.slane %v10415_v12, 7 }
 0x235   : > { %8293 = vrot.lane.b32.xlu0 %v8292_v44, %s9912_s24  ;;  %v10873_v44 = vsel %vm16956_vm7, %v2068_v18, %v2070_v53  ;;  %v1580_v18 = vrot.slane %v10339_v40, 4  ;;  %v17051_v45 = vpack.i.bf16 %v10742_v5, %v10737_v24  ;;  %v2072_v19 = vrot.slane %v10335_v35, 6 }
 0x236   : > { %8088 = vrot.lane.b32.xlu1 %v8087_v0, %s9917_s14  ;;  %v10899_v50 = vsel %vm1317_vm1, %v1351_v55, %v1353_v10  ;;  %v10904_v11 = vsel %vm1070_vm5, %v17052_v31, %v1084_v41  ;;  %v861_v24 = vrot.slane %v10434_v28, 1  ;;  %v17053_v58 = vrot.slane %v10407_v2, 5 }
 0x237   : > { %v10922_v31 = vsel %vm1564_vm6, %v1576_v62, %v1578_v9  ;;  %v10925_v52 = vsel %vm1564_vm6, %v1578_v9, %v1580_v18  ;;  %v17055_v5 = vrot.slane %v10407_v2, 7  ;;  %v1088_v14 = vrot.slane %v10349_v38, 2 }
 0x238   : > { %v10914_v0 = vsel %vm1811_vm2, %v17053_v58, %v1845_v16  ;;  %v10941_v62 = vsel %vm16956_vm7, %v2070_v53, %v2072_v19  ;;  %v17057_v9 = vrot.slane %v10339_v40, 6  ;;  %v10953_v58 = vsel %vm16885_vm4, %v859_v63, %v861_v24 }
 0x239   : > { %8303 = vrot.lane.b32.xlu0 %v17051_v45, %s9913_s27  ;;  %v10909_v45 = vsel %vm1070_vm5, %v1084_v41, %v1086_v36  ;;  %v10930_v41 = vsel %vm16904_vm3, %v17055_v5, %v2339_v7  ;;  %v1355_v5 = vrot.slane %v10434_v28, 3  ;;  %v17061_v63 = vpack.i.bf16 %v10794_v23, %v10791_v6 }
 0x23a   : > { %8103 = vrot.lane.b32.xlu1 %v8102_v13, %s9915_s29  ;;  %v17054_v13 = vrot.slane %v10419_v32, 5  ;;  %v10946_v35 = vsel %vm16956_vm7, %v2072_v19, %v17057_v9  ;;  %v9627_v19 = vld [vmem:[%s16664_s6 + $0x18] ss:$0 sps:$4 sm:$0x77]   ;;  %v1092_v23 = vrot.slane %v10370_v27, 2 }
 0x23c   : > { %v10919_v55 = vsel %vm1811_vm2, %v1845_v16, %v17054_v13  ;;  %v17056_v16 = vrot.slane %v10419_v32, 7 }
 0x23d   : > { %8308 = vrot.lane.b32.xlu0 %v8307_v59, %s9914_s28  ;;  %v1582_v59 = vrot.slane %v10349_v38, 4 }
 0x23e   : > { %v10938_v13 = vsel %vm16904_vm3, %v2339_v7, %v17056_v16  ;;  %8113 = vrot.lane.b32.xlu1 %v8112_v47, %s9916_s30  ;;  %v17058_v7 = vrot.slane %v10439_v56, 1  ;;  %v10978_v16 = vsel %vm1070_vm5, %v1086_v36, %v1088_v14  ;;  %v17060_v47 = vrot.slane %v10353_v21, 2 }
 0x23f   : > { %v1849_v36 = vrot.slane %v10434_v28, 5  ;;  %v11012_v57 = vsel %vm1564_vm6, %v1580_v18, %v1582_v59  ;;  %v9628_v18 = vld [vmem:[%s16664_s6 + $0x10] sm:$0xff]  }
 0x240   : > { %v10958_v53 = vsel %vm16885_vm4, %v861_v24, %v17058_v7  ;;  %v10971_v30 = vpop.permute.xlu1 %7948  ;;  %v10983_v9 = vsel %vm1070_vm5, %v1088_v14, %v17060_v47  ;;  %v10992_v24 = vsel %vm1317_vm1, %v1353_v10, %v1355_v5  ;;  %v1584_v7 = vrot.slane %v10353_v21, 4 }
 0x241   : > { %17059 = vst [vmem:[#allocation53_spill] sm:$0xff] %v10971_v30  ;;  %8318 = vrot.lane.b32.xlu0 %v17061_v63, %s9911_s23  ;;  %17062 = vst [vmem:[#allocation54_spill] sm:$0xff] %v10992_v24  ;;  %v17063_v14 = vpack.i.bf16 %v10800_v48, %v10797_v60  ;;  %v17064_v47 = vrot.slane %v10439_v56, 3  ;;  %v3235_v63 = vsel %vm1811_vm2, %v9627_v19, 0  ;;  %v2076_v60 = vrot.slane %v10349_v38, 6 }
 0x242   : > { %v2078_v48 = vrot.slane %v10353_v21, 6  ;;  %v17068_v38 = vpack.i.bf16 %v10810_v20, %v10805_v3  ;;  %v865_v19 = vrot.slane %v10447_v37, 1  ;;  %v17071_v20 = vrot.slane %v10419_v32, 5 }
 0x243   : > { %8123 = vrot.lane.b32.xlu1 %v17063_v14, %s9917_s14  ;;  %v11003_v6 = vsel %vm1317_vm1, %v1355_v5, %v17064_v47  ;;  %v11007_v10 = vpop.permute.xlu0 %8073  ;;  %v16743_v14 = vmov 0.0   ;;  %v2343_v47 = vrot.slane %v10434_v28, 7  ;;  %v17072_v3 = vrot.slane %v10439_v56, 5 }
 0x244   : > { %17065 = vst [vmem:[#allocation55_spill] sm:$0xff] %v11003_v6  ;;  %17066 = vst [vmem:[#allocation56_spill] sm:$0xff] %v11007_v10  ;;  %7627 = vmatprep.subr.bf16.mxu0 %v16743_v14  ;;  %v11017_v5 = vpop.permute.xlu1 %7953  ;;  %v17070_v10 = vpack.i.bf16 %v10820_v29, %v10813_v43  ;;  %v1586_v14 = vrot.slane %v10370_v27, 4  ;;  %v17074_v24 = vrot.slane %v10339_v40, 6  ;;  %v11062_v29 = vsel %vm16956_vm7, %v2076_v60, %v2078_v48 }
 0x245   : > { %17067 = vst [vmem:[#allocation57_spill] sm:$0xff] %v11017_v5  ;;  %7628 = vmatpush3.bf16.msra.mxu0 %v3235_v63  ;;  %8328 = vrot.lane.b32.xlu0 %v17068_v38, %s9912_s24  ;;  %v11033_v5 = vsel %vm1564_vm6, %v1582_v59, %v1584_v7  ;;  %v17069_v63 = vmov 0.0   ;;  %v11045_v38 = vsel %vm1811_vm2, %v17071_v20, %v1849_v36  ;;  %v17079_v6 = vrot.slane %v10375_v61, 2 }
 0x246   : > { %7629 = vmatprep.subr.bf16.mxu0 %v17069_v63  ;;  %v11050_v59 = vsel %vm1811_vm2, %v1849_v36, %v17072_v3  ;;  %v11059_v43 = vsel %vm16956_vm7, %v17074_v24, %v2076_v60  ;;  %v17076_v3 = vrot.slane %v10419_v32, 7  ;;  %v17078_v24 = vrot.slane %v10353_v21, 2  ;;  %7635 = vmatprep.mubr.msk.bf16.mxu0 %vm16957_vm8, %v17069_v63 }
 0x247   : > { %8138 = vrot.lane.b32.xlu1 %v17070_v10, %s9915_s29  ;;  %v11054_v28 = vpop.permute.xlu0 %8083  ;;  %v1359_v10 = vrot.slane %v10447_v37, 3  ;;  %v11086_v20 = vsel %vm1070_vm5, %v1092_v23, %v17079_v6  ;;  %v17082_v21 = vrot.slane %v10451_v54, 1 }
 0x248   : > { %17073 = vst [vmem:[#allocation58_spill] sm:$0xff] %v11054_v28  ;;  %v11066_v36 = vpop.permute.xlu1 %7958  ;;  %v11071_v30 = vsel %vm16904_vm3, %v17076_v3, %v2343_v47  ;;  %v17077_v28 = vrot.slane %v10439_v56, 7  ;;  %v11081_v60 = vsel %vm1070_vm5, %v17078_v24, %v1092_v23  ;;  %v9629_v3 = vld [vmem:[%s16664_s6 + $0x8] sm:$0xff]   ;;  %v2080_v23 = vrot.slane %v10370_v27, 6 }
 0x249   : > { %17075 = vst [vmem:[#allocation59_spill] sm:$0xff] %v11066_v36  ;;  %7630 = vmatpush3.bf16.msra.mxu0 %v9628_v18  ;;  %v11103_v6 = vsel %vm16885_vm4, %v865_v19, %v17082_v21  ;;  %v1853_v21 = vrot.slane %v10447_v37, 5  ;;  %v17094_v27 = vrot.slane %v10439_v56, 5 }
 0x24a   : > { %v11076_v40 = vsel %vm16904_vm3, %v2343_v47, %v17077_v28  ;;  %v17080_v28 = vpack.i.bf16 %v10830_v17, %v10825_v51  ;;  %v17081_v47 = vrot.slane %v10439_v56, 1  ;;  %7631 = vmatprep.subr.bf16.mxu0 %v17069_v63  ;;  %v17083_v51 = vpack.i.bf16 %v10838_v22, %v10835_v34 }
 0x24b   : > { %v11113_v17 = vsel %vm1564_vm6, %v1584_v7, %v1586_v14  ;;  %v11122_v18 = vpop.permute.xlu0 %8093  ;;  %v17086_v22 = vrot.slane %v10439_v56, 3  ;;  %v11159_v34 = vsel %vm16956_vm7, %v2078_v48, %v2080_v23  ;;  %v11176_v48 = vsel %vm1811_vm2, %v17094_v27, %v1853_v21 }
 0x24c   : > { %8338 = vrot.lane.b32.xlu0 %v17080_v28, %s9913_s27  ;;  %v11098_v24 = vsel %vm16885_vm4, %v17081_v47, %v865_v19  ;;  %8148 = vrot.lane.b32.xlu1 %v17083_v51, %s9916_s30  ;;  %v17084_v28 = vrot.slane %v10375_v61, 4  ;;  %17085 = vst [vmem:[#allocation60_spill] sm:$0xff] %v11122_v18  ;;  %v1096_v18 = vrot.slane %v10383_v26, 2  ;;  %v17098_v27 = vrot.slane %v10375_v61, 2 }
 0x24d   : > { %v11131_v7 = vsel %vm1317_vm1, %v17086_v22, %v1359_v10  ;;  %7632 = vmatpush3.bf16.msra.mxu0 %v9629_v3  ;;  %v9630_v22 = vld [vmem:[%s16664_s6] sm:$0xff]   ;;  %v17092_v3 = vpack.i.bf16 %v10873_v44, %v10870_v49  ;;  %v1098_v44 = vrot.slane %v10387_v15, 2 }
 0x24e   : > { %v11118_v47 = vsel %vm1564_vm6, %v1586_v14, %v17084_v28  ;;  %17087 = vst [vmem:[#allocation61_spill] sm:$0xff] %v11131_v7  ;;  %v17088_v14 = vrot.slane %v10451_v54, 3  ;;  %v11138_v28 = vpop.permute.xlu1 %7963  ;;  %7633 = vmatprep.subr.bf16.mxu0 %v17069_v63  ;;  %v2084_v7 = vrot.slane %v10383_v26, 6 }
 0x24f   : > { %17090 = vst [vmem:[#allocation63_spill] sm:$0xff] %v11138_v28  ;;  %v11183_v49 = vpop.permute.xlu0 %8098  ;;  %v11194_v28 = vsel %vm1070_vm5, %v17098_v27, %v1096_v18  ;;  %v17102_v27 = vrot.slane %v10439_v56, 7 }
 0x250   : > { %v11136_v51 = vsel %vm1317_vm1, %v1359_v10, %v17088_v14  ;;  %v17091_v10 = vpack.i.bf16 %v10866_v39, %v10863_v1  ;;  %8158 = vrot.lane.b32.xlu1 %v17092_v3, %s9917_s14  ;;  %v17093_v39 = vrot.slane %v10375_v61, 6  ;;  %v17095_v14 = vrot.slane %v10451_v54, 5  ;;  %17096 = vst [vmem:[#allocation64_spill] sm:$0xff] %v11183_v49 }
 0x251   : > { %17089 = vst [vmem:[#allocation62_spill] sm:$0xff] %v11136_v51  ;;  %v2347_v3 = vrot.slane %v10447_v37, 7  ;;  %7634 = vmatpush3.bf16.msra.mxu0 %v9630_v22  ;;  %v17099_v1 = vpack.i.bf16 %v10899_v50, %v10884_v42  ;;  %v1363_v51 = vrot.slane %v10466_v33, 3  ;;  %v17100_v49 = vpack.i.bf16 %v10909_v45, %v10904_v11 }
 0x252   : > { %8343 = vrot.lane.b32.xlu0 %v17091_v10, %s9914_s28  ;;  %v11171_v10 = vsel %vm16956_vm7, %v2080_v23, %v17093_v39  ;;  %v11181_v19 = vsel %vm1811_vm2, %v1853_v21, %v17095_v14  ;;  %v1590_v23 = vrot.slane %v10383_v26, 4  ;;  %v11189_v39 = vpop.permute.xlu1 %7968  ;;  %v869_v14 = vrot.slane %v10466_v33, 1  ;;  %7855 = vmatprep.subr.bf16.mxu0 %v17069_v63 }
 0x253   : > { %17097 = vst [vmem:[#allocation65_spill] sm:$0xff] %v11189_v39  ;;  %v1100_v22 = vrot.slane %v10402_v4, 2  ;;  %v1857_v50 = vrot.slane %v10466_v33, 5  ;;  %v11216_v39 = vpop.permute.xlu0 %8108  ;;  %v11219_v21 = vsel %vm1070_vm5, %v1096_v18, %v1098_v44  ;;  %v11224_v26 = vsel %vm16904_vm3, %v17102_v27, %v2347_v3 }
 0x254   : > { %8173 = vrot.lane.b32.xlu1 %v17100_v49, %s9915_s29  ;;  %17101 = vst [vmem:[#allocation66_spill] sm:$0xff] %v11216_v39  ;;  %v17103_v11 = vrot.slane %v10451_v54, 7  ;;  %v17105_v42 = vrot.slane %v10375_v61, 4  ;;  %v17107_v18 = vrot.slane %v10387_v15, 4  ;;  %v17108_v27 = vrot.slane %v10451_v54, 1 }
 0x255   : > { %v17119_v63 = vrot.slane %v10471_v25, 3 }
 0x256   : > { %8353 = vrot.lane.b32.xlu0 %v17099_v1, %s9911_s23  ;;  %v11229_v45 = vsel %vm16904_vm3, %v2347_v3, %v17103_v11  ;;  %v11231_v49 = vpop.permute.xlu1 %7973  ;;  %v11236_v1 = vsel %vm1564_vm6, %v17105_v42, %v1590_v23  ;;  %v11241_v39 = vsel %vm1564_vm6, %v1590_v23, %v17107_v18  ;;  %v11246_v36 = vsel %vm16885_vm4, %v17108_v27, %v869_v14 }
 0x257   : > { %17104 = vst [vmem:[#allocation67_spill] sm:$0xff] %v11231_v49  ;;  %17106 = vst [vmem:[#allocation68_spill] sm:$0xff] %v11236_v1  ;;  %v17110_v3 = vrot.slane %v10471_v25, 1  ;;  %v17112_v42 = vpack.i.bf16 %v10919_v55, %v10914_v0  ;;  %v17113_v23 = vrot.slane %v10375_v61, 6  ;;  %v17115_v27 = vrot.slane %v10387_v15, 6 }
 0x258   : > { %17109 = vst [vmem:[#allocation69_spill] sm:$0xff] %v11246_v36  ;;  %v11277_v0 = vsel %vm1317_vm1, %v1363_v51, %v17119_v63  ;;  %v17121_v55 = vpack.i.bf16 %v10925_v52, %v10922_v31  ;;  %v17127_v63 = vrot.slane %v10471_v25, 5  ;;  %v11301_v52 = vpop.permute.xlu0 %8118  ;;  %v1594_v31 = vrot.slane %v10402_v4, 4 }
 0x259   : > { %v11251_v11 = vsel %vm16885_vm4, %v869_v14, %v17110_v3  ;;  %v11262_v18 = vsel %vm16956_vm7, %v17113_v23, %v2084_v7  ;;  %v11267_v49 = vsel %vm16956_vm7, %v2084_v7, %v17115_v27  ;;  %v17117_v14 = vrot.slane %v10451_v54, 3  ;;  %17120 = vst [vmem:[#allocation74_spill] sm:$0xff] %v11277_v0  ;;  %17129 = vst [vmem:[#allocation79_spill] sm:$0xff] %v11301_v52 }
 0x25a   : > { %17111 = vst [vmem:[#allocation70_spill] sm:$0xff] %v11251_v11  ;;  %8363 = vrot.lane.b32.xlu0 %v17112_v42, %s9912_s24  ;;  %17114 = vst [vmem:[#allocation71_spill] sm:$0xff] %v11262_v18  ;;  %8183 = vrot.lane.b32.xlu1 %v17121_v55, %s9916_s30  ;;  %v11284_v42 = vsel %vm1070_vm5, %v1098_v44, %v1100_v22  ;;  %v17123_v7 = vrot.slane %v10407_v2, 2  ;;  %v17125_v27 = vrot.slane %v10451_v54, 5  ;;  %v2351_v44 = vrot.slane %v10466_v33, 7  ;;  %v17149_v18 = vld [vmem:[#allocation54_spill] sm:$0xff] }
 0x25b   : > { %17116 = vst [vmem:[#allocation72_spill] sm:$0xff] %v11267_v49  ;;  %v11272_v3 = vsel %vm1317_vm1, %v17117_v14, %v1363_v51  ;;  %17122 = vst [vmem:[#allocation75_spill] sm:$0xff] %v11284_v42  ;;  %v11299_v51 = vsel %vm1811_vm2, %v1857_v50, %v17127_v63  ;;  %v17132_v63 = vpack.i.bf16 %v10946_v35, %v10941_v62  ;;  %v875_v61 = vrot.slane %v10483_v8, 1 }
 0x25c   : > { %17118 = vst [vmem:[#allocation73_spill] sm:$0xff] %v11272_v3  ;;  %v11289_v23 = vsel %vm1070_vm5, %v1100_v22, %v17123_v7  ;;  %v11294_v14 = vsel %vm1811_vm2, %v17125_v27, %v1857_v50  ;;  %17128 = vst [vmem:[#allocation78_spill] sm:$0xff] %v11299_v51  ;;  %v11311_v7 = vpop.permute.xlu1 %7978  ;;  %v17131_v22 = vpack.i.bf16 %v10938_v13, %v10930_v41  ;;  %v1596_v27 = vrot.slane %v10407_v2, 4  ;;  %v11339_v55 = vpop.permute.xlu0 %8128 }
 0x25d   : > { %17124 = vst [vmem:[#allocation76_spill] sm:$0xff] %v11289_v23  ;;  %17126 = vst [vmem:[#allocation77_spill] sm:$0xff] %v11294_v14  ;;  %v2353_v41 = vrot.slane %v10471_v25, 7  ;;  %v2088_v13 = vrot.slane %v10402_v4, 6  ;;  %v873_v50 = vrot.slane %v10479_v46, 1  ;;  %v1104_v14 = vrot.slane %v10415_v12, 2 }
 0x25e   : > { %17130 = vst [vmem:[#allocation80_spill] sm:$0xff] %v11311_v7  ;;  %8373 = vrot.lane.b32.xlu0 %v17131_v22, %s9913_s27  ;;  %8193 = vrot.lane.b32.xlu1 %v17132_v63, %s9917_s14  ;;  %v2090_v22 = vrot.slane %v10407_v2, 6  ;;  %17133 = vst [vmem:[#allocation81_spill] sm:$0xff] %v11339_v55  ;;  %v1106_v51 = vrot.slane %v10419_v32, 2  ;;  %v1367_v62 = vrot.slane %v10479_v46, 3  ;;  %v1598_v4 = vrot.slane %v10415_v12, 4 }
 0x25f   : > { %v17135_v23 = vpack.i.bf16 %v10958_v53, %v10953_v58  ;;  %v17136_v3 = vrot.slane %v10387_v15, 4  ;;  %v1861_v55 = vrot.slane %v10479_v46, 5  ;;  %v17137_v42 = vpack.i.bf16 %v10983_v9, %v10978_v16 }
 0x260   : > { %v11345_v35 = vpop.permute.xlu1 %7983  ;;  %v17138_v58 = vrot.slane %v10451_v54, 7  ;;  %v11383_v63 = vsel %vm16956_vm7, %v2088_v13, %v2090_v22  ;;  %v11385_v7 = vpop.permute.xlu0 %8133  ;;  %v17142_v16 = vrot.slane %v10471_v25, 1 }
 0x261   : > { %17134 = vst [vmem:[#allocation82_spill] sm:$0xff] %v11345_v35  ;;  %v11358_v0 = vsel %vm1564_vm6, %v17136_v3, %v1594_v31  ;;  %v11361_v35 = vsel %vm1564_vm6, %v1594_v31, %v1596_v27  ;;  %v11375_v3 = vsel %vm16904_vm3, %v2351_v44, %v2353_v41  ;;  %17141 = vst [vmem:[#allocation84_spill] sm:$0xff] %v11385_v7 }
 0x262   : > { %8378 = vrot.lane.b32.xlu0 %v17135_v23, %s9914_s28  ;;  %8208 = vrot.lane.b32.xlu1 %v17137_v42, %s9915_s29  ;;  %v11372_v53 = vsel %vm16904_vm3, %v17138_v58, %v2351_v44  ;;  %v17139_v23 = vrot.slane %v10387_v15, 6  ;;  %v11390_v9 = vsel %vm16885_vm4, %v17142_v16, %v873_v50  ;;  %v11393_v42 = vsel %vm16885_vm4, %v873_v50, %v875_v61 }
 0x263   : > { %v17143_v44 = vrot.slane %v10407_v2, 2  ;;  %v17145_v15 = vrot.slane %v10471_v25, 3  ;;  %v17146_v16 = vrot.slane %v10483_v8, 3  ;;  %v11416_v2 = vsel %vm1564_vm6, %v1596_v27, %v1598_v4 }
 0x264   : > { %v11380_v31 = vsel %vm16956_vm7, %v17139_v23, %v2088_v13  ;;  %v11401_v23 = vsel %vm1070_vm5, %v1104_v14, %v1106_v51  ;;  %v11403_v13 = vpop.permute.xlu1 %7988  ;;  %v11447_v52 = vpop.permute.xlu0 %8143 }
 0x265   : > { %17140 = vst [vmem:[#allocation83_spill] sm:$0xff] %v11380_v31  ;;  %v11398_v58 = vsel %vm1070_vm5, %v17143_v44, %v1104_v14  ;;  %17144 = vst [vmem:[#allocation85_spill] sm:$0xff] %v11403_v13  ;;  %v11408_v7 = vsel %vm1317_vm1, %v17145_v15, %v1367_v62  ;;  %v11413_v50 = vsel %vm1317_vm1, %v1367_v62, %v17146_v16  ;;  %v17147_v44 = vrot.slane %v10419_v32, 4  ;;  %v17148_v13 = vld [vmem:[#allocation55_spill] sm:$0xff] }
 0x266   : > { %v17150_v49 = vpack.i.bf16 %v17148_v13, %v17149_v18  ;;  %v17151_v15 = vrot.slane %v10471_v25, 5  ;;  %v17153_v62 = vrot.slane %v10483_v8, 5  ;;  %v2092_v16 = vrot.slane %v10415_v12, 6  ;;  %v17155_v13 = vld [vmem:[#allocation33_spill] sm:$0xff]  ;;  %17156 = vst [vmem:[#allocation54_spill] sm:$0xff] %v11447_v52 }
 0x267   : > { %v11421_v14 = vsel %vm1564_vm6, %v1598_v4, %v17147_v44  ;;  %v2094_v4 = vrot.slane %v10419_v32, 6  ;;  %v17154_v44 = vpack.i.bf16 %v11033_v5, %v11012_v57  ;;  %v17157_v12 = vld [vmem:[#allocation41_spill] sm:$0xff]  ;;  %v17158_v57 = vld [vmem:[#allocation42_spill] sm:$0xff] }
 0x268   : > { %8388 = vrot.lane.b32.xlu0 %v17150_v49, %s9911_s23  ;;  %v11430_v36 = vsel %vm1811_vm2, %v17151_v15, %v1861_v55  ;;  %v11435_v27 = vsel %vm1811_vm2, %v1861_v55, %v17153_v62  ;;  %v2355_v49 = vrot.slane %v10479_v46, 7  ;;  %v1108_v15 = vrot.slane %v17155_v13, 2  ;;  %v11499_v5 = vpop.permute.xlu0 %8153 }
 0x269   : > { %17152 = vst [vmem:[#allocation55_spill] sm:$0xff] %v11430_v36  ;;  %8218 = vrot.lane.b32.xlu1 %v17154_v44, %s9916_s30  ;;  %v877_v1 = vrot.slane %v17157_v12, 1  ;;  %v11455_v44 = vpop.permute.xlu1 %7993  ;;  %v17160_v62 = vpack.i.bf16 %v11050_v59, %v11045_v38  ;;  %v11474_v31 = vsel %vm16956_vm7, %v2090_v22, %v2092_v16  ;;  %v11477_v11 = vsel %vm16956_vm7, %v2092_v16, %v2094_v4 }
 0x26a   : > { %17159 = vst [vmem:[#allocation86_spill] sm:$0xff] %v11455_v44  ;;  %v17161_v55 = vpack.i.bf16 %v11062_v29, %v11059_v43  ;;  %v11484_v38 = vsel %vm16904_vm3, %v2353_v41, %v2355_v49  ;;  %v17163_v59 = vrot.slane %v10483_v8, 7  ;;  %v11492_v18 = vsel %vm1070_vm5, %v1106_v51, %v1108_v15 }
 0x26b   : > { %17162 = vst [vmem:[#allocation87_spill] sm:$0xff] %v11484_v38  ;;  %v17164_v22 = vrot.slane %v10439_v56, 2  ;;  %v11502_v43 = vsel %vm16885_vm4, %v875_v61, %v877_v1  ;;  %v17166_v29 = vrot.slane %v17158_v57, 1  ;;  %v17171_v36 = vpack.i.bf16 %v11086_v20, %v11081_v60 }
 0x26c   : > { %8398 = vrot.lane.b32.xlu0 %v17160_v62, %s9912_s24  ;;  %v11489_v62 = vsel %vm16904_vm3, %v2355_v49, %v17163_v59  ;;  %17165 = vst [vmem:[#allocation88_spill] sm:$0xff] %v11502_v43  ;;  %v1602_v49 = vrot.slane %v17155_v13, 4  ;;  %v1371_v59 = vrot.slane %v17157_v12, 3  ;;  %v11539_v38 = vpop.permute.xlu0 %8163  ;;  %v17175_v20 = vrot.slane %v10439_v56, 4 }
 0x26d   : > { %8228 = vrot.lane.b32.xlu1 %v17161_v55, %s9917_s14  ;;  %v11497_v16 = vsel %vm1070_vm5, %v1108_v15, %v17164_v22  ;;  %v11507_v41 = vsel %vm16885_vm4, %v877_v1, %v17166_v29  ;;  %v11511_v55 = vpop.permute.xlu1 %7998  ;;  %v2096_v22 = vrot.slane %v17155_v13, 6  ;;  %v17170_v1 = vpack.i.bf16 %v11076_v40, %v11071_v30 }
 0x26e   : > { %17167 = vst [vmem:[#allocation89_spill] sm:$0xff] %v11507_v41  ;;  %17168 = vst [vmem:[#allocation90_spill] sm:$0xff] %v11511_v55  ;;  %v1865_v30 = vrot.slane %v17157_v12, 5  ;;  %v17173_v13 = vrot.slane %v10419_v32, 4  ;;  %v17178_v40 = vrot.slane %v10483_v8, 3  ;;  %v17180_v51 = vrot.slane %v17158_v57, 3 }
 0x26f   : > { %v17182_v32 = vrot.slane %v10439_v56, 6  ;;  %v17189_v52 = vrot.slane %v17158_v57, 5  ;;  %v17201_v41 = vpack.i.bf16 %v11171_v10, %v11159_v34  ;;  %v17207_v34 = vld [vmem:[#allocation64_spill] sm:$0xff]  ;;  %v17318_v44 = vpack.i.bf16 %v11421_v14, %v11416_v2 }
 0x270   : > { %8408 = vrot.lane.b32.xlu0 %v17170_v1, %s9913_s27  ;;  %v11544_v15 = vsel %vm1564_vm6, %v17173_v13, %v1602_v49  ;;  %v11556_v61 = vsel %vm1317_vm1, %v17178_v40, %v1371_v59  ;;  %v11561_v1 = vsel %vm1317_vm1, %v1371_v59, %v17180_v51  ;;  %v11564_v13 = vsel %vm16956_vm7, %v2094_v4, %v2096_v22 }
 0x271   : > { %8243 = vrot.lane.b32.xlu1 %v17171_v36, %s9915_s29  ;;  %17174 = vst [vmem:[#allocation91_spill] sm:$0xff] %v11544_v15  ;;  %v11549_v36 = vsel %vm1564_vm6, %v1602_v49, %v17175_v20  ;;  %v11551_v60 = vpop.permute.xlu1 %8003  ;;  %17179 = vst [vmem:[#allocation94_spill] sm:$0xff] %v11556_v61  ;;  %v11569_v49 = vsel %vm16956_vm7, %v2096_v22, %v17182_v32  ;;  %v17185_v40 = vpack.i.bf16 %v11103_v6, %v11098_v24  ;;  %v11596_v20 = vpop.permute.xlu0 %8168  ;;  %v17195_v15 = vld [vmem:[#allocation61_spill] sm:$0xff] }
 0x272   : > { %17176 = vst [vmem:[#allocation92_spill] sm:$0xff] %v11549_v36  ;;  %17177 = vst [vmem:[#allocation93_spill] sm:$0xff] %v11551_v60  ;;  %v1112_v51 = vrot.slane %v10447_v37, 2  ;;  %v17186_v4 = vpack.i.bf16 %v11118_v47, %v11113_v17  ;;  %v17187_v32 = vrot.slane %v10483_v8, 5  ;;  %v11591_v29 = vsel %vm1811_vm2, %v1865_v30, %v17189_v52  ;;  %v17194_v17 = vld [vmem:[#allocation62_spill] sm:$0xff] }
 0x273   : > { %17181 = vst [vmem:[#allocation95_spill] sm:$0xff] %v11564_v13  ;;  %17183 = vst [vmem:[#allocation96_spill] sm:$0xff] %v11569_v49  ;;  %v2359_v24 = vrot.slane %v17157_v12, 7  ;;  %v1606_v6 = vrot.slane %v10447_v37, 4  ;;  %v17196_v36 = vpack.i.bf16 %v17194_v17, %v17195_v15  ;;  %v17197_v52 = vrot.slane %v10439_v56, 2 }
 0x274   : > { %8413 = vrot.lane.b32.xlu0 %v17185_v40, %s9914_s28  ;;  %v11586_v22 = vsel %vm1811_vm2, %v17187_v32, %v1865_v30  ;;  %17190 = vst [vmem:[#allocation98_spill] sm:$0xff] %v11591_v29  ;;  %v17199_v47 = vrot.slane %v10451_v54, 2  ;;  %v17202_v15 = vrot.slane %v10483_v8, 7  ;;  %v17203_v17 = vrot.slane %v17158_v57, 7  ;;  %v17205_v30 = vld [vmem:[#allocation44_spill] sm:$0xff] }
 0x275   : > { %8253 = vrot.lane.b32.xlu1 %v17186_v4, %s9916_s30  ;;  %17188 = vst [vmem:[#allocation97_spill] sm:$0xff] %v11586_v22  ;;  %v11606_v43 = vpop.permute.xlu1 %8008  ;;  %v11620_v32 = vsel %vm1070_vm5, %v17197_v52, %v1112_v51  ;;  %v17204_v4 = vld [vmem:[#allocation43_spill] sm:$0xff]  ;;  %v8101_v10 = vunpack.i.h.bf16 %v17207_v34  ;;  %v17211_v22 = vrot.slane %v10451_v54, 4  ;;  %v17217_v61 = vrot.slane %v17158_v57, 1 }
 0x276   : > { %17193 = vst [vmem:[#allocation99_spill] sm:$0xff] %v11606_v43  ;;  %17198 = vst [vmem:[#allocation62_spill] sm:$0xff] %v11620_v32  ;;  %v11625_v40 = vsel %vm1070_vm5, %v1112_v51, %v17199_v47  ;;  %v11639_v52 = vsel %vm16904_vm3, %v2359_v24, %v17203_v17  ;;  %v881_v59 = vrot.slane %v17204_v4, 1  ;;  %v17209_v17 = vrot.slane %v10439_v56, 4  ;;  %v17345_v43 = vld [vmem:[#allocation21_spill] sm:$0xff] }
 0x277   : > { %17200 = vst [vmem:[#allocation61_spill] sm:$0xff] %v11625_v40  ;;  %v11661_v29 = vsel %vm1564_vm6, %v1606_v6, %v17211_v22  ;;  %v16814_v51 = vrot.slane %v10451_v54, 6  ;;  %v1610_v32 = vrot.slane %v10466_v33, 4  ;;  %v2112_v2 = vrot.slane %v17157_v12, 6 }
 0x278   : > { %8423 = vrot.lane.b32.xlu0 %v17196_v36, %s9911_s23  ;;  %v11634_v36 = vsel %vm16904_vm3, %v17202_v15, %v2359_v24  ;;  %v2100_v15 = vrot.slane %v10447_v37, 6  ;;  %v11656_v49 = vsel %vm1564_vm6, %v17209_v17, %v1606_v6  ;;  %17212 = vst [vmem:[#allocation101_spill] sm:$0xff] %v11661_v29  ;;  %v17214_v24 = vpack.i.bf16 %v11181_v19, %v11176_v48 }
 0x279   : > { %8263 = vrot.lane.b32.xlu1 %v17201_v41, %s9917_s14  ;;  %v11646_v41 = vpop.permute.xlu0 %8178  ;;  %v11649_v13 = vpop.permute.xlu1 %8013  ;;  %17210 = vst [vmem:[#allocation100_spill] sm:$0xff] %v11656_v49  ;;  %v17216_v6 = vpack.i.bf16 %v11219_v21, %v11194_v28  ;;  %v17219_v19 = vrot.slane %v17205_v30, 1  ;;  %v17224_v21 = vrot.slane %v10439_v56, 6  ;;  %v17228_v28 = vld [vmem:[#allocation15_spill] sm:$0xff]  ;;  %v17243_v56 = vrot.slane %v10471_v25, 2 }
 0x27a   : > { %17208 = vst [vmem:[#allocation64_spill] sm:$0xff] %v11649_v13  ;;  %v8100_v13 = vunpack.i.l.bf16 %v17207_v34  ;;  %v11682_v34 = vsel %vm16885_vm4, %v17217_v61, %v881_v59  ;;  %v1375_v61 = vrot.slane %v17204_v4, 3  ;;  %v1120_v29 = vrot.slane %v10479_v46, 2 }
 0x27b   : > { %17218 = vst [vmem:[#allocation102_spill] sm:$0xff] %v11682_v34  ;;  %v11687_v48 = vsel %vm16885_vm4, %v881_v59, %v17219_v19  ;;  %v11708_v59 = vsel %vm16956_vm7, %v2100_v15, %v16814_v51  ;;  %v1116_v19 = vrot.slane %v10466_v33, 2  ;;  %v8170_v14 = vunpack.i.l.bf16 %v11596_v20 }
 0x27c   : > { %8433 = vrot.lane.b32.xlu0 %v17214_v24, %s9912_s24  ;;  %17220 = vst [vmem:[#allocation103_spill] sm:$0xff] %v11687_v48  ;;  %v17221_v24 = vld [vmem:[#allocation17_spill] sm:$0xff]  ;;  %17227 = vst [vmem:[#allocation107_spill] sm:$0xff] %v11708_v59  ;;  %v11715_v17 = vsel %vm16906_vm0, %v17228_v28, %v8100_v13  ;;  %v17232_v13 = vld [vmem:[#allocation68_spill] sm:$0xff] }
 0x27d   : > { %8278 = vrot.lane.b32.xlu1 %v17216_v6, %s9915_s29  ;;  %v11691_v40 = vsel %vm16906_vm0, %v17221_v24, %v8101_v10  ;;  %v11693_v22 = vpop.permute.xlu0 %8188  ;;  %v11700_v6 = vsel %vm16956_vm7, %v17224_v21, %v2100_v15  ;;  %v11703_v37 = vpop.permute.xlu1 %8018  ;;  %17229 = vst [vmem:[#allocation15_spill] sm:$0xff] %v11715_v17  ;;  %v17230_v21 = vpack.i.bf16 %v11229_v45, %v11224_v26  ;;  %v1869_v15 = vrot.slane %v17204_v4, 5 }
 0x27e   : > { %17222 = vst [vmem:[#allocation17_spill] sm:$0xff] %v11691_v40  ;;  %17223 = vst [vmem:[#allocation104_spill] sm:$0xff] %v11693_v22  ;;  %v17233_v28 = vpack.i.bf16 %v11241_v39, %v17232_v13  ;;  %v17235_v24 = vrot.slane %v17158_v57, 3  ;;  %v17239_v26 = vrot.slane %v17205_v30, 3  ;;  %v11760_v10 = vsel %vm1070_vm5, %v1116_v19, %v17243_v56  ;;  %v17246_v13 = vld [vmem:[#allocation69_spill] sm:$0xff]  ;;  %v17269_v39 = vld [vmem:[#allocation76_spill] sm:$0xff] }
 0x27f   : > { %17225 = vst [vmem:[#allocation105_spill] sm:$0xff] %v11700_v6  ;;  %17226 = vst [vmem:[#allocation106_spill] sm:$0xff] %v11703_v37  ;;  %v17241_v37 = vrot.slane %v10451_v54, 2  ;;  %v2363_v40 = vrot.slane %v17204_v4, 7  ;;  %v17253_v6 = vld [vmem:[#allocation71_spill] sm:$0xff]  ;;  %v17401_v22 = vld [vmem:[#allocation62_spill] sm:$0xff] }
 0x280   : > { %8443 = vrot.lane.b32.xlu0 %v17230_v21, %s9913_s27  ;;  %v11742_v51 = vsel %vm1317_vm1, %v17235_v24, %v1375_v61  ;;  %v11750_v21 = vsel %vm1317_vm1, %v1375_v61, %v17239_v26  ;;  %17244 = vst [vmem:[#allocation111_spill] sm:$0xff] %v11760_v10  ;;  %v17245_v24 = vld [vmem:[#allocation70_spill] sm:$0xff]  ;;  %v17250_v26 = vrot.slane %v17205_v30, 5  ;;  %v17270_v56 = vld [vmem:[#allocation75_spill] sm:$0xff] }
 0x281   : > { %8288 = vrot.lane.b32.xlu1 %v17233_v28, %s9916_s30  ;;  %v11735_v47 = vpop.permute.xlu0 %8198  ;;  %17236 = vst [vmem:[#allocation68_spill] sm:$0xff] %v11742_v51  ;;  %v11745_v28 = vpop.permute.xlu1 %8023  ;;  %17240 = vst [vmem:[#allocation109_spill] sm:$0xff] %v11750_v21  ;;  %v11755_v45 = vsel %vm1070_vm5, %v17241_v37, %v1116_v19  ;;  %v17247_v17 = vpack.i.bf16 %v17245_v24, %v17246_v13  ;;  %v17252_v19 = vld [vmem:[#allocation72_spill] sm:$0xff]  ;;  %v17265_v51 = vld [vmem:[#allocation73_spill] sm:$0xff]  ;;  %v17271_v49 = vpack.i.bf16 %v17269_v39, %v17270_v56 }
 0x282   : > { %17238 = vst [vmem:[#allocation108_spill] sm:$0xff] %v11745_v28  ;;  %17242 = vst [vmem:[#allocation110_spill] sm:$0xff] %v11755_v45  ;;  %v17248_v28 = vrot.slane %v17158_v57, 5  ;;  %v11774_v37 = vsel %vm1811_vm2, %v1869_v15, %v17250_v26  ;;  %v17254_v59 = vpack.i.bf16 %v17252_v19, %v17253_v6  ;;  %v17264_v6 = vld [vmem:[#allocation74_spill] sm:$0xff]  ;;  %v17268_v26 = vrot.slane %v17205_v30, 7  ;;  %v17282_v45 = vld [vmem:[#allocation77_spill] sm:$0xff] }
 0x283   : > { %17251 = vst [vmem:[#allocation69_spill] sm:$0xff] %v11774_v37  ;;  %v17266_v21 = vpack.i.bf16 %v17264_v6, %v17265_v51  ;;  %v17272_v51 = vrot.slane %v10451_v54, 6  ;;  %v17273_v6 = vrot.slane %v10471_v25, 6  ;;  %v17289_v37 = vld [vmem:[#allocation19_spill] sm:$0xff] }
 0x284   : > { %8448 = vrot.lane.b32.xlu0 %v17247_v17, %s9914_s28  ;;  %v11769_v61 = vsel %vm1811_vm2, %v17248_v28, %v1869_v15  ;;  %v17255_v17 = vrot.slane %v10451_v54, 4  ;;  %v17257_v28 = vrot.slane %v10471_v25, 4  ;;  %v2104_v15 = vrot.slane %v10466_v33, 6  ;;  %v17278_v54 = vld [vmem:[#allocation84_spill] sm:$0xff] }
 0x285   : > { %17249 = vst [vmem:[#allocation70_spill] sm:$0xff] %v11769_v61  ;;  %8298 = vrot.lane.b32.xlu1 %v17254_v59, %s9917_s14  ;;  %v11795_v34 = vpop.permute.xlu0 %8203  ;;  %v17259_v59 = vld [vmem:[#allocation45_spill] sm:$0xff] }
 0x286   : > { %v11785_v13 = vsel %vm1564_vm6, %v17255_v17, %v1610_v32  ;;  %v11790_v24 = vsel %vm1564_vm6, %v1610_v32, %v17257_v28  ;;  %v885_v19 = vrot.slane %v17259_v59, 1  ;;  %v17260_v17 = vld [vmem:[#allocation46_spill] sm:$0xff]  ;;  %v11803_v28 = vpop.permute.xlu1 %8028  ;;  %v17267_v32 = vrot.slane %v17158_v57, 7 }
 0x287   : > { %17256 = vst [vmem:[#allocation72_spill] sm:$0xff] %v11785_v13  ;;  %17258 = vst [vmem:[#allocation71_spill] sm:$0xff] %v11790_v24  ;;  %v17284_v24 = vpack.i.bf16 %v11361_v35, %v11358_v0  ;;  %v1873_v35 = vrot.slane %v17259_v59, 5  ;;  %v17292_v0 = vpack.i.bf16 %v11375_v3, %v11372_v53  ;;  %v17296_v13 = vld [vmem:[#allocation54_spill] sm:$0xff]  ;;  %v17297_v3 = vld [vmem:[#allocation83_spill] sm:$0xff]  ;;  %v17301_v53 = vrot.slane %v17205_v30, 5 }
 0x288   : > { %17262 = vst [vmem:[#allocation112_spill] sm:$0xff] %v11803_v28  ;;  %8458 = vrot.lane.b32.xlu0 %v17266_v21, %s9911_s23  ;;  %v11819_v48 = vsel %vm16904_vm3, %v17267_v32, %v2363_v40  ;;  %v11824_v28 = vsel %vm16904_vm3, %v2363_v40, %v17268_v26  ;;  %v11833_v21 = vsel %vm16956_vm7, %v17272_v51, %v2104_v15  ;;  %v17277_v51 = vrot.slane %v17260_v17, 1 }
 0x289   : > { %8313 = vrot.lane.b32.xlu1 %v17271_v49, %s9915_s29  ;;  %v11838_v32 = vsel %vm16956_vm7, %v2104_v15, %v17273_v6  ;;  %v11844_v39 = vpop.permute.xlu0 %8213  ;;  %v17275_v49 = vrot.slane %v17205_v30, 1  ;;  %v8136_v40 = vunpack.i.h.bf16 %v17278_v54  ;;  %v8135_v26 = vunpack.i.l.bf16 %v17278_v54 }
 0x28a   : > { %v11854_v15 = vsel %vm16885_vm4, %v885_v19, %v17277_v51  ;;  %v11859_v33 = vpop.permute.xlu1 %8033  ;;  %v1379_v51 = vrot.slane %v17259_v59, 3  ;;  %v1614_v54 = vrot.slane %v10479_v46, 4 }
 0x28b   : > { %v11849_v56 = vsel %vm16885_vm4, %v17275_v49, %v885_v19  ;;  %17279 = vst [vmem:[#allocation73_spill] sm:$0xff] %v11859_v33  ;;  %v17281_v49 = vld [vmem:[#allocation78_spill] sm:$0xff]  ;;  %v11897_v33 = vsel %vm16906_vm0, %v17289_v37, %v8136_v40  ;;  %v17295_v40 = vrot.slane %v17260_v17, 3 }
 0x28c   : > { %17276 = vst [vmem:[#allocation74_spill] sm:$0xff] %v11849_v56  ;;  %v17283_v10 = vpack.i.bf16 %v17281_v49, %v17282_v45  ;;  %v17285_v45 = vrot.slane %v10471_v25, 2  ;;  %v17287_v49 = vrot.slane %v10483_v8, 2 }
 0x28d   : > { %8323 = vrot.lane.b32.xlu1 %v17284_v24, %s9916_s30  ;;  %v11889_v6 = vpop.permute.xlu0 %8223  ;;  %v17293_v24 = vrot.slane %v17205_v30, 3 }
 0x28e   : > { %8468 = vrot.lane.b32.xlu0 %v17283_v10, %s9912_s24  ;;  %v11882_v10 = vsel %vm1070_vm5, %v17285_v45, %v1120_v29  ;;  %v11887_v19 = vsel %vm1070_vm5, %v1120_v29, %v17287_v49  ;;  %v17290_v45 = vld [vmem:[#allocation18_spill] sm:$0xff]  ;;  %v11903_v29 = vpop.permute.xlu1 %8038  ;;  %v2108_v49 = vrot.slane %v10479_v46, 6  ;;  %v17300_v46 = vrot.slane %v10483_v8, 4 }
 0x28f   : > { %17286 = vst [vmem:[#allocation76_spill] sm:$0xff] %v11882_v10  ;;  %17288 = vst [vmem:[#allocation75_spill] sm:$0xff] %v11887_v19  ;;  %v11901_v61 = vsel %vm16906_vm0, %v17290_v45, %v8135_v26  ;;  %v11914_v37 = vsel %vm1317_vm1, %v17293_v24, %v1379_v51  ;;  %v11919_v26 = vsel %vm1317_vm1, %v1379_v51, %v17295_v40  ;;  %v2367_v45 = vrot.slane %v17259_v59, 7 }
 0x290   : > { %17291 = vst [vmem:[#allocation84_spill] sm:$0xff] %v11903_v29  ;;  %17294 = vst [vmem:[#allocation78_spill] sm:$0xff] %v11914_v37  ;;  %v17299_v40 = vrot.slane %v10471_v25, 4  ;;  %v11942_v56 = vsel %vm1564_vm6, %v1614_v54, %v17300_v46  ;;  %v17304_v46 = vrot.slane %v10471_v25, 6  ;;  %v17312_v25 = vld [vmem:[#allocation48_spill] sm:$0xff]  ;;  %v17315_v37 = vrot.slane %v10483_v8, 2 }
 0x291   : > { %v11932_v51 = vpop.permute.xlu0 %8233 }
 0x292   : > { %8478 = vrot.lane.b32.xlu0 %v17292_v0, %s9913_s27  ;;  %v17298_v0 = vpack.i.bf16 %v11383_v63, %v17297_v3  ;;  %v11937_v29 = vsel %vm1564_vm6, %v17299_v40, %v1614_v54  ;;  %v11947_v63 = vsel %vm1811_vm2, %v17301_v53, %v1873_v35  ;;  %v17302_v3 = vrot.slane %v17260_v17, 5  ;;  %v11955_v10 = vpop.permute.xlu1 %8043 }
 0x293   : > { %17303 = vst [vmem:[#allocation77_spill] sm:$0xff] %v11955_v10  ;;  %v11962_v54 = vsel %vm16956_vm7, %v17304_v46, %v2108_v49  ;;  %v17305_v53 = vrot.slane %v10483_v8, 6  ;;  %v17309_v40 = vrot.slane %v17260_v17, 7  ;;  %v1124_v10 = vrot.slane %v17157_v12, 2 }
 0x294   : > { %8333 = vrot.lane.b32.xlu1 %v17298_v0, %s9917_s14  ;;  %v11952_v0 = vsel %vm1811_vm2, %v1873_v35, %v17302_v3  ;;  %v17306_v35 = vpack.i.bf16 %v11393_v42, %v11390_v9  ;;  %v17307_v3 = vrot.slane %v17205_v30, 7  ;;  %v17343_v9 = vrot.slane %v17312_v25, 5 }
 0x295   : > { %v11967_v19 = vsel %vm16956_vm7, %v2108_v49, %v17305_v53  ;;  %v11981_v46 = vsel %vm16904_vm3, %v2367_v45, %v17309_v40  ;;  %v17310_v53 = vpack.i.bf16 %v11401_v23, %v11398_v58  ;;  %v11999_v58 = vpop.permute.xlu0 %8238  ;;  %v1618_v40 = vrot.slane %v17157_v12, 4 }
 0x296   : > { %8483 = vrot.lane.b32.xlu0 %v17306_v35, %s9914_s28  ;;  %v11976_v24 = vsel %vm16904_vm3, %v17307_v3, %v2367_v45  ;;  %v17311_v35 = vld [vmem:[#allocation47_spill] sm:$0xff]  ;;  %v17314_v49 = vpack.i.bf16 %v11413_v50, %v11408_v7  ;;  %v12017_v23 = vsel %vm1070_vm5, %v17315_v37, %v1124_v10  ;;  %v17317_v45 = vrot.slane %v17158_v57, 2 }
 0x297   : > { %17308 = vst [vmem:[#allocation19_spill] sm:$0xff] %v11976_v24  ;;  %v889_v3 = vrot.slane %v17311_v35, 1  ;;  %17316 = vst [vmem:[#allocation54_spill] sm:$0xff] %v12017_v23  ;;  %v17319_v7 = vrot.slane %v17260_v17, 1  ;;  %v17321_v37 = vrot.slane %v17312_v25, 1  ;;  %v8171_v12 = vunpack.i.h.bf16 %v11596_v20  ;;  %v17326_v24 = vld [vmem:[#allocation55_spill] sm:$0xff] }
 0x298   : > { %8348 = vrot.lane.b32.xlu1 %v17310_v53, %s9915_s29  ;;  %v12002_v53 = vpop.permute.xlu1 %8048  ;;  %v12022_v42 = vsel %vm1070_vm5, %v1124_v10, %v17317_v45  ;;  %v1383_v10 = vrot.slane %v17311_v35, 3  ;;  %v17330_v20 = vpack.i.bf16 %v11477_v11, %v11474_v31  ;;  %v17338_v11 = vrot.slane %v17158_v57, 6  ;;  %v17414_v23 = vld [vmem:[#allocation101_spill] sm:$0xff] }
 0x299   : > { %17313 = vst [vmem:[#allocation18_spill] sm:$0xff] %v12002_v53  ;;  %v12032_v50 = vsel %vm16885_vm4, %v17319_v7, %v889_v3  ;;  %v12042_v53 = vpop.permute.xlu0 %8248  ;;  %v17327_v7 = vpack.i.bf16 %v11435_v27, %v17326_v24  ;;  %v17331_v27 = vrot.slane %v17260_v17, 3 }
 0x29a   : > { %8493 = vrot.lane.b32.xlu0 %v17314_v49, %s9911_s23  ;;  %17320 = vst [vmem:[#allocation83_spill] sm:$0xff] %v12032_v50  ;;  %v12037_v49 = vsel %vm16885_vm4, %v889_v3, %v17321_v37  ;;  %v17324_v37 = vrot.slane %v10483_v8, 4  ;;  %v17328_v3 = vrot.slane %v17158_v57, 4  ;;  %v12097_v31 = vsel %vm16956_vm7, %v2112_v2, %v17338_v11  ;;  %v17346_v50 = vld [vmem:[#allocation87_spill] sm:$0xff]  ;;  %v17353_v11 = vld [vmem:[#allocation49_spill] sm:$0xff] }
 0x29b   : > { %17322 = vst [vmem:[#allocation113_spill] sm:$0xff] %v12037_v49  ;;  %v12080_v24 = vsel %vm1317_vm1, %v17331_v27, %v1383_v10  ;;  %17339 = vst [vmem:[#allocation120_spill] sm:$0xff] %v12097_v31  ;;  %v17364_v31 = vrot.slane %v17158_v57, 4 }
 0x29c   : > { %8358 = vrot.lane.b32.xlu1 %v17318_v44, %s9916_s30  ;;  %v1877_v44 = vrot.slane %v17311_v35, 5  ;;  %v12048_v55 = vpop.permute.xlu1 %8053  ;;  %v12055_v45 = vsel %vm1564_vm6, %v17324_v37, %v1618_v40  ;;  %v12069_v60 = vsel %vm1564_vm6, %v1618_v40, %v17328_v3  ;;  %17332 = vst [vmem:[#allocation116_spill] sm:$0xff] %v12080_v24  ;;  %v17336_v3 = vrot.slane %v10483_v8, 6  ;;  %v17348_v8 = vld [vmem:[#allocation20_spill] sm:$0xff] }
 0x29d   : > { %17323 = vst [vmem:[#allocation114_spill] sm:$0xff] %v12048_v55  ;;  %17325 = vst [vmem:[#allocation115_spill] sm:$0xff] %v12055_v45  ;;  %v12087_v40 = vpop.permute.xlu0 %8258  ;;  %v17366_v24 = vrot.slane %v17205_v30, 4  ;;  %v17397_v45 = vld [vmem:[#allocation56_spill] sm:$0xff] }
 0x29e   : > { %8503 = vrot.lane.b32.xlu0 %v17327_v7, %s9912_s24  ;;  %17329 = vst [vmem:[#allocation55_spill] sm:$0xff] %v12069_v60  ;;  %v17333_v7 = vrot.slane %v17312_v25, 3  ;;  %17335 = vst [vmem:[#allocation118_spill] sm:$0xff] %v12087_v40  ;;  %v12092_v37 = vsel %vm16956_vm7, %v17336_v3, %v2112_v2  ;;  %v12110_v3 = vsel %vm1811_vm2, %v1877_v44, %v17343_v9  ;;  %v2371_v2 = vrot.slane %v17311_v35, 7 }
 0x29f   : > { %17337 = vst [vmem:[#allocation119_spill] sm:$0xff] %v12092_v37  ;;  %17344 = vst [vmem:[#allocation123_spill] sm:$0xff] %v12110_v3  ;;  %v1622_v9 = vrot.slane %v17204_v4, 4  ;;  %v12129_v40 = vsel %vm16906_vm0, %v17348_v8, %v8170_v14  ;;  %v17351_v14 = vrot.slane %v17158_v57, 2  ;;  %v17358_v8 = vrot.slane %v17312_v25, 7  ;;  %v17361_v37 = vld [vmem:[#allocation89_spill] sm:$0xff] }
 0x2a0   : > { %8368 = vrot.lane.b32.xlu1 %v17330_v20, %s9917_s14  ;;  %v12085_v55 = vsel %vm1317_vm1, %v1383_v10, %v17333_v7  ;;  %v17340_v20 = vrot.slane %v17260_v17, 5  ;;  %v1128_v10 = vrot.slane %v17204_v4, 2  ;;  %v12105_v7 = vpop.permute.xlu1 %8058  ;;  %v17369_v3 = vld [vmem:[#allocation91_spill] sm:$0xff] }
 0x2a1   : > { %17334 = vst [vmem:[#allocation117_spill] sm:$0xff] %v12085_v55  ;;  %17342 = vst [vmem:[#allocation122_spill] sm:$0xff] %v12105_v7  ;;  %v17347_v7 = vpack.i.bf16 %v11489_v62, %v17346_v50  ;;  %v17349_v62 = vpack.i.bf16 %v11497_v16, %v11492_v18  ;;  %v12139_v50 = vpop.permute.xlu0 %8268  ;;  %v893_v18 = vrot.slane %v17353_v11, 1 }
 0x2a2   : > { %v12102_v27 = vsel %vm1811_vm2, %v17340_v20, %v1877_v44  ;;  %v12117_v20 = vsel %vm16906_vm0, %v17345_v43, %v8171_v12  ;;  %17350 = vst [vmem:[#allocation21_spill] sm:$0xff] %v12139_v50  ;;  %v12148_v49 = vsel %vm1070_vm5, %v17351_v14, %v1128_v10  ;;  %v17356_v12 = vrot.slane %v17260_v17, 7  ;;  %v17360_v14 = vld [vmem:[#allocation50_spill] sm:$0xff] }
 0x2a3   : > { %17341 = vst [vmem:[#allocation121_spill] sm:$0xff] %v12102_v27  ;;  %8513 = vrot.lane.b32.xlu0 %v17347_v7, %s9913_s27  ;;  %17352 = vst [vmem:[#allocation87_spill] sm:$0xff] %v12148_v49  ;;  %v12164_v44 = vsel %vm16904_vm3, %v2371_v2, %v17358_v8  ;;  %v17368_v27 = vld [vmem:[#allocation92_spill] sm:$0xff] }
 0x2a4   : > { %8383 = vrot.lane.b32.xlu1 %v17349_v62, %s9915_s29  ;;  %v8064_v16 = vpop.permute.xlu1 %8063  ;;  %v17354_v62 = vrot.slane %v17205_v30, 2  ;;  %v12159_v7 = vsel %vm16904_vm3, %v17356_v12, %v2371_v2  ;;  %17359 = vst [vmem:[#allocation125_spill] sm:$0xff] %v12164_v44  ;;  %v12176_v12 = vsel %vm1564_vm6, %v17364_v31, %v1622_v9  ;;  %v12181_v2 = vsel %vm1564_vm6, %v1622_v9, %v17366_v24  ;;  %v17377_v49 = vld [vmem:[#allocation16_spill] sm:$0xff] }
 0x2a5   : > { %17357 = vst [vmem:[#allocation124_spill] sm:$0xff] %v12159_v7  ;;  %17365 = vst [vmem:[#allocation89_spill] sm:$0xff] %v12176_v12  ;;  %v8066_v8 = vunpack.i.h.bf16 %v8064_v16  ;;  %v8065_v50 = vunpack.i.l.bf16 %v8064_v16  ;;  %v17370_v55 = vpack.i.bf16 %v17368_v27, %v17369_v3  ;;  %v1387_v9 = vrot.slane %v17353_v11, 3  ;;  %v17374_v27 = vld [vmem:[#allocation94_spill] sm:$0xff] }
 0x2a6   : > { %v12154_v43 = vsel %vm1070_vm5, %v1128_v10, %v17354_v62  ;;  %v17362_v10 = vld [vmem:[#allocation88_spill] sm:$0xff]  ;;  %v17373_v31 = vrot.slane %v17360_v14, 1  ;;  %v17375_v16 = vpack.i.bf16 %v11561_v1, %v17374_v27  ;;  %v1132_v3 = vrot.slane %v17259_v59, 2 }
 0x2a7   : > { %17355 = vst [vmem:[#allocation20_spill] sm:$0xff] %v12154_v43  ;;  %v17363_v62 = vpack.i.bf16 %v17361_v37, %v17362_v10  ;;  %17367 = vst [vmem:[#allocation88_spill] sm:$0xff] %v12181_v2  ;;  %v2116_v37 = vrot.slane %v17204_v4, 6  ;;  %v17372_v10 = vrot.slane %v17312_v25, 1  ;;  %v17376_v2 = vld [vmem:[#allocation14_spill] sm:$0xff]  ;;  %v2699_v43 = vsel %vm16906_vm0, %v17377_v49, %v8065_v50 }
 0x2a8   : > { %8393 = vrot.lane.b32.xlu1 %v17370_v55, %s9916_s30  ;;  %v8069_v55 = vpop.permute.xlu1 %8068  ;;  %v12208_v24 = vsel %vm16885_vm4, %v893_v18, %v17373_v31  ;;  %v17379_v31 = vld [vmem:[#allocation95_spill] sm:$0xff]  ;;  %v17381_v1 = vrot.slane %v17158_v57, 6  ;;  %v17383_v27 = vrot.slane %v17205_v30, 6  ;;  %v17390_v57 = vld [vmem:[#allocation98_spill] sm:$0xff] }
 0x2a9   : > { %8518 = vrot.lane.b32.xlu0 %v17363_v62, %s9914_s28  ;;  %v12189_v62 = vpop.permute.xlu0 %8273  ;;  %v12203_v4 = vsel %vm16885_vm4, %v17372_v10, %v893_v18  ;;  %v8071_v7 = vunpack.i.h.bf16 %v8069_v55  ;;  %v8070_v44 = vunpack.i.l.bf16 %v8069_v55  ;;  %v2700_v10 = vsel %vm16906_vm0, %v17376_v2, %v8066_v8  ;;  %v17378_v18 = vld [vmem:[#allocation96_spill] sm:$0xff] }
 0x2aa   : > { %17371 = vst [vmem:[#allocation92_spill] sm:$0xff] %v12189_v62  ;;  %v17380_v55 = vpack.i.bf16 %v17378_v18, %v17379_v31  ;;  %v12232_v12 = vsel %vm16956_vm7, %v2116_v37, %v17383_v27  ;;  %v17386_v8 = vrot.slane %v17312_v25, 3  ;;  %v17388_v31 = vrot.slane %v17360_v14, 3 }
 0x2ab   : > { %17384 = vst [vmem:[#allocation94_spill] sm:$0xff] %v12232_v12  ;;  %v2749_v2 = vsel %vm2748_vm9, %v2699_v43, %v8070_v44  ;;  %v2750_v49 = vsel %vm2748_vm9, %v2700_v10, %v8071_v7  ;;  %v1881_v44 = vrot.slane %v17353_v11, 5  ;;  %vm3158_vm4 = vcmask 441344  }
 0x2ac   : > { %8403 = vrot.lane.b32.xlu1 %v17380_v55, %s9917_s14  ;;  %v12241_v18 = vsel %vm1317_vm1, %v17386_v8, %v1387_v9  ;;  %v12246_v55 = vsel %vm1317_vm1, %v1387_v9, %v17388_v31  ;;  %v8079_v27 = vpop.permute.xlu1 %8078  ;;  %v17391_v8 = vld [vmem:[#allocation97_spill] sm:$0xff]  ;;  %v17393_v9 = vrot.slane %v17205_v30, 2 }
 0x2ad   : > { %8528 = vrot.lane.b32.xlu0 %v17375_v16, %s9911_s23  ;;  %v12227_v16 = vsel %vm16956_vm7, %v17381_v1, %v2116_v37  ;;  %v12236_v50 = vpop.permute.xlu0 %8283  ;;  %17387 = vst [vmem:[#allocation16_spill] sm:$0xff] %v12241_v18  ;;  %17389 = vst [vmem:[#allocation96_spill] sm:$0xff] %v12246_v55  ;;  %v8206_v1 = vunpack.i.h.bf16 %v11795_v34  ;;  %v8205_v37 = vunpack.i.l.bf16 %v11795_v34  ;;  %v8081_v7 = vunpack.i.h.bf16 %v8079_v27  ;;  %v17430_v18 = vld [vmem:[#allocation51_spill] sm:$0xff] }
 0x2ae   : > { %17382 = vst [vmem:[#allocation91_spill] sm:$0xff] %v12227_v16  ;;  %17385 = vst [vmem:[#allocation14_spill] sm:$0xff] %v12236_v50  ;;  %v8080_v10 = vunpack.i.l.bf16 %v8079_v27  ;;  %v17392_v50 = vpack.i.bf16 %v17390_v57, %v17391_v8  ;;  %v12259_v31 = vsel %vm1070_vm5, %v17393_v9, %v1132_v3  ;;  %v17395_v34 = vrot.slane %v17260_v17, 2  ;;  %v17400_v8 = vld [vmem:[#allocation61_spill] sm:$0xff] }
 0x2af   : > { %17394 = vst [vmem:[#allocation95_spill] sm:$0xff] %v12259_v31  ;;  %v17398_v27 = vunpack.i.l.bf16 %v17397_v45  ;;  %v17399_v57 = vunpack.i.h.bf16 %v17397_v45  ;;  %v17402_v9 = vpack.i.bf16 %v17400_v8, %v17401_v22  ;;  %v17405_v22 = vld [vmem:[#allocation22_spill] sm:$0xff]  ;;  %v17415_v31 = vld [vmem:[#allocation100_spill] sm:$0xff]  ;;  %v897_v55 = vrot.slane %v17430_v18, 1 }
 0x2b0   : > { %v12264_v62 = vsel %vm1070_vm5, %v1132_v3, %v17395_v34  ;;  %v8089_v8 = vpop.permute.xlu1 %8088 }
 0x2b1   : > { %8538 = vrot.lane.b32.xlu0 %v17392_v50, %s9912_s24  ;;  %17396 = vst [vmem:[#allocation98_spill] sm:$0xff] %v12264_v62  ;;  %v2799_v60 = vsel %vm2798_vm10, %v2749_v2, %v17398_v27  ;;  %v2800_v50 = vsel %vm2798_vm10, %v2750_v49, %v17399_v57  ;;  %8418 = vrot.lane.b32.xlu1 %v17402_v9, %s9915_s29  ;;  %v12281_v43 = vpop.permute.xlu0 %8293  ;;  %v17404_v49 = vld [vmem:[#allocation23_spill] sm:$0xff]  ;;  %v8090_v9 = vunpack.i.l.bf16 %v8089_v8 }
 0x2b2   : > { %v2849_v3 = vsel %vm2848_vm11, %v2799_v60, %v8080_v10  ;;  %v2850_v34 = vsel %vm2848_vm11, %v2800_v50, %v8081_v7  ;;  %17403 = vst [vmem:[#allocation97_spill] sm:$0xff] %v12281_v43  ;;  %v12289_v27 = vsel %vm16906_vm0, %v17404_v49, %v8206_v1  ;;  %v12293_v57 = vsel %vm16906_vm0, %v17405_v22, %v8205_v37  ;;  %v17411_v60 = vld [vmem:[#allocation58_spill] sm:$0xff] }
 0x2b3   : > { %v17406_v7 = vrot.slane %v17312_v25, 5  ;;  %v8091_v50 = vunpack.i.h.bf16 %v8089_v8  ;;  %v17408_v1 = vpack.i.bf16 %v11639_v52, %v11634_v36  ;;  %v17409_v49 = vrot.slane %v17360_v14, 5 }
 0x2b4   : > { %v1626_v22 = vrot.slane %v17259_v59, 4  ;;  %v17412_v45 = vunpack.i.l.bf16 %v17411_v60  ;;  %v17416_v36 = vpack.i.bf16 %v17414_v23, %v17415_v31  ;;  %v2120_v52 = vrot.slane %v17259_v59, 6 }
 0x2b5   : > { %v12300_v10 = vsel %vm1811_vm2, %v17406_v7, %v1881_v44  ;;  %8548 = vrot.lane.b32.xlu0 %v17408_v1, %s9913_s27  ;;  %v12309_v37 = vsel %vm1811_vm2, %v1881_v44, %v17409_v49  ;;  %v17413_v7 = vunpack.i.h.bf16 %v17411_v60  ;;  %v2375_v44 = vrot.slane %v17353_v11, 7  ;;  %v17428_v1 = vld [vmem:[#allocation105_spill] sm:$0xff] }
 0x2b6   : > { %17407 = vst [vmem:[#allocation56_spill] sm:$0xff] %v12300_v10  ;;  %17410 = vst [vmem:[#allocation61_spill] sm:$0xff] %v12309_v37  ;;  %v2899_v2 = vsel %vm2898_vm12, %v2849_v3, %v17412_v45  ;;  %8428 = vrot.lane.b32.xlu1 %v17416_v36, %s9916_s30  ;;  %v12327_v3 = vpop.permute.xlu0 %8303  ;;  %v8104_v36 = vpop.permute.xlu1 %8103  ;;  %v17424_v45 = vld [vmem:[#allocation53_spill] sm:$0xff]  ;;  %v17452_v37 = vld [vmem:[#allocation110_spill] sm:$0xff] }
 0x2b7   : > { %v2900_v8 = vsel %vm2898_vm12, %v2850_v34, %v17413_v7  ;;  %v2949_v49 = vsel %vm2948_vm13, %v2899_v2, %v8090_v9  ;;  %17417 = vst [vmem:[#allocation62_spill] sm:$0xff] %v12327_v3  ;;  %v17418_v34 = vld [vmem:[#allocation60_spill] sm:$0xff]  ;;  %v8106_v2 = vunpack.i.h.bf16 %v8104_v36  ;;  %v8105_v9 = vunpack.i.l.bf16 %v8104_v36 }
 0x2b8   : > { %v2950_v62 = vsel %vm2948_vm13, %v2900_v8, %v8091_v50  ;;  %v17419_v60 = vunpack.i.l.bf16 %v17418_v34  ;;  %v17420_v23 = vunpack.i.h.bf16 %v17418_v34  ;;  %v17421_v50 = vld [vmem:[#allocation103_spill] sm:$0xff]  ;;  %v17422_v8 = vld [vmem:[#allocation102_spill] sm:$0xff]  ;;  %v17425_v43 = vunpack.i.l.bf16 %v17424_v45 }
 0x2b9   : > { %v17423_v3 = vpack.i.bf16 %v17421_v50, %v17422_v8  ;;  %v17426_v34 = vunpack.i.h.bf16 %v17424_v45  ;;  %v17431_v50 = vld [vmem:[#allocation52_spill] sm:$0xff]  ;;  %v17432_v8 = vld [vmem:[#allocation17_spill] sm:$0xff] }
 0x2ba   : > { %v2999_v7 = vsel %vm2998_vm14, %v2949_v49, %v17419_v60  ;;  %v3000_v31 = vsel %vm2998_vm14, %v2950_v62, %v17420_v23  ;;  %v17427_v23 = vld [vmem:[#allocation107_spill] sm:$0xff]  ;;  %v2752_v16 = vsel %vm2748_vm9, %v17432_v8, %v8106_v2  ;;  %v17441_v60 = vld [vmem:[#allocation68_spill] sm:$0xff] }
 0x2bb   : > { %8553 = vrot.lane.b32.xlu0 %v17423_v3, %s9914_s28  ;;  %v3049_v49 = vsel %vm3048_vm15, %v2999_v7, %v17425_v43  ;;  %v3050_v62 = vsel %vm3048_vm15, %v3000_v31, %v17426_v34  ;;  %v17429_v59 = vpack.i.bf16 %v17427_v23, %v17428_v1  ;;  %v17433_v43 = vld [vmem:[#allocation15_spill] sm:$0xff]  ;;  %v12359_v7 = vpop.permute.xlu0 %8308  ;;  %v17435_v34 = vrot.slane %v17205_v30, 4  ;;  %v8114_v1 = vpop.permute.xlu1 %8113 }
 0x2bc   : > { %v3098_v36 = vpack.c.bf16 %v3050_v62, %v3049_v49  ;;  %v2751_v45 = vsel %vm2748_vm9, %v17433_v43, %v8105_v9  ;;  %17434 = vst [vmem:[#allocation23_spill] sm:$0xff] %v12359_v7  ;;  %v17436_v49 = vrot.slane %v17260_v17, 4  ;;  %v17437_v9 = vrot.slane %v17312_v25, 7  ;;  %v17448_v7 = vld [vmem:[#allocation66_spill] sm:$0xff] }
 0x2bd   : > { %8438 = vrot.lane.b32.xlu1 %v17429_v59, %s9917_s14  ;;  %v12366_v59 = vsel %vm1564_vm6, %v17435_v34, %v1626_v22  ;;  %v17439_v23 = vrot.slane %v17360_v14, 7  ;;  %v1136_v43 = vrot.slane %v17311_v35, 2  ;;  %v8116_v34 = vunpack.i.h.bf16 %v8114_v1 }
 0x2be   : > { %7636 = vmatmul.mubr.msk.bf16.vlgmr.msra.gmra.mxu0 %vm3158_vm4, %v3098_v36  ;;  %v12372_v2 = vsel %vm1564_vm6, %v1626_v22, %v17436_v49  ;;  %v12377_v62 = vsel %vm16904_vm3, %v17437_v9, %v2375_v44  ;;  %v8115_v31 = vunpack.i.l.bf16 %v8114_v1  ;;  %v17440_v36 = vld [vmem:[#allocation109_spill] sm:$0xff]  ;;  %v17443_v22 = vmov 0.0  }
 0x2bf   : > { %17438 = vst [vmem:[#allocation22_spill] sm:$0xff] %v12377_v62  ;;  %v12382_v8 = vsel %vm16904_vm3, %v2375_v44, %v17439_v23  ;;  %v17442_v3 = vpack.i.bf16 %v17440_v36, %v17441_v60  ;;  %7639 = vmatprep.mubr.msk.bf16.mxu0 %vm16957_vm8, %v17443_v22  ;;  %v17444_v49 = vrot.slane %v17205_v30, 6  ;;  %v17446_v44 = vrot.slane %v17260_v17, 6  ;;  %v17451_v36 = vld [vmem:[#allocation111_spill] sm:$0xff] }
 0x2c0   : > { %v17449_v1 = vunpack.i.l.bf16 %v17448_v7  ;;  %v17450_v60 = vunpack.i.h.bf16 %v17448_v7  ;;  %v17453_v30 = vpack.i.bf16 %v17451_v36, %v17452_v37  ;;  %vm17455_vm3 = vcmask 1046528   ;;  %v8124_v36 = vpop.permute.xlu1 %8123 }
 0x2c1   : > { %8563 = vrot.lane.b32.xlu0 %v17442_v3, %s9911_s23  ;;  %v12394_v9 = vsel %vm16956_vm7, %v17444_v49, %v2120_v52  ;;  %v12399_v23 = vsel %vm16956_vm7, %v2120_v52, %v17446_v44  ;;  %v17454_v49 = vrot.slane %v17360_v14, 1  ;;  %v17456_v52 = vrot.slane %v17431_v50, 1  ;;  %vm17457_vm0 = vmmov %vm17455_vm3 }
 0x2c2   : > { %17445 = vst [vmem:[#allocation58_spill] sm:$0xff] %v12394_v9  ;;  %17447 = vst [vmem:[#allocation101_spill] sm:$0xff] %v12399_v23  ;;  %v2801_v10 = vsel %vm2798_vm10, %v2751_v45, %v17449_v1  ;;  %v2802_v3 = vsel %vm2798_vm10, %v2752_v16, %v17450_v60  ;;  %8453 = vrot.lane.b32.xlu1 %v17453_v30, %s9915_s29  ;;  %v12423_v16 = vpop.permute.xlu0 %8318  ;;  %v17463_v60 = vld [vmem:[#allocation79_spill] sm:$0xff]  ;;  %v17467_v23 = vld [vmem:[#allocation72_spill] sm:$0xff] }
 0x2c3   : > { %v12414_v12 = vsel %vm17455_vm3, %v17454_v49, %v897_v55  ;;  %v12419_v44 = vsel %vm17457_vm0, %v897_v55, %v17456_v52  ;;  %v2851_v45 = vsel %vm2848_vm11, %v2801_v10, %v8115_v31  ;;  %v2852_v7 = vsel %vm2848_vm11, %v2802_v3, %v8116_v34  ;;  %17458 = vst [vmem:[#allocation100_spill] sm:$0xff] %v12423_v16  ;;  %v17460_v49 = vld [vmem:[#allocation69_spill] sm:$0xff]  ;;  %v17461_v52 = vld [vmem:[#allocation70_spill] sm:$0xff] }
 0x2c4   : > { %v17459_v10 = vrot.slane %v17260_v17, 2  ;;  %v8126_v34 = vunpack.i.h.bf16 %v8124_v36  ;;  %v8125_v3 = vunpack.i.l.bf16 %v8124_v36  ;;  %v17462_v37 = vpack.i.bf16 %v17460_v49, %v17461_v52  ;;  %v17466_v36 = vld [vmem:[#allocation71_spill] sm:$0xff]  ;;  %v8139_v49 = vpop.permute.xlu1 %8138 }
 0x2c5   : > { %v17464_v16 = vunpack.i.l.bf16 %v17463_v60  ;;  %v17465_v9 = vunpack.i.h.bf16 %v17463_v60  ;;  %v17468_v62 = vpack.i.bf16 %v17466_v36, %v17467_v23  ;;  %v16913_v52 = vrot.slane %v17312_v25, 4 }
 0x2c6   : > { %v12436_v31 = vsel %vm1070_vm5, %v17459_v10, %v1136_v43  ;;  %8573 = vrot.lane.b32.xlu0 %v17462_v37, %s9912_s24  ;;  %v1391_v37 = vrot.slane %v17430_v18, 3  ;;  %vm17493_vm0 = vcmask 48128  }
 0x2c7   : > { %v2901_v55 = vsel %vm2898_vm12, %v2851_v45, %v17464_v16  ;;  %v2902_v10 = vsel %vm2898_vm12, %v2852_v7, %v17465_v9  ;;  %8463 = vrot.lane.b32.xlu1 %v17468_v62, %s9916_s30  ;;  %v12460_v45 = vpop.permute.xlu0 %8328  ;;  %v1630_v16 = vrot.slane %v17311_v35, 4  ;;  %v17470_v7 = vld [vmem:[#allocation81_spill] sm:$0xff]  ;;  %vm17495_vm3 = vmmov %vm17493_vm0 }
 0x2c8   : > { %v2951_v30 = vsel %vm2948_vm13, %v2901_v55, %v8125_v3  ;;  %v2952_v1 = vsel %vm2948_vm13, %v2902_v10, %v8126_v34  ;;  %17469 = vst [vmem:[#allocation60_spill] sm:$0xff] %v12460_v45  ;;  %v17471_v60 = vunpack.i.l.bf16 %v17470_v7  ;;  %v17472_v23 = vunpack.i.h.bf16 %v17470_v7  ;;  %v17474_v10 = vld [vmem:[#allocation57_spill] sm:$0xff] }
 0x2c9   : > { %v8141_v55 = vunpack.i.h.bf16 %v8139_v49  ;;  %v8140_v3 = vunpack.i.l.bf16 %v8139_v49  ;;  %v17473_v34 = vpack.i.bf16 %v11824_v28, %v11819_v48  ;;  %v17475_v9 = vunpack.i.l.bf16 %v17474_v10 }
 0x2ca   : > { %v3001_v62 = vsel %vm2998_vm14, %v2951_v30, %v17471_v60  ;;  %v3002_v36 = vsel %vm2998_vm14, %v2952_v1, %v17472_v23  ;;  %v17476_v30 = vunpack.i.h.bf16 %v17474_v10  ;;  %v17477_v1 = vpack.i.bf16 %v11838_v32, %v11833_v21 }
 0x2cb   : > { %8583 = vrot.lane.b32.xlu0 %v17473_v34, %s9913_s27  ;;  %v3051_v45 = vsel %vm3048_vm15, %v3001_v62, %v17475_v9  ;;  %v17478_v49 = vrot.slane %v17312_v25, 2  ;;  %v1885_v48 = vrot.slane %v17430_v18, 5  ;;  %v16912_v28 = vrot.slane %v17431_v50, 5 }
 0x2cc   : > { %v3052_v7 = vsel %vm3048_vm15, %v3002_v36, %v17476_v30  ;;  %8473 = vrot.lane.b32.xlu1 %v17477_v1, %s9917_s14  ;;  %v2754_v9 = vsel %vm2748_vm9, %v11897_v33, %v8141_v55  ;;  %v2753_v62 = vsel %vm2748_vm9, %v11901_v61, %v8140_v3  ;;  %v12496_v36 = vpop.permute.xlu0 %8338  ;;  %v2124_v21 = vrot.slane %v17311_v35, 6  ;;  %v17538_v35 = vld [vmem:[#allocation104_spill] sm:$0xff] }
 0x2cd   : > { %v3099_v60 = vpack.c.bf16 %v3052_v7, %v3051_v45  ;;  %v12488_v23 = vsel %vm1070_vm5, %v1136_v43, %v17478_v49  ;;  %v8241_v45 = vunpack.i.h.bf16 %v11999_v58  ;;  %v8149_v43 = vpop.permute.xlu1 %8148  ;;  %v17479_v34 = vrot.slane %v17360_v14, 3 }
 0x2ce   : > { %v17480_v33 = vrot.slane %v17431_v50, 3  ;;  %v17481_v55 = vrot.slane %v17260_v17, 4  ;;  %v8240_v30 = vunpack.i.l.bf16 %v11999_v58  ;;  %v8151_v7 = vunpack.i.h.bf16 %v8149_v43 }
 0x2cf   : > { %7640 = vmatmul.mubr.msk.bf16.gmra.mxu0 %vm3158_vm4, %v3099_v60  ;;  %v12505_v10 = vsel %vm1317_vm1, %v17479_v34, %v1391_v37  ;;  %v8150_v1 = vunpack.i.l.bf16 %v8149_v43  ;;  %v17482_v60 = vld [vmem:[#allocation74_spill] sm:$0xff]  ;;  %v17484_v34 = vunpack.i.l.bf16 %v17296_v13  ;;  %v17485_v58 = vunpack.i.h.bf16 %v17296_v13 }
 0x2d0   : > { %v12510_v61 = vsel %vm1317_vm1, %v1391_v37, %v17480_v33  ;;  %v12515_v3 = vsel %vm1564_vm6, %v17481_v55, %v1630_v16  ;;  %v17483_v49 = vpack.i.bf16 %v11854_v15, %v17482_v60  ;;  %7643 = vmatprep.mubr.msk.bf16.mxu0 %vm16957_vm8, %v17443_v22  ;;  %v12527_v37 = vsel %vm1564_vm6, %v1630_v16, %v16913_v52  ;;  %v17486_v55 = vld [vmem:[#allocation75_spill] sm:$0xff]  ;;  %v17487_v15 = vld [vmem:[#allocation76_spill] sm:$0xff] }
 0x2d1   : > { %v2803_v33 = vsel %vm2798_vm10, %v2753_v62, %v17484_v34  ;;  %v2804_v43 = vsel %vm2798_vm10, %v2754_v9, %v17485_v58  ;;  %v17488_v60 = vpack.i.bf16 %v17486_v55, %v17487_v15  ;;  %v12547_v16 = vsel %vm1811_vm2, %v1885_v48, %v16912_v28  ;;  %v12551_v9 = vpop.permute.xlu0 %8343 }
 0x2d2   : > { %8588 = vrot.lane.b32.xlu0 %v17483_v49, %s9914_s28  ;;  %v17489_v49 = vrot.slane %v17360_v14, 5  ;;  %v2853_v62 = vsel %vm2848_vm11, %v2803_v33, %v8150_v1  ;;  %v2854_v13 = vsel %vm2848_vm11, %v2804_v43, %v8151_v7  ;;  %v17490_v34 = vrot.slane %v17260_v17, 6  ;;  %v17494_v43 = vld [vmem:[#allocation24_spill] sm:$0xff] }
 0x2d3   : > { %8488 = vrot.lane.b32.xlu1 %v17488_v60, %s9915_s29  ;;  %v17491_v55 = vrot.slane %v17312_v25, 6  ;;  %v17492_v60 = vld [vmem:[#allocation25_spill] sm:$0xff]  ;;  %v17498_v28 = vunpack.i.l.bf16 %v11499_v5  ;;  %v17499_v33 = vunpack.i.h.bf16 %v11499_v5  ;;  %v16914_v5 = vrot.slane %v17431_v50, 7 }
 0x2d4   : > { %v12542_v32 = vsel %vm1811_vm2, %v17489_v49, %v1885_v48  ;;  %v12556_v58 = vsel %vm16956_vm7, %v17490_v34, %v2124_v21  ;;  %v12565_v48 = vsel %vm17493_vm0, %v17492_v60, %v8241_v45  ;;  %v8159_v49 = vpop.permute.xlu1 %8158  ;;  %v12575_v34 = vsel %vm17495_vm3, %v17494_v43, %v8240_v30  ;;  %v17496_v45 = vld [vmem:[#allocation78_spill] sm:$0xff] }
 0x2d5   : > { %v12561_v15 = vsel %vm16956_vm7, %v2124_v21, %v17491_v55  ;;  %v8161_v21 = vunpack.i.h.bf16 %v8159_v49  ;;  %v8160_v55 = vunpack.i.l.bf16 %v8159_v49  ;;  %v17497_v60 = vpack.i.bf16 %v11919_v26, %v17496_v45  ;;  %v17505_v26 = vld [vmem:[#allocation59_spill] sm:$0xff] }
 0x2d6   : > { %v2903_v1 = vsel %vm2898_vm12, %v2853_v62, %v17498_v28  ;;  %v2904_v52 = vsel %vm2898_vm12, %v2854_v13, %v17499_v33  ;;  %v17500_v30 = vpack.i.bf16 %v11942_v56, %v11937_v29  ;;  %v2379_v49 = vrot.slane %v17430_v18, 7 }
 0x2d7   : > { %8598 = vrot.lane.b32.xlu0 %v17497_v60, %s9911_s23  ;;  %v2953_v43 = vsel %vm2948_vm13, %v2903_v1, %v8160_v55  ;;  %v2954_v45 = vsel %vm2948_vm13, %v2904_v52, %v8161_v21  ;;  %v12598_v60 = vpop.permute.xlu0 %8353  ;;  %v1140_v28 = vrot.slane %v17353_v11, 2  ;;  %v17502_v56 = vunpack.i.l.bf16 %v11539_v38 }
 0x2d8   : > { %8498 = vrot.lane.b32.xlu1 %v17500_v30, %s9916_s30  ;;  %17501 = vst [vmem:[#allocation103_spill] sm:$0xff] %v12598_v60  ;;  %v17503_v13 = vunpack.i.h.bf16 %v11539_v38  ;;  %v8174_v30 = vpop.permute.xlu1 %8173  ;;  %v16915_v1 = vrot.slane %v17360_v14, 2  ;;  %v17504_v55 = vpack.i.bf16 %v11952_v0, %v11947_v63  ;;  %v17506_v7 = vunpack.i.l.bf16 %v17505_v26  ;;  %v17511_v0 = vld [vmem:[#allocation3_spill] sm:$0xff] }
 0x2d9   : > { %v3003_v29 = vsel %vm2998_vm14, %v2953_v43, %v17502_v56  ;;  %v8176_v52 = vunpack.i.h.bf16 %v8174_v30  ;;  %v8175_v21 = vunpack.i.l.bf16 %v8174_v30  ;;  %v17507_v43 = vunpack.i.h.bf16 %v17505_v26 }
 0x2da   : > { %v3004_v33 = vsel %vm2998_vm14, %v2954_v45, %v17503_v13  ;;  %v3053_v62 = vsel %vm3048_vm15, %v3003_v29, %v17506_v7  ;;  %v17508_v56 = vpack.i.bf16 %v11967_v19, %v11962_v54  ;;  %v17509_v30 = vrot.slane %v17360_v14, 7 }
 0x2db   : > { %8608 = vrot.lane.b32.xlu0 %v17504_v55, %s9912_s24  ;;  %v3054_v38 = vsel %vm3048_vm15, %v3004_v33, %v17507_v43  ;;  %vm17510_vm0 = vcmask 1040384   ;;  %v901_v55 = vrot.slane %v17511_v0, 1  ;;  %v2756_v7 = vsel %vm2748_vm9, %v12117_v20, %v8176_v52  ;;  %v12635_v29 = vpop.permute.xlu0 %8363  ;;  %v17532_v52 = vld [vmem:[#allocation83_spill] sm:$0xff] }
 0x2dc   : > { %8508 = vrot.lane.b32.xlu1 %v17508_v56, %s9917_s14  ;;  %v3100_v13 = vpack.c.bf16 %v3054_v38, %v3053_v62  ;;  %v12628_v63 = vsel %vm17510_vm0, %v17509_v30, %v2379_v49  ;;  %v2755_v26 = vsel %vm2748_vm9, %v12129_v40, %v8175_v21  ;;  %17512 = vst [vmem:[#allocation102_spill] sm:$0xff] %v12635_v29  ;;  %vm17513_vm3 = vmmov %vm17510_vm0  ;;  %v17514_v54 = vrot.slane %v17312_v25, 2  ;;  %v8184_v33 = vpop.permute.xlu1 %8183  ;;  %v17515_v40 = vld [vmem:[#allocation4_spill] sm:$0xff]  ;;  %v17516_v56 = vld [vmem:[#allocation19_spill] sm:$0xff] }
 0x2dd   : > { %v12640_v19 = vsel %vm17513_vm3, %v2379_v49, %v16914_v5  ;;  %v12651_v20 = vsel %vm1070_vm5, %v1140_v28, %v16915_v1  ;;  %v1634_v21 = vrot.slane %v17353_v11, 4  ;;  %v8186_v43 = vunpack.i.h.bf16 %v8184_v33  ;;  %v17520_v1 = vld [vmem:[#allocation54_spill] sm:$0xff] }
 0x2de   : > { %v12645_v62 = vsel %vm1070_vm5, %v17514_v54, %v1140_v28  ;;  %7644 = vmatmul.mubr.msk.bf16.gmra.mxu0 %vm3158_vm4, %v3100_v13  ;;  %v8185_v38 = vunpack.i.l.bf16 %v8184_v33  ;;  %v17517_v30 = vpack.i.bf16 %v11981_v46, %v17516_v56  ;;  %v1395_v13 = vrot.slane %v17511_v0, 3  ;;  %v17524_v49 = vld [vmem:[#allocation118_spill] sm:$0xff] }
 0x2df   : > { %7647 = vmatprep.mubr.msk.bf16.mxu0 %vm16957_vm8, %v17443_v22  ;;  %v17518_v54 = vunpack.i.l.bf16 %v11646_v41  ;;  %v17519_v5 = vunpack.i.h.bf16 %v11646_v41  ;;  %v17521_v46 = vpack.i.bf16 %v12022_v42, %v17520_v1  ;;  %vm17523_vm0 = vcmask 1046528   ;;  %v17531_v42 = vld [vmem:[#allocation113_spill] sm:$0xff] }
 0x2e0   : > { %8618 = vrot.lane.b32.xlu0 %v17517_v30, %s9913_s27  ;;  %v17522_v30 = vrot.slane %v17431_v50, 1  ;;  %vm17527_vm3 = vmmov %vm17523_vm0  ;;  %v17533_v1 = vpack.i.bf16 %v17531_v42, %v17532_v52  ;;  %v17541_v52 = vld [vmem:[#allocation55_spill] sm:$0xff] }
 0x2e1   : > { %v2805_v45 = vsel %vm2798_vm10, %v2755_v26, %v17518_v54  ;;  %v2806_v33 = vsel %vm2798_vm10, %v2756_v7, %v17519_v5  ;;  %8523 = vrot.lane.b32.xlu1 %v17521_v46, %s9915_s29  ;;  %v12684_v5 = vpop.permute.xlu0 %8373  ;;  %v8194_v7 = vpop.permute.xlu1 %8193  ;;  %v17526_v54 = vrot.slane %v17515_v40, 1  ;;  %v17542_v42 = vld [vmem:[#allocation115_spill] sm:$0xff] }
 0x2e2   : > { %v12679_v28 = vsel %vm17523_vm0, %v17522_v30, %v901_v55  ;;  %v2855_v26 = vsel %vm2848_vm11, %v2805_v45, %v8185_v38  ;;  %v2856_v41 = vsel %vm2848_vm11, %v2806_v33, %v8186_v43  ;;  %17525 = vst [vmem:[#allocation53_spill] sm:$0xff] %v12684_v5  ;;  %v17528_v30 = vrot.slane %v17312_v25, 4 }
 0x2e3   : > { %v12692_v46 = vsel %vm17527_vm3, %v901_v55, %v17526_v54  ;;  %v17530_v45 = vrot.slane %v17360_v14, 4  ;;  %v8196_v38 = vunpack.i.h.bf16 %v8194_v7  ;;  %v8195_v33 = vunpack.i.l.bf16 %v8194_v7 }
 0x2e4   : > { %v12697_v56 = vsel %vm1564_vm6, %v17528_v30, %v1634_v21  ;;  %8623 = vrot.lane.b32.xlu0 %v17533_v1, %s9914_s28  ;;  %v17534_v55 = vrot.slane %v17431_v50, 3  ;;  %v17536_v30 = vrot.slane %v17515_v40, 3  ;;  %v17540_v7 = vunpack.i.h.bf16 %v17538_v35 }
 0x2e5   : > { %17529 = vst [vmem:[#allocation107_spill] sm:$0xff] %v12697_v56  ;;  %v12702_v43 = vsel %vm1564_vm6, %v1634_v21, %v17530_v45  ;;  %v17539_v21 = vunpack.i.l.bf16 %v17538_v35  ;;  %v17543_v1 = vpack.i.bf16 %v17541_v52, %v17542_v42  ;;  %v12732_v60 = vpop.permute.xlu0 %8378  ;;  %v8209_v42 = vpop.permute.xlu1 %8208  ;;  %v17548_v35 = vld [vmem:[#allocation116_spill] sm:$0xff]  ;;  %vm17577_vm0 = vcmask 48128  }
 0x2e6   : > { %v12711_v54 = vsel %vm1317_vm1, %v17534_v55, %v1395_v13  ;;  %v12716_v17 = vsel %vm1317_vm1, %v1395_v13, %v17536_v30  ;;  %v2906_v5 = vsel %vm2898_vm12, %v2856_v41, %v17540_v7  ;;  %v2128_v55 = vrot.slane %v17353_v11, 6  ;;  %17544 = vst [vmem:[#allocation15_spill] sm:$0xff] %v12732_v60  ;;  %v17550_v11 = vld [vmem:[#allocation63_spill] sm:$0xff]  ;;  %vm17579_vm3 = vmmov %vm17577_vm0 }
 0x2e7   : > { %17535 = vst [vmem:[#allocation105_spill] sm:$0xff] %v12711_v54  ;;  %17537 = vst [vmem:[#allocation17_spill] sm:$0xff] %v12716_v17  ;;  %v2905_v45 = vsel %vm2898_vm12, %v2855_v26, %v17539_v21  ;;  %8533 = vrot.lane.b32.xlu1 %v17543_v1, %s9916_s30  ;;  %v2956_v30 = vsel %vm2948_vm13, %v2906_v5, %v8196_v38  ;;  %v1889_v26 = vrot.slane %v17511_v0, 5  ;;  %v17545_v41 = vunpack.i.l.bf16 %v11735_v47  ;;  %v17547_v1 = vld [vmem:[#allocation117_spill] sm:$0xff] }
 0x2e8   : > { %v2955_v13 = vsel %vm2948_vm13, %v2905_v45, %v8195_v33  ;;  %v17546_v7 = vunpack.i.h.bf16 %v11735_v47  ;;  %v8211_v38 = vunpack.i.h.bf16 %v8209_v42  ;;  %v8210_v45 = vunpack.i.l.bf16 %v8209_v42  ;;  %v17554_v33 = vld [vmem:[#allocation119_spill] sm:$0xff] }
 0x2e9   : > { %v3005_v21 = vsel %vm2998_vm14, %v2955_v13, %v17545_v41  ;;  %v17549_v29 = vpack.i.bf16 %v17547_v1, %v17548_v35  ;;  %v17551_v13 = vunpack.i.l.bf16 %v17550_v11  ;;  %v17556_v35 = vrot.slane %v17312_v25, 6 }
 0x2ea   : > { %v3006_v52 = vsel %vm2998_vm14, %v2956_v30, %v17546_v7  ;;  %v17552_v30 = vunpack.i.h.bf16 %v17550_v11  ;;  %v17553_v7 = vld [vmem:[#allocation120_spill] sm:$0xff]  ;;  %v17561_v1 = vrot.slane %v17431_v50, 5 }
 0x2eb   : > { %8633 = vrot.lane.b32.xlu0 %v17549_v29, %s9911_s23  ;;  %v3055_v47 = vsel %vm3048_vm15, %v3005_v21, %v17551_v13  ;;  %v17555_v60 = vpack.i.bf16 %v17553_v7, %v17554_v33  ;;  %v12765_v29 = vsel %vm16956_vm7, %v17556_v35, %v2128_v55  ;;  %v17558_v21 = vrot.slane %v17360_v14, 6  ;;  %v12776_v33 = vpop.permute.xlu0 %8388 }
 0x2ec   : > { %v3056_v41 = vsel %vm3048_vm15, %v3006_v52, %v17552_v30  ;;  %17557 = vst [vmem:[#allocation109_spill] sm:$0xff] %v12765_v29  ;;  %v2758_v52 = vsel %vm2748_vm9, %v12289_v27, %v8211_v38  ;;  %17560 = vst [vmem:[#allocation66_spill] sm:$0xff] %v12776_v33  ;;  %v12781_v13 = vsel %vm1811_vm2, %v17561_v1, %v1889_v26  ;;  %v8219_v27 = vpop.permute.xlu1 %8218  ;;  %v17567_v1 = vld [vmem:[#allocation121_spill] sm:$0xff]  ;;  %v17570_v38 = vunpack.i.l.bf16 %v11844_v39 }
 0x2ed   : > { %8543 = vrot.lane.b32.xlu1 %v17555_v60, %s9917_s14  ;;  %v3101_v5 = vpack.c.bf16 %v3056_v41, %v3055_v47  ;;  %v12770_v11 = vsel %vm16956_vm7, %v2128_v55, %v17558_v21  ;;  %v2757_v60 = vsel %vm2748_vm9, %v12293_v57, %v8210_v45  ;;  %17562 = vst [vmem:[#allocation111_spill] sm:$0xff] %v12781_v13  ;;  %v17563_v47 = vrot.slane %v17515_v40, 5  ;;  %v17565_v55 = vld [vmem:[#allocation92_spill] sm:$0xff]  ;;  %v17566_v21 = vld [vmem:[#allocation123_spill] sm:$0xff]  ;;  %v17600_v29 = vld [vmem:[#allocation65_spill] sm:$0xff] }
 0x2ee   : > { %17559 = vst [vmem:[#allocation68_spill] sm:$0xff] %v12770_v11  ;;  %v8276_v41 = vunpack.i.h.bf16 %v17565_v55  ;;  %v8275_v7 = vunpack.i.l.bf16 %v17565_v55  ;;  %v1144_v57 = vrot.slane %v17430_v18, 2  ;;  %v8221_v45 = vunpack.i.h.bf16 %v8219_v27  ;;  %v17569_v55 = vld [vmem:[#allocation21_spill] sm:$0xff] }
 0x2ef   : > { %v12786_v30 = vsel %vm1811_vm2, %v1889_v26, %v17563_v47  ;;  %7648 = vmatmul.mubr.msk.bf16.gmra.mxu0 %vm3158_vm4, %v3101_v5  ;;  %v8220_v35 = vunpack.i.l.bf16 %v8219_v27  ;;  %v17568_v42 = vpack.i.bf16 %v17566_v21, %v17567_v1  ;;  %v2383_v26 = vrot.slane %v17511_v0, 7  ;;  %v17573_v1 = vld [vmem:[#allocation87_spill] sm:$0xff]  ;;  %v12815_v5 = vpop.permute.xlu0 %8398 }
 0x2f0   : > { %17564 = vst [vmem:[#allocation110_spill] sm:$0xff] %v12786_v30  ;;  %7651 = vmatprep.mubr.msk.bf16.mxu0 %vm16957_vm8, %v17443_v22  ;;  %v2807_v27 = vsel %vm2798_vm10, %v2757_v60, %v17570_v38  ;;  %v17571_v33 = vunpack.i.h.bf16 %v11844_v39  ;;  %17575 = vst [vmem:[#allocation69_spill] sm:$0xff] %v12815_v5  ;;  %v17576_v39 = vld [vmem:[#allocation27_spill] sm:$0xff]  ;;  %v2132_v13 = vrot.slane %v17430_v18, 6 }
 0x2f1   : > { %8643 = vrot.lane.b32.xlu0 %v17568_v42, %s9912_s24  ;;  %v17572_v42 = vld [vmem:[#allocation20_spill] sm:$0xff]  ;;  %v2857_v17 = vsel %vm2848_vm11, %v2807_v27, %v8220_v35  ;;  %v17580_v35 = vrot.slane %v17360_v14, 2  ;;  %v17581_v27 = vrot.slane %v17431_v50, 2 }
 0x2f2   : > { %v2808_v21 = vsel %vm2798_vm10, %v2758_v52, %v17571_v33  ;;  %v17574_v54 = vpack.i.bf16 %v17572_v42, %v17573_v1  ;;  %v12823_v52 = vsel %vm17577_vm0, %v17576_v39, %v8276_v41  ;;  %v17578_v33 = vld [vmem:[#allocation26_spill] sm:$0xff]  ;;  %v17582_v41 = vld [vmem:[#allocation125_spill] sm:$0xff]  ;;  %v17583_v39 = vld [vmem:[#allocation124_spill] sm:$0xff]  ;;  %vm17586_vm0 = vcmask 1040384  }
 0x2f3   : > { %v2858_v47 = vsel %vm2848_vm11, %v2808_v21, %v8221_v45  ;;  %v12827_v38 = vsel %vm17579_vm3, %v17578_v33, %v8275_v7  ;;  %v12832_v45 = vsel %vm1070_vm5, %v17580_v35, %v1144_v57  ;;  %v12837_v21 = vsel %vm1070_vm5, %v1144_v57, %v17581_v27  ;;  %vm17588_vm3 = vmmov %vm17586_vm0  ;;  %v12867_v30 = vpop.permute.xlu0 %8408 }
 0x2f4   : > { %8558 = vrot.lane.b32.xlu1 %v17574_v54, %s9915_s29  ;;  %v8229_v54 = vpop.permute.xlu1 %8228  ;;  %v17584_v60 = vpack.i.bf16 %v17582_v41, %v17583_v39  ;;  %v17585_v7 = vrot.slane %v17431_v50, 7  ;;  %v17587_v35 = vrot.slane %v17515_v40, 7  ;;  %v17589_v57 = vunpack.i.l.bf16 %v11889_v6  ;;  %v17592_v41 = vld [vmem:[#allocation89_spill] sm:$0xff]  ;;  %17594 = vst [vmem:[#allocation70_spill] sm:$0xff] %v12867_v30 }
 0x2f5   : > { %v8231_v42 = vunpack.i.h.bf16 %v8229_v54  ;;  %v8230_v1 = vunpack.i.l.bf16 %v8229_v54  ;;  %v17590_v54 = vunpack.i.h.bf16 %v11889_v6  ;;  %v17596_v6 = vld [vmem:[#allocation6_spill] sm:$0xff]  ;;  %v17601_v30 = vunpack.i.l.bf16 %v17600_v29 }
 0x2f6   : > { %8653 = vrot.lane.b32.xlu0 %v17584_v60, %s9913_s27  ;;  %v12846_v33 = vsel %vm17586_vm0, %v17585_v7, %v2383_v26  ;;  %v12851_v25 = vsel %vm17588_vm3, %v2383_v26, %v17587_v35  ;;  %v2907_v27 = vsel %vm2898_vm12, %v2857_v17, %v17589_v57  ;;  %v17591_v60 = vld [vmem:[#allocation88_spill] sm:$0xff]  ;;  %v1638_v7 = vrot.slane %v17430_v18, 4  ;;  %v17595_v17 = vld [vmem:[#allocation5_spill] sm:$0xff]  ;;  %v17626_v18 = vld [vmem:[#allocation95_spill] sm:$0xff] }
 0x2f7   : > { %v2908_v5 = vsel %vm2898_vm12, %v2858_v47, %v17590_v54  ;;  %v17593_v39 = vpack.i.bf16 %v17591_v60, %v17592_v41  ;;  %v2957_v26 = vsel %vm2948_vm13, %v2907_v27, %v8230_v1  ;;  %v905_v57 = vrot.slane %v17595_v17, 1  ;;  %v17604_v1 = vld [vmem:[#allocation94_spill] sm:$0xff] }
 0x2f8   : > { %v2958_v35 = vsel %vm2948_vm13, %v2908_v5, %v8231_v42  ;;  %v17597_v47 = vunpack.i.l.bf16 %v11932_v51  ;;  %v17598_v60 = vunpack.i.h.bf16 %v11932_v51  ;;  %v17599_v27 = vpack.i.bf16 %v12208_v24, %v12203_v4 }
 0x2f9   : > { %8568 = vrot.lane.b32.xlu1 %v17593_v39, %s9916_s30  ;;  %v8244_v39 = vpop.permute.xlu1 %8243  ;;  %v17602_v51 = vunpack.i.h.bf16 %v17600_v29  ;;  %vm17611_vm0 = vcmask 1046528  }
 0x2fa   : > { %v3007_v54 = vsel %vm2998_vm14, %v2957_v26, %v17597_v47  ;;  %v3008_v41 = vsel %vm2998_vm14, %v2958_v35, %v17598_v60  ;;  %v8246_v5 = vunpack.i.h.bf16 %v8244_v39  ;;  %v8245_v42 = vunpack.i.l.bf16 %v8244_v39  ;;  %8658 = vrot.lane.b32.xlu0 %v17599_v27, %s9914_s28  ;;  %v17603_v47 = vld [vmem:[#allocation14_spill] sm:$0xff]  ;;  %v17605_v39 = vld [vmem:[#allocation91_spill] sm:$0xff]  ;;  %vm17614_vm3 = vmmov %vm17611_vm0 }
 0x2fb   : > { %v3057_v26 = vsel %vm3048_vm15, %v3007_v54, %v17601_v30  ;;  %v3058_v35 = vsel %vm3048_vm15, %v3008_v41, %v17602_v51  ;;  %v17606_v11 = vpack.i.bf16 %v17604_v1, %v17605_v39  ;;  %v12901_v30 = vpop.permute.xlu0 %8413  ;;  %v17608_v41 = vrot.slane %v17360_v14, 4 }
 0x2fc   : > { %v3102_v56 = vpack.c.bf16 %v3058_v35, %v3057_v26  ;;  %v2760_v24 = vsel %vm2748_vm9, %v12565_v48, %v8246_v5  ;;  %v2759_v29 = vsel %vm2748_vm9, %v12575_v34, %v8245_v42  ;;  %17607 = vst [vmem:[#allocation79_spill] sm:$0xff] %v12901_v30  ;;  %v17609_v27 = vrot.slane %v17431_v50, 4 }
 0x2fd   : > { %8578 = vrot.lane.b32.xlu1 %v17606_v11, %s9917_s14  ;;  %v12908_v1 = vsel %vm1564_vm6, %v17608_v41, %v1638_v7  ;;  %v8254_v11 = vpop.permute.xlu1 %8253  ;;  %v17610_v34 = vrot.slane %v17515_v40, 1  ;;  %v17613_v42 = vrot.slane %v17596_v6, 1  ;;  %v1399_v51 = vrot.slane %v17595_v17, 3  ;;  %v17616_v41 = vld [vmem:[#allocation16_spill] sm:$0xff] }
 0x2fe   : > { %7652 = vmatmul.mubr.msk.bf16.gmra.mxu0 %vm3158_vm4, %v3102_v56  ;;  %v12914_v48 = vsel %vm1564_vm6, %v1638_v7, %v17609_v27  ;;  %v8256_v35 = vunpack.i.h.bf16 %v8254_v11  ;;  %v8255_v39 = vunpack.i.l.bf16 %v8254_v11  ;;  %v17615_v56 = vld [vmem:[#allocation96_spill] sm:$0xff]  ;;  %v17618_v7 = vrot.slane %v17360_v14, 6 }
 0x2ff   : > { %v12919_v5 = vsel %vm17611_vm0, %v17610_v34, %v905_v57  ;;  %v12924_v26 = vsel %vm17614_vm3, %v905_v57, %v17613_v42  ;;  %v17617_v54 = vpack.i.bf16 %v17615_v56, %v17616_v41  ;;  %7655 = vmatprep.mubr.msk.bf16.mxu0 %vm16957_vm8, %v17443_v22  ;;  %v17620_v57 = vrot.slane %v17431_v50, 6  ;;  %v17622_v42 = vld [vmem:[#allocation97_spill] sm:$0xff]  ;;  %v12957_v11 = vpop.permute.xlu0 %8423 }
 0x300   : > { %17612 = vst [vmem:[#allocation71_spill] sm:$0xff] %v12919_v5  ;;  %v12936_v27 = vsel %vm16956_vm7, %v17618_v7, %v2132_v13  ;;  %v17623_v56 = vunpack.i.l.bf16 %v12042_v53  ;;  %v17624_v41 = vunpack.i.h.bf16 %v12042_v53  ;;  %v17625_v7 = vld [vmem:[#allocation98_spill] sm:$0xff]  ;;  %17628 = vst [vmem:[#allocation57_spill] sm:$0xff] %v12957_v11  ;;  %v17634_v11 = vld [vmem:[#allocation23_spill] sm:$0xff]  ;;  %v17635_v30 = vunpack.i.l.bf16 %v17524_v49 }
 0x301   : > { %8668 = vrot.lane.b32.xlu0 %v17617_v54, %s9911_s23  ;;  %17619 = vst [vmem:[#allocation72_spill] sm:$0xff] %v12936_v27  ;;  %v12941_v34 = vsel %vm16956_vm7, %v2132_v13, %v17620_v57  ;;  %v17627_v14 = vpack.i.bf16 %v17625_v7, %v17626_v18  ;;  %v17631_v7 = vld [vmem:[#allocation56_spill] sm:$0xff]  ;;  %vm17650_vm0 = vcmask 48128  }
 0x302   : > { %17621 = vst [vmem:[#allocation81_spill] sm:$0xff] %v12941_v34  ;;  %v2809_v54 = vsel %vm2798_vm10, %v2759_v29, %v17623_v56  ;;  %v2810_v60 = vsel %vm2798_vm10, %v2760_v24, %v17624_v41  ;;  %v8264_v56 = vpop.permute.xlu1 %8263  ;;  %v17630_v41 = vld [vmem:[#allocation61_spill] sm:$0xff]  ;;  %v17633_v29 = vrot.slane %v17515_v40, 3  ;;  %v8311_v24 = vunpack.i.h.bf16 %v17634_v11  ;;  %vm17655_vm3 = vmmov %vm17650_vm0 }
 0x303   : > { %8593 = vrot.lane.b32.xlu1 %v17627_v14, %s9915_s29  ;;  %v2859_v13 = vsel %vm2848_vm11, %v2809_v54, %v8255_v39  ;;  %v2860_v57 = vsel %vm2848_vm11, %v2810_v60, %v8256_v35  ;;  %v1148_v14 = vrot.slane %v17511_v0, 2  ;;  %v17629_v39 = vld [vmem:[#allocation62_spill] sm:$0xff]  ;;  %v8266_v35 = vunpack.i.h.bf16 %v8264_v56  ;;  %v12993_v34 = vpop.permute.xlu0 %8433 }
 0x304   : > { %v8265_v54 = vunpack.i.l.bf16 %v8264_v56  ;;  %v17632_v4 = vpack.i.bf16 %v17630_v41, %v17631_v7  ;;  %v12976_v53 = vsel %vm1317_vm1, %v17633_v29, %v1399_v51  ;;  %v2909_v18 = vsel %vm2898_vm12, %v2859_v13, %v17635_v30  ;;  %17638 = vst [vmem:[#allocation74_spill] sm:$0xff] %v12993_v34  ;;  %v17649_v34 = vld [vmem:[#allocation29_spill] sm:$0xff] }
 0x305   : > { %v17636_v60 = vunpack.i.h.bf16 %v17524_v49  ;;  %v17637_v41 = vpack.i.bf16 %v12372_v2, %v12366_v59  ;;  %v8310_v29 = vunpack.i.l.bf16 %v17634_v11  ;;  %v17639_v30 = vrot.slane %v17596_v6, 3 }
 0x306   : > { %8678 = vrot.lane.b32.xlu0 %v17632_v4, %s9912_s24  ;;  %v1893_v4 = vrot.slane %v17595_v17, 5  ;;  %v2959_v7 = vsel %vm2948_vm13, %v2909_v18, %v8265_v54  ;;  %v17640_v13 = vunpack.i.l.bf16 %v17569_v55  ;;  %v17641_v2 = vunpack.i.h.bf16 %v17569_v55  ;;  %v8279_v11 = vpop.permute.xlu1 %8278  ;;  %v17646_v55 = vld [vmem:[#allocation67_spill] sm:$0xff] }
 0x307   : > { %v2910_v56 = vsel %vm2898_vm12, %v2860_v57, %v17636_v60  ;;  %8603 = vrot.lane.b32.xlu1 %v17637_v41, %s9916_s30  ;;  %v12998_v49 = vsel %vm1317_vm1, %v1399_v51, %v17639_v30  ;;  %v17642_v18 = vrot.slane %v17431_v50, 2  ;;  %v8281_v51 = vunpack.i.h.bf16 %v8279_v11  ;;  %v17644_v41 = vld [vmem:[#allocation22_spill] sm:$0xff] }
 0x308   : > { %v2960_v27 = vsel %vm2948_vm13, %v2910_v56, %v8266_v35  ;;  %v3009_v59 = vsel %vm2998_vm14, %v2959_v7, %v17640_v13  ;;  %v17643_v35 = vrot.slane %v17515_v40, 2  ;;  %v8280_v56 = vunpack.i.l.bf16 %v8279_v11  ;;  %v17651_v11 = vld [vmem:[#allocation101_spill] sm:$0xff] }
 0x309   : > { %v3010_v57 = vsel %vm2998_vm14, %v2960_v27, %v17641_v2  ;;  %v13009_v60 = vsel %vm1070_vm5, %v17642_v18, %v1148_v14  ;;  %v17645_v7 = vpack.i.bf16 %v12382_v8, %v17644_v41  ;;  %v17647_v27 = vunpack.i.l.bf16 %v17646_v55 }
 0x30a   : > { %v13014_v54 = vsel %vm1070_vm5, %v1148_v14, %v17643_v35  ;;  %v17648_v13 = vunpack.i.h.bf16 %v17646_v55  ;;  %v8305_v18 = vunpack.i.l.bf16 %v17629_v39  ;;  %v13029_v14 = vsel %vm17650_vm0, %v17649_v34, %v8311_v24  ;;  %v17652_v35 = vld [vmem:[#allocation58_spill] sm:$0xff]  ;;  %v17654_v24 = vld [vmem:[#allocation28_spill] sm:$0xff] }
 0x30b   : > { %8688 = vrot.lane.b32.xlu0 %v17645_v7, %s9913_s27  ;;  %v3059_v30 = vsel %vm3048_vm15, %v3009_v59, %v17647_v27  ;;  %v17653_v5 = vpack.i.bf16 %v17651_v11, %v17652_v35  ;;  %v16942_v41 = vrot.slane %v17596_v6, 5  ;;  %v2762_v59 = vsel %vm2748_vm9, %v12823_v52, %v8281_v51  ;;  %v13040_v7 = vpop.permute.xlu0 %8443 }
 0x30c   : > { %v3060_v2 = vsel %vm3048_vm15, %v3010_v57, %v17648_v13  ;;  %v2761_v57 = vsel %vm2748_vm9, %v12827_v38, %v8280_v56  ;;  %v1642_v55 = vrot.slane %v17511_v0, 4  ;;  %v16943_v34 = vrot.slane %v17515_v40, 4  ;;  %v8289_v13 = vpop.permute.xlu1 %8288  ;;  %v17657_v56 = vld [vmem:[#allocation100_spill] sm:$0xff] }
 0x30d   : > { %8613 = vrot.lane.b32.xlu1 %v17653_v5, %s9917_s14  ;;  %v3103_v8 = vpack.c.bf16 %v3060_v2, %v3059_v30  ;;  %v2713_v27 = vsel %vm17655_vm3, %v17654_v24, %v8310_v29  ;;  %v17656_v38 = vrot.slane %v17515_v40, 5  ;;  %v8291_v2 = vunpack.i.h.bf16 %v8289_v13 }
 0x30e   : > { %v8290_v11 = vunpack.i.l.bf16 %v8289_v13  ;;  %v17658_v29 = vpack.i.bf16 %v12419_v44, %v12414_v12  ;;  %v2387_v35 = vrot.slane %v17595_v17, 7  ;;  %v17661_v13 = vpack.i.bf16 %v12488_v23, %v12436_v31 }
 0x30f   : > { %7656 = vmatmul.mubr.msk.bf16.gmra.mxu0 %vm3158_vm4, %v3103_v8  ;;  %v13054_v51 = vsel %vm1811_vm2, %v17656_v38, %v1893_v4  ;;  %v17659_v8 = vunpack.i.l.bf16 %v17603_v47  ;;  %v17660_v38 = vunpack.i.h.bf16 %v17603_v47  ;;  %v13077_v12 = vsel %vm1811_vm2, %v1893_v4, %v16942_v41  ;;  %v17663_v4 = vld [vmem:[#allocation60_spill] sm:$0xff] }
 0x310   : > { %8693 = vrot.lane.b32.xlu0 %v17658_v29, %s9914_s28  ;;  %7659 = vmatprep.mubr.msk.bf16.mxu0 %vm16957_vm8, %v17443_v22  ;;  %v16944_v44 = vrot.slane %v17596_v6, 7  ;;  %v17662_v47 = vrot.slane %v17431_v50, 4  ;;  %v13092_v31 = vsel %vm1564_vm6, %v1642_v55, %v16943_v34  ;;  %v8320_v23 = vunpack.i.l.bf16 %v17657_v56 }
 0x311   : > { %v2811_v24 = vsel %vm2798_vm10, %v2761_v57, %v17659_v8  ;;  %v2812_v52 = vsel %vm2798_vm10, %v2762_v59, %v17660_v38  ;;  %8628 = vrot.lane.b32.xlu1 %v17661_v13, %s9915_s29  ;;  %v13082_v8 = vpop.permute.xlu0 %8448  ;;  %v17665_v5 = vrot.slane %v17515_v40, 7  ;;  %vm17666_vm0 = vcmask 1040384  }
 0x312   : > { %v2861_v29 = vsel %vm2848_vm11, %v2811_v24, %v8290_v11  ;;  %v2862_v57 = vsel %vm2848_vm11, %v2812_v52, %v8291_v2  ;;  %v13087_v59 = vsel %vm1564_vm6, %v17662_v47, %v1642_v55  ;;  %v8299_v24 = vpop.permute.xlu1 %8298  ;;  %v2136_v52 = vrot.slane %v17511_v0, 6  ;;  %vm17670_vm3 = vmmov %vm17666_vm0  ;;  %v17673_v55 = vld [vmem:[#allocation8_spill] sm:$0xff] }
 0x313   : > { %v8301_v2 = vunpack.i.h.bf16 %v8299_v24  ;;  %v8300_v13 = vunpack.i.l.bf16 %v8299_v24  ;;  %v17664_v47 = vpack.i.bf16 %v12510_v61, %v12505_v10  ;;  %v13107_v41 = vsel %vm17666_vm0, %v17665_v5, %v2387_v35  ;;  %v17672_v61 = vld [vmem:[#allocation7_spill] sm:$0xff]  ;;  %v17739_v0 = vld [vmem:[#allocation72_spill] sm:$0xff] }
 0x314   : > { %v17667_v34 = vunpack.i.l.bf16 %v17622_v42  ;;  %v17668_v11 = vunpack.i.h.bf16 %v17622_v42  ;;  %v17669_v10 = vpack.i.bf16 %v12527_v37, %v12515_v3  ;;  %v13124_v5 = vsel %vm17670_vm3, %v2387_v35, %v16944_v44 }
 0x315   : > { %8703 = vrot.lane.b32.xlu0 %v17664_v47, %s9911_s23  ;;  %v17671_v37 = vunpack.i.h.bf16 %v17629_v39  ;;  %v909_v35 = vrot.slane %v17672_v61, 1  ;;  %v16945_v44 = vrot.slane %v17673_v55, 1  ;;  %vm17681_vm0 = vcmask 1046528  }
 0x316   : > { %v2911_v38 = vsel %vm2898_vm12, %v2861_v29, %v17667_v34  ;;  %v2912_v24 = vsel %vm2898_vm12, %v2862_v57, %v17668_v11  ;;  %8638 = vrot.lane.b32.xlu1 %v17669_v10, %s9916_s30  ;;  %v13129_v29 = vpop.permute.xlu0 %8458  ;;  %v16947_v57 = vrot.slane %v17515_v40, 6  ;;  %v8314_v10 = vpop.permute.xlu1 %8313  ;;  %vm17682_vm3 = vmmov %vm17681_vm0 }
 0x317   : > { %v2961_v34 = vsel %vm2948_vm13, %v2911_v38, %v8300_v13  ;;  %v2962_v42 = vsel %vm2948_vm13, %v2912_v24, %v8301_v2  ;;  %v8316_v47 = vunpack.i.h.bf16 %v8314_v10  ;;  %v8315_v30 = vunpack.i.l.bf16 %v8314_v10  ;;  %v17675_v2 = vld [vmem:[#allocation80_spill] sm:$0xff] }
 0x318   : > { %v3011_v3 = vsel %vm2998_vm14, %v2961_v34, %v8305_v18  ;;  %v3012_v11 = vsel %vm2998_vm14, %v2962_v42, %v17671_v37  ;;  %v17674_v38 = vpack.i.bf16 %v12547_v16, %v12542_v32  ;;  %v17676_v13 = vunpack.i.l.bf16 %v17675_v2 }
 0x319   : > { %v17677_v39 = vunpack.i.h.bf16 %v17675_v2  ;;  %v8340_v34 = vunpack.i.l.bf16 %v12496_v36  ;;  %v8346_v42 = vunpack.i.h.bf16 %v12551_v9  ;;  %v8345_v37 = vunpack.i.l.bf16 %v12551_v9 }
 0x31a   : > { %8713 = vrot.lane.b32.xlu0 %v17674_v38, %s9912_s24  ;;  %v3061_v18 = vsel %vm3048_vm15, %v3011_v3, %v17676_v13  ;;  %v17678_v10 = vpack.i.bf16 %v12561_v15, %v12556_v58  ;;  %v2764_v16 = vsel %vm2748_vm9, %v13029_v14, %v8316_v47  ;;  %v2763_v3 = vsel %vm2748_vm9, %v2713_v27, %v8315_v30  ;;  %v13158_v38 = vpop.permute.xlu0 %8468  ;;  %v8324_v13 = vpop.permute.xlu1 %8323 }
 0x31b   : > { %v3062_v24 = vsel %vm3048_vm15, %v3012_v11, %v17677_v39  ;;  %v17679_v11 = vrot.slane %v17431_v50, 6  ;;  %v1152_v9 = vrot.slane %v17595_v17, 2  ;;  %v13170_v58 = vsel %vm16956_vm7, %v2136_v52, %v16947_v57  ;;  %v17702_v57 = vld [vmem:[#allocation82_spill] sm:$0xff]  ;;  %v17738_v50 = vld [vmem:[#allocation81_spill] sm:$0xff] }
 0x31c   : > { %8648 = vrot.lane.b32.xlu1 %v17678_v10, %s9917_s14  ;;  %v3104_v32 = vpack.c.bf16 %v3062_v24, %v3061_v18  ;;  %v17680_v15 = vrot.slane %v17596_v6, 1  ;;  %v13180_v27 = vsel %vm17682_vm3, %v909_v35, %v16945_v44  ;;  %v16946_v30 = vrot.slane %v17596_v6, 2  ;;  %v17684_v10 = vld [vmem:[#allocation31_spill] sm:$0xff] }
 0x31d   : > { %v13163_v2 = vsel %vm16956_vm7, %v17679_v11, %v2136_v52  ;;  %v8326_v47 = vunpack.i.h.bf16 %v8324_v13  ;;  %v8325_v18 = vunpack.i.l.bf16 %v8324_v13  ;;  %v17683_v39 = vpack.i.bf16 %v12640_v19, %v12628_v63 }
 0x31e   : > { %7660 = vmatmul.mubr.msk.bf16.gmra.mxu0 %vm3158_vm4, %v3104_v32  ;;  %v13175_v14 = vsel %vm17681_vm0, %v17680_v15, %v909_v35  ;;  %v1403_v24 = vrot.slane %v17672_v61, 3  ;;  %vm17685_vm0 = vcmask 48128   ;;  %v17686_v32 = vld [vmem:[#allocation30_spill] sm:$0xff]  ;;  %v2813_v13 = vsel %vm2798_vm10, %v2763_v3, %v8320_v23  ;;  %v13206_v44 = vpop.permute.xlu0 %8478  ;;  %v8334_v3 = vpop.permute.xlu1 %8333 }
 0x31f   : > { %8723 = vrot.lane.b32.xlu0 %v17683_v39, %s9913_s27  ;;  %7663 = vmatprep.mubr.msk.bf16.mxu0 %vm16957_vm8, %v17443_v22  ;;  %v2716_v35 = vsel %vm17685_vm0, %v17684_v10, %v8346_v42  ;;  %vm17687_vm3 = vmmov %vm17685_vm0  ;;  %v17688_v15 = vunpack.i.h.bf16 %v17657_v56  ;;  %v17689_v19 = vpack.i.bf16 %v12651_v20, %v12645_v62  ;;  %v2863_v39 = vsel %vm2848_vm11, %v2813_v13, %v8325_v18  ;;  %v17690_v56 = vld [vmem:[#allocation103_spill] sm:$0xff] }
 0x320   : > { %v2715_v11 = vsel %vm17687_vm3, %v17686_v32, %v8345_v37  ;;  %v8356_v37 = vunpack.i.h.bf16 %v17690_v56  ;;  %v17691_v62 = vrot.slane %v17515_v40, 2  ;;  %v8336_v18 = vunpack.i.h.bf16 %v8334_v3 }
 0x321   : > { %v2814_v63 = vsel %vm2798_vm10, %v2764_v16, %v17688_v15  ;;  %8663 = vrot.lane.b32.xlu1 %v17689_v19, %s9915_s29  ;;  %v8355_v16 = vunpack.i.l.bf16 %v17690_v56  ;;  %v8335_v10 = vunpack.i.l.bf16 %v8334_v3  ;;  %v17692_v32 = vpack.i.bf16 %v12692_v46, %v12679_v28 }
 0x322   : > { %v2864_v52 = vsel %vm2848_vm11, %v2814_v63, %v8326_v47  ;;  %v13217_v20 = vsel %vm1070_vm5, %v17691_v62, %v1152_v9  ;;  %v13222_v47 = vsel %vm1070_vm5, %v1152_v9, %v16946_v30  ;;  %v17693_v13 = vrot.slane %v17596_v6, 3  ;;  %v17696_v62 = vld [vmem:[#allocation107_spill] sm:$0xff]  ;;  %v13248_v42 = vpop.permute.xlu0 %8483 }
 0x323   : > { %8728 = vrot.lane.b32.xlu0 %v17692_v32, %s9914_s28  ;;  %v17694_v19 = vunpack.i.l.bf16 %v17663_v4  ;;  %v17695_v9 = vunpack.i.h.bf16 %v17663_v4  ;;  %v17697_v28 = vpack.i.bf16 %v12702_v43, %v17696_v62  ;;  %v1646_v46 = vrot.slane %v17595_v17, 4 }
 0x324   : > { %v13231_v15 = vsel %vm1317_vm1, %v17693_v13, %v1403_v24  ;;  %v2140_v62 = vrot.slane %v17595_v17, 6  ;;  %v17703_v4 = vunpack.i.l.bf16 %v17702_v57  ;;  %vm17726_vm3 = vcmask 1040384  }
 0x325   : > { %v2913_v56 = vsel %vm2898_vm12, %v2863_v39, %v17694_v19  ;;  %v2914_v3 = vsel %vm2898_vm12, %v2864_v52, %v17695_v9  ;;  %8673 = vrot.lane.b32.xlu1 %v17697_v28, %s9916_s30  ;;  %v1897_v39 = vrot.slane %v17672_v61, 5  ;;  %v17698_v19 = vunpack.i.h.bf16 %v12496_v36  ;;  %v8349_v9 = vpop.permute.xlu1 %8348  ;;  %v17706_v28 = vld [vmem:[#allocation68_spill] sm:$0xff] }
 0x326   : > { %v2963_v13 = vsel %vm2948_vm13, %v2913_v56, %v8335_v10  ;;  %v2964_v23 = vsel %vm2948_vm13, %v2914_v3, %v8336_v18  ;;  %v8351_v10 = vunpack.i.h.bf16 %v8349_v9  ;;  %v8350_v56 = vunpack.i.l.bf16 %v8349_v9  ;;  %v17699_v18 = vld [vmem:[#allocation17_spill] sm:$0xff] }
 0x327   : > { %v3013_v52 = vsel %vm2998_vm14, %v2963_v13, %v8340_v34  ;;  %v3014_v43 = vsel %vm2998_vm14, %v2964_v23, %v17698_v19  ;;  %v17700_v3 = vld [vmem:[#allocation105_spill] sm:$0xff]  ;;  %v17704_v36 = vunpack.i.h.bf16 %v17702_v57  ;;  %v17705_v13 = vld [vmem:[#allocation102_spill] sm:$0xff]  ;;  %v13278_v57 = vpop.permute.xlu0 %8493 }
 0x328   : > { %v17701_v30 = vpack.i.bf16 %v17699_v18, %v17700_v3  ;;  %v3063_v34 = vsel %vm3048_vm15, %v3013_v52, %v17703_v4  ;;  %v8366_v19 = vunpack.i.h.bf16 %v17705_v13  ;;  %v8365_v32 = vunpack.i.l.bf16 %v17705_v13  ;;  %v17707_v9 = vld [vmem:[#allocation109_spill] sm:$0xff] }
 0x329   : > { %v3064_v23 = vsel %vm3048_vm15, %v3014_v43, %v17704_v36  ;;  %v17708_v63 = vpack.i.bf16 %v17706_v28, %v17707_v9  ;;  %v2766_v18 = vsel %vm2748_vm9, %v2716_v35, %v8351_v10  ;;  %v2765_v4 = vsel %vm2748_vm9, %v2715_v11, %v8350_v56 }
 0x32a   : > { %8738 = vrot.lane.b32.xlu0 %v17701_v30, %s9911_s23  ;;  %v3105_v17 = vpack.c.bf16 %v3064_v23, %v3063_v34  ;;  %v17709_v52 = vrot.slane %v17673_v55, 3  ;;  %v17710_v3 = vrot.slane %v17515_v40, 4  ;;  %v17711_v34 = vrot.slane %v17596_v6, 4 }
 0x32b   : > { %8683 = vrot.lane.b32.xlu1 %v17708_v63, %s9917_s14  ;;  %v8359_v63 = vpop.permute.xlu1 %8358  ;;  %v17712_v11 = vrot.slane %v17596_v6, 5  ;;  %v17714_v36 = vrot.slane %v17515_v40, 6 }
 0x32c   : > { %v13283_v43 = vsel %vm1317_vm1, %v1403_v24, %v17709_v52  ;;  %v13288_v28 = vsel %vm1564_vm6, %v17710_v3, %v1646_v46  ;;  %7664 = vmatmul.mubr.msk.bf16.gmra.mxu0 %vm3158_vm4, %v3105_v17  ;;  %v13294_v35 = vsel %vm1564_vm6, %v1646_v46, %v17711_v34  ;;  %v17713_v24 = vrot.slane %v17673_v55, 5  ;;  %v17715_v17 = vld [vmem:[#allocation15_spill] sm:$0xff]  ;;  %v17716_v52 = vld [vmem:[#allocation110_spill] sm:$0xff] }
 0x32d   : > { %v13299_v10 = vsel %vm1811_vm2, %v17712_v11, %v1897_v39  ;;  %v13309_v23 = vsel %vm16956_vm7, %v17714_v36, %v2140_v62  ;;  %v8381_v13 = vunpack.i.h.bf16 %v17715_v17  ;;  %v8361_v9 = vunpack.i.h.bf16 %v8359_v63  ;;  %v17717_v3 = vld [vmem:[#allocation111_spill] sm:$0xff]  ;;  %7667 = vmatprep.mubr.msk.bf16.mxu0 %vm16957_vm8, %v17443_v22 }
 0x32e   : > { %v13304_v56 = vsel %vm1811_vm2, %v1897_v39, %v17713_v24  ;;  %v8360_v46 = vunpack.i.l.bf16 %v8359_v63  ;;  %v17718_v34 = vpack.i.bf16 %v17716_v52, %v17717_v3  ;;  %v17719_v39 = vrot.slane %v17596_v6, 6 }
 0x32f   : > { %v2815_v24 = vsel %vm2798_vm10, %v2765_v4, %v8355_v16  ;;  %v2816_v36 = vsel %vm2798_vm10, %v2766_v18, %v8356_v37  ;;  %v17720_v63 = vpack.i.bf16 %v12837_v21, %v12832_v45  ;;  %v2391_v3 = vrot.slane %v17672_v61, 7  ;;  %v8369_v18 = vpop.permute.xlu1 %8368 }
 0x330   : > { %8748 = vrot.lane.b32.xlu0 %v17718_v34, %s9912_s24  ;;  %v13321_v11 = vsel %vm16956_vm7, %v2140_v62, %v17719_v39  ;;  %v17721_v34 = vld [vmem:[#allocation53_spill] sm:$0xff]  ;;  %v2865_v40 = vsel %vm2848_vm11, %v2815_v24, %v8360_v46  ;;  %v2866_v62 = vsel %vm2848_vm11, %v2816_v36, %v8361_v9  ;;  %v13335_v39 = vpop.permute.xlu0 %8503  ;;  %v16950_v37 = vrot.slane %v17673_v55, 7 }
 0x331   : > { %8698 = vrot.lane.b32.xlu1 %v17720_v63, %s9915_s29  ;;  %v8376_v30 = vunpack.i.h.bf16 %v17721_v34  ;;  %v8375_v16 = vunpack.i.l.bf16 %v17721_v34  ;;  %v17722_v63 = vld [vmem:[#allocation33_spill] sm:$0xff]  ;;  %v8380_v9 = vunpack.i.l.bf16 %v17715_v17  ;;  %v8371_v24 = vunpack.i.h.bf16 %v8369_v18 }
 0x332   : > { %v2718_v46 = vsel %vm17685_vm0, %v17722_v63, %v8381_v13  ;;  %v8370_v36 = vunpack.i.l.bf16 %v8369_v18  ;;  %v17723_v34 = vpack.i.bf16 %v12851_v25, %v12846_v33  ;;  %v2915_v45 = vsel %vm2898_vm12, %v2865_v40, %v8365_v32  ;;  %vm17727_vm0 = vmmov %vm17726_vm3 }
 0x333   : > { %v2916_v52 = vsel %vm2898_vm12, %v2866_v62, %v8366_v19  ;;  %v17724_v4 = vpack.i.bf16 %v12914_v48, %v12908_v1  ;;  %v17725_v13 = vrot.slane %v17596_v6, 7  ;;  %v1156_v18 = vrot.slane %v17672_v61, 2  ;;  %v8384_v19 = vpop.permute.xlu1 %8383  ;;  %v17728_v62 = vld [vmem:[#allocation9_spill] sm:$0xff]  ;;  %v17737_v1 = vld [vmem:[#allocation66_spill] sm:$0xff] }
 0x334   : > { %8758 = vrot.lane.b32.xlu0 %v17723_v34, %s9913_s27  ;;  %v2965_v63 = vsel %vm2948_vm13, %v2915_v45, %v8370_v36  ;;  %v2966_v25 = vsel %vm2948_vm13, %v2916_v52, %v8371_v24  ;;  %v13366_v33 = vpop.permute.xlu0 %8513  ;;  %v13371_v40 = vsel %vm17727_vm0, %v2391_v3, %v16950_v37  ;;  %v17729_v34 = vld [vmem:[#allocation10_spill] sm:$0xff]  ;;  %v8386_v36 = vunpack.i.h.bf16 %v8384_v19  ;;  %v17730_v24 = vld [vmem:[#allocation71_spill] sm:$0xff] }
 0x335   : > { %8708 = vrot.lane.b32.xlu1 %v17724_v4, %s9916_s30  ;;  %v13361_v17 = vsel %vm17726_vm3, %v17725_v13, %v2391_v3  ;;  %v3015_v48 = vsel %vm2998_vm14, %v2965_v63, %v8375_v16  ;;  %v3016_v32 = vsel %vm2998_vm14, %v2966_v25, %v8376_v30  ;;  %v913_v4 = vrot.slane %v17728_v62, 1  ;;  %v17732_v3 = vld [vmem:[#allocation85_spill] sm:$0xff]  ;;  %v17735_v63 = vld [vmem:[#allocation32_spill] sm:$0xff] }
 0x336   : > { %v8385_v52 = vunpack.i.l.bf16 %v8384_v19  ;;  %v17731_v13 = vpack.i.bf16 %v12924_v26, %v17730_v24  ;;  %v17733_v21 = vunpack.i.l.bf16 %v17732_v3  ;;  %v17734_v16 = vunpack.i.h.bf16 %v17732_v3 }
 0x337   : > { %vm17736_vm3 = vcmask 48128   ;;  %v8391_v45 = vunpack.i.h.bf16 %v17737_v1  ;;  %v8390_v19 = vunpack.i.l.bf16 %v17737_v1  ;;  %v17740_v26 = vpack.i.bf16 %v17738_v50, %v17739_v0  ;;  %v8394_v3 = vpop.permute.xlu1 %8393 }
 0x338   : > { %8763 = vrot.lane.b32.xlu0 %v17731_v13, %s9914_s28  ;;  %v3065_v37 = vsel %vm3048_vm15, %v3015_v48, %v17733_v21  ;;  %v3066_v30 = vsel %vm3048_vm15, %v3016_v32, %v17734_v16  ;;  %v2717_v25 = vsel %vm17736_vm3, %v17735_v63, %v8380_v9  ;;  %v2768_v13 = vsel %vm2748_vm9, %v2718_v46, %v8386_v36  ;;  %v13398_v48 = vpop.permute.xlu0 %8518 }
 0x339   : > { %8718 = vrot.lane.b32.xlu1 %v17740_v26, %s9917_s14  ;;  %v3106_v24 = vpack.c.bf16 %v3066_v30, %v3065_v37  ;;  %v2767_v21 = vsel %vm2748_vm9, %v2717_v25, %v8385_v52  ;;  %v1650_v9 = vrot.slane %v17672_v61, 4  ;;  %v17741_v1 = vrot.slane %v17596_v6, 2 }
 0x33a   : > { %v17742_v0 = vrot.slane %v17673_v55, 2  ;;  %v17743_v46 = vrot.slane %v17673_v55, 1  ;;  %vm17744_vm0 = vcmask 1046528   ;;  %v17745_v52 = vrot.slane %v17729_v34, 1 }
 0x33b   : > { %7668 = vmatmul.mubr.msk.bf16.gmra.mxu0 %vm3158_vm4, %v3106_v24  ;;  %v13407_v50 = vsel %vm1070_vm5, %v17741_v1, %v1156_v18  ;;  %vm17746_vm3 = vmmov %vm17744_vm0  ;;  %v8396_v30 = vunpack.i.h.bf16 %v8394_v3  ;;  %v8395_v63 = vunpack.i.l.bf16 %v8394_v3  ;;  %v17747_v25 = vpack.i.bf16 %v12998_v49, %v12976_v53  ;;  %v17748_v24 = vld [vmem:[#allocation69_spill] sm:$0xff] }
 0x33c   : > { %v13412_v37 = vsel %vm1070_vm5, %v1156_v18, %v17742_v0  ;;  %v13417_v36 = vsel %vm17744_vm0, %v17743_v46, %v913_v4  ;;  %v13422_v16 = vsel %vm17746_vm3, %v913_v4, %v17745_v52  ;;  %7671 = vmatprep.mubr.msk.bf16.mxu0 %vm16957_vm8, %v17443_v22  ;;  %v16953_v18 = vrot.slane %v17673_v55, 4  ;;  %v13442_v52 = vpop.permute.xlu0 %8528 }
 0x33d   : > { %8773 = vrot.lane.b32.xlu0 %v17747_v25, %s9911_s23  ;;  %v1407_v26 = vrot.slane %v17728_v62, 3  ;;  %v8401_v1 = vunpack.i.h.bf16 %v17748_v24  ;;  %v8400_v0 = vunpack.i.l.bf16 %v17748_v24  ;;  %v2817_v4 = vsel %vm2798_vm10, %v2767_v21, %v8390_v19 }
 0x33e   : > { %v2818_v3 = vsel %vm2798_vm10, %v2768_v13, %v8391_v45  ;;  %v17749_v53 = vpack.i.bf16 %v13014_v54, %v13009_v60  ;;  %v2867_v49 = vsel %vm2848_vm11, %v2817_v4, %v8395_v63  ;;  %v17750_v24 = vrot.slane %v17596_v6, 4  ;;  %v17751_v45 = vld [vmem:[#allocation70_spill] sm:$0xff]  ;;  %v8404_v60 = vpop.permute.xlu1 %8403  ;;  %v17754_v54 = vld [vmem:[#allocation79_spill] sm:$0xff] }
 0x33f   : > { %v2868_v46 = vsel %vm2848_vm11, %v2818_v3, %v8396_v30  ;;  %v8411_v13 = vunpack.i.h.bf16 %v17751_v45  ;;  %v8410_v21 = vunpack.i.l.bf16 %v17751_v45  ;;  %v8406_v63 = vunpack.i.h.bf16 %v8404_v60 }
 0x340   : > { %8733 = vrot.lane.b32.xlu1 %v17749_v53, %s9915_s29  ;;  %v13449_v19 = vsel %vm1564_vm6, %v17750_v24, %v1650_v9  ;;  %v8405_v4 = vunpack.i.l.bf16 %v8404_v60  ;;  %v17752_v3 = vpack.i.bf16 %v13077_v12, %v13054_v51  ;;  %v13463_v53 = vsel %vm1564_vm6, %v1650_v9, %v16953_v18 }
 0x341   : > { %v17753_v24 = vrot.slane %v17673_v55, 3  ;;  %v8416_v25 = vunpack.i.h.bf16 %v17754_v54  ;;  %v8415_v32 = vunpack.i.l.bf16 %v17754_v54  ;;  %v2917_v60 = vsel %vm2898_vm12, %v2867_v49, %v8400_v0 }
 0x342   : > { %8783 = vrot.lane.b32.xlu0 %v17752_v3, %s9912_s24  ;;  %v2918_v30 = vsel %vm2898_vm12, %v2868_v46, %v8401_v1  ;;  %v17755_v51 = vpack.i.bf16 %v13092_v31, %v13087_v59  ;;  %v2967_v12 = vsel %vm2948_vm13, %v2917_v60, %v8405_v4  ;;  %v13480_v3 = vpop.permute.xlu0 %8538  ;;  %v2146_v18 = vrot.slane %v17673_v55, 6  ;;  %v8419_v1 = vpop.permute.xlu1 %8418  ;;  %v17758_v4 = vld [vmem:[#allocation86_spill] sm:$0xff] }
 0x343   : > { %v13468_v45 = vsel %vm1317_vm1, %v17753_v24, %v1407_v26  ;;  %v2968_v9 = vsel %vm2948_vm13, %v2918_v30, %v8406_v63  ;;  %v2144_v24 = vrot.slane %v17672_v61, 6  ;;  %v3017_v54 = vsel %vm2998_vm14, %v2967_v12, %v8410_v21  ;;  %v17761_v12 = vld [vmem:[#allocation35_spill] sm:$0xff] }
 0x344   : > { %8743 = vrot.lane.b32.xlu1 %v17755_v51, %s9916_s30  ;;  %v3018_v0 = vsel %vm2998_vm14, %v2968_v9, %v8411_v13  ;;  %v17756_v49 = vrot.slane %v17729_v34, 3  ;;  %v1901_v31 = vrot.slane %v17728_v62, 5  ;;  %v8421_v46 = vunpack.i.h.bf16 %v8419_v1  ;;  %v17763_v9 = vld [vmem:[#allocation34_spill] sm:$0xff] }
 0x345   : > { %v8420_v30 = vunpack.i.l.bf16 %v8419_v1  ;;  %v17757_v63 = vpack.i.bf16 %v13124_v5, %v13107_v41  ;;  %v17759_v60 = vunpack.i.l.bf16 %v17758_v4  ;;  %v17760_v13 = vunpack.i.h.bf16 %v17758_v4 }
 0x346   : > { %v13489_v59 = vsel %vm1317_vm1, %v1407_v26, %v17756_v49  ;;  %vm17762_vm0 = vcmask 48128   ;;  %v17765_v1 = vpack.i.bf16 %v13170_v58, %v13163_v2  ;;  %v16954_v5 = vrot.slane %v17729_v34, 5  ;;  %v13513_v4 = vpop.permute.xlu0 %8548  ;;  %v17767_v2 = vld [vmem:[#allocation57_spill] sm:$0xff] }
 0x347   : > { %8793 = vrot.lane.b32.xlu0 %v17757_v63, %s9913_s27  ;;  %v3067_v21 = vsel %vm3048_vm15, %v3017_v54, %v17759_v60  ;;  %v3068_v51 = vsel %vm3048_vm15, %v3018_v0, %v17760_v13  ;;  %v2720_v26 = vsel %vm17762_vm0, %v17761_v12, %v8416_v25  ;;  %vm17764_vm3 = vmmov %vm17762_vm0  ;;  %v17766_v0 = vrot.slane %v17596_v6, 6 }
 0x348   : > { %v2719_v49 = vsel %vm17764_vm3, %v17763_v9, %v8415_v32  ;;  %8753 = vrot.lane.b32.xlu1 %v17765_v1, %s9917_s14  ;;  %v3107_v41 = vpack.c.bf16 %v3068_v51, %v3067_v21  ;;  %v2770_v54 = vsel %vm2748_vm9, %v2720_v26, %v8421_v46  ;;  %v13523_v32 = vsel %vm16956_vm7, %v2144_v24, %v2146_v18  ;;  %v8429_v21 = vpop.permute.xlu1 %8428 }
 0x349   : > { %v2769_v63 = vsel %vm2748_vm9, %v2719_v49, %v8420_v30  ;;  %v13518_v25 = vsel %vm16956_vm7, %v17766_v0, %v2144_v24  ;;  %v8426_v58 = vunpack.i.h.bf16 %v17767_v2  ;;  %v8425_v60 = vunpack.i.l.bf16 %v17767_v2 }
 0x34a   : > { %7672 = vmatmul.mubr.msk.bf16.gmra.mxu0 %vm3158_vm4, %v3107_v41  ;;  %v1160_v30 = vrot.slane %v17728_v62, 2  ;;  %v8431_v13 = vunpack.i.h.bf16 %v8429_v21  ;;  %v8430_v51 = vunpack.i.l.bf16 %v8429_v21  ;;  %v17768_v12 = vpack.i.bf16 %v13180_v27, %v13175_v14 }
 0x34b   : > { %7675 = vmatprep.mubr.msk.bf16.mxu0 %vm16957_vm8, %v17443_v22  ;;  %v17769_v26 = vrot.slane %v17673_v55, 5  ;;  %v2819_v49 = vsel %vm2798_vm10, %v2769_v63, %v8425_v60  ;;  %v2820_v1 = vsel %vm2798_vm10, %v2770_v54, %v8426_v58  ;;  %v17770_v14 = vpack.i.bf16 %v13222_v47, %v13217_v20  ;;  %v13559_v63 = vpop.permute.xlu0 %8553  ;;  %v17771_v20 = vld [vmem:[#allocation74_spill] sm:$0xff] }
 0x34c   : > { %8798 = vrot.lane.b32.xlu0 %v17768_v12, %s9914_s28  ;;  %v13555_v41 = vsel %vm1811_vm2, %v1901_v31, %v16954_v5  ;;  %v2869_v0 = vsel %vm2848_vm11, %v2819_v49, %v8430_v51  ;;  %v2870_v2 = vsel %vm2848_vm11, %v2820_v1, %v8431_v13  ;;  %v1162_v54 = vrot.slane %v17729_v34, 2  ;;  %v8439_v21 = vpop.permute.xlu1 %8438 }
 0x34d   : > { %v13542_v9 = vsel %vm1811_vm2, %v17769_v26, %v1901_v31  ;;  %8768 = vrot.lane.b32.xlu1 %v17770_v14, %s9915_s29  ;;  %v2395_v58 = vrot.slane %v17728_v62, 7  ;;  %v8436_v47 = vunpack.i.h.bf16 %v17771_v20  ;;  %v8435_v60 = vunpack.i.l.bf16 %v17771_v20 }
 0x34e   : > { %v17772_v12 = vrot.slane %v17673_v55, 2  ;;  %v2397_v51 = vrot.slane %v17729_v34, 7  ;;  %v8446_v13 = vunpack.i.h.bf16 %v13040_v7  ;;  %v8445_v26 = vunpack.i.l.bf16 %v13040_v7 }
 0x34f   : > { %v8441_v49 = vunpack.i.h.bf16 %v8439_v21  ;;  %v8440_v1 = vunpack.i.l.bf16 %v8439_v21  ;;  %v17773_v14 = vpack.i.bf16 %v13283_v43, %v13231_v15  ;;  %v8451_v20 = vunpack.i.h.bf16 %v13082_v8  ;;  %v13587_v46 = vpop.permute.xlu0 %8563 }
 0x350   : > { %v13568_v31 = vsel %vm1070_vm5, %v17772_v12, %v1160_v30  ;;  %v8450_v5 = vunpack.i.l.bf16 %v13082_v8  ;;  %v2919_v12 = vsel %vm2898_vm12, %v2869_v0, %v8435_v60  ;;  %v2920_v27 = vsel %vm2898_vm12, %v2870_v2, %v8436_v47  ;;  %v17779_v60 = vld [vmem:[#allocation90_spill] sm:$0xff] }
 0x351   : > { %8808 = vrot.lane.b32.xlu0 %v17773_v14, %s9911_s23  ;;  %v17774_v24 = vpack.i.bf16 %v13294_v35, %v13288_v28  ;;  %v2969_v7 = vsel %vm2948_vm13, %v2919_v12, %v8440_v1  ;;  %v2970_v21 = vsel %vm2948_vm13, %v2920_v27, %v8441_v49  ;;  %v13592_v15 = vsel %vm1070_vm5, %v1160_v30, %v1162_v54  ;;  %v8454_v35 = vpop.permute.xlu1 %8453  ;;  %v17782_v14 = vld [vmem:[#allocation37_spill] sm:$0xff]  ;;  %v17784_v12 = vld [vmem:[#allocation36_spill] sm:$0xff] }
 0x352   : > { %v17775_v8 = vrot.slane %v17673_v55, 7  ;;  %vm17776_vm0 = vcmask 1040384   ;;  %v3019_v0 = vsel %vm2998_vm14, %v2969_v7, %v8445_v26  ;;  %v3020_v28 = vsel %vm2998_vm14, %v2970_v21, %v8446_v13 }
 0x353   : > { %8778 = vrot.lane.b32.xlu1 %v17774_v24, %s9916_s30  ;;  %vm17777_vm3 = vmmov %vm17776_vm0  ;;  %v1654_v27 = vrot.slane %v17728_v62, 4  ;;  %v8456_v2 = vunpack.i.h.bf16 %v8454_v35  ;;  %v8455_v30 = vunpack.i.l.bf16 %v8454_v35  ;;  %v17778_v47 = vpack.i.bf16 %v13304_v56, %v13299_v10  ;;  %v13628_v35 = vpop.permute.xlu0 %8573 }
 0x354   : > { %v13597_v43 = vsel %vm17776_vm0, %v17775_v8, %v2395_v58  ;;  %v13604_v24 = vsel %vm17777_vm3, %v2395_v58, %v2397_v51  ;;  %v17780_v49 = vunpack.i.l.bf16 %v17779_v60  ;;  %v17781_v13 = vunpack.i.h.bf16 %v17779_v60 }
 0x355   : > { %8818 = vrot.lane.b32.xlu0 %v17778_v47, %s9912_s24  ;;  %vm17783_vm0 = vcmask 48128   ;;  %v17786_v21 = vpack.i.bf16 %v13321_v11, %v13309_v23  ;;  %v1656_v56 = vrot.slane %v17729_v34, 4  ;;  %v8852_v23 = vpack.i.bf16 %v13555_v41, %v13542_v9 }
 0x356   : > { %v3069_v26 = vsel %vm3048_vm15, %v3019_v0, %v17780_v49  ;;  %v3070_v1 = vsel %vm3048_vm15, %v3020_v28, %v17781_v13  ;;  %v2722_v58 = vsel %vm17783_vm0, %v17782_v14, %v8451_v20  ;;  %vm17785_vm3 = vmmov %vm17783_vm0  ;;  %v17787_v28 = vld [vmem:[#allocation11_spill] sm:$0xff]  ;;  %v17788_v20 = vld [vmem:[#allocation12_spill] sm:$0xff]  ;;  %v8460_v49 = vunpack.i.l.bf16 %v13129_v29  ;;  %v8464_v13 = vpop.permute.xlu1 %8463 }
 0x357   : > { %v2721_v7 = vsel %vm17785_vm3, %v17784_v12, %v8450_v5  ;;  %8788 = vrot.lane.b32.xlu1 %v17786_v21, %s9917_s14  ;;  %v3108_v10 = vpack.c.bf16 %v3070_v1, %v3069_v26  ;;  %v2772_v8 = vsel %vm2748_vm9, %v2722_v58, %v8456_v2  ;;  %v917_v47 = vrot.slane %v17787_v28, 1 }
 0x358   : > { %v2771_v0 = vsel %vm2748_vm9, %v2721_v7, %v8455_v30  ;;  %v16955_v60 = vrot.slane %v17788_v20, 1  ;;  %v8461_v5 = vunpack.i.h.bf16 %v13129_v29  ;;  %v2148_v11 = vrot.slane %v17728_v62, 6 }
 0x359   : > { %7676 = vmatmul.mubr.msk.bf16.gmra.mxu0 %vm3158_vm4, %v3108_v10  ;;  %v8466_v2 = vunpack.i.h.bf16 %v8464_v13  ;;  %v8465_v30 = vunpack.i.l.bf16 %v8464_v13  ;;  %v17789_v26 = vpack.i.bf16 %v13371_v40, %v13361_v17  ;;  %v8837_v29 = vpack.i.bf16 %v13592_v15, %v13568_v31 }
 0x35a   : > { %7679 = vmatprep.mubr.msk.bf16.mxu0 %vm16957_vm8, %v17443_v22  ;;  %v8862_v1 = vpack.i.bf16 %v13604_v24, %v13597_v43  ;;  %v2821_v14 = vsel %vm2798_vm10, %v2771_v0, %v8460_v49  ;;  %v2822_v58 = vsel %vm2798_vm10, %v2772_v8, %v8461_v5  ;;  %v17790_v12 = vpack.i.bf16 %v13412_v37, %v13407_v50  ;;  %v13666_v8 = vpop.permute.xlu0 %8583  ;;  %v8474_v49 = vpop.permute.xlu1 %8473 }
 0x35b   : > { %8828 = vrot.lane.b32.xlu0 %v17789_v26, %s9913_s27  ;;  %v17791_v17 = vrot.slane %v17673_v55, 4  ;;  %v13662_v7 = vsel %vm1564_vm6, %v1654_v27, %v1656_v56  ;;  %v2871_v21 = vsel %vm2848_vm11, %v2821_v14, %v8465_v30  ;;  %v2872_v10 = vsel %vm2848_vm11, %v2822_v58, %v8466_v2 }
 0x35c   : > { %8803 = vrot.lane.b32.xlu1 %v17790_v12, %s9915_s29  ;;  %v17792_v0 = vrot.slane %v17729_v34, 1  ;;  %vm17793_vm0 = vcmask 1046528   ;;  %v8471_v5 = vunpack.i.h.bf16 %v13158_v38  ;;  %v13683_v13 = vsel %vm16956_vm7, %v2146_v18, %v2148_v11 }
 0x35d   : > { %v13657_v40 = vsel %vm1564_vm6, %v17791_v17, %v1654_v27  ;;  %vm17794_vm3 = vmmov %vm17793_vm0  ;;  %v8470_v27 = vunpack.i.l.bf16 %v13158_v38  ;;  %v2150_v2 = vrot.slane %v17729_v34, 6  ;;  %v8481_v30 = vunpack.i.h.bf16 %v13206_v44 }
 0x35e   : > { %v13671_v50 = vsel %vm17793_vm0, %v17792_v0, %v917_v47  ;;  %v13676_v37 = vsel %vm17794_vm3, %v917_v47, %v16955_v60  ;;  %v8480_v26 = vunpack.i.l.bf16 %v13206_v44  ;;  %v8476_v14 = vunpack.i.h.bf16 %v8474_v49  ;;  %v13702_v60 = vpop.permute.xlu0 %8588 }
 0x35f   : > { %v8475_v58 = vunpack.i.l.bf16 %v8474_v49  ;;  %v17795_v47 = vpack.i.bf16 %v13422_v16, %v13417_v36  ;;  %v8486_v38 = vunpack.i.h.bf16 %v13248_v42  ;;  %v8485_v12 = vunpack.i.l.bf16 %v13248_v42 }
 0x360   : > { %v2921_v18 = vsel %vm2898_vm12, %v2871_v21, %v8470_v27  ;;  %v2922_v17 = vsel %vm2898_vm12, %v2872_v10, %v8471_v5  ;;  %v17796_v0 = vpack.i.bf16 %v13463_v53, %v13449_v19  ;;  %v1411_v36 = vrot.slane %v17787_v28, 3  ;;  %v8489_v10 = vpop.permute.xlu1 %8488 }
 0x361   : > { %8833 = vrot.lane.b32.xlu0 %v17795_v47, %s9914_s28  ;;  %v2971_v44 = vsel %vm2948_vm13, %v2921_v18, %v8475_v58  ;;  %v2972_v49 = vsel %vm2948_vm13, %v2922_v17, %v8476_v14  ;;  %v1413_v16 = vrot.slane %v17788_v20, 3  ;;  %v1164_v5 = vrot.slane %v17787_v28, 2  ;;  %v17798_v58 = vld [vmem:[#allocation93_spill] sm:$0xff]  ;;  %v17801_v17 = vld [vmem:[#allocation39_spill] sm:$0xff] }
 0x362   : > { %8813 = vrot.lane.b32.xlu1 %v17796_v0, %s9916_s30  ;;  %v3021_v42 = vsel %vm2998_vm14, %v2971_v44, %v8480_v26  ;;  %v3022_v21 = vsel %vm2998_vm14, %v2972_v49, %v8481_v30  ;;  %v1166_v19 = vrot.slane %v17788_v20, 2  ;;  %v8491_v53 = vunpack.i.h.bf16 %v8489_v10  ;;  %v17803_v44 = vld [vmem:[#allocation38_spill] sm:$0xff] }
 0x363   : > { %v8490_v27 = vunpack.i.l.bf16 %v8489_v10  ;;  %v17797_v14 = vpack.i.bf16 %v13489_v59, %v13468_v45  ;;  %v17799_v47 = vunpack.i.l.bf16 %v17798_v58  ;;  %v17800_v26 = vunpack.i.h.bf16 %v17798_v58 }
 0x364   : > { %vm17802_vm0 = vcmask 48128   ;;  %v17805_v10 = vpack.i.bf16 %v13523_v32, %v13518_v25  ;;  %v2151_v59 = vsel %vm16956_vm7, %v2148_v11, %v2150_v2  ;;  %v13743_v25 = vsel %vm1317_vm1, %v1411_v36, %v1413_v16  ;;  %v8499_v58 = vpop.permute.xlu1 %8498 }
 0x365   : > { %8843 = vrot.lane.b32.xlu0 %v17797_v14, %s9911_s23  ;;  %v3071_v18 = vsel %vm3048_vm15, %v3021_v42, %v17799_v47  ;;  %v3072_v30 = vsel %vm3048_vm15, %v3022_v21, %v17800_v26  ;;  %v2724_v0 = vsel %vm17802_vm0, %v17801_v17, %v8486_v38  ;;  %vm17804_vm3 = vmmov %vm17802_vm0  ;;  %v13733_v14 = vpop.permute.xlu0 %8598  ;;  %v17806_v38 = vrot.slane %v17729_v34, 3 }
 0x366   : > { %v2723_v49 = vsel %vm17804_vm3, %v17803_v44, %v8485_v12  ;;  %8823 = vrot.lane.b32.xlu1 %v17805_v10, %s9917_s14  ;;  %v3109_v45 = vpack.c.bf16 %v3072_v30, %v3071_v18  ;;  %v2774_v42 = vsel %vm2748_vm9, %v2724_v0, %v8491_v53  ;;  %v8496_v32 = vunpack.i.h.bf16 %v13278_v57  ;;  %vm17813_vm3 = vmmov %vm17802_vm0 }
 0x367   : > { %v2773_v21 = vsel %vm2748_vm9, %v2723_v49, %v8490_v27  ;;  %v13738_v12 = vsel %vm1317_vm1, %v17806_v38, %v1411_v36  ;;  %v8495_v11 = vunpack.i.l.bf16 %v13278_v57  ;;  %v13751_v53 = vsel %vm1070_vm5, %v1162_v54, %v1164_v5 }
 0x368   : > { %7680 = vmatmul.mubr.msk.bf16.gmra.mxu0 %vm3158_vm4, %v3109_v45  ;;  %v13756_v27 = vsel %vm1070_vm5, %v1164_v5, %v1166_v19  ;;  %v8501_v47 = vunpack.i.h.bf16 %v8499_v58  ;;  %v8500_v36 = vunpack.i.l.bf16 %v8499_v58  ;;  %v8847_v57 = vpack.i.bf16 %v13662_v7, %v13657_v40  ;;  %v8509_v15 = vpop.permute.xlu1 %8508  ;;  %v17808_v58 = vld [vmem:[#allocation99_spill] sm:$0xff] }
 0x369   : > { %8853 = vrot.lane.b32.xlu0 %v8852_v23, %s9912_s24  ;;  %v8867_v18 = vpack.i.bf16 %v13676_v37, %v13671_v50  ;;  %7683 = vmatprep.mubr.msk.bf16.mxu0 %vm16957_vm8, %v17443_v22  ;;  %v2823_v54 = vsel %vm2798_vm10, %v2773_v21, %v8495_v11  ;;  %v2824_v5 = vsel %vm2798_vm10, %v2774_v42, %v8496_v32  ;;  %v13779_v7 = vpop.permute.xlu0 %8608  ;;  %v1905_v37 = vrot.slane %v17787_v28, 5 }
 0x36a   : > { %8838 = vrot.lane.b32.xlu1 %v8837_v29, %s9915_s29  ;;  %v8857_v9 = vpack.i.bf16 %v2151_v59, %v13683_v13  ;;  %v8877_v41 = vpack.i.bf16 %v13743_v25, %v13738_v12  ;;  %v2873_v23 = vsel %vm2848_vm11, %v2823_v54, %v8500_v36  ;;  %v2874_v40 = vsel %vm2848_vm11, %v2824_v5, %v8501_v47  ;;  %v17812_v5 = vld [vmem:[#allocation40_spill] sm:$0xff] }
 0x36b   : > { %v8872_v50 = vpack.i.bf16 %v13756_v27, %v13751_v53  ;;  %v8506_v26 = vunpack.i.h.bf16 %v13335_v39  ;;  %v8505_v31 = vunpack.i.l.bf16 %v13335_v39  ;;  %v1907_v29 = vrot.slane %v17788_v20, 5 }
 0x36c   : > { %v1658_v13 = vrot.slane %v17787_v28, 4  ;;  %v8516_v30 = vunpack.i.h.bf16 %v13366_v33  ;;  %v8515_v17 = vunpack.i.l.bf16 %v13366_v33  ;;  %v8511_v0 = vunpack.i.h.bf16 %v8509_v15 }
 0x36d   : > { %v8510_v44 = vunpack.i.l.bf16 %v8509_v15  ;;  %8863 = vrot.lane.b32.xlu0 %v8862_v1, %s9913_s27  ;;  %v8521_v49 = vunpack.i.h.bf16 %v13398_v48  ;;  %v8520_v39 = vunpack.i.l.bf16 %v13398_v48  ;;  %v2923_v10 = vsel %vm2898_vm12, %v2873_v23, %v8505_v31  ;;  %v13801_v42 = vpop.permute.xlu0 %8618  ;;  %v8524_v1 = vpop.permute.xlu1 %8523 }
 0x36e   : > { %v2924_v45 = vsel %vm2898_vm12, %v2874_v40, %v8506_v26  ;;  %8848 = vrot.lane.b32.xlu1 %v8847_v57, %s9916_s30  ;;  %v1660_v21 = vrot.slane %v17788_v20, 4  ;;  %v2399_v43 = vrot.slane %v17787_v28, 7  ;;  %v17807_v38 = vrot.slane %v17729_v34, 5  ;;  %v17811_v57 = vld [vmem:[#allocation41_spill] sm:$0xff] }
 0x36f   : > { %v2973_v59 = vsel %vm2948_vm13, %v2923_v10, %v8510_v44  ;;  %v2974_v33 = vsel %vm2948_vm13, %v2924_v45, %v8511_v0  ;;  %v2401_v25 = vrot.slane %v17788_v20, 7  ;;  %v8526_v32 = vunpack.i.h.bf16 %v8524_v1 }
 0x370   : > { %v3023_v24 = vsel %vm2998_vm14, %v2973_v59, %v8515_v17  ;;  %v3024_v48 = vsel %vm2998_vm14, %v2974_v33, %v8516_v30  ;;  %v1906_v12 = vsel %vm1811_vm2, %v17807_v38, %v1905_v37  ;;  %v8525_v11 = vunpack.i.l.bf16 %v8524_v1 }
 0x371   : > { %8868 = vrot.lane.b32.xlu0 %v8867_v18, %s9914_s28  ;;  %v17809_v53 = vunpack.i.l.bf16 %v17808_v58  ;;  %v17810_v47 = vunpack.i.h.bf16 %v17808_v58  ;;  %v2726_v54 = vsel %vm17802_vm0, %v17811_v57, %v8521_v49  ;;  %v2725_v23 = vsel %vm17813_vm3, %v17812_v5, %v8520_v39  ;;  %v13828_v15 = vpop.permute.xlu0 %8623  ;;  %v8534_v44 = vpop.permute.xlu1 %8533  ;;  %v17814_v39 = vld [vmem:[#allocation64_spill] sm:$0xff] }
 0x372   : > { %8858 = vrot.lane.b32.xlu1 %v8857_v9, %s9917_s14  ;;  %v1908_v18 = vsel %vm1811_vm2, %v1905_v37, %v1907_v29  ;;  %v2776_v26 = vsel %vm2748_vm9, %v2726_v54, %v8526_v32  ;;  %v2775_v31 = vsel %vm2748_vm9, %v2725_v23, %v8525_v11  ;;  %v1659_v30 = vsel %vm1564_vm6, %v1656_v56, %v1658_v13 }
 0x373   : > { %v3073_v27 = vsel %vm3048_vm15, %v3023_v24, %v17809_v53  ;;  %v3074_v36 = vsel %vm3048_vm15, %v3024_v48, %v17810_v47  ;;  %v1661_v17 = vsel %vm1564_vm6, %v1658_v13, %v1660_v21  ;;  %v8531_v9 = vunpack.i.h.bf16 %v13442_v52 }
 0x374   : > { %v3110_v40 = vpack.c.bf16 %v3074_v36, %v3073_v27  ;;  %v8530_v0 = vunpack.i.l.bf16 %v13442_v52  ;;  %v2152_v37 = vrot.slane %v17787_v28, 6  ;;  %v2154_v49 = vrot.slane %v17788_v20, 6 }
 0x375   : > { %v8016_v10 = vunpack.i.h.bf16 %v17814_v39  ;;  %v8015_v45 = vunpack.i.l.bf16 %v17814_v39  ;;  %v8536_v56 = vunpack.i.h.bf16 %v8534_v44  ;;  %v8535_v59 = vunpack.i.l.bf16 %v8534_v44  ;;  %8878 = vrot.lane.b32.xlu0 %v8877_v41, %s9911_s23  ;;  %v13851_v38 = vpop.permute.xlu0 %8633 }
 0x376   : > { %7684 = vmatmul.mubr.msk.bf16.gmra.mxu0 %vm3158_vm4, %v3110_v40  ;;  %v2825_v52 = vsel %vm2798_vm10, %v2775_v31, %v8530_v0  ;;  %v2826_v13 = vsel %vm2798_vm10, %v2776_v26, %v8531_v9  ;;  %8873 = vrot.lane.b32.xlu1 %v8872_v50, %s9915_s29  ;;  %v8887_v33 = vpack.i.bf16 %v1908_v18, %v1906_v12  ;;  %vm17815_vm0 = vcmask 1040384   ;;  %v8544_v12 = vpop.permute.xlu1 %8543  ;;  %v17817_v40 = vld [vmem:[#allocation13_spill] sm:$0xff] }
 0x377   : > { %7687 = vmatprep.mubr.msk.bf16.mxu0 %vm16957_vm8, %v17443_v22  ;;  %v8882_v24 = vpack.i.bf16 %v1661_v17, %v1659_v30  ;;  %v2875_v48 = vsel %vm2848_vm11, %v2825_v52, %v8535_v59  ;;  %v2876_v1 = vsel %vm2848_vm11, %v2826_v13, %v8536_v56  ;;  %v2400_v41 = vsel %vm17815_vm0, %v2397_v51, %v2399_v43  ;;  %vm17816_vm3 = vmmov %vm17815_vm0  ;;  %v17820_v56 = vld [vmem:[#allocation42_spill] sm:$0xff] }
 0x378   : > { %v2402_v32 = vsel %vm17816_vm3, %v2399_v43, %v2401_v25  ;;  %v8541_v11 = vunpack.i.h.bf16 %v13480_v3  ;;  %v8540_v50 = vunpack.i.l.bf16 %v13480_v3  ;;  %v2153_v58 = vsel %vm16956_vm7, %v2150_v2, %v2152_v37 }
 0x379   : > { %v2155_v53 = vsel %vm16956_vm7, %v2152_v37, %v2154_v49  ;;  %v8551_v27 = vunpack.i.h.bf16 %v13513_v4  ;;  %v8550_v51 = vunpack.i.l.bf16 %v13513_v4  ;;  %v8546_v47 = vunpack.i.h.bf16 %v8544_v12  ;;  %8888 = vrot.lane.b32.xlu0 %v8887_v33, %s9912_s24  ;;  %v13877_v23 = vpop.permute.xlu0 %8643  ;;  %v17818_v37 = vld [vmem:[#allocation43_spill] sm:$0xff] }
 0x37a   : > { %v8545_v36 = vunpack.i.l.bf16 %v8544_v12  ;;  %v8556_v43 = vunpack.i.h.bf16 %v13559_v63  ;;  %v8555_v3 = vunpack.i.l.bf16 %v13559_v63  ;;  %v2925_v57 = vsel %vm2898_vm12, %v2875_v48, %v8540_v50  ;;  %8883 = vrot.lane.b32.xlu1 %v8882_v24, %s9916_s30  ;;  %v8559_v63 = vpop.permute.xlu1 %8558 }
 0x37b   : > { %v2926_v2 = vsel %vm2898_vm12, %v2876_v1, %v8541_v11  ;;  %v8897_v4 = vpack.i.bf16 %v2402_v32, %v2400_v41  ;;  %v921_v18 = vrot.slane %v17817_v40, 1  ;;  %v8892_v30 = vpack.i.bf16 %v2155_v53, %v2153_v58  ;;  %v17824_v53 = vld [vmem:[#allocation106_spill] sm:$0xff] }
 0x37c   : > { %v2975_v54 = vsel %vm2948_vm13, %v2925_v57, %v8545_v36  ;;  %v2976_v5 = vsel %vm2948_vm13, %v2926_v2, %v8546_v47  ;;  %v8561_v17 = vunpack.i.h.bf16 %v8559_v63  ;;  %v8560_v9 = vunpack.i.l.bf16 %v8559_v63 }
 0x37d   : > { %v3025_v26 = vsel %vm2998_vm14, %v2975_v54, %v8550_v51  ;;  %v3026_v31 = vsel %vm2998_vm14, %v2976_v5, %v8551_v27  ;;  %8898 = vrot.lane.b32.xlu0 %v8897_v4, %s9913_s27  ;;  %vm17819_vm0 = vcmask 48128   ;;  %v13892_v24 = vpop.permute.xlu0 %8653  ;;  %v17822_v48 = vrot.slane %v17788_v20, 1 }
 0x37e   : > { %v3075_v0 = vsel %vm3048_vm15, %v3025_v26, %v8015_v45  ;;  %v3076_v44 = vsel %vm3048_vm15, %v3026_v31, %v8016_v10  ;;  %v2728_v39 = vsel %vm17819_vm0, %v17818_v37, %v8556_v43  ;;  %vm17821_vm3 = vmmov %vm17819_vm0  ;;  %8893 = vrot.lane.b32.xlu1 %v8892_v30, %s9917_s14  ;;  %vm17823_vm7 = vcmask 1046528   ;;  %v8569_v32 = vpop.permute.xlu1 %8568 }
 0x37f   : > { %v2727_v59 = vsel %vm17821_vm3, %v17820_v56, %v8555_v3  ;;  %v3111_v52 = vpack.c.bf16 %v3076_v44, %v3075_v0  ;;  %v2778_v13 = vsel %vm2748_vm9, %v2728_v39, %v8561_v17  ;;  %v922_v45 = vsel %vm17823_vm7, %v17822_v48, %v921_v18  ;;  %vm17826_vm7 = vmmov %vm17819_vm0 }
 0x380   : > { %v2777_v33 = vsel %vm2748_vm9, %v2727_v59, %v8560_v9  ;;  %v8902_v10 = vpack.i.bf16 %v17788_v20, %v17787_v28  ;;  %v8566_v1 = vunpack.i.h.bf16 %v13587_v46  ;;  %v8565_v41 = vunpack.i.l.bf16 %v13587_v46 }
 0x381   : > { %7688 = vmatmul.mubr.msk.bf16.gmra.mxu0 %vm3158_vm4, %v3111_v52  ;;  %v1415_v11 = vrot.slane %v17817_v40, 3  ;;  %v1168_v50 = vrot.slane %v17817_v40, 2  ;;  %v8571_v12 = vunpack.i.h.bf16 %v8569_v32  ;;  %v8570_v58 = vunpack.i.l.bf16 %v8569_v32  ;;  %1019 = vrot.lane.b32.xlu0 %v922_v45, %s9914_s28  ;;  %v13914_v3 = vpop.permute.xlu0 %8658  ;;  %s9923_s28 = smov 40  }
 0x382   : > { %7691 = vmatprep.mubr.msk.bf16.mxu0 %vm16957_vm8, %v17443_v22  ;;  %v8021_v27 = vunpack.i.h.bf16 %v17824_v53  ;;  %v8020_v51 = vunpack.i.l.bf16 %v17824_v53  ;;  %v2827_v46 = vsel %vm2798_vm10, %v2777_v33, %v8565_v41  ;;  %v2828_v47 = vsel %vm2798_vm10, %v2778_v13, %v8566_v1  ;;  %8903 = vrot.lane.b32.xlu1 %v8902_v10, %s9910_s22  ;;  %v8579_v4 = vpop.permute.xlu1 %8578  ;;  %v17825_v10 = vld [vmem:[#allocation45_spill] sm:$0xff]  ;;  %v17827_v1 = vld [vmem:[#allocation44_spill] sm:$0xff] }
 0x383   : > { %v2877_v36 = vsel %vm2848_vm11, %v2827_v46, %v8570_v58  ;;  %v2878_v43 = vsel %vm2848_vm11, %v2828_v47, %v8571_v12  ;;  %v1909_v57 = vrot.slane %v17817_v40, 5  ;;  %v1662_v2 = vrot.slane %v17817_v40, 4 }
 0x384   : > { %v8576_v54 = vunpack.i.h.bf16 %v13628_v35  ;;  %v8575_v5 = vunpack.i.l.bf16 %v13628_v35  ;;  %v1416_v18 = vsel %vm1317_vm1, %v1413_v16, %v1415_v11  ;;  %v1169_v26 = vsel %vm1070_vm5, %v1166_v19, %v1168_v50 }
 0x385   : > { %v8586_v31 = vunpack.i.h.bf16 %v13666_v8  ;;  %v8585_v63 = vunpack.i.l.bf16 %v13666_v8  ;;  %v8581_v30 = vunpack.i.h.bf16 %v8579_v4  ;;  %v8580_v17 = vunpack.i.l.bf16 %v8579_v4  ;;  %1513 = vrot.lane.b32.xlu0 %v1416_v18, %s9911_s23  ;;  %v13936_v37 = vpop.permute.xlu0 %8668  ;;  %s9922_s23 = smov 32  }
 0x386   : > { %v8591_v9 = vunpack.i.h.bf16 %v13702_v60  ;;  %v8590_v35 = vunpack.i.l.bf16 %v13702_v60  ;;  %v2927_v0 = vsel %vm2898_vm12, %v2877_v36, %v8575_v5  ;;  %v2928_v16 = vsel %vm2898_vm12, %v2878_v43, %v8576_v54  ;;  %1266 = vrot.lane.b32.xlu1 %v1169_v26, %s9915_s29  ;;  %v8594_v59 = vpop.permute.xlu1 %8593  ;;  %s9925_s29 = smov 112  }
 0x387   : > { %v2977_v19 = vsel %vm2948_vm13, %v2927_v0, %v8580_v17  ;;  %v2978_v44 = vsel %vm2948_vm13, %v2928_v16, %v8581_v30  ;;  %v1910_v8 = vsel %vm1811_vm2, %v1907_v29, %v1909_v57  ;;  %v1663_v60 = vsel %vm1564_vm6, %v1660_v21, %v1662_v2 }
 0x388   : > { %v3027_v39 = vsel %vm2998_vm14, %v2977_v19, %v8585_v63  ;;  %v3028_v56 = vsel %vm2998_vm14, %v2978_v44, %v8586_v31  ;;  %v2403_v52 = vrot.slane %v17817_v40, 7  ;;  %v2156_v13 = vrot.slane %v17817_v40, 6 }
 0x389   : > { %v8596_v33 = vunpack.i.h.bf16 %v8594_v59  ;;  %v8595_v48 = vunpack.i.l.bf16 %v8594_v59  ;;  %2007 = vrot.lane.b32.xlu0 %v1910_v8, %s9912_s24  ;;  %v3077_v45 = vsel %vm3048_vm15, %v3027_v39, %v8020_v51  ;;  %v3078_v29 = vsel %vm3048_vm15, %v3028_v56, %v8021_v27  ;;  %v13958_v12 = vpop.permute.xlu0 %8678  ;;  %v17831_v59 = vld [vmem:[#allocation47_spill] sm:$0xff] }
 0x38a   : > { %v2730_v21 = vsel %vm17826_vm7, %v17825_v10, %v8591_v9  ;;  %v2729_v41 = vsel %vm17819_vm0, %v17827_v1, %v8590_v35  ;;  %1760 = vrot.lane.b32.xlu1 %v1663_v60, %s9916_s30  ;;  %v3112_v32 = vpack.c.bf16 %v3078_v29, %v3077_v45  ;;  %v8601_v58 = vunpack.i.h.bf16 %v13733_v14  ;;  %v8604_v27 = vpop.permute.xlu1 %8603  ;;  %v17830_v35 = vld [vmem:[#allocation108_spill] sm:$0xff] }
 0x38b   : > { %v2780_v11 = vsel %vm2748_vm9, %v2730_v21, %v8596_v33  ;;  %v2779_v50 = vsel %vm2748_vm9, %v2729_v41, %v8595_v48  ;;  %v8600_v53 = vunpack.i.l.bf16 %v13733_v14  ;;  %vm17828_vm3 = vcmask 1040384  }
 0x38c   : > { %7692 = vmatmul.mubr.msk.bf16.gmra.mxu0 %vm3158_vm4, %v3112_v32  ;;  %v2404_v51 = vsel %vm17828_vm3, %v2401_v25, %v2403_v52  ;;  %v8606_v46 = vunpack.i.h.bf16 %v8604_v27  ;;  %v8605_v47 = vunpack.i.l.bf16 %v8604_v27  ;;  %vm17829_vm7 = vcmask 1041408   ;;  %vm17833_vm3 = vmmov %vm17819_vm0 }
 0x38d   : > { %2501 = vrot.lane.b32.xlu0 %v2404_v51, %s9913_s27  ;;  %v2157_v36 = vsel %vm17829_vm7, %v2154_v49, %v2156_v13  ;;  %7695 = vmatprep.mubr.msk.bf16.mxu0 %vm16957_vm8, %v17443_v22  ;;  %v2829_v14 = vsel %vm2798_vm10, %v2779_v50, %v8600_v53  ;;  %v2830_v43 = vsel %vm2798_vm10, %v2780_v11, %v8601_v58  ;;  %v13977_v2 = vpop.permute.xlu0 %8688  ;;  %v8611_v54 = vunpack.i.h.bf16 %v13779_v7  ;;  %v17832_v13 = vld [vmem:[#allocation46_spill] sm:$0xff]  ;;  %vm17836_vm7 = vmmov %vm17819_vm0  ;;  %s9924_s27 = smov 120  }
 0x38e   : > { %2254 = vrot.lane.b32.xlu1 %v2157_v36, %s9917_s14  ;;  %v2879_v57 = vsel %vm2848_vm11, %v2829_v14, %v8605_v47  ;;  %v2880_v25 = vsel %vm2848_vm11, %v2830_v43, %v8606_v46  ;;  %v8610_v5 = vunpack.i.l.bf16 %v13779_v7  ;;  %v8614_v49 = vpop.permute.xlu1 %8613  ;;  %v8621_v4 = vunpack.i.h.bf16 %v13801_v42 }
 0x38f   : > { %v8620_v18 = vunpack.i.l.bf16 %v13801_v42  ;;  %v8616_v26 = vunpack.i.h.bf16 %v8614_v49  ;;  %v8615_v31 = vunpack.i.l.bf16 %v8614_v49  ;;  %v8626_v63 = vunpack.i.h.bf16 %v13828_v15 }
 0x390   : > { %v8625_v30 = vunpack.i.l.bf16 %v13828_v15  ;;  %v2929_v17 = vsel %vm2898_vm12, %v2879_v57, %v8610_v5  ;;  %v2930_v9 = vsel %vm2898_vm12, %v2880_v25, %v8611_v54  ;;  %v8026_v7 = vunpack.i.h.bf16 %v17830_v35 }
 0x391   : > { %v8025_v0 = vunpack.i.l.bf16 %v17830_v35  ;;  %v2979_v16 = vsel %vm2948_vm13, %v2929_v17, %v8615_v31  ;;  %v2980_v42 = vsel %vm2948_vm13, %v2930_v9, %v8616_v26  ;;  %v13993_v19 = vpop.permute.xlu0 %8693  ;;  %v2732_v52 = vsel %vm17819_vm0, %v17831_v59, %v8626_v63 }
 0x392   : > { %2648 = vrot.lane.b32.xlu1 %v17817_v40, %s9910_s22  ;;  %v3029_v44 = vsel %vm2998_vm14, %v2979_v16, %v8620_v18  ;;  %v3030_v15 = vsel %vm2998_vm14, %v2980_v42, %v8621_v4  ;;  %v8629_v8 = vpop.permute.xlu1 %8628  ;;  %v2731_v33 = vsel %vm17833_vm3, %v17832_v13, %v8625_v30  ;;  %v8636_v21 = vunpack.i.h.bf16 %v13851_v38  ;;  %v17834_v4 = vld [vmem:[#allocation112_spill] sm:$0xff]  ;;  %vm17840_vm3 = vmmov %vm17819_vm0 }
 0x393   : > { %v8631_v60 = vunpack.i.h.bf16 %v8629_v8  ;;  %v8630_v39 = vunpack.i.l.bf16 %v8629_v8  ;;  %v3079_v56 = vsel %vm3048_vm15, %v3029_v44, %v8025_v0  ;;  %v3080_v40 = vsel %vm3048_vm15, %v3030_v15, %v8026_v7  ;;  %v17835_v0 = vld [vmem:[#allocation49_spill] sm:$0xff]  ;;  %v17837_v42 = vld [vmem:[#allocation48_spill] sm:$0xff] }
 0x394   : > { %v3113_v48 = vpack.c.bf16 %v3080_v40, %v3079_v56  ;;  %v8635_v1 = vunpack.i.l.bf16 %v13851_v38  ;;  %v8646_v38 = vunpack.i.h.bf16 %v13877_v23  ;;  %v8645_v46 = vunpack.i.l.bf16 %v13877_v23 }
 0x395   : > { %v2782_v45 = vsel %vm2748_vm9, %v2732_v52, %v8631_v60  ;;  %v2781_v29 = vsel %vm2748_vm9, %v2731_v33, %v8630_v39  ;;  %v14005_v10 = vpop.permute.xlu0 %8703  ;;  %v8656_v36 = vunpack.i.h.bf16 %v13892_v24  ;;  %v8655_v14 = vunpack.i.l.bf16 %v13892_v24  ;;  %v14046_v52 = vpop.f32.mrf.mxu0 }
 0x396   : > { %v8639_v41 = vpop.permute.xlu1 %8638  ;;  %7696 = vmatmul.mubr.msk.bf16.gmra.mxu0 %vm3158_vm4, %v3113_v48  ;;  %v2831_v50 = vsel %vm2798_vm10, %v2781_v29, %v8635_v1  ;;  %v2832_v58 = vsel %vm2798_vm10, %v2782_v45, %v8636_v21  ;;  %v8661_v25 = vunpack.i.h.bf16 %v13914_v3  ;;  %v8660_v54 = vunpack.i.l.bf16 %v13914_v3 }
 0x397   : > { %v8641_v32 = vunpack.i.h.bf16 %v8639_v41  ;;  %v8640_v11 = vunpack.i.l.bf16 %v8639_v41  ;;  %7699 = vmatprep.mubr.msk.bf16.mxu0 %vm16957_vm8, %v17443_v22  ;;  %v8031_v18 = vunpack.i.h.bf16 %v17834_v4  ;;  %v8030_v26 = vunpack.i.l.bf16 %v17834_v4  ;;  %v7637_v29 = vpop.f32.mrf.mxu0 }
 0x398   : > { %v2734_v16 = vsel %vm17836_vm7, %v17835_v0, %v8661_v25  ;;  %v2733_v44 = vsel %vm17819_vm0, %v17837_v42, %v8660_v54  ;;  %v8671_v56 = vunpack.i.h.bf16 %v13936_v37  ;;  %v8670_v40 = vunpack.i.l.bf16 %v13936_v37  ;;  %vm17842_vm7 = vmmov %vm17819_vm0 }
 0x399   : > { %v2881_v53 = vsel %vm2848_vm11, %v2831_v50, %v8640_v11  ;;  %v2882_v27 = vsel %vm2848_vm11, %v2832_v58, %v8641_v32  ;;  %v14016_v51 = vpop.permute.xlu0 %8713  ;;  %v8681_v41 = vunpack.i.h.bf16 %v13958_v12  ;;  %v8680_v32 = vunpack.i.l.bf16 %v13958_v12  ;;  %v14059_v50 = vpop.f32.mrf.mxu0 }
 0x39a   : > { %v8649_v47 = vpop.permute.xlu1 %8648  ;;  %v2931_v5 = vsel %vm2898_vm12, %v2881_v53, %v8645_v46  ;;  %v2932_v49 = vsel %vm2898_vm12, %v2882_v27, %v8646_v38  ;;  %v8691_v58 = vunpack.i.h.bf16 %v13977_v2  ;;  %v8690_v53 = vunpack.i.l.bf16 %v13977_v2 }
 0x39b   : > { %v8651_v43 = vunpack.i.h.bf16 %v8649_v47  ;;  %v8650_v57 = vunpack.i.l.bf16 %v8649_v47  ;;  %v8696_v46 = vunpack.i.h.bf16 %v13993_v19  ;;  %v8695_v47 = vunpack.i.l.bf16 %v13993_v19 }
 0x39c   : > { %v8705_v42 = vunpack.i.l.bf16 %v14005_v10 }
 0x39d   : > { %v2981_v23 = vsel %vm2948_vm13, %v2931_v5, %v8650_v57  ;;  %v2982_v31 = vsel %vm2948_vm13, %v2932_v49, %v8651_v43  ;;  %v14030_v63 = vpop.permute.xlu0 %8723  ;;  %v7638_v43 = vpop.f32.mrf.mxu0  ;;  %v17838_v57 = vld [vmem:[#allocation73_spill] sm:$0xff] }
 0x39e   : > { %v3031_v24 = vsel %vm2998_vm14, %v2981_v23, %v8655_v14  ;;  %v3032_v30 = vsel %vm2998_vm14, %v2982_v31, %v8656_v36  ;;  %v8664_v17 = vpop.permute.xlu1 %8663  ;;  %v8035_v12 = vunpack.i.l.bf16 %v17838_v57  ;;  %v8036_v2 = vunpack.i.h.bf16 %v17838_v57  ;;  %v17839_v31 = vld [vmem:[#allocation51_spill] sm:$0xff] }
 0x39f   : > { %v8666_v3 = vunpack.i.h.bf16 %v8664_v17  ;;  %v8665_v9 = vunpack.i.l.bf16 %v8664_v17  ;;  %v3081_v35 = vsel %vm3048_vm15, %v3031_v24, %v8030_v26  ;;  %v3082_v7 = vsel %vm3048_vm15, %v3032_v30, %v8031_v18  ;;  %v17841_v30 = vld [vmem:[#allocation50_spill] sm:$0xff] }
 0x3a0   : > { %v3114_v15 = vpack.c.bf16 %v3082_v7, %v3081_v35  ;;  %v2736_v24 = vsel %vm17840_vm3, %v17839_v31, %v8696_v46  ;;  %v2735_v17 = vsel %vm17842_vm7, %v17841_v30, %v8695_v47  ;;  %v17843_v47 = vld [vmem:[#allocation84_spill] sm:$0xff]  ;;  %vm17846_vm3 = vmmov %vm17819_vm0 }
 0x3a1   : > { %v2784_v8 = vsel %vm2748_vm9, %v2734_v16, %v8666_v3  ;;  %v2783_v60 = vsel %vm2748_vm9, %v2733_v44, %v8665_v9  ;;  %v14042_v39 = vpop.permute.xlu0 %8728  ;;  %v8706_v16 = vunpack.i.h.bf16 %v14005_v10  ;;  %vm17849_vm7 = vmmov %vm17819_vm0 }
 0x3a2   : > { %v8674_v59 = vpop.permute.xlu1 %8673  ;;  %7700 = vmatmul.mubr.msk.bf16.gmra.mxu0 %vm3158_vm4, %v3114_v15  ;;  %v2833_v48 = vsel %vm2798_vm10, %v2783_v60, %v8670_v40  ;;  %v2834_v45 = vsel %vm2798_vm10, %v2784_v8, %v8671_v56  ;;  %v14087_v15 = vpop.f32.mrf.mxu0 }
 0x3a3   : > { %v8676_v13 = vunpack.i.h.bf16 %v8674_v59  ;;  %v8675_v33 = vunpack.i.l.bf16 %v8674_v59  ;;  %7703 = vmatprep.mubr.msk.bf16.mxu0 %vm16957_vm8, %v17443_v22 }
 0x3a4   : > { %v7641_v59 = vpop.f32.mrf.mxu0 }
 0x3a5   : > { %v2883_v21 = vsel %vm2848_vm11, %v2833_v48, %v8675_v33  ;;  %v2884_v1 = vsel %vm2848_vm11, %v2834_v45, %v8676_v13  ;;  %v14055_v37 = vpop.permute.xlu0 %8738  ;;  %v8716_v48 = vunpack.i.h.bf16 %v14016_v51  ;;  %v8715_v45 = vunpack.i.l.bf16 %v14016_v51 }
 0x3a6   : > { %v8684_v11 = vpop.permute.xlu1 %8683  ;;  %v2933_v36 = vsel %vm2898_vm12, %v2883_v21, %v8680_v32  ;;  %v2934_v14 = vsel %vm2898_vm12, %v2884_v1, %v8681_v41  ;;  %v14100_v21 = vpop.f32.mrf.mxu0  ;;  %v8726_v1 = vunpack.i.h.bf16 %v14030_v63  ;;  %v8725_v41 = vunpack.i.l.bf16 %v14030_v63 }
 0x3a7   : > { %v8686_v27 = vunpack.i.h.bf16 %v8684_v11  ;;  %v8685_v38 = vunpack.i.l.bf16 %v8684_v11  ;;  %v8040_v51 = vunpack.i.l.bf16 %v17843_v47  ;;  %v8041_v63 = vunpack.i.h.bf16 %v17843_v47 }
 0x3a8   : > { %v7642_v46 = vpop.f32.mrf.mxu0 }
 0x3a9   : > { %v2983_v25 = vsel %vm2948_vm13, %v2933_v36, %v8685_v38  ;;  %v2984_v54 = vsel %vm2948_vm13, %v2934_v14, %v8686_v27  ;;  %v14070_v5 = vpop.permute.xlu0 %8748 }
 0x3aa   : > { %v3033_v49 = vsel %vm2998_vm14, %v2983_v25, %v8690_v53  ;;  %v3034_v4 = vsel %vm2998_vm14, %v2984_v54, %v8691_v58  ;;  %v8699_v19 = vpop.permute.xlu1 %8698  ;;  %v8731_v58 = vunpack.i.h.bf16 %v14042_v39  ;;  %v8730_v53 = vunpack.i.l.bf16 %v14042_v39 }
 0x3ab   : > { %v8701_v18 = vunpack.i.h.bf16 %v8699_v19  ;;  %v8700_v26 = vunpack.i.l.bf16 %v8699_v19  ;;  %v3083_v23 = vsel %vm3048_vm15, %v3033_v49, %v8035_v12  ;;  %v3084_v3 = vsel %vm3048_vm15, %v3034_v4, %v8036_v2  ;;  %v17844_v49 = vld [vmem:[#allocation3_spill] sm:$0xff]  ;;  %v17845_v19 = vld [vmem:[#allocation52_spill] sm:$0xff] }
 0x3ac   : > { %v3115_v0 = vpack.c.bf16 %v3084_v3, %v3083_v23  ;;  %v2738_v4 = vsel %vm17819_vm0, %v17844_v49, %v8731_v58  ;;  %v8740_v3 = vunpack.i.l.bf16 %v14055_v37  ;;  %v8750_v59 = vunpack.i.l.bf16 %v14070_v5 }
 0x3ad   : > { %v2786_v9 = vsel %vm2748_vm9, %v2736_v24, %v8701_v18  ;;  %v2785_v35 = vsel %vm2748_vm9, %v2735_v17, %v8700_v26  ;;  %v14083_v7 = vpop.permute.xlu0 %8758  ;;  %v2737_v18 = vsel %vm17846_vm3, %v17845_v19, %v8730_v53  ;;  %v8741_v17 = vunpack.i.h.bf16 %v14055_v37  ;;  %vm17852_vm3 = vmmov %vm17819_vm0 }
 0x3ae   : > { %v8709_v44 = vpop.permute.xlu1 %8708  ;;  %7704 = vmatmul.mubr.msk.bf16.gmra.mxu0 %vm3158_vm4, %v3115_v0  ;;  %v2835_v56 = vsel %vm2798_vm10, %v2785_v35, %v8705_v42  ;;  %v2836_v40 = vsel %vm2798_vm10, %v2786_v9, %v8706_v16  ;;  %v14128_v35 = vpop.f32.mrf.mxu0 }
 0x3af   : > { %v8711_v8 = vunpack.i.h.bf16 %v8709_v44  ;;  %v8710_v60 = vunpack.i.l.bf16 %v8709_v44  ;;  %7707 = vmatprep.mubr.msk.bf16.mxu0 %vm16957_vm8, %v17443_v22 }
 0x3b1   : > { %v2885_v13 = vsel %vm2848_vm11, %v2835_v56, %v8710_v60  ;;  %v2886_v33 = vsel %vm2848_vm11, %v2836_v40, %v8711_v8  ;;  %v14096_v10 = vpop.permute.xlu0 %8763  ;;  %v7645_v8 = vpop.f32.mrf.mxu0  ;;  %v8751_v40 = vunpack.i.h.bf16 %v14070_v5 }
 0x3b2   : > { %v8719_v29 = vpop.permute.xlu1 %8718  ;;  %v2935_v27 = vsel %vm2898_vm12, %v2885_v13, %v8715_v45  ;;  %v2936_v38 = vsel %vm2898_vm12, %v2886_v33, %v8716_v48  ;;  %v8761_v48 = vunpack.i.h.bf16 %v14083_v7  ;;  %v8760_v45 = vunpack.i.l.bf16 %v14083_v7 }
 0x3b3   : > { %v8721_v32 = vunpack.i.h.bf16 %v8719_v29  ;;  %v8720_v11 = vunpack.i.l.bf16 %v8719_v29  ;;  %v14141_v33 = vpop.f32.mrf.mxu0 }
 0x3b5   : > { %v2985_v36 = vsel %vm2948_vm13, %v2935_v27, %v8720_v11  ;;  %v2986_v14 = vsel %vm2948_vm13, %v2936_v38, %v8721_v32  ;;  %v14111_v43 = vpop.permute.xlu0 %8773  ;;  %v8765_v32 = vunpack.i.l.bf16 %v14096_v10  ;;  %v7646_v53 = vpop.f32.mrf.mxu0  ;;  %v17847_v27 = vld [vmem:[#allocation77_spill] sm:$0xff] }
 0x3b6   : > { %v3035_v57 = vsel %vm2998_vm14, %v2985_v36, %v8725_v41  ;;  %v3036_v12 = vsel %vm2998_vm14, %v2986_v14, %v8726_v1  ;;  %v8734_v39 = vpop.permute.xlu1 %8733  ;;  %v8766_v41 = vunpack.i.h.bf16 %v14096_v10  ;;  %v8045_v5 = vunpack.i.l.bf16 %v17847_v27 }
 0x3b7   : > { %v8736_v25 = vunpack.i.h.bf16 %v8734_v39  ;;  %v8735_v54 = vunpack.i.l.bf16 %v8734_v39  ;;  %v3085_v2 = vsel %vm3048_vm15, %v3035_v57, %v8040_v51  ;;  %v3086_v26 = vsel %vm3048_vm15, %v3036_v12, %v8041_v63  ;;  %v17848_v12 = vld [vmem:[#allocation5_spill] sm:$0xff] }
 0x3b8   : > { %v3116_v30 = vpack.c.bf16 %v3086_v26, %v3085_v2  ;;  %v8046_v7 = vunpack.i.h.bf16 %v17847_v27  ;;  %v2740_v39 = vsel %vm17849_vm7, %v17848_v12, %v8766_v41  ;;  %v8776_v26 = vunpack.i.h.bf16 %v14111_v43  ;;  %vm17853_vm7 = vmmov %vm17819_vm0 }
 0x3b9   : > { %v2788_v23 = vsel %vm2748_vm9, %v2738_v4, %v8736_v25  ;;  %v2787_v31 = vsel %vm2748_vm9, %v2737_v18, %v8735_v54  ;;  %v14124_v24 = vpop.permute.xlu0 %8783  ;;  %v17850_v25 = vld [vmem:[#allocation4_spill] sm:$0xff] }
 0x3ba   : > { %v8744_v9 = vpop.permute.xlu1 %8743  ;;  %7708 = vmatmul.mubr.msk.bf16.gmra.mxu0 %vm3158_vm4, %v3116_v30  ;;  %v2837_v42 = vsel %vm2798_vm10, %v2787_v31, %v8740_v3  ;;  %v2838_v44 = vsel %vm2798_vm10, %v2788_v23, %v8741_v17  ;;  %v2739_v54 = vsel %vm17819_vm0, %v17850_v25, %v8765_v32  ;;  %v8775_v23 = vunpack.i.l.bf16 %v14111_v43  ;;  %v14165_v30 = vpop.f32.mrf.mxu0 }
 0x3bb   : > { %v8746_v0 = vunpack.i.h.bf16 %v8744_v9  ;;  %v8745_v16 = vunpack.i.l.bf16 %v8744_v9  ;;  %7711 = vmatprep.mubr.msk.bf16.mxu0 %vm16957_vm8, %v17443_v22  ;;  %v8786_v8 = vunpack.i.h.bf16 %v14124_v24 }
 0x3bd   : > { %v2887_v60 = vsel %vm2848_vm11, %v2837_v42, %v8745_v16  ;;  %v2888_v56 = vsel %vm2848_vm11, %v2838_v44, %v8746_v0  ;;  %v14137_v37 = vpop.permute.xlu0 %8793  ;;  %v7649_v16 = vpop.f32.mrf.mxu0 }
 0x3be   : > { %v8754_v13 = vpop.permute.xlu1 %8753  ;;  %v2937_v11 = vsel %vm2898_vm12, %v2887_v60, %v8750_v59  ;;  %v2938_v58 = vsel %vm2898_vm12, %v2888_v56, %v8751_v40  ;;  %v8785_v60 = vunpack.i.l.bf16 %v14124_v24  ;;  %v8796_v59 = vunpack.i.h.bf16 %v14137_v37 }
 0x3bf   : > { %v8756_v29 = vunpack.i.h.bf16 %v8754_v13  ;;  %v8755_v1 = vunpack.i.l.bf16 %v8754_v13  ;;  %v14176_v40 = vpop.f32.mrf.mxu0  ;;  %v8795_v13 = vunpack.i.l.bf16 %v14137_v37 }
 0x3c1   : > { %v2987_v38 = vsel %vm2948_vm13, %v2937_v11, %v8755_v1  ;;  %v2988_v46 = vsel %vm2948_vm13, %v2938_v58, %v8756_v29  ;;  %v8799_v47 = vpop.permute.xlu0 %8798  ;;  %v7650_v11 = vpop.f32.mrf.mxu0  ;;  %v17851_v58 = vld [vmem:[#allocation18_spill] sm:$0xff] }
 0x3c2   : > { %v3037_v51 = vsel %vm2998_vm14, %v2987_v38, %v8760_v45  ;;  %v3038_v36 = vsel %vm2998_vm14, %v2988_v46, %v8761_v48  ;;  %v8769_v14 = vpop.permute.xlu1 %8768  ;;  %v8801_v29 = vunpack.i.h.bf16 %v8799_v47  ;;  %v8800_v1 = vunpack.i.l.bf16 %v8799_v47 }
 0x3c3   : > { %v8771_v10 = vunpack.i.h.bf16 %v8769_v14  ;;  %v8770_v63 = vunpack.i.l.bf16 %v8769_v14  ;;  %v3087_v57 = vsel %vm3048_vm15, %v3037_v51, %v8045_v5  ;;  %v3088_v2 = vsel %vm3048_vm15, %v3038_v36, %v8046_v7 }
 0x3c4   : > { %v3117_v18 = vpack.c.bf16 %v3088_v2, %v3087_v57  ;;  %v8050_v53 = vunpack.i.l.bf16 %v17851_v58  ;;  %v8051_v38 = vunpack.i.h.bf16 %v17851_v58  ;;  %v2742_v14 = vsel %vm17852_vm3, %v17672_v61, %v8801_v29  ;;  %v17854_v29 = vld [vmem:[#allocation114_spill] sm:$0xff]  ;;  %vm17855_vm3 = vmmov %vm17819_vm0 }
 0x3c5   : > { %v2790_v49 = vsel %vm2748_vm9, %v2740_v39, %v8771_v10  ;;  %v2789_v4 = vsel %vm2748_vm9, %v2739_v54, %v8770_v63  ;;  %v8809_v19 = vpop.permute.xlu0 %8808  ;;  %v2741_v10 = vsel %vm17853_vm7, %v17596_v6, %v8800_v1  ;;  %v8055_v1 = vunpack.i.l.bf16 %v17854_v29  ;;  %vm17857_vm7 = vmmov %vm17819_vm0 }
 0x3c6   : > { %v8779_v31 = vpop.permute.xlu1 %8778  ;;  %7712 = vmatmul.mubr.msk.bf16.gmra.mxu0 %vm3158_vm4, %v3117_v18  ;;  %v2839_v9 = vsel %vm2798_vm10, %v2789_v4, %v8775_v23  ;;  %v2840_v0 = vsel %vm2798_vm10, %v2790_v49, %v8776_v26  ;;  %v8811_v54 = vunpack.i.h.bf16 %v8809_v19  ;;  %v8810_v2 = vunpack.i.l.bf16 %v8809_v19  ;;  %v14196_v4 = vpop.f32.mrf.mxu0 }
 0x3c7   : > { %v8781_v17 = vunpack.i.h.bf16 %v8779_v31  ;;  %v8780_v3 = vunpack.i.l.bf16 %v8779_v31  ;;  %7715 = vmatprep.mubr.msk.bf16.mxu0 %vm16957_vm8, %v17443_v22  ;;  %v8056_v11 = vunpack.i.h.bf16 %v17854_v29 }
 0x3c8   : > { %v7653_v23 = vpop.f32.mrf.mxu0 }
 0x3c9   : > { %v2889_v42 = vsel %vm2848_vm11, %v2839_v9, %v8780_v3  ;;  %v2890_v44 = vsel %vm2848_vm11, %v2840_v0, %v8781_v17  ;;  %v8819_v43 = vpop.permute.xlu0 %8818 }
 0x3ca   : > { %v8789_v56 = vpop.permute.xlu1 %8788  ;;  %v2939_v41 = vsel %vm2898_vm12, %v2889_v42, %v8785_v60  ;;  %v2940_v32 = vsel %vm2898_vm12, %v2890_v44, %v8786_v8  ;;  %v8821_v3 = vunpack.i.h.bf16 %v8819_v43  ;;  %v8820_v9 = vunpack.i.l.bf16 %v8819_v43  ;;  %v14205_v16 = vpop.f32.mrf.mxu0 }
 0x3cb   : > { %v8791_v48 = vunpack.i.h.bf16 %v8789_v56  ;;  %v8790_v45 = vunpack.i.l.bf16 %v8789_v56 }
 0x3cd   : > { %v2989_v24 = vsel %vm2948_vm13, %v2939_v41, %v8790_v45  ;;  %v2990_v27 = vsel %vm2948_vm13, %v2940_v32, %v8791_v48  ;;  %v8829_v5 = vpop.permute.xlu0 %8828  ;;  %v7654_v45 = vpop.f32.mrf.mxu0 }
 0x3ce   : > { %v3039_v37 = vsel %vm2998_vm14, %v2989_v24, %v8795_v13  ;;  %v3040_v46 = vsel %vm2998_vm14, %v2990_v27, %v8796_v59  ;;  %v8804_v7 = vpop.permute.xlu1 %8803  ;;  %v8831_v42 = vunpack.i.h.bf16 %v8829_v5  ;;  %v8830_v44 = vunpack.i.l.bf16 %v8829_v5 }
 0x3cf   : > { %v8806_v47 = vunpack.i.h.bf16 %v8804_v7  ;;  %v8805_v51 = vunpack.i.l.bf16 %v8804_v7  ;;  %v3089_v36 = vsel %vm3048_vm15, %v3039_v37, %v8050_v53  ;;  %v3090_v63 = vsel %vm3048_vm15, %v3040_v46, %v8051_v38 }
 0x3d0   : > { %v3118_v25 = vpack.c.bf16 %v3090_v63, %v3089_v36 }
 0x3d1   : > { %v2792_v57 = vsel %vm2748_vm9, %v2742_v14, %v8806_v47  ;;  %v2791_v12 = vsel %vm2748_vm9, %v2741_v10, %v8805_v51 }
 0x3d2   : > { %7716 = vmatmul.mubr.msk.bf16.gmra.mxu0 %vm3158_vm4, %v3118_v25  ;;  %v2841_v61 = vsel %vm2798_vm10, %v2791_v12, %v8810_v2  ;;  %v2842_v6 = vsel %vm2798_vm10, %v2792_v57, %v8811_v54  ;;  %v14223_v12 = vpop.f32.mrf.mxu0 }
 0x3d3   : > { %v8834_v39 = vpop.permute.xlu0 %8833  ;;  %7719 = vmatprep.mubr.msk.bf16.mxu0 %vm16957_vm8, %v17443_v22 }
 0x3d4   : > { %v8814_v49 = vpop.permute.xlu1 %8813  ;;  %v8836_v56 = vunpack.i.h.bf16 %v8834_v39  ;;  %v8835_v59 = vunpack.i.l.bf16 %v8834_v39  ;;  %v7657_v54 = vpop.f32.mrf.mxu0 }
 0x3d5   : > { %v8816_v18 = vunpack.i.h.bf16 %v8814_v49  ;;  %v8815_v26 = vunpack.i.l.bf16 %v8814_v49 }
 0x3d6   : > { %v2744_v37 = vsel %vm17819_vm0, %v17728_v62, %v8836_v56  ;;  %v2743_v46 = vsel %vm17855_vm3, %v17673_v55, %v8835_v59  ;;  %v14232_v23 = vpop.f32.mrf.mxu0  ;;  %vm17858_vm3 = vmmov %vm17819_vm0 }
 0x3d7   : > { %v2891_v31 = vsel %vm2848_vm11, %v2841_v61, %v8815_v26  ;;  %v2892_v17 = vsel %vm2848_vm11, %v2842_v6, %v8816_v18  ;;  %v8844_v19 = vpop.permute.xlu0 %8843 }
 0x3d8   : > { %v8824_v0 = vpop.permute.xlu1 %8823  ;;  %v2941_v13 = vsel %vm2898_vm12, %v2891_v31, %v8820_v9  ;;  %v2942_v48 = vsel %vm2898_vm12, %v2892_v17, %v8821_v3  ;;  %v8846_v10 = vunpack.i.h.bf16 %v8844_v19  ;;  %v8845_v63 = vunpack.i.l.bf16 %v8844_v19 }
 0x3d9   : > { %v8826_v8 = vunpack.i.h.bf16 %v8824_v0  ;;  %v8825_v60 = vunpack.i.l.bf16 %v8824_v0 }
 0x3db   : > { %v2991_v41 = vsel %vm2948_vm13, %v2941_v13, %v8825_v60  ;;  %v2992_v43 = vsel %vm2948_vm13, %v2942_v48, %v8826_v8  ;;  %v8854_v32 = vpop.permute.xlu0 %8853  ;;  %v7658_v8 = vpop.f32.mrf.mxu0  ;;  %v17856_v60 = vld [vmem:[#allocation122_spill] sm:$0xff] }
 0x3dc   : > { %v3041_v58 = vsel %vm2998_vm14, %v2991_v41, %v8830_v44  ;;  %v3042_v53 = vsel %vm2998_vm14, %v2992_v43, %v8831_v42  ;;  %v8839_v24 = vpop.permute.xlu1 %8838  ;;  %v8856_v26 = vunpack.i.h.bf16 %v8854_v32  ;;  %v8855_v61 = vunpack.i.l.bf16 %v8854_v32 }
 0x3dd   : > { %v8841_v27 = vunpack.i.h.bf16 %v8839_v24  ;;  %v8840_v5 = vunpack.i.l.bf16 %v8839_v24  ;;  %v3091_v38 = vsel %vm3048_vm15, %v3041_v58, %v8055_v1  ;;  %v3092_v7 = vsel %vm3048_vm15, %v3042_v53, %v8056_v11 }
 0x3de   : > { %v3119_v14 = vpack.c.bf16 %v3092_v7, %v3091_v38  ;;  %v8060_v56 = vunpack.i.l.bf16 %v17856_v60  ;;  %v8061_v45 = vunpack.i.h.bf16 %v17856_v60 }
 0x3df   : > { %v2794_v47 = vsel %vm2748_vm9, %v2744_v37, %v8841_v27  ;;  %v2793_v51 = vsel %vm2748_vm9, %v2743_v46, %v8840_v5  ;;  %v8864_v36 = vpop.permute.xlu0 %8863 }
 0x3e0   : > { %v8849_v57 = vpop.permute.xlu1 %8848  ;;  %7720 = vmatmul.mubr.msk.bf16.gmra.mxu0 %vm3158_vm4, %v3119_v14  ;;  %v2843_v62 = vsel %vm2798_vm10, %v2793_v51, %v8845_v63  ;;  %v2844_v55 = vsel %vm2798_vm10, %v2794_v47, %v8846_v10  ;;  %v8866_v31 = vunpack.i.h.bf16 %v8864_v36  ;;  %v8865_v17 = vunpack.i.l.bf16 %v8864_v36  ;;  %v3319_v51 = vpop.f32.mrf.mxu0 }
 0x3e1   : > { %v8851_v39 = vunpack.i.h.bf16 %v8849_v57  ;;  %v8850_v25 = vunpack.i.l.bf16 %v8849_v57  ;;  %7723 = vmatprep.mubr.msk.bf16.mxu0 %vm16957_vm8, %v17443_v22 }
 0x3e2   : > { %v7661_v10 = vpop.f32.mrf.mxu0 }
 0x3e3   : > { %v2893_v2 = vsel %vm2848_vm11, %v2843_v62, %v8850_v25  ;;  %v2894_v49 = vsel %vm2848_vm11, %v2844_v55, %v8851_v39  ;;  %v8869_v18 = vpop.permute.xlu0 %8868  ;;  %v14260_v25 = vld [vmem:[%s16665_s7] ss:$0 sm:$0xff] }
 0x3e4   : > { %v8859_v6 = vpop.permute.xlu1 %8858  ;;  %v8871_v9 = vunpack.i.h.bf16 %v8869_v18  ;;  %v8870_v0 = vunpack.i.l.bf16 %v8869_v18  ;;  %v2943_v42 = vsel %vm2898_vm12, %v2893_v2, %v8855_v61  ;;  %v2944_v44 = vsel %vm2898_vm12, %v2894_v49, %v8856_v26  ;;  %v3322_v2 = vpop.f32.mrf.mxu0 }
 0x3e5   : > { %v8861_v19 = vunpack.i.h.bf16 %v8859_v6  ;;  %v8860_v3 = vunpack.i.l.bf16 %v8859_v6  ;;  %v14263_v49 = vadd.f32 %v14260_v25, %v3319_v51 }
 0x3e6   : > { %v2746_v58 = vsel %vm17857_vm7, %v17787_v28, %v8871_v9  ;;  %v2745_v53 = vsel %vm17819_vm0, %v17729_v34, %v8870_v0 }
 0x3e7   : > { %v2993_v59 = vsel %vm2948_vm13, %v2943_v42, %v8860_v3  ;;  %v2994_v13 = vsel %vm2948_vm13, %v2944_v44, %v8861_v19  ;;  %v8879_v48 = vpop.permute.xlu0 %8878  ;;  %v3530_v8 = vmin.f32 %v14263_v49, 0.0 }
 0x3e8   : > { %v3043_v29 = vsel %vm2998_vm14, %v2993_v59, %v8865_v17  ;;  %v3044_v1 = vsel %vm2998_vm14, %v2994_v13, %v8866_v31  ;;  %v8874_v41 = vpop.permute.xlu1 %8873  ;;  %v8881_v46 = vunpack.i.h.bf16 %v8879_v48  ;;  %v8880_v7 = vunpack.i.l.bf16 %v8879_v48  ;;  %v7662_v17 = vpop.f32.mrf.mxu0 }
 0x3e9   : > { %v8876_v43 = vunpack.i.h.bf16 %v8874_v41  ;;  %v8875_v32 = vunpack.i.l.bf16 %v8874_v41  ;;  %v3093_v11 = vsel %vm3048_vm15, %v3043_v29, %v8060_v56  ;;  %v3094_v24 = vsel %vm3048_vm15, %v3044_v1, %v8061_v45 }
 0x3ea   : > { %v3120_v37 = vpack.c.bf16 %v3094_v24, %v3093_v11  ;;  %v14268_v31 = vadd.f32 %v14260_v25, %v3322_v2  ;;  %v14275_v59 = vadd.f32 %v14260_v25, %v14223_v12 }
 0x3eb   : > { %v2796_v27 = vsel %vm2748_vm9, %v2746_v58, %v8876_v43  ;;  %v2795_v5 = vsel %vm2748_vm9, %v2745_v53, %v8875_v32  ;;  %v8889_v38 = vpop.permute.xlu0 %8888  ;;  %v14284_v43 = vadd.f32 %v14260_v25, %v14232_v23  ;;  %v3591_v53 = vmul.f32 1.442695, %v3530_v8 }
 0x3ec   : > { %v8884_v47 = vpop.permute.xlu1 %8883  ;;  %7724 = vmatmul.mubr.msk.bf16.gmra.mxu0 %vm3158_vm4, %v3120_v37  ;;  %v2845_v28 = vsel %vm2798_vm10, %v2795_v5, %v8880_v7  ;;  %v2846_v34 = vsel %vm2798_vm10, %v2796_v27, %v8881_v46  ;;  %v8891_v62 = vunpack.i.h.bf16 %v8889_v38  ;;  %v8890_v55 = vunpack.i.l.bf16 %v8889_v38  ;;  %v3327_v11 = vpop.f32.mrf.mxu0 }
 0x3ed   : > { %v8886_v36 = vunpack.i.h.bf16 %v8884_v47  ;;  %v8885_v14 = vunpack.i.l.bf16 %v8884_v47  ;;  %7727 = vmatprep.mubr.msk.bf16.mxu0 %vm16957_vm8, %v17443_v22  ;;  %v3531_v13 = vmin.f32 %v14268_v31, 0.0  ;;  %v14290_v27 = vadd.f32 %v14260_v25, %v3327_v11 }
 0x3ee   : > { %v3528_v5 = vmin.f32 %v14275_v59, 0.0  ;;  %v7665_v37 = vpop.f32.mrf.mxu0  ;;  %v14296_v23 = vadd.f32 %v14260_v25, %v14165_v30  ;;  %v14303_v46 = vadd.f32 %v14260_v25, %v14196_v4  ;;  %v14307_v7 = vadd.f32 %v14260_v25, %v14205_v16 }
 0x3ef   : > { %v2895_v63 = vsel %vm2848_vm11, %v2845_v28, %v8885_v14  ;;  %v2896_v57 = vsel %vm2848_vm11, %v2846_v34, %v8886_v36  ;;  %v8899_v39 = vpop.permute.xlu0 %8898  ;;  %v3593_v38 = vmul.f32 1.442695, %v3531_v13  ;;  %v3529_v47 = vmin.f32 %v14284_v43, 0.0 }
 0x3f0   : > { %v8894_v54 = vpop.permute.xlu1 %8893  ;;  %v2945_v61 = vsel %vm2898_vm12, %v2895_v63, %v8890_v55  ;;  %v2946_v6 = vsel %vm2898_vm12, %v2896_v57, %v8891_v62  ;;  %v8901_v0 = vunpack.i.h.bf16 %v8899_v39  ;;  %v8900_v42 = vunpack.i.l.bf16 %v8899_v39  ;;  %v3330_v30 = vpop.f32.mrf.mxu0 }
 0x3f1   : > { %v8896_v18 = vunpack.i.h.bf16 %v8894_v54  ;;  %v8895_v26 = vunpack.i.l.bf16 %v8894_v54  ;;  %9675 = vpow2.f32 %v3591_v53  ;;  %v14313_v10 = vadd.f32 %v14260_v25, %v3330_v30 }
 0x3f2   : > { %v14317_v4 = vadd.f32 %v14260_v25, %v14176_v40  ;;  %v3587_v16 = vmul.f32 1.442695, %v3528_v5  ;;  %9677 = vpow2.f32 %v3593_v38  ;;  %v7666_v63 = vpop.f32.mrf.mxu0  ;;  %v14321_v57 = vadd.f32 %v14260_v25, %v14046_v52 }
 0x3f3   : > { %v2995_v19 = vsel %vm2948_vm13, %v2945_v61, %v8895_v26  ;;  %v2996_v3 = vsel %vm2948_vm13, %v2946_v6, %v8896_v18  ;;  %v1020_v9 = vpop.permute.xlu0 %1019  ;;  %v3524_v39 = vmin.f32 %v14296_v23, 0.0  ;;  %v3533_v62 = vmin.f32 %v14313_v10, 0.0 }
 0x3f4   : > { %v8904_v44 = vpop.permute.xlu1 %8903  ;;  %v3045_v48 = vsel %vm2998_vm14, %v2995_v19, %v8900_v42  ;;  %v3046_v45 = vsel %vm2998_vm14, %v2996_v3, %v8901_v0  ;;  %v2747_v32 = vsel %vm17858_vm3, %v17788_v20, %v1020_v9  ;;  %v3532_v20 = vmin.f32 %v14290_v27, 0.0 }
 0x3f5   : > { %v8906_v60 = vunpack.i.h.bf16 %v8904_v44  ;;  %v8905_v56 = vunpack.i.l.bf16 %v8904_v44  ;;  %v3526_v55 = vmin.f32 %v14303_v46, 0.0  ;;  %v3589_v54 = vmul.f32 1.442695, %v3529_v47 }
 0x3f6   : > { %v3595_v14 = vmul.f32 1.442695, %v3532_v20  ;;  %v14329_v40 = vadd.f32 %v14260_v25, %v14059_v50  ;;  %v3527_v26 = vmin.f32 %v14307_v7, 0.0  ;;  %v3597_v61 = vmul.f32 1.442695, %v3533_v62 }
 0x3f7   : > { %v3095_v29 = vsel %vm3048_vm15, %v3045_v48, %v8905_v56  ;;  %v3096_v1 = vsel %vm3048_vm15, %v3046_v45, %v8906_v60  ;;  %v1514_v41 = vpop.permute.xlu0 %1513  ;;  %v3525_v6 = vmin.f32 %v14317_v4, 0.0  ;;  %v3518_v17 = vmin.f32 %v14321_v57, 0.0 }
 0x3f8   : > { %v1267_v12 = vpop.permute.xlu1 %1266  ;;  %v3121_v58 = vpack.c.bf16 %v3096_v1, %v3095_v29  ;;  %9679 = vpow2.f32 %v3595_v14  ;;  %v14337_v19 = vadd.f32 %v14260_v25, %v14128_v35  ;;  %v3579_v3 = vmul.f32 1.442695, %v3524_v39 }
 0x3f9   : > { %v2797_v24 = vsel %vm2748_vm9, %v2747_v32, %v1267_v12  ;;  %9681 = vpow2.f32 %v3587_v16  ;;  %v14341_v50 = vadd.f32 %v14260_v25, %v14141_v33  ;;  %v3583_v0 = vmul.f32 1.442695, %v3526_v55 }
 0x3fa   : > { %7728 = vmatmul.mubr.msk.bf16.gmra.mxu0 %vm3158_vm4, %v3121_v58  ;;  %v2847_v51 = vsel %vm2798_vm10, %v2797_v24, %v1514_v41  ;;  %9683 = vpow2.f32 %v3597_v61  ;;  %v3519_v60 = vmin.f32 %v14329_v40, 0.0  ;;  %v14347_v56 = vadd.f32 %v14260_v25, %v14087_v15 }
 0x3fb   : > { %7731 = vmatprep.mubr.msk.bf16.mxu0 %vm16957_vm8, %v17443_v22  ;;  %v2008_v28 = vpop.permute.xlu0 %2007  ;;  %9685 = vpow2.f32 %v3589_v54  ;;  %v3335_v8 = vpop.f32.mrf.mxu0  ;;  %v3585_v35 = vmul.f32 1.442695, %v3527_v26  ;;  %v14352_v48 = vadd.f32 %v14260_v25, %v14100_v21  ;;  %v3581_v33 = vmul.f32 1.442695, %v3525_v6 }
 0x3fc   : > { %v1761_v36 = vpop.permute.xlu1 %1760  ;;  %v3522_v1 = vmin.f32 %v14337_v19, 0.0  ;;  %9687 = vpow2.f32 %v3579_v3  ;;  %v3567_v41 = vmul.f32 1.442695, %v3518_v17  ;;  %v3523_v32 = vmin.f32 %v14341_v50, 0.0 }
 0x3fd   : > { %v2897_v34 = vsel %vm2848_vm11, %v2847_v51, %v1761_v36  ;;  %v7669_v29 = vpop.f32.mrf.mxu0  ;;  %9689 = vpow2.f32 %v3583_v0  ;;  %v3569_v15 = vmul.f32 1.442695, %v3519_v60  ;;  %v3520_v11 = vmin.f32 %v14347_v56, 0.0 }
 0x3fe   : > { %v2947_v2 = vsel %vm2898_vm12, %v2897_v34, %v2008_v28  ;;  %9691 = vpow2.f32 %v3585_v35  ;;  %v14359_v21 = vadd.f32 %v14260_v25, %v3335_v8  ;;  %v9676_v58 = vpop.eup %9675  ;;  %v3521_v53 = vmin.f32 %v14352_v48, 0.0 }
 0x3ff   : > { %v2502_v9 = vpop.permute.xlu0 %2501  ;;  %v3338_v12 = vpop.f32.mrf.mxu0  ;;  %9693 = vpow2.f32 %v3581_v33  ;;  %v3575_v37 = vmul.f32 1.442695, %v3522_v1  ;;  %v3577_v47 = vmul.f32 1.442695, %v3523_v32  ;;  %v3571_v51 = vmul.f32 1.442695, %v3520_v11 }
 0x400   : > { %v2255_v18 = vpop.permute.xlu1 %2254  ;;  %v14365_v24 = vadd.f32 %v14260_v25, %v3338_v12  ;;  %v9678_v38 = vpop.eup %9677  ;;  %9695 = vpow2.f32 %v3567_v41  ;;  %v3534_v36 = vmin.f32 %v14359_v21, 0.0  ;;  %v3573_v30 = vmul.f32 1.442695, %v3521_v53 }
 0x401   : > { %v2997_v52 = vsel %vm2948_vm13, %v2947_v2, %v2255_v18  ;;  %v7670_v5 = vpop.f32.mrf.mxu0  ;;  %9697 = vpow2.f32 %v3569_v15  ;;  %v7359_v28 = vadd.f32 -1.0, %v9676_v58  ;;  %v7360_v34 = vadd.f32 -1.0, %v9678_v38 }
 0x402   : > { %v3047_v42 = vsel %vm2998_vm14, %v2997_v52, %v2502_v9  ;;  %v3535_v14 = vmin.f32 %v14365_v24, 0.0  ;;  %9699 = vpow2.f32 %v3575_v37  ;;  %vm3482_vm9 = vcmp.gt.f32.partialorder %v14268_v31, 0.0 }
 0x403   : > { %9701 = vpow2.f32 %v3577_v47  ;;  %v14375_v54 = vsel %vm3482_vm9, %v14268_v31, %v7360_v34  ;;  %v3599_v18 = vmul.f32 1.442695, %v3534_v36  ;;  %vm3483_vm10 = vcmp.gt.f32.partialorder %v14290_v27, 0.0 }
 0x404   : > { %v2649_v44 = vpop.permute.xlu1 %2648  ;;  %9703 = vpow2.f32 %v3571_v51  ;;  %v3601_v6 = vmul.f32 1.442695, %v3535_v14  ;;  %vm3484_vm12 = vcmp.gt.f32.partialorder %v14313_v10, 0.0  ;;  %vm3479_vm13 = vcmp.gt.f32.partialorder %v14275_v59, 0.0 }
 0x405   : > { %v3097_v13 = vsel %vm3048_vm15, %v3047_v42, %v2649_v44  ;;  %v9680_v20 = vpop.eup %9679  ;;  %9705 = vpow2.f32 %v3573_v30  ;;  %vm3480_vm14 = vcmp.gt.f32.partialorder %v14284_v43, 0.0  ;;  %vm3475_vm7 = vcmp.gt.f32.partialorder %v14296_v23, 0.0 }
 0x406   : > { %v3122_v45 = vpack.c.bf16 %v3097_v13, %v3097_v13  ;;  %v9682_v16 = vpop.eup %9681  ;;  %v7361_v63 = vadd.f32 -1.0, %v9680_v20  ;;  %9707 = vpow2.f32 %v3599_v18  ;;  %vm3477_vm0 = vcmp.gt.f32.partialorder %v14303_v46, 0.0 }
 0x407   : > { %v9684_v39 = vpop.eup %9683  ;;  %v7357_v44 = vadd.f32 -1.0, %v9682_v16  ;;  %9709 = vpow2.f32 %v3601_v6  ;;  %vm3478_vm3 = vcmp.gt.f32.partialorder %v14307_v7, 0.0  ;;  %vm3473_vm9 = vcmp.gt.f32.partialorder %v14337_v19, 0.0 }
 0x408   : > { %7732 = vmatmul.mubr.msk.bf16.gmra.mxu0 %vm3158_vm4, %v3122_v45  ;;  %vm3481_vm4 = vcmp.gt.f32.partialorder %v14263_v49, 0.0  ;;  %v9686_v2 = vpop.eup %9685  ;;  %v7362_v61 = vadd.f32 -1.0, %v9684_v39  ;;  %v14386_v31 = vsel %vm3483_vm10, %v14290_v27, %v7361_v63  ;;  %vm3474_vm10 = vcmp.gt.f32.partialorder %v14341_v50, 0.0 }
 0x409   : > { %7863 = vmatprep.mubr.msk.bf16.mxu0 %vm16957_vm8, %v17443_v22  ;;  %v14372_v55 = vsel %vm3481_vm4, %v14263_v49, %v7359_v28  ;;  %v9688_v9 = vpop.eup %9687  ;;  %v7358_v8 = vadd.f32 -1.0, %v9686_v2  ;;  %v14399_v33 = vsel %vm3479_vm13, %v14275_v59, %v7357_v44  ;;  %vm3476_vm4 = vcmp.gt.f32.partialorder %v14317_v4, 0.0 }
 0x40a   : > { %v3343_v62 = vpop.f32.mrf.mxu0  ;;  %v3769_v52 = vpack.c.bf16 %v14375_v54, %v14372_v55  ;;  %v14389_v3 = vsel %vm3484_vm12, %v14313_v10, %v7362_v61  ;;  %v9690_v60 = vpop.eup %9689  ;;  %v7353_v58 = vadd.f32 -1.0, %v9688_v9  ;;  %vm3469_vm12 = vcmp.gt.f32.partialorder %v14321_v57, 0.0 }
 0x40b   : > { %v14378_v26 = vadd.f32 %v14260_v25, %v3343_v62  ;;  %v3770_v42 = vpack.c.bf16 %v14389_v3, %v14386_v31  ;;  %v9692_v13 = vpop.eup %9691  ;;  %v14402_v45 = vsel %vm3480_vm14, %v14284_v43, %v7358_v8  ;;  %v7355_v15 = vadd.f32 -1.0, %v9690_v60 }
 0x40c   : > { %v7673_v17 = vpop.f32.mrf.mxu0  ;;  %v9694_v29 = vpop.eup %9693  ;;  %v3768_v41 = vpack.c.bf16 %v14402_v45, %v14399_v33  ;;  %v7356_v11 = vadd.f32 -1.0, %v9692_v13  ;;  %v14420_v47 = vsel %vm3475_vm7, %v14296_v23, %v7353_v58  ;;  %vm3471_vm13 = vcmp.gt.f32.partialorder %v14347_v56, 0.0 }
 0x40d   : > { %v3536_v49 = vmin.f32 %v14378_v26, 0.0  ;;  %v9696_v32 = vpop.eup %9695  ;;  %v7354_v59 = vadd.f32 -1.0, %v9694_v29  ;;  %v14412_v43 = vsel %vm3477_vm0, %v14303_v46, %v7355_v15  ;;  %vm3472_vm14 = vcmp.gt.f32.partialorder %v14352_v48, 0.0 }
 0x40e   : > { %v3346_v0 = vpop.f32.mrf.mxu0  ;;  %v9698_v53 = vpop.eup %9697  ;;  %v14415_v5 = vsel %vm3478_vm3, %v14307_v7, %v7356_v11  ;;  %vm3485_vm7 = vcmp.gt.f32.partialorder %v14359_v21, 0.0  ;;  %vm3486_vm0 = vcmp.gt.f32.partialorder %v14365_v24, 0.0  ;;  %v7347_v60 = vadd.f32 -1.0, %v9696_v32 }
 0x40f   : > { %v3603_v35 = vmul.f32 1.442695, %v3536_v49  ;;  %v14396_v27 = vadd.f32 %v14260_v25, %v3346_v0  ;;  %v9700_v38 = vpop.eup %9699  ;;  %v3767_v20 = vpack.c.bf16 %v14415_v5, %v14412_v43  ;;  %v14423_v51 = vsel %vm3476_vm4, %v14317_v4, %v7354_v59 }
 0x410   : > { %v7674_v10 = vpop.f32.mrf.mxu0  ;;  %v9702_v36 = vpop.eup %9701  ;;  %v3766_v46 = vpack.c.bf16 %v14423_v51, %v14420_v47  ;;  %v7351_v63 = vadd.f32 -1.0, %v9700_v38  ;;  %vm3470_vm3 = vcmp.gt.f32.partialorder %v14329_v40, 0.0  ;;  %v14473_v58 = vsel %vm3469_vm12, %v14321_v57, %v7347_v60 }
 0x411   : > { %9711 = vpow2.f32 %v3603_v35  ;;  %v3537_v1 = vmin.f32 %v14396_v27, 0.0  ;;  %v9704_v14 = vpop.eup %9703  ;;  %v7352_v39 = vadd.f32 -1.0, %v9702_v36  ;;  %v7348_v35 = vadd.f32 -1.0, %v9698_v53 }
 0x412   : > { %v9706_v34 = vpop.eup %9705  ;;  %v14435_v18 = vsel %vm3473_vm9, %v14337_v19, %v7351_v63  ;;  %vm3487_vm4 = vcmp.gt.f32.partialorder %v14378_v26, 0.0  ;;  %vm3488_vm9 = vcmp.gt.f32.partialorder %v14396_v27, 0.0 }
 0x413   : > { %v3605_v12 = vmul.f32 1.442695, %v3537_v1  ;;  %v9708_v62 = vpop.eup %9707  ;;  %v14438_v61 = vsel %vm3474_vm10, %v14341_v50, %v7352_v39  ;;  %v7349_v50 = vadd.f32 -1.0, %v9704_v14  ;;  %v7350_v0 = vadd.f32 -1.0, %v9706_v34 }
 0x414   : > { %v9710_v6 = vpop.eup %9709  ;;  %v3765_v49 = vpack.c.bf16 %v14438_v61, %v14435_v18  ;;  %v7363_v44 = vadd.f32 -1.0, %v9708_v62  ;;  %v14476_v53 = vsel %vm3470_vm3, %v14329_v40, %v7348_v35 }
 0x415   : > { %9713 = vpow2.f32 %v3605_v12  ;;  %v7364_v8 = vadd.f32 -1.0, %v9710_v6  ;;  %v14448_v10 = vsel %vm3471_vm13, %v14347_v56, %v7349_v50  ;;  %v14451_v29 = vsel %vm3472_vm14, %v14352_v48, %v7350_v0 }
 0x416   : > { %v3764_v15 = vpack.c.bf16 %v14451_v29, %v14448_v10  ;;  %v14461_v32 = vsel %vm3485_vm7, %v14359_v21, %v7363_v44  ;;  %v9634_v10 = vld [vmem:[%s16659_s1 + $0x24] ss:$16 sps:$4 sm:$0xff]  }
 0x417   : > { %v14466_v56 = vsel %vm3486_vm0, %v14365_v24, %v7364_v8 }
 0x419   : > { %v3351_v37 = vpop.f32.mrf.mxu0 }
 0x41a   : > { %v14426_v30 = vadd.f32 %v14260_v25, %v3351_v37 }
 0x41b   : > { %v7677_v7 = vpop.f32.mrf.mxu0 }
 0x41c   : > { %v3538_v28 = vmin.f32 %v14426_v30, 0.0  ;;  %vm3489_vm10 = vcmp.gt.f32.partialorder %v14426_v30, 0.0 }
 0x41d   : > { %v3354_v16 = vpop.f32.mrf.mxu0 }
 0x41e   : > { %v3607_v23 = vmul.f32 1.442695, %v3538_v28  ;;  %v3355_v4 = vadd.f32 %v14260_v25, %v3354_v16  ;;  %v9712_v9 = vpop.eup %9711 }
 0x41f   : > { %v7678_v2 = vpop.f32.mrf.mxu0  ;;  %v7365_v13 = vadd.f32 -1.0, %v9712_v9 }
 0x420   : > { %9715 = vpow2.f32 %v3607_v23  ;;  %v3539_v17 = vmin.f32 %v3355_v4, 0.0  ;;  %vm3490_vm12 = vcmp.gt.f32.partialorder %v3355_v4, 0.0 }
 0x421   : > { %v14483_v59 = vsel %vm3487_vm4, %v14378_v26, %v7365_v13 }
 0x422   : > { %v3609_v19 = vmul.f32 1.442695, %v3539_v17  ;;  %v9714_v1 = vpop.eup %9713 }
 0x423   : > { %v7366_v48 = vadd.f32 -1.0, %v9714_v1 }
 0x424   : > { %9717 = vpow2.f32 %v3609_v19 }
 0x425   : > { %v14486_v38 = vsel %vm3488_vm9, %v14396_v27, %v7366_v48  ;;  %vm442_vm9 = vcmask 64512  }
 0x426   : > { %v3772_v57 = vpack.c.bf16 %v14486_v38, %v14483_v59  ;;  %443 = vst.msk [vmem:[#allocation2] sm:$0xff] %vm442_vm9, %v17443_v22  ;;  %444 = vst.msk [vmem:[#allocation2 + $0x8] sm:$0xff] %vm442_vm9, %v17443_v22 }
 0x427   : > { %445 = vst.msk [vmem:[#allocation2 + $0x10] sm:$0xff] %vm442_vm9, %v17443_v22  ;;  %446 = vst.msk [vmem:[#allocation2 + $0x18] sm:$0xff] %vm442_vm9, %v17443_v22 }
 0x428   : > { %v14454_v12 = vpop.f32.mrf.mxu0  ;;  %447 = vst.msk [vmem:[#allocation2 + $0x20] sm:$0xff] %vm442_vm9, %v17443_v22  ;;  %448 = vst.msk [vmem:[#allocation2 + $0x28] sm:$0xff] %vm442_vm9, %v17443_v22 }
 0x429   : > { %449 = vst.msk [vmem:[#allocation2 + $0x30] sm:$0xff] %vm442_vm9, %v17443_v22 }
 0x42a   : > { %v7681_v21 = vpop.f32.mrf.mxu0 }
 0x42c   : > { %v3362_v37 = vpop.f32.mrf.mxu0 }
 0x42d   : > { %v9716_v36 = vpop.eup %9715 }
 0x42e   : > { %v7682_v40 = vpop.f32.mrf.mxu0  ;;  %v7367_v7 = vadd.f32 -1.0, %v9716_v36 }
 0x430   : > { %v14492_v26 = vsel %vm3489_vm10, %v14426_v30, %v7367_v7 }
 0x431   : > { %v9718_v14 = vpop.eup %9717 }
 0x432   : > { %v7368_v34 = vadd.f32 -1.0, %v9718_v14 }
 0x434   : > { %v14494_v63 = vsel %vm3490_vm12, %v3355_v4, %v7368_v34 }
 0x435   : > { %v3773_v39 = vpack.c.bf16 %v14494_v63, %v14492_v26 }
 0x436   : > { %v3367_v28 = vpop.f32.mrf.mxu0 }
 0x437   : > { %v14521_v14 = vadd.f32 %v14260_v25, %v3367_v28  ;;  %v14531_v28 = vadd.f32 %v14260_v25, %v14454_v12 }
 0x438   : > { %v7685_v16 = vpop.f32.mrf.mxu0 }
 0x439   : > { %vm3493_vm12 = vcmp.gt.f32.partialorder %v14521_v14, 0.0 }
 0x43a   : > { %v3370_v27 = vpop.f32.mrf.mxu0 }
 0x43b   : > { %v14517_v36 = vadd.f32 %v14260_v25, %v3370_v27 }
 0x43c   : > { %v7686_v23 = vpop.f32.mrf.mxu0 }
 0x43d   : > { %v3543_v27 = vmin.f32 %v14517_v36, 0.0  ;;  %vm3494_vm10 = vcmp.gt.f32.partialorder %v14517_v36, 0.0 }
 0x441   : > { %v3375_v62 = vpop.f32.mrf.mxu0 }
 0x442   : > { %v14509_v35 = vadd.f32 %v14260_v25, %v3375_v62 }
 0x443   : > { %v7689_v2 = vpop.f32.mrf.mxu0 }
 0x444   : > { %v3544_v16 = vmin.f32 %v14509_v35, 0.0  ;;  %vm3495_vm4 = vcmp.gt.f32.partialorder %v14509_v35, 0.0 }
 0x445   : > { %v3378_v6 = vpop.f32.mrf.mxu0 }
 0x446   : > { %v14505_v4 = vadd.f32 %v14260_v25, %v3378_v6  ;;  %v14526_v6 = vadd.f32 %v14260_v25, %v3362_v37 }
 0x447   : > { %v7690_v17 = vpop.f32.mrf.mxu0 }
 0x448   : > { %v3545_v48 = vmin.f32 %v14505_v4, 0.0  ;;  %vm3496_vm3 = vcmp.gt.f32.partialorder %v14505_v4, 0.0 }
 0x44a   : > { %v3621_v17 = vmul.f32 1.442695, %v3545_v48 }
 0x44c   : > { %v3383_v9 = vpop.f32.mrf.mxu0 }
 0x44d   : > { %v14502_v30 = vadd.f32 %v14260_v25, %v3383_v9 }
 0x44e   : > { %v7693_v19 = vpop.f32.mrf.mxu0 }
 0x44f   : > { %v3546_v13 = vmin.f32 %v14502_v30, 0.0  ;;  %vm3497_vm0 = vcmp.gt.f32.partialorder %v14502_v30, 0.0 }
 0x450   : > { %v3386_v50 = vpop.f32.mrf.mxu0 }
 0x451   : > { %v14499_v0 = vadd.f32 %v14260_v25, %v3386_v50  ;;  %v3623_v23 = vmul.f32 1.442695, %v3546_v13  ;;  %v9633_v50 = vld [vmem:[%s16659_s1 + $0x4] ss:$16 sps:$4 sm:$0xff]   ;;  %v3617_v13 = vmul.f32 1.442695, %v3543_v27 }
 0x452   : > { %v7694_v44 = vpop.f32.mrf.mxu0  ;;  %3893 = vmatprep.mubr.bf16.mxu1 %v9633_v50 }
 0x453   : > { %v3547_v8 = vmin.f32 %v14499_v0, 0.0  ;;  %v3542_v44 = vmin.f32 %v14521_v14, 0.0  ;;  %vm3498_vm13 = vcmp.gt.f32.partialorder %v14499_v0, 0.0 }
 0x455   : > { %v3625_v21 = vmul.f32 1.442695, %v3547_v8  ;;  %v3619_v8 = vmul.f32 1.442695, %v3544_v16  ;;  %v3615_v12 = vmul.f32 1.442695, %v3542_v44 }
 0x456   : > { %v3391_v60 = vpop.f32.mrf.mxu0 }
 0x457   : > { %v14513_v1 = vadd.f32 %v14260_v25, %v3391_v60  ;;  %9719 = vpow2.f32 %v3625_v21  ;;  %v3541_v60 = vmin.f32 %v14526_v6, 0.0  ;;  %v3540_v21 = vmin.f32 %v14531_v28, 0.0 }
 0x458   : > { %v7697_v40 = vpop.f32.mrf.mxu0 }
 0x459   : > { %v3548_v7 = vmin.f32 %v14513_v1, 0.0  ;;  %vm3499_vm14 = vcmp.gt.f32.partialorder %v14513_v1, 0.0 }
 0x45a   : > { %v3394_v34 = vpop.f32.mrf.mxu0 }
 0x45b   : > { %v3627_v62 = vmul.f32 1.442695, %v3548_v7  ;;  %v3395_v2 = vadd.f32 %v14260_v25, %v3394_v34  ;;  %v3613_v7 = vmul.f32 1.442695, %v3541_v60 }
 0x45c   : > { %v7698_v9 = vpop.f32.mrf.mxu0 }
 0x45d   : > { %9721 = vpow2.f32 %v3627_v62  ;;  %v3549_v19 = vmin.f32 %v3395_v2, 0.0  ;;  %v3611_v62 = vmul.f32 1.442695, %v3540_v21  ;;  %vm3500_vm7 = vcmp.gt.f32.partialorder %v3395_v2, 0.0 }
 0x45e   : > { %9723 = vpow2.f32 %v3623_v23 }
 0x45f   : > { %v3629_v37 = vmul.f32 1.442695, %v3549_v19  ;;  %9725 = vpow2.f32 %v3621_v17 }
 0x461   : > { %9727 = vpow2.f32 %v3629_v37 }
 0x462   : > { %v3399_v48 = vpop.f32.mrf.mxu0  ;;  %9729 = vpow2.f32 %v3619_v8 }
 0x463   : > { %v14540_v40 = vadd.f32 %v14260_v25, %v3399_v48  ;;  %9731 = vpow2.f32 %v3617_v13 }
 0x464   : > { %v7701_v34 = vpop.f32.mrf.mxu0  ;;  %9733 = vpow2.f32 %v3615_v12  ;;  %v9720_v19 = vpop.eup %9719 }
 0x465   : > { %v3550_v16 = vmin.f32 %v14540_v40, 0.0  ;;  %9735 = vpow2.f32 %v3613_v7  ;;  %v7376_v48 = vadd.f32 -1.0, %v9720_v19 }
 0x466   : > { %v3402_v23 = vpop.f32.mrf.mxu0 }
 0x467   : > { %v3631_v17 = vmul.f32 1.442695, %v3550_v16  ;;  %v14544_v9 = vadd.f32 %v14260_v25, %v3402_v23 }
 0x468   : > { %v7702_v27 = vpop.f32.mrf.mxu0 }
 0x469   : > { %9737 = vpow2.f32 %v3631_v17  ;;  %v3551_v50 = vmin.f32 %v14544_v9, 0.0 }
 0x46a   : > { %v9722_v44 = vpop.eup %9721  ;;  %9739 = vpow2.f32 %v3611_v62 }
 0x46b   : > { %v3633_v8 = vmul.f32 1.442695, %v3551_v50  ;;  %v9724_v37 = vpop.eup %9723  ;;  %v7377_v13 = vadd.f32 -1.0, %v9722_v44  ;;  %v3743_v50 = vsel %vm3498_vm13, %v14499_v0, %v7376_v48  ;;  %vm3492_vm13 = vcmp.gt.f32.partialorder %v14526_v6, 0.0 }
 0x46c   : > { %v9726_v60 = vpop.eup %9725  ;;  %v7375_v16 = vadd.f32 -1.0, %v9724_v37 }
 0x46d   : > { %9741 = vpow2.f32 %v3633_v8  ;;  %v3744_v17 = vsel %vm3499_vm14, %v14513_v1, %v7377_v13  ;;  %v7374_v19 = vadd.f32 -1.0, %v9726_v60  ;;  %vm3501_vm14 = vcmp.gt.f32.partialorder %v14540_v40, 0.0 }
 0x46e   : > { %v9728_v21 = vpop.eup %9727  ;;  %v3407_v12 = vpop.f32.mrf.mxu0 }
 0x46f   : > { %v7378_v34 = vadd.f32 -1.0, %v9728_v21  ;;  %v9730_v23 = vpop.eup %9729  ;;  %v14549_v7 = vadd.f32 %v14260_v25, %v3407_v12  ;;  %v3742_v12 = vsel %vm3497_vm0, %v14502_v30, %v7375_v16  ;;  %v3741_v13 = vsel %vm3496_vm3, %v14505_v4, %v7374_v19 }
 0x470   : > { %v7705_v62 = vpop.f32.mrf.mxu0  ;;  %v9732_v44 = vpop.eup %9731  ;;  %v7373_v24 = vadd.f32 -1.0, %v9730_v23  ;;  %v3777_v0 = vpack.c.bf16 %v3743_v50, %v3742_v12  ;;  %vm3491_vm0 = vcmp.gt.f32.partialorder %v14531_v28, 0.0 }
 0x471   : > { %v3745_v27 = vsel %vm3500_vm7, %v3395_v2, %v7378_v34  ;;  %v3552_v8 = vmin.f32 %v14549_v7, 0.0  ;;  %v9734_v11 = vpop.eup %9733  ;;  %v7372_v48 = vadd.f32 -1.0, %v9732_v44  ;;  %vm3502_vm7 = vcmp.gt.f32.partialorder %v14544_v9, 0.0 }
 0x472   : > { %v3778_v37 = vpack.c.bf16 %v3745_v27, %v3744_v17  ;;  %v3410_v21 = vpop.f32.mrf.mxu0  ;;  %v9736_v2 = vpop.eup %9735  ;;  %v3740_v16 = vsel %vm3495_vm4, %v14509_v35, %v7373_v24  ;;  %v7371_v23 = vadd.f32 -1.0, %v9734_v11  ;;  %vm3503_vm3 = vcmp.gt.f32.partialorder %v14549_v7, 0.0 }
 0x473   : > { %v3635_v62 = vmul.f32 1.442695, %v3552_v8  ;;  %v14559_v1 = vadd.f32 %v14260_v25, %v3410_v21  ;;  %v3739_v24 = vsel %vm3494_vm10, %v14517_v36, %v7372_v48  ;;  %v7370_v4 = vadd.f32 -1.0, %v9736_v2  ;;  %v3796_v48 = vld [vmem:[%s16659_s1 + $0x40] sm:$0xff] }
 0x474   : > { %7537 = vmatprep.subr.bf16.mxu1 %v3778_v37  ;;  %v7706_v60 = vpop.f32.mrf.mxu0  ;;  %v3738_v50 = vsel %vm3493_vm12, %v14521_v14, %v7371_v23 }
 0x475   : > { %7538 = vmatpush3.bf16.msra.mxu1 %v3770_v42  ;;  %9743 = vpow2.f32 %v3635_v62  ;;  %v3553_v34 = vmin.f32 %v14559_v1, 0.0  ;;  %v3776_v42 = vpack.c.bf16 %v3741_v13, %v3740_v16  ;;  %v3775_v54 = vpack.c.bf16 %v3739_v24, %v3738_v50  ;;  %v9636_v16 = vld [vmem:[%s16659_s1 + $0x20] ss:$16 sps:$4 sm:$0xff]  }
 0x476   : > { %v9738_v30 = vpop.eup %9737  ;;  %7539 = vmatprep.subr.bf16.mxu1 %v3777_v0  ;;  %v3737_v14 = vsel %vm3492_vm13, %v14526_v6, %v7370_v4  ;;  %vm3504_vm4 = vcmp.gt.f32.partialorder %v14559_v1, 0.0 }
 0x477   : > { %v9740_v31 = vpop.eup %9739  ;;  %v3637_v3 = vmul.f32 1.442695, %v3553_v34  ;;  %v7379_v11 = vadd.f32 -1.0, %v9738_v30 }
 0x478   : > { %v7369_v19 = vadd.f32 -1.0, %v9740_v31  ;;  %v7405_v31 = vcombine.high %v3796_v48, %v3796_v48 }
 0x479   : > { %7540 = vmatpush3.bf16.msra.mxu1 %v3769_v52  ;;  %9745 = vpow2.f32 %v3637_v3  ;;  %v14596_v52 = vsel %vm3501_vm14, %v14540_v40, %v7379_v11 }
 0x47a   : > { %v9742_v35 = vpop.eup %9741  ;;  %7541 = vmatprep.subr.bf16.mxu1 %v3776_v42  ;;  %v3415_v27 = vpop.f32.mrf.mxu0  ;;  %v3736_v21 = vsel %vm3491_vm0, %v14531_v28, %v7369_v19 }
 0x47b   : > { %v7380_v17 = vadd.f32 -1.0, %v9742_v35  ;;  %v14593_v55 = vadd.f32 %v14260_v25, %v3415_v27  ;;  %v3774_v62 = vpack.c.bf16 %v3737_v14, %v3736_v21  ;;  %v7404_v35 = vcombine.low %v3796_v48, %v3796_v48  ;;  %v9641_v27 = vld [vmem:[%s16659_s1 + $0xc] ss:$16 sps:$4 sm:$0xff]  }
 0x47c   : > { %v7709_v44 = vpop.f32.mrf.mxu0 }
 0x47d   : > { %v14599_v36 = vsel %vm3502_vm7, %v14544_v9, %v7380_v17  ;;  %7542 = vmatpush3.bf16.msra.mxu1 %v3768_v41  ;;  %v3554_v37 = vmin.f32 %v14593_v55, 0.0  ;;  %vm3505_vm10 = vcmp.gt.f32.partialorder %v14593_v55, 0.0 }
 0x47e   : > { %v3779_v8 = vpack.c.bf16 %v14599_v36, %v14596_v52  ;;  %7543 = vmatprep.subr.bf16.mxu1 %v3775_v54  ;;  %v3418_v40 = vpop.f32.mrf.mxu0  ;;  %v3797_v52 = vld [vmem:[%s16659_s1 + $0x48] sm:$0xff] }
 0x47f   : > { %v3639_v9 = vmul.f32 1.442695, %v3554_v37  ;;  %v3419_v12 = vadd.f32 %v14260_v25, %v3418_v40  ;;  %v9644_v36 = vld [vmem:[%s16659_s1 + $0x28] ss:$16 sps:$4 sm:$0xff]  }
 0x480   : > { %v7710_v0 = vpop.f32.mrf.mxu0 }
 0x481   : > { %7544 = vmatpush3.bf16.msra.mxu1 %v3767_v20  ;;  %9747 = vpow2.f32 %v3639_v9  ;;  %v3555_v33 = vmin.f32 %v3419_v12, 0.0  ;;  %vm3506_vm12 = vcmp.gt.f32.partialorder %v3419_v12, 0.0 }
 0x482   : > { %7545 = vmatprep.subr.bf16.mxu1 %v3774_v62  ;;  %v9744_v45 = vpop.eup %9743 }
 0x483   : > { %v3641_v41 = vmul.f32 1.442695, %v3555_v33  ;;  %v7381_v6 = vadd.f32 -1.0, %v9744_v45 }
 0x485   : > { %7546 = vmatpush3.bf16.msra.mxu1 %v3766_v46  ;;  %9749 = vpow2.f32 %v3641_v41  ;;  %v14627_v20 = vsel %vm3503_vm3, %v14549_v7, %v7381_v6  ;;  %v17860_v7 = vpack.c.bf16 %v14476_v53, %v14473_v58 }
 0x486   : > { %7547 = vmatprep.subr.bf16.mxu1 %v3773_v39  ;;  %v9746_v28 = vpop.eup %9745  ;;  %v3423_v2 = vpop.f32.mrf.mxu0 }
 0x487   : > { %v7382_v60 = vadd.f32 -1.0, %v9746_v28  ;;  %v3424_v43 = vadd.f32 %v14260_v25, %v3423_v2 }
 0x488   : > { %v7713_v5 = vpop.f32.mrf.mxu0 }
 0x489   : > { %7548 = vmatpush3.bf16.msra.mxu1 %v3765_v49  ;;  %v14630_v47 = vsel %vm3504_vm4, %v14559_v1, %v7382_v60  ;;  %v3556_v51 = vmin.f32 %v3424_v43, 0.0  ;;  %v17859_v49 = vpack.c.bf16 %v14466_v56, %v14461_v32  ;;  %vm3507_vm13 = vcmp.gt.f32.partialorder %v3424_v43, 0.0 }
 0x48a   : > { %7549 = vmatprep.subr.bf16.mxu1 %v3772_v57  ;;  %v3780_v46 = vpack.c.bf16 %v14630_v47, %v14627_v20  ;;  %v3426_v26 = vpop.f32.mrf.mxu0  ;;  %v9631_v57 = vld [vmem:[%s16659_s1] ss:$16 sps:$4 sm:$0xff]   ;;  %v9642_v20 = vld [vmem:[%s16659_s1 + $0x2c] ss:$16 sps:$4 sm:$0xff]   ;;  %v7406_v47 = vcombine.low %v3797_v52, %v3797_v52 }
 0x48b   : > { %v3643_v63 = vmul.f32 1.442695, %v3556_v51  ;;  %v3427_v39 = vadd.f32 %v14260_v25, %v3426_v26 }
 0x48c   : > { %v7714_v18 = vpop.f32.mrf.mxu0 }
 0x48d   : > { %7550 = vmatpush3.bf16.msra.mxu1 %v3764_v15  ;;  %9751 = vpow2.f32 %v3643_v63  ;;  %v3557_v61 = vmin.f32 %v3427_v39, 0.0  ;;  %v17861_v15 = vmov 0   ;;  %vm3508_vm14 = vcmp.gt.f32.partialorder %v3427_v39, 0.0 }
 0x48e   : > { %7551 = vmatprep.subr.bf16.mxu1 %v17859_v49  ;;  %v9748_v59 = vpop.eup %9747 }
 0x48f   : > { %v3645_v38 = vmul.f32 1.442695, %v3557_v61  ;;  %v7383_v29 = vadd.f32 -1.0, %v9748_v59 }
 0x491   : > { %7552 = vmatpush3.bf16.msra.mxu1 %v17860_v7  ;;  %9753 = vpow2.f32 %v3645_v38  ;;  %v14656_v58 = vsel %vm3505_vm10, %v14593_v55, %v7383_v29 }
 0x492   : > { %3917 = vmatprep.subr.bf16.mxu1 %v17861_v15  ;;  %v9750_v32 = vpop.eup %9749  ;;  %v3431_v56 = vpop.f32.mrf.mxu0 }
 0x493   : > { %v7384_v1 = vadd.f32 -1.0, %v9750_v32  ;;  %v14696_v61 = vadd.f32 %v14260_v25, %v3431_v56 }
 0x494   : > { %3894 = vmatmul.mubr.bf16.vlgmr.msra.gmra.mxu1 %v9631_v57  ;;  %v7717_v13 = vpop.f32.mrf.mxu0 }
 0x495   : > { %3901 = vmatprep.mubr.bf16.mxu1 %v9634_v10  ;;  %v14658_v53 = vsel %vm3506_vm12, %v3419_v12, %v7384_v1  ;;  %v3558_v10 = vmin.f32 %v14696_v61, 0.0 }
 0x496   : > { %v3781_v30 = vpack.c.bf16 %v14658_v53, %v14656_v58  ;;  %v3434_v34 = vpop.f32.mrf.mxu0  ;;  %v9639_v53 = vld [vmem:[%s16659_s1 + $0x8] ss:$16 sps:$4 sm:$0xff]  }
 0x497   : > { %v14691_v60 = vadd.f32 %v14260_v25, %v3434_v34  ;;  %v3647_v13 = vmul.f32 1.442695, %v3558_v10 }
 0x498   : > { %v7718_v23 = vpop.f32.mrf.mxu0 }
 0x499   : > { %v3559_v38 = vmin.f32 %v14691_v60, 0.0  ;;  %v9893_v23 = vld [vmem:[%s16665_s7] ss:$0 sm:$0xff] }
 0x49a   : > { %v9752_v3 = vpop.eup %9751 }
 0x49b   : > { %v7385_v42 = vadd.f32 -1.0, %v9752_v3  ;;  %v3649_v32 = vmul.f32 1.442695, %v3559_v38 }
 0x49c   : > { %3902 = vmatmul.mubr.bf16.gmra.mxu1 %v9636_v16 }
 0x49d   : > { %3909 = vmatprep.mubr.bf16.mxu1 %v7405_v31  ;;  %v14671_v50 = vsel %vm3507_vm13, %v3424_v43, %v7385_v42  ;;  %vm3510_vm13 = vcmp.gt.f32.partialorder %v14691_v60, 0.0 }
 0x49e   : > { %v9754_v11 = vpop.eup %9753 }
 0x49f   : > { %v7386_v4 = vadd.f32 -1.0, %v9754_v11 }
 0x4a0   : > { %v3439_v24 = vpop.f32.mrf.mxu0 }
 0x4a1   : > { %v14673_v19 = vsel %vm3508_vm14, %v3427_v39, %v7386_v4  ;;  %v14688_v28 = vadd.f32 %v14260_v25, %v3439_v24  ;;  %vm3509_vm14 = vcmp.gt.f32.partialorder %v14696_v61, 0.0 }
 0x4a2   : > { %v7721_v17 = vpop.f32.mrf.mxu0  ;;  %v3782_v55 = vpack.c.bf16 %v14673_v19, %v14671_v50 }
 0x4a3   : > { %v3560_v49 = vmin.f32 %v14688_v28, 0.0  ;;  %vm3511_vm12 = vcmp.gt.f32.partialorder %v14688_v28, 0.0 }
 0x4a4   : > { %v3442_v54 = vpop.f32.mrf.mxu0  ;;  %3910 = vmatmul.mubr.bf16.gmra.mxu1 %v7404_v35 }
 0x4a5   : > { %7408 = vmatprep.mubr.msk.bf16.mxu1 %vm442_vm9, %v9641_v27  ;;  %v14683_v0 = vadd.f32 %v14260_v25, %v3442_v54  ;;  %v3651_v29 = vmul.f32 1.442695, %v3560_v49 }
 0x4a6   : > { %v7722_v44 = vpop.f32.mrf.mxu0 }
 0x4a7   : > { %v3561_v5 = vmin.f32 %v14683_v0, 0.0  ;;  %vm3512_vm10 = vcmp.gt.f32.partialorder %v14683_v0, 0.0 }
 0x4a9   : > { %v3653_v57 = vmul.f32 1.442695, %v3561_v5 }
 0x4ac   : > { %v3447_v14 = vpop.f32.mrf.mxu0 }
 0x4ad   : > { %v14680_v12 = vadd.f32 %v14260_v25, %v3447_v14 }
 0x4ae   : > { %v7725_v37 = vpop.f32.mrf.mxu0 }
 0x4af   : > { %v3562_v41 = vmin.f32 %v14680_v12, 0.0  ;;  %vm3513_vm4 = vcmp.gt.f32.partialorder %v14680_v12, 0.0 }
 0x4b0   : > { %v3450_v40 = vpop.f32.mrf.mxu0 }
 0x4b1   : > { %v3451_v9 = vadd.f32 %v14260_v25, %v3450_v40  ;;  %v3655_v39 = vmul.f32 1.442695, %v3562_v41 }
 0x4b2   : > { %v7726_v21 = vpop.f32.mrf.mxu0 }
 0x4b3   : > { %v3563_v33 = vmin.f32 %v3451_v9, 0.0  ;;  %vm3514_vm3 = vcmp.gt.f32.partialorder %v3451_v9, 0.0 }
 0x4b5   : > { %v3657_v51 = vmul.f32 1.442695, %v3563_v33 }
 0x4ba   : > { %v3455_v62 = vpop.f32.mrf.mxu0 }
 0x4bb   : > { %v3456_v45 = vadd.f32 %v14260_v25, %v3455_v62 }
 0x4bc   : > { %v7729_v6 = vpop.f32.mrf.mxu0 }
 0x4bd   : > { %v3564_v2 = vmin.f32 %v3456_v45, 0.0  ;;  %vm3515_vm7 = vcmp.gt.f32.partialorder %v3456_v45, 0.0 }
 0x4be   : > { %v3458_v43 = vpop.f32.mrf.mxu0 }
 0x4bf   : > { %v3659_v26 = vmul.f32 1.442695, %v3564_v2  ;;  %v3459_v63 = vadd.f32 %v14260_v25, %v3458_v43 }
 0x4c0   : > { %v7730_v18 = vpop.f32.mrf.mxu0 }
 0x4c1   : > { %9755 = vpow2.f32 %v3659_v26  ;;  %v3565_v59 = vmin.f32 %v3459_v63, 0.0  ;;  %vm3516_vm0 = vcmp.gt.f32.partialorder %v3459_v63, 0.0 }
 0x4c2   : > { %9757 = vpow2.f32 %v3657_v51 }
 0x4c3   : > { %v3661_v7 = vmul.f32 1.442695, %v3565_v59  ;;  %9759 = vpow2.f32 %v3655_v39 }
 0x4c5   : > { %9761 = vpow2.f32 %v3661_v7 }
 0x4c6   : > { %9763 = vpow2.f32 %v3653_v57 }
 0x4c7   : > { %9765 = vpow2.f32 %v3651_v29 }
 0x4c8   : > { %v3463_v1 = vpop.f32.mrf.mxu0  ;;  %9767 = vpow2.f32 %v3649_v32 }
 0x4c9   : > { %9769 = vpow2.f32 %v3647_v13  ;;  %v3464_v31 = vadd.f32 %v9893_v23, %v3463_v1 }
 0x4ca   : > { %v7733_v25 = vpop.f32.mrf.mxu0 }
 0x4cb   : > { %v3566_v17 = vmin.f32 %v3464_v31, 0.0 }
 0x4cc   : > { %v3466_v56 = vpop.f32.mrf.mxu0 }
 0x4cd   : > { %v3663_v33 = vmul.f32 1.442695, %v3566_v17 }
 0x4ce   : > { %v9756_v48 = vpop.eup %9755  ;;  %v7734_v34 = vpop.f32.mrf.mxu0 }
 0x4cf   : > { %v9758_v16 = vpop.eup %9757  ;;  %v7393_v42 = vadd.f32 -1.0, %v9756_v48  ;;  %9771 = vpow2.f32 %v3663_v33 }
 0x4d0   : > { %v9760_v3 = vpop.eup %9759  ;;  %v7392_v24 = vadd.f32 -1.0, %v9758_v16 }
 0x4d1   : > { %v7391_v27 = vadd.f32 -1.0, %v9760_v3  ;;  %v3760_v54 = vsel %vm3515_vm7, %v3456_v45, %v7393_v42  ;;  %vm3517_vm7 = vcmp.gt.f32.partialorder %v3464_v31, 0.0 }
 0x4d2   : > { %v9762_v11 = vpop.eup %9761  ;;  %v3759_v21 = vsel %vm3514_vm3, %v3451_v9, %v7392_v24  ;;  %vm17862_vm3 = vcmask 1046528  }
 0x4d3   : > { %v7394_v4 = vadd.f32 -1.0, %v9762_v11  ;;  %v9764_v35 = vpop.eup %9763  ;;  %v3758_v6 = vsel %vm3513_vm4, %v14680_v12, %v7391_v27  ;;  %v14762_v11 = vld [vmem:[#allocation2] sm:$0xff]  ;;  %vm17863_vm4 = vmmov %vm17862_vm3 }
 0x4d4   : > { %v9766_v14 = vpop.eup %9765  ;;  %v7390_v40 = vadd.f32 -1.0, %v9764_v35  ;;  %v3785_v45 = vpack.c.bf16 %v3759_v21, %v3758_v6  ;;  %v14771_v17 = vrot.slane %v14762_v11, 1  ;;  %v14781_v21 = vrot.slane %v14762_v11, 2 }
 0x4d5   : > { %v3761_v44 = vsel %vm3516_vm0, %v3459_v63, %v7394_v4  ;;  %v9768_v62 = vpop.eup %9767  ;;  %v7389_v41 = vadd.f32 -1.0, %v9766_v14  ;;  %vm16960_vm0 = vcmask 63488  }
 0x4d6   : > { %v3786_v37 = vpack.c.bf16 %v3761_v44, %v3760_v54  ;;  %v9770_v2 = vpop.eup %9769  ;;  %v7388_v43 = vadd.f32 -1.0, %v9768_v62  ;;  %v3757_v5 = vsel %vm3512_vm10, %v14683_v0, %v7390_v40  ;;  %vm17864_vm10 = vmmov %vm17862_vm3 }
 0x4d7   : > { %v7387_v9 = vadd.f32 -1.0, %v9770_v2  ;;  %v3756_v51 = vsel %vm3511_vm12, %v14688_v28, %v7389_v41  ;;  %vm17865_vm12 = vmmov %vm17862_vm3 }
 0x4d8   : > { %3918 = vmatpush1.bf16.msra.mxu1 %v3786_v37  ;;  %v3784_v12 = vpack.c.bf16 %v3757_v5, %v3756_v51  ;;  %v3755_v26 = vsel %vm3510_vm13, %v14691_v60, %v7388_v43  ;;  %vm17866_vm13 = vcmask 1041408  }
 0x4d9   : > { %3919 = vmatprep.subr.bf16.mxu1 %v17861_v15  ;;  %v3754_v63 = vsel %vm3509_vm14, %v14696_v61, %v7387_v9  ;;  %vm17867_vm14 = vmmov %vm17862_vm3 }
 0x4da   : > { %v3783_v0 = vpack.c.bf16 %v3755_v26, %v3754_v63 }
 0x4dc   : > { %3920 = vmatpush1.bf16.msra.mxu1 %v3785_v45  ;;  %v9772_v28 = vpop.eup %9771 }
 0x4dd   : > { %3921 = vmatprep.subr.bf16.mxu1 %v17861_v15  ;;  %v7395_v39 = vadd.f32 -1.0, %v9772_v28 }
 0x4df   : > { %v3762_v60 = vsel %vm3517_vm7, %v3464_v31, %v7395_v39  ;;  %vm17868_vm7 = vmmov %vm17866_vm13 }
 0x4e0   : > { %3922 = vmatpush1.bf16.msra.mxu1 %v3784_v12  ;;  %v3787_v50 = vpack.c.bf16 %v3762_v60, %v3762_v60 }
 0x4e1   : > { %3923 = vmatprep.subr.bf16.mxu1 %v17861_v15 }
 0x4e2   : > { %v3859_v58 = vsel %vm1564_vm6, %v3787_v50, 0 }
 0x4e4   : > { %3924 = vmatpush1.bf16.msra.mxu1 %v3783_v0 }
 0x4e5   : > { %3925 = vmatprep.subr.bf16.mxu1 %v17861_v15 }
 0x4e8   : > { %3926 = vmatpush1.bf16.msra.mxu1 %v3782_v55 }
 0x4e9   : > { %3927 = vmatprep.subr.bf16.mxu1 %v17861_v15 }
 0x4ec   : > { %3928 = vmatpush1.bf16.msra.mxu1 %v3781_v30 }
 0x4ed   : > { %3929 = vmatprep.subr.bf16.mxu1 %v17861_v15 }
 0x4f0   : > { %3930 = vmatpush1.bf16.msra.mxu1 %v3780_v46 }
 0x4f1   : > { %3931 = vmatprep.subr.bf16.mxu1 %v17861_v15 }
 0x4f4   : > { %3932 = vmatpush1.bf16.msra.mxu1 %v3779_v8  ;;  %v7407_v8 = vcombine.high %v3797_v52, %v3797_v52 }
 0x4f5   : > { %3947 = vmatprep.subr.bf16.mxu1 %v17861_v15 }
 0x4f8   : > { %3948 = vmatpush2.bf16.msra.mxu1 %v3859_v58 }
 0x4f9   : > { %7735 = vmatprep.subr.bf16.mxu1 %v17443_v22 }
 0x4fb   : > { %3950 = vmatmul.mubr.bf16.vlgmr.msra.gmra.mxu1 %v9639_v53 }
 0x4fc   : > { %7409 = vmatprep.mubr.msk.bf16.mxu1 %vm442_vm9, %v9642_v20 }
 0x503   : > { %3958 = vmatmul.mubr.bf16.gmra.mxu1 %v9644_v36 }
 0x504   : > { %7410 = vmatprep.mubr.msk.bf16.mxu1 %vm442_vm9, %v7407_v8 }
 0x50b   : > { %3966 = vmatmul.mubr.bf16.gmra.mxu1 %v7406_v47 }
 0x50c   : > { %7743 = vmatprep.mubr.msk.bf16.mxu1 %vm16957_vm8, %v17443_v22 }
 0x554   : > { %v7553_v46 = vpop.f32.mrf.mxu1 }
 0x556   : > { %v7554_v15 = vpop.f32.mrf.mxu1 }
 0x557   : > { %v7555_v30 = vadd.f32 %v7554_v15, %v7553_v46 }
 0x558   : > { %v7556_v19 = vpop.f32.mrf.mxu1 }
 0x55a   : > { %v7557_v55 = vpop.f32.mrf.mxu1 }
 0x55b   : > { %v7558_v18 = vadd.f32 %v7557_v55, %v7556_v19 }
 0x55c   : > { %v7559_v61 = vpop.f32.mrf.mxu1 }
 0x55e   : > { %v7560_v49 = vpop.f32.mrf.mxu1 }
 0x55f   : > { %v7561_v59 = vadd.f32 %v7560_v49, %v7559_v61 }
 0x560   : > { %v7562_v38 = vpop.f32.mrf.mxu1 }
 0x562   : > { %v7563_v57 = vpop.f32.mrf.mxu1 }
 0x563   : > { %v7564_v7 = vadd.f32 %v7563_v57, %v7562_v38 }
 0x564   : > { %v7565_v10 = vpop.f32.mrf.mxu1 }
 0x566   : > { %v7566_v29 = vpop.f32.mrf.mxu1 }
 0x567   : > { %v7567_v32 = vadd.f32 %v7566_v29, %v7565_v10 }
 0x568   : > { %v7568_v1 = vpop.f32.mrf.mxu1 }
 0x56a   : > { %v7569_v13 = vpop.f32.mrf.mxu1 }
 0x5bb   : > { %v3951_v25 = vpop.f32.mrf.mxu1 }
 0x5bc   : > { %v14752_v56 = vadd.f32 %v7555_v30, %v3951_v25 }
 0x5bd   : > { %v3953_v48 = vpop.f32.mrf.mxu1 }
 0x5be   : > { %3996 = vst.msk [vmem:[#allocation2 + $0x8] sm:$0xff] %vm442_vm9, %v14752_v56 }
 0x5bf   : > { %v3954_v34 = vpop.f32.mrf.mxu1 }
 0x5c0   : > { %v14756_v16 = vadd.f32 %v7558_v18, %v3954_v34 }
 0x5c1   : > { %v3956_v23 = vpop.f32.mrf.mxu1 }
 0x5c2   : > { %3997 = vst.msk [vmem:[#allocation2 + $0x10] sm:$0xff] %vm442_vm9, %v14756_v16  ;;  %v9647_v23 = vld [vmem:[%s16666_s8 + $0x18] ss:$0 sps:$4 sm:$0xff]  }
 0x5c3   : > { %v3959_v31 = vpop.f32.mrf.mxu1 }
 0x5c4   : > { %v14760_v3 = vadd.f32 %v7561_v59, %v3959_v31 }
 0x5c5   : > { %v3961_v42 = vpop.f32.mrf.mxu1  ;;  %v14764_v24 = vld [vmem:[#allocation2 + $0x8] sm:$0xff] }
 0x5c6   : > { %3998 = vst.msk [vmem:[#allocation2 + $0x18] sm:$0xff] %vm442_vm9, %v14760_v3  ;;  %v4016_v27 = vrot.slane %v14764_v24, 1  ;;  %v4045_v6 = vrot.slane %v14764_v24, 2  ;;  %v4073_v63 = vrot.slane %v14764_v24, 3  ;;  %v4100_v8 = vrot.slane %v14764_v24, 4 }
 0x5c7   : > { %v3962_v4 = vpop.f32.mrf.mxu1  ;;  %v4128_v49 = vrot.slane %v14764_v24, 5  ;;  %v4157_v25 = vrot.slane %v14764_v24, 6 }
 0x5c8   : > { %v14768_v35 = vadd.f32 %v7564_v7, %v3962_v4  ;;  %v4017_v33 = vsel %vm17862_vm3, %v14771_v17, %v4016_v27  ;;  %v4046_v12 = vsel %vm1070_vm5, %v14781_v21, %v4045_v6  ;;  %vm17869_vm3 = vmmov %vm17868_vm7 }
 0x5c9   : > { %v3964_v54 = vpop.f32.mrf.mxu1  ;;  %v14774_v44 = vld [vmem:[#allocation2 + $0x10] sm:$0xff] }
 0x5ca   : > { %3999 = vst.msk [vmem:[#allocation2 + $0x20] sm:$0xff] %vm442_vm9, %v14768_v35  ;;  %v4018_v14 = vrot.slane %v14774_v44, 1  ;;  %v4047_v37 = vrot.slane %v14774_v44, 2  ;;  %v4074_v9 = vrot.slane %v14774_v44, 3  ;;  %v4101_v53 = vrot.slane %v14774_v44, 4 }
 0x5cb   : > { %v3967_v40 = vpop.f32.mrf.mxu1  ;;  %v4129_v55 = vrot.slane %v14774_v44, 5  ;;  %v4158_v29 = vrot.slane %v14774_v44, 6  ;;  %v14845_v54 = vsel %vm1564_vm6, %v9647_v23, 0 }
 0x5cc   : > { %v14783_v62 = vadd.f32 %v7567_v32, %v3967_v40  ;;  %v4019_v41 = vsel %vm17863_vm4, %v4016_v27, %v4018_v14  ;;  %v4048_v5 = vsel %vm1070_vm5, %v4045_v6, %v4047_v37  ;;  %v4075_v50 = vsel %vm1317_vm1, %v4073_v63, %v4074_v9  ;;  %7736 = vmatpush3.bf16.msra.mxu1 %v14845_v54  ;;  %v14853_v40 = vld [vmem:[%s16666_s8 + $0x10] sm:$0xff]   ;;  %vm17870_vm4 = vmmov %vm17869_vm3 }
 0x5cd   : > { %v8907_v2 = vpack.i.bf16 %v4019_v41, %v4017_v33  ;;  %v14789_v45 = vld [vmem:[#allocation2 + $0x18] sm:$0xff]  ;;  %v3969_v43 = vpop.f32.mrf.mxu1  ;;  %v8912_v0 = vpack.i.bf16 %v4048_v5, %v4046_v12  ;;  %v8917_v46 = vpack.i.bf16 %v4075_v50, %v4073_v63  ;;  %v4102_v30 = vsel %vm1564_vm6, %v4100_v8, %v4101_v53  ;;  %7737 = vmatprep.subr.bf16.mxu1 %v17443_v22 }
 0x5ce   : > { %4001 = vst.msk [vmem:[#allocation2 + $0x28] sm:$0x7f] %vm16960_vm0, %v14783_v62  ;;  %v4020_v26 = vrot.slane %v14789_v45, 1  ;;  %v4049_v36 = vrot.slane %v14789_v45, 2  ;;  %v4076_v61 = vrot.slane %v14789_v45, 3  ;;  %v8922_v38 = vpack.i.bf16 %v4102_v30, %v4100_v8 }
 0x5cf   : > { %8908 = vrot.lane.b32.xlu0 %v8907_v2, %s9920_s21  ;;  %v3970_v51 = vpop.f32.mrf.mxu1  ;;  %v4130_v7 = vsel %vm1811_vm2, %v4128_v49, %v4129_v55  ;;  %v4103_v13 = vrot.slane %v14789_v45, 4  ;;  %v4159_v42 = vsel %vm17866_vm13, %v4157_v25, %v4158_v29  ;;  %v4160_v12 = vrot.slane %v14789_v45, 6 }
 0x5d0   : > { %v4021_v20 = vsel %vm17864_vm10, %v4018_v14, %v4020_v26  ;;  %v4050_v18 = vsel %vm1070_vm5, %v4047_v37, %v4049_v36  ;;  %v4077_v1 = vsel %vm1317_vm1, %v4074_v9, %v4076_v61  ;;  %v8927_v34 = vpack.i.bf16 %v4130_v7, %v4128_v49  ;;  %v14860_v9 = vld [vmem:[#allocation2 + $0x30] sm:$0xff]  ;;  %7738 = vmatpush3.bf16.msra.mxu1 %v14853_v40  ;;  %vm17871_vm10 = vmmov %vm17869_vm3 }
 0x5d1   : > { %v14800_v28 = vld [vmem:[#allocation2 + $0x20] sm:$0xff]  ;;  %v3971_v39 = vpop.f32.mrf.mxu1  ;;  %v4104_v14 = vsel %vm1564_vm6, %v4101_v53, %v4103_v13  ;;  %v4131_v37 = vrot.slane %v14789_v45, 5  ;;  %v8932_v41 = vpack.i.bf16 %v4159_v42, %v4157_v25  ;;  %7739 = vmatprep.subr.bf16.mxu1 %v17443_v22  ;;  %v4166_v49 = vrot.slane %v14860_v9, 6 }
 0x5d2   : > { %v4022_v60 = vrot.slane %v14800_v28, 1  ;;  %v4051_v58 = vrot.slane %v14800_v28, 2  ;;  %v4078_v19 = vrot.slane %v14800_v28, 3  ;;  %v4105_v10 = vrot.slane %v14800_v28, 4  ;;  %v14872_v39 = vld [vmem:[%s16666_s8 + $0x8] sm:$0xff]  }
 0x5d3   : > { %8913 = vrot.lane.b32.xlu0 %v8912_v0, %s9921_s15  ;;  %v4133_v4 = vrot.slane %v14800_v28, 5  ;;  %v4162_v43 = vrot.slane %v14800_v28, 6  ;;  %v4132_v51 = vsel %vm1811_vm2, %v4129_v55, %v4131_v37  ;;  %v4137_v0 = vrot.slane %v14860_v9, 5 }
 0x5d4   : > { %v4023_v52 = vsel %vm17865_vm12, %v4020_v26, %v4022_v60  ;;  %v4052_v15 = vsel %vm1070_vm5, %v4049_v36, %v4051_v58  ;;  %v4079_v57 = vsel %vm1317_vm1, %v4076_v61, %v4078_v19  ;;  %v4106_v31 = vsel %vm1564_vm6, %v4103_v13, %v4105_v10  ;;  %7740 = vmatpush3.bf16.msra.mxu1 %v14872_v39  ;;  %v14885_v36 = vld [vmem:[%s16666_s8] sm:$0xff]  }
 0x5d5   : > { %v8937_v47 = vpack.i.bf16 %v4023_v52, %v4021_v20  ;;  %v8942_v59 = vpack.i.bf16 %v4052_v15, %v4050_v18  ;;  %v14826_v32 = vld [vmem:[#allocation2 + $0x28] sm:$0xff]  ;;  %v8947_v48 = vpack.i.bf16 %v4079_v57, %v4077_v1  ;;  %v8952_v33 = vpack.i.bf16 %v4106_v31, %v4104_v14  ;;  %7741 = vmatprep.subr.bf16.mxu1 %v17443_v22 }
 0x5d6   : > { %v4024_v27 = vrot.slane %v14826_v32, 1  ;;  %v4134_v6 = vsel %vm1811_vm2, %v4131_v37, %v4133_v4  ;;  %v4080_v5 = vrot.slane %v14826_v32, 3  ;;  %v4053_v53 = vrot.slane %v14826_v32, 2 }
 0x5d7   : > { %8938 = vrot.lane.b32.xlu1 %v8937_v47, %s9920_s21  ;;  %8918 = vrot.lane.b32.xlu0 %v8917_v46, %s9916_s30  ;;  %v8957_v26 = vpack.i.bf16 %v4134_v6, %v4132_v51  ;;  %v4135_v20 = vrot.slane %v14826_v32, 5  ;;  %v4161_v52 = vsel %vm17869_vm3, %v4158_v29, %v4160_v12  ;;  %v4164_v61 = vrot.slane %v14826_v32, 6 }
 0x5d8   : > { %v4025_v2 = vsel %vm17867_vm14, %v4022_v60, %v4024_v27  ;;  %v4163_v60 = vsel %vm17868_vm7, %v4160_v12, %v4162_v43  ;;  %v4081_v50 = vsel %vm1317_vm1, %v4078_v19, %v4080_v5  ;;  %v4054_v46 = vsel %vm1070_vm5, %v4051_v58, %v4053_v53  ;;  %7742 = vmatpush3.bf16.msra.mxu1 %v14885_v36 }
 0x5d9   : > { %v8967_v63 = vpack.i.bf16 %v4024_v27, %v4025_v2  ;;  %v8962_v8 = vpack.i.bf16 %v4163_v60, %v4161_v52  ;;  %v8977_v47 = vpack.i.bf16 %v4080_v5, %v4081_v50  ;;  %v4136_v15 = vsel %vm1811_vm2, %v4133_v4, %v4135_v20  ;;  %7755 = vmatprep.subr.bf16.mxu1 %v17443_v22 }
 0x5da   : > { %v4138_v30 = vsel %vm1811_vm2, %v4135_v20, %v4137_v0  ;;  %v4107_v19 = vrot.slane %v14826_v32, 4  ;;  %v8972_v55 = vpack.i.bf16 %v4053_v53, %v4054_v46  ;;  %v4165_v57 = vsel %vm17870_vm4, %v4162_v43, %v4164_v61 }
 0x5db   : > { %8943 = vrot.lane.b32.xlu1 %v8942_v59, %s9921_s15  ;;  %8923 = vrot.lane.b32.xlu0 %v8922_v38, %s9922_s23  ;;  %v8987_v18 = vpack.i.bf16 %v4138_v30, %v4136_v15  ;;  %v7424_v59 = vld [vmem:[%s16670_s12] ss:$0 sm:$0xff]  ;;  %v4167_v7 = vsel %vm17871_vm10, %v4164_v61, %v4166_v49  ;;  %vm4192_vm12 = vcmask 130048   ;;  %vm4205_vm13 = vcmask 261120  }
 0x5dc   : > { %v4108_v58 = vsel %vm1564_vm6, %v4105_v10, %v4107_v19  ;;  %v8992_v10 = vpack.i.bf16 %v4167_v7, %v4165_v57  ;;  %vm4212_vm14 = vcmask 326656   ;;  %vm4228_vm7 = vsmask.f32 5376 }
 0x5dd   : > { %v8982_v38 = vpack.i.bf16 %v4107_v19, %v4108_v58  ;;  %vm16959_vm3 = vcmask 457728   ;;  %vm17872_vm4 = vcmask 1046528  }
 0x5de   : > { %vm17873_vm10 = vmmov %vm17872_vm4 }
 0x5df   : > { %8948 = vrot.lane.b32.xlu1 %v8947_v48, %s9916_s30  ;;  %8928 = vrot.lane.b32.xlu0 %v8927_v34, %s9923_s28 }
 0x5e3   : > { %8953 = vrot.lane.b32.xlu1 %v8952_v33, %s9922_s23  ;;  %8933 = vrot.lane.b32.xlu0 %v8932_v41, %s9910_s22 }
 0x5e7   : > { %8958 = vrot.lane.b32.xlu1 %v8957_v26, %s9923_s28  ;;  %8968 = vrot.lane.b32.xlu0 %v8967_v63, %s9920_s21 }
 0x5eb   : > { %8963 = vrot.lane.b32.xlu1 %v8962_v8, %s9910_s22  ;;  %8978 = vrot.lane.b32.xlu0 %v8977_v47, %s9916_s30 }
 0x5ef   : > { %8973 = vrot.lane.b32.xlu1 %v8972_v55, %s9921_s15  ;;  %8988 = vrot.lane.b32.xlu0 %v8987_v18, %s9923_s28 }
 0x5f3   : > { %8983 = vrot.lane.b32.xlu1 %v8982_v38, %s9922_s23  ;;  %4391 = vrot.lane.b32.xlu0 %v7424_v59, %s9921_s15 }
 0x5f7   : > { %8993 = vrot.lane.b32.xlu1 %v8992_v10, %s9910_s22  ;;  %4436 = vrot.lane.b32.xlu0 %v14756_v16, %s9924_s27 }
 0x5fb   : > { %4434 = vrot.lane.b32.xlu1 %v14752_v56, %s9924_s27  ;;  %4440 = vrot.lane.b32.xlu0 %v14768_v35, %s9924_s27 }
 0x5ff   : > { %4438 = vrot.lane.b32.xlu1 %v14760_v3, %s9924_s27 }
 0x603   : > { %4442 = vrot.lane.b32.xlu1 %v14783_v62, %s9924_s27 }
 0x641   : > { %v8909_v29 = vpop.permute.xlu0 %8908 }
 0x642   : > { %v8911_v23 = vunpack.i.h.bf16 %v8909_v29  ;;  %v8910_v16 = vunpack.i.l.bf16 %v8909_v29 }
 0x644   : > { %v4187_v62 = vsel %vm442_vm9, %v14764_v24, %v8911_v23  ;;  %v4186_v37 = vsel %vm442_vm9, %v14762_v11, %v8910_v16 }
 0x645   : > { %v8914_v1 = vpop.permute.xlu0 %8913 }
 0x646   : > { %v8916_v31 = vunpack.i.h.bf16 %v8914_v1  ;;  %v8915_v42 = vunpack.i.l.bf16 %v8914_v1 }
 0x648   : > { %v4193_v6 = vsel %vm4192_vm12, %v4186_v37, %v8915_v42  ;;  %v4194_v2 = vsel %vm4192_vm12, %v4187_v62, %v8916_v31 }
 0x649   : > { %v8939_v13 = vpop.permute.xlu1 %8938  ;;  %v8919_v25 = vpop.permute.xlu0 %8918 }
 0x64a   : > { %v8921_v56 = vunpack.i.h.bf16 %v8919_v25  ;;  %v8920_v4 = vunpack.i.l.bf16 %v8919_v25  ;;  %v8941_v43 = vunpack.i.h.bf16 %v8939_v13  ;;  %v8940_v5 = vunpack.i.l.bf16 %v8939_v13 }
 0x64c   : > { %v4199_v51 = vsel %vm2848_vm11, %v4193_v6, %v8920_v4  ;;  %v4200_v12 = vsel %vm2848_vm11, %v4194_v2, %v8921_v56  ;;  %v4188_v19 = vsel %vm442_vm9, %v14774_v44, %v8940_v5  ;;  %v4189_v59 = vsel %vm442_vm9, %v14789_v45, %v8941_v43 }
 0x64d   : > { %v8944_v48 = vpop.permute.xlu1 %8943  ;;  %v8924_v34 = vpop.permute.xlu0 %8923 }
 0x64e   : > { %v8926_v3 = vunpack.i.h.bf16 %v8924_v34  ;;  %v8925_v14 = vunpack.i.l.bf16 %v8924_v34  ;;  %v8945_v26 = vunpack.i.l.bf16 %v8944_v48  ;;  %v8946_v20 = vunpack.i.h.bf16 %v8944_v48 }
 0x650   : > { %v4206_v24 = vsel %vm4205_vm13, %v4199_v51, %v8925_v14  ;;  %v4207_v11 = vsel %vm4205_vm13, %v4200_v12, %v8926_v3  ;;  %v4195_v38 = vsel %vm4192_vm12, %v4188_v19, %v8945_v26  ;;  %v4196_v57 = vsel %vm4192_vm12, %v4189_v59, %v8946_v20 }
 0x651   : > { %v8949_v35 = vpop.permute.xlu1 %8948  ;;  %v8929_v27 = vpop.permute.xlu0 %8928 }
 0x652   : > { %v8931_v33 = vunpack.i.h.bf16 %v8929_v27  ;;  %v8930_v41 = vunpack.i.l.bf16 %v8929_v27  ;;  %v8951_v47 = vunpack.i.h.bf16 %v8949_v35  ;;  %v8950_v46 = vunpack.i.l.bf16 %v8949_v35 }
 0x654   : > { %v4213_v52 = vsel %vm4212_vm14, %v4206_v24, %v8930_v41  ;;  %v4214_v8 = vsel %vm4212_vm14, %v4207_v11, %v8931_v33  ;;  %v4201_v1 = vsel %vm2848_vm11, %v4195_v38, %v8950_v46  ;;  %v4202_v13 = vsel %vm2848_vm11, %v4196_v57, %v8951_v47 }
 0x655   : > { %v8954_v63 = vpop.permute.xlu1 %8953  ;;  %v8934_v60 = vpop.permute.xlu0 %8933 }
 0x656   : > { %v8936_v50 = vunpack.i.h.bf16 %v8934_v60  ;;  %v8935_v53 = vunpack.i.l.bf16 %v8934_v60  ;;  %v8956_v55 = vunpack.i.h.bf16 %v8954_v63  ;;  %v8955_v18 = vunpack.i.l.bf16 %v8954_v63 }
 0x658   : > { %v4219_v15 = vsel %vm3048_vm15, %v4213_v52, %v8935_v53  ;;  %v4220_v30 = vsel %vm3048_vm15, %v4214_v8, %v8936_v50  ;;  %v4208_v44 = vsel %vm4205_vm13, %v4201_v1, %v8955_v18  ;;  %v4209_v25 = vsel %vm4205_vm13, %v4202_v13, %v8956_v55 }
 0x659   : > { %v8959_v58 = vpop.permute.xlu1 %8958  ;;  %v8969_v61 = vpop.permute.xlu0 %8968  ;;  %v4225_v7 = vpack.c.bf16 %v4220_v30, %v4219_v15 }
 0x65a   : > { %v8961_v10 = vunpack.i.h.bf16 %v8959_v58  ;;  %v8960_v29 = vunpack.i.l.bf16 %v8959_v58  ;;  %v8971_v23 = vunpack.i.h.bf16 %v8969_v61  ;;  %v8970_v16 = vunpack.i.l.bf16 %v8969_v61 }
 0x65b   : > { %v4230_v42 = vshrl.u32 %v4225_v7, 16  ;;  %v4233_v56 = vshll.u32 %v4225_v7, 16 }
 0x65c   : > { %v4215_v4 = vsel %vm4212_vm14, %v4208_v44, %v8960_v29  ;;  %v4216_v35 = vsel %vm4212_vm14, %v4209_v25, %v8961_v10  ;;  %v4191_v33 = vsel %vm442_vm9, %v14826_v32, %v8971_v23  ;;  %v4190_v41 = vsel %vm442_vm9, %v14800_v28, %v8970_v16 }
 0x65d   : > { %v8964_v48 = vpop.permute.xlu1 %8963  ;;  %v8979_v34 = vpop.permute.xlu0 %8978  ;;  %v4232_v43 = vrot.slane %v4230_v42, 2  ;;  %v4235_v5 = vrot.slane %v4233_v56, 3 }
 0x65e   : > { %v8966_v45 = vunpack.i.h.bf16 %v8964_v48  ;;  %v8965_v31 = vunpack.i.l.bf16 %v8964_v48  ;;  %v8981_v11 = vunpack.i.h.bf16 %v8979_v34  ;;  %v8980_v50 = vunpack.i.l.bf16 %v8979_v34 }
 0x65f   : > { %v4236_v47 = vor.u32 %v4235_v5, %v4232_v43 }
 0x660   : > { %v4221_v27 = vsel %vm3048_vm15, %v4215_v4, %v8965_v31  ;;  %v4222_v3 = vsel %vm3048_vm15, %v4216_v35, %v8966_v45 }
 0x661   : > { %v4226_v14 = vpack.c.bf16 %v4222_v3, %v4221_v27  ;;  %v8974_v62 = vpop.permute.xlu1 %8973  ;;  %v8989_v37 = vpop.permute.xlu0 %8988 }
 0x662   : > { %v8976_v6 = vunpack.i.h.bf16 %v8974_v62  ;;  %v8975_v2 = vunpack.i.l.bf16 %v8974_v62  ;;  %v8991_v19 = vunpack.i.h.bf16 %v8989_v37  ;;  %v8990_v55 = vunpack.i.l.bf16 %v8989_v37 }
 0x663   : > { %v4238_v51 = vshrl.u32 %v4226_v14, 16  ;;  %v4241_v12 = vshll.u32 %v4226_v14, 16 }
 0x664   : > { %v4197_v26 = vsel %vm4192_vm12, %v4190_v41, %v8975_v2  ;;  %v4198_v63 = vsel %vm4192_vm12, %v4191_v33, %v8976_v6 }
 0x665   : > { %v4240_v60 = vrot.slane %v4238_v51, 2  ;;  %v4243_v24 = vrot.slane %v4241_v12, 3  ;;  %v8984_v53 = vpop.permute.xlu1 %8983  ;;  %v14961_v20 = vpop.permute.xlu0 %4391  ;;  %v4203_v28 = vsel %vm2848_vm11, %v4197_v26, %v8980_v50  ;;  %v4204_v8 = vsel %vm2848_vm11, %v4198_v63, %v8981_v11 }
 0x666   : > { %v8986_v32 = vunpack.i.h.bf16 %v8984_v53  ;;  %v8985_v52 = vunpack.i.l.bf16 %v8984_v53 }
 0x667   : > { %v4244_v46 = vor.u32 %v4243_v24, %v4240_v60 }
 0x668   : > { %v4210_v15 = vsel %vm4205_vm13, %v4203_v28, %v8985_v52  ;;  %v4211_v30 = vsel %vm4205_vm13, %v4204_v8, %v8986_v32 }
 0x669   : > { %v8994_v18 = vpop.permute.xlu1 %8993  ;;  %v4437_v58 = vpop.permute.xlu0 %4436  ;;  %v4245_v61 = vsel %vm4228_vm7, %v4236_v47, %v4244_v46  ;;  %v4217_v57 = vsel %vm4212_vm14, %v4210_v15, %v8990_v55  ;;  %v4218_v7 = vsel %vm4212_vm14, %v4211_v30, %v8991_v19 }
 0x66a   : > { %v8996_v59 = vunpack.i.h.bf16 %v8994_v18  ;;  %v8995_v38 = vunpack.i.l.bf16 %v8994_v18  ;;  %4450 = vst.msk [vmem:[#allocation2 + $0x10] sm:$0xff] %vm442_vm9, %v4437_v58  ;;  %7744 = vmatmul.mubr.msk.bf16.vlgmr.msra.gmra.mxu1 %vm16959_vm3, %v4245_v61 }
 0x66b   : > { %7747 = vmatprep.mubr.msk.bf16.mxu1 %vm16957_vm8, %v17443_v22  ;;  %7756 = vmatpush3.bf16.msra.mxu1 %v14845_v54 }
 0x66c   : > { %v4223_v10 = vsel %vm3048_vm15, %v4217_v57, %v8995_v38  ;;  %v4224_v29 = vsel %vm3048_vm15, %v4218_v7, %v8996_v59  ;;  %7757 = vmatprep.subr.bf16.mxu1 %v17443_v22 }
 0x66d   : > { %v4227_v1 = vpack.c.bf16 %v4224_v29, %v4223_v10  ;;  %v4435_v13 = vpop.permute.xlu1 %4434  ;;  %v4441_v44 = vpop.permute.xlu0 %4440 }
 0x66e   : > { %4449 = vst.msk [vmem:[#allocation2 + $0x8] sm:$0xff] %vm442_vm9, %v4435_v13  ;;  %4452 = vst.msk [vmem:[#allocation2 + $0x20] sm:$0xff] %vm442_vm9, %v4441_v44 }
 0x66f   : > { %v4247_v25 = vshrl.u32 %v4227_v1, 16  ;;  %v4250_v48 = vshll.u32 %v4227_v1, 16  ;;  %7758 = vmatpush3.bf16.msra.mxu1 %v14853_v40 }
 0x670   : > { %7759 = vmatprep.subr.bf16.mxu1 %v17443_v22 }
 0x671   : > { %v4439_v54 = vpop.permute.xlu1 %4438  ;;  %v4249_v34 = vrot.slane %v4247_v25, 2  ;;  %v4252_v23 = vrot.slane %v4250_v48, 3  ;;  %v15019_v26 = vld [vmem:[#allocation2 + $0x10] sm:$0xff] }
 0x672   : > { %4451 = vst.msk [vmem:[#allocation2 + $0x18] sm:$0xff] %vm442_vm9, %v4439_v54  ;;  %v4470_v11 = vrot.slane %v15019_v26, 1  ;;  %v4499_v47 = vrot.slane %v15019_v26, 2  ;;  %v4526_v38 = vrot.slane %v15019_v26, 3  ;;  %v4553_v48 = vrot.slane %v15019_v26, 4 }
 0x673   : > { %v4253_v16 = vor.u32 %v4252_v23, %v4249_v34  ;;  %7760 = vmatpush3.bf16.msra.mxu1 %v14872_v39 }
 0x674   : > { %7761 = vmatprep.subr.bf16.mxu1 %v17443_v22 }
 0x675   : > { %v4443_v45 = vpop.permute.xlu1 %4442  ;;  %v4254_v31 = vsel %vm4228_vm7, %v4244_v46, %v4253_v16  ;;  %v15017_v51 = vld [vmem:[#allocation2 + $0x8] sm:$0xff]  ;;  %v15027_v53 = vld [vmem:[#allocation2 + $0x20] sm:$0xff] }
 0x676   : > { %4453 = vst.msk [vmem:[#allocation2 + $0x28] sm:$0x7f] %vm16960_vm0, %v4443_v45  ;;  %7748 = vmatmul.mubr.msk.bf16.gmra.mxu1 %vm16959_vm3, %v4254_v31  ;;  %v4468_v60 = vrot.slane %v15017_v51, 1  ;;  %v4497_v50 = vrot.slane %v15017_v51, 2  ;;  %v4474_v46 = vrot.slane %v15027_v53, 1  ;;  %v4525_v19 = vrot.slane %v15017_v51, 3 }
 0x677   : > { %7751 = vmatprep.mubr.msk.bf16.mxu1 %vm16957_vm8, %v17443_v22  ;;  %7762 = vmatpush3.bf16.msra.mxu1 %v14885_v36  ;;  %v4503_v57 = vrot.slane %v15027_v53, 2  ;;  %v4552_v44 = vrot.slane %v15017_v51, 4  ;;  %v4530_v54 = vrot.slane %v15027_v53, 3 }
 0x678   : > { %7775 = vmatprep.subr.bf16.mxu1 %v17443_v22  ;;  %v4469_v52 = vsel %vm17872_vm4, %v14771_v17, %v4468_v60  ;;  %v4471_v28 = vsel %vm17873_vm10, %v4468_v60, %v4470_v11  ;;  %v4498_v30 = vsel %vm1070_vm5, %v14781_v21, %v4497_v50  ;;  %v4500_v18 = vsel %vm1070_vm5, %v4497_v50, %v4499_v47  ;;  %vm17874_vm10 = vmmov %vm17872_vm4 }
 0x679   : > { %v15023_v24 = vld [vmem:[#allocation2 + $0x18] sm:$0xff]  ;;  %v8997_v15 = vpack.i.bf16 %v4471_v28, %v4469_v52  ;;  %v9007_v7 = vpack.i.bf16 %v4500_v18, %v4498_v30  ;;  %v4527_v29 = vsel %vm1317_vm1, %v4525_v19, %v4526_v38  ;;  %v4554_v45 = vsel %vm1564_vm6, %v4552_v44, %v4553_v48 }
 0x67a   : > { %v4472_v8 = vrot.slane %v15023_v24, 1  ;;  %v4501_v59 = vrot.slane %v15023_v24, 2  ;;  %v4528_v25 = vrot.slane %v15023_v24, 3  ;;  %v9017_v34 = vpack.i.bf16 %v4527_v29, %v4525_v19 }
 0x67b   : > { %v4612_v28 = vrot.slane %v15023_v24, 6 }
 0x67c   : > { %v4473_v58 = vsel %vm17872_vm4, %v4470_v11, %v4472_v8  ;;  %v4475_v61 = vsel %vm17874_vm10, %v4472_v8, %v4474_v46  ;;  %v4502_v1 = vsel %vm1070_vm5, %v4499_v47, %v4501_v59  ;;  %v4504_v13 = vsel %vm1070_vm5, %v4501_v59, %v4503_v57 }
 0x67d   : > { %v9002_v10 = vpack.i.bf16 %v4475_v61, %v4473_v58  ;;  %v9012_v23 = vpack.i.bf16 %v4504_v13, %v4502_v1  ;;  %v4529_v31 = vsel %vm1317_vm1, %v4526_v38, %v4528_v25  ;;  %vm17875_vm4 = vcmask 1041408  }
 0x67e   : > { %7752 = vmatmul.mubr.msk.bf16.gmra.mxu1 %vm16959_vm3, %v4253_v16  ;;  %v4580_v16 = vrot.slane %v15017_v51, 5  ;;  %v4614_v8 = vrot.slane %v15027_v53, 6  ;;  %vm17877_vm3 = vmmov %vm17875_vm4 }
 0x67f   : > { %7763 = vmatprep.mubr.msk.bf16.mxu1 %vm16957_vm8, %v17443_v22  ;;  %vm17876_vm8 = vmmov %vm17875_vm4 }
 0x72a   : > { %v14995_v40 = vpop.f32.mrf.mxu1 }
 0x72b   : > { %v4394_v39 = vadd.f32 %v14961_v20, %v14995_v40 }
 0x72c   : > { %v7745_v42 = vpop.f32.mrf.mxu1 }
 0x72d   : > { %9773 = vtanh.f32 %v4394_v39  ;;  %v4531_v39 = vsel %vm1317_vm1, %v4528_v25, %v4530_v54  ;;  %v4555_v42 = vrot.slane %v15023_v24, 4 }
 0x72e   : > { %v14999_v56 = vpop.f32.mrf.mxu1 }
 0x72f   : > { %v4395_v4 = vadd.f32 %v14961_v20, %v14999_v56 }
 0x730   : > { %v7746_v36 = vpop.f32.mrf.mxu1 }
 0x731   : > { %9775 = vtanh.f32 %v4395_v4  ;;  %v4581_v4 = vrot.slane %v15019_v26, 5  ;;  %v4557_v36 = vrot.slane %v15027_v53, 4 }
 0x736   : > { %v15003_v35 = vpop.f32.mrf.mxu1 }
 0x737   : > { %v4396_v27 = vadd.f32 %v14961_v20, %v15003_v35 }
 0x738   : > { %v7749_v3 = vpop.f32.mrf.mxu1 }
 0x739   : > { %9777 = vtanh.f32 %v4396_v27  ;;  %v9027_v27 = vpack.i.bf16 %v4554_v45, %v4552_v44  ;;  %v9022_v3 = vpack.i.bf16 %v4531_v39, %v4529_v31 }
 0x73a   : > { %v9774_v14 = vpop.eup %9773  ;;  %v15007_v62 = vpop.f32.mrf.mxu1 }
 0x73b   : > { %v4397_v37 = vadd.f32 %v14961_v20, %v15007_v62  ;;  %4409 = vrot.lane.b32.xlu0 %v9774_v14, %s9925_s29  ;;  %v4582_v14 = vsel %vm1811_vm2, %v4580_v16, %v4581_v4 }
 0x73c   : > { %v7750_v33 = vpop.f32.mrf.mxu1 }
 0x73d   : > { %9779 = vtanh.f32 %v4397_v37  ;;  %v15066_v37 = vld [vmem:[#allocation2 + $0x28] sm:$0xff]  ;;  %v4556_v33 = vsel %vm1564_vm6, %v4553_v48, %v4555_v42 }
 0x73e   : > { %v9776_v41 = vpop.eup %9775  ;;  %v15012_v6 = vpop.f32.mrf.mxu1  ;;  %v4476_v11 = vrot.slane %v15066_v37, 1  ;;  %v4532_v18 = vrot.slane %v15066_v37, 3  ;;  %v4505_v58 = vrot.slane %v15066_v37, 2 }
 0x73f   : > { %v4398_v2 = vadd.f32 %v14961_v20, %v15012_v6  ;;  %4411 = vrot.lane.b32.xlu1 %v9776_v41, %s9925_s29  ;;  %v4558_v41 = vsel %vm1564_vm6, %v4555_v42, %v4557_v36 }
 0x740   : > { %v7753_v43 = vpop.f32.mrf.mxu1  ;;  %v9032_v60 = vpack.i.bf16 %v4558_v41, %v4556_v33  ;;  %v4477_v30 = vsel %vm17874_vm10, %v4474_v46, %v4476_v11  ;;  %v4533_v38 = vsel %vm1317_vm1, %v4530_v54, %v4532_v18  ;;  %v4587_v46 = vrot.slane %v15066_v37, 5 }
 0x741   : > { %9781 = vtanh.f32 %v4398_v2  ;;  %v4609_v2 = vrot.slane %v15017_v51, 6  ;;  %v4583_v43 = vrot.slane %v15023_v24, 5  ;;  %v9057_v61 = vpack.i.bf16 %v4476_v11, %v4477_v30 }
 0x742   : > { %v4342_v5 = vpop.f32.mrf.mxu1  ;;  %v9067_v29 = vpack.i.bf16 %v4532_v18, %v4533_v38  ;;  %v4590_v44 = vsel %vm1811_vm2, %v4587_v46, %v4137_v0 }
 0x743   : > { %v4610_v5 = vrot.slane %v15019_v26, 6 }
 0x744   : > { %v7754_v12 = vpop.f32.mrf.mxu1 }
 0x745   : > { %v4585_v12 = vrot.slane %v15027_v53, 5  ;;  %v4611_v50 = vsel %vm17875_vm4, %v4609_v2, %v4610_v5  ;;  %v4613_v19 = vsel %vm17876_vm8, %v4610_v5, %v4612_v28  ;;  %vm17878_vm8 = vmmov %vm17877_vm3 }
 0x746   : > { %v9778_v63 = vpop.eup %9777  ;;  %v9047_v47 = vpack.i.bf16 %v4611_v50, %v4609_v2  ;;  %vm17879_vm4 = vmmov %vm17874_vm10 }
 0x747   : > { %4413 = vrot.lane.b32.xlu0 %v9778_v63, %s9925_s29  ;;  %v9037_v63 = vpack.i.bf16 %v4582_v14, %v4580_v16  ;;  %v4586_v52 = vsel %vm1811_vm2, %v4583_v43, %v4585_v12  ;;  %v4588_v13 = vsel %vm1811_vm2, %v4585_v12, %v4587_v46  ;;  %v15115_v16 = vld [vmem:[%s16669_s11] ss:$0 sm:$0xff]  ;;  %vm17880_vm10 = vmmov %vm17879_vm4 }
 0x748   : > { %v9077_v48 = vpack.i.bf16 %v4590_v44, %v4588_v13  ;;  %v4351_v45 = vadd.f32 %v15115_v16, %v14995_v40  ;;  %v4352_v9 = vadd.f32 %v15115_v16, %v14999_v56  ;;  %v4353_v39 = vadd.f32 %v15115_v16, %v15003_v35 }
 0x749   : > { %v4355_v40 = vadd.f32 %v15115_v16, %v15012_v6 }
 0x74a   : > { %v9780_v32 = vpop.eup %9779  ;;  %v7419_v31 = vmul.f32 -1.442695, %v4351_v45  ;;  %v7421_v42 = vmul.f32 -1.442695, %v4353_v39 }
 0x74b   : > { %4415 = vrot.lane.b32.xlu1 %v9780_v32, %s9925_s29  ;;  %v4584_v32 = vsel %vm1811_vm2, %v4581_v4, %v4583_v43  ;;  %v4354_v4 = vadd.f32 %v15115_v16, %v15007_v62  ;;  %v7423_v56 = vmul.f32 -1.442695, %v4355_v40 }
 0x74c   : > { %9783 = vpow2.f32 %v7419_v31 }
 0x74e   : > { %v9782_v55 = vpop.eup %9781 }
 0x74f   : > { %8998 = vrot.lane.b32.xlu1 %v8997_v15, %s9920_s21  ;;  %4417 = vrot.lane.b32.xlu0 %v9782_v55, %s9925_s29  ;;  %v9042_v15 = vpack.i.bf16 %v4586_v52, %v4584_v32  ;;  %v4615_v55 = vsel %vm17877_vm3, %v4612_v28, %v4614_v8 }
 0x750   : > { %v9052_v59 = vpack.i.bf16 %v4615_v55, %v4613_v19 }
 0x753   : > { %9008 = vrot.lane.b32.xlu1 %v9007_v7, %s9921_s15  ;;  %9003 = vrot.lane.b32.xlu0 %v9002_v10, %s9920_s21  ;;  %v4506_v7 = vsel %vm1070_vm5, %v4503_v57, %v4505_v58  ;;  %v4559_v10 = vrot.slane %v15066_v37, 4  ;;  %v4616_v57 = vrot.slane %v15066_v37, 6 }
 0x754   : > { %v9062_v1 = vpack.i.bf16 %v4505_v58, %v4506_v7 }
 0x755   : > { %v4560_v25 = vsel %vm1564_vm6, %v4557_v36, %v4559_v10 }
 0x756   : > { %v9072_v54 = vpack.i.bf16 %v4559_v10, %v4560_v25 }
 0x757   : > { %9018 = vrot.lane.b32.xlu1 %v9017_v34, %s9916_s30  ;;  %9013 = vrot.lane.b32.xlu0 %v9012_v23, %s9921_s15  ;;  %v4617_v34 = vsel %vm17878_vm8, %v4614_v8, %v4616_v57  ;;  %v4619_v23 = vsel %vm17877_vm3, %v4616_v57, %v4166_v49  ;;  %v7420_v49 = vmul.f32 -1.442695, %v4352_v9  ;;  %vm17881_vm8 = vmmov %vm17877_vm3 }
 0x758   : > { %v9082_v0 = vpack.i.bf16 %v4619_v23, %v4617_v34  ;;  %vm17882_vm3 = vmmov %vm17879_vm4 }
 0x759   : > { %9785 = vpow2.f32 %v7420_v49  ;;  %v9784_v36 = vpop.eup %9783  ;;  %v15196_v49 = vld [vmem:[#allocation2 + $0x30] sm:$0xff] }
 0x75a   : > { %9787 = vpow2.f32 %v7421_v42 }
 0x75b   : > { %9028 = vrot.lane.b32.xlu1 %v9027_v27, %s9922_s23  ;;  %9023 = vrot.lane.b32.xlu0 %v9022_v3, %s9916_s30  ;;  %v7422_v27 = vmul.f32 -1.442695, %v4354_v4  ;;  %v4371_v3 = vadd.f32 1.0, %v9784_v36 }
 0x75d   : > { %9789 = vpow2.f32 %v7422_v27 }
 0x75e   : > { %9791 = vrcp.f32 %v4371_v3 }
 0x75f   : > { %9038 = vrot.lane.b32.xlu1 %v9037_v63, %s9923_s28  ;;  %9033 = vrot.lane.b32.xlu0 %v9032_v60, %s9922_s23  ;;  %9793 = vpow2.f32 %v7423_v56  ;;  %v15213_v56 = vrot.slane %v15196_v49, 5 }
 0x763   : > { %9048 = vrot.lane.b32.xlu1 %v9047_v47, %s9910_s22  ;;  %9043 = vrot.lane.b32.xlu0 %v9042_v15, %s9923_s28 }
 0x766   : > { %v9786_v14 = vpop.eup %9785 }
 0x767   : > { %9058 = vrot.lane.b32.xlu1 %v9057_v61, %s9920_s21  ;;  %9053 = vrot.lane.b32.xlu0 %v9052_v59, %s9910_s22  ;;  %v4372_v33 = vadd.f32 1.0, %v9786_v14  ;;  %v9788_v35 = vpop.eup %9787 }
 0x768   : > { %v4373_v41 = vadd.f32 1.0, %v9788_v35 }
 0x769   : > { %9795 = vrcp.f32 %v4372_v33 }
 0x76a   : > { %v9790_v2 = vpop.eup %9789  ;;  %9797 = vrcp.f32 %v4373_v41 }
 0x76b   : > { %9068 = vrot.lane.b32.xlu1 %v9067_v29, %s9916_s30  ;;  %9063 = vrot.lane.b32.xlu0 %v9062_v1, %s9921_s15  ;;  %v9792_v62 = vpop.eup %9791  ;;  %v4374_v43 = vadd.f32 1.0, %v9790_v2 }
 0x76c   : > { %v9794_v5 = vpop.eup %9793 }
 0x76d   : > { %9799 = vrcp.f32 %v4374_v43  ;;  %v4375_v63 = vadd.f32 1.0, %v9794_v5 }
 0x76f   : > { %9078 = vrot.lane.b32.xlu1 %v9077_v48, %s9923_s28  ;;  %9073 = vrot.lane.b32.xlu0 %v9072_v54, %s9922_s23  ;;  %9801 = vrcp.f32 %v4375_v63 }
 0x773   : > { %9083 = vrot.lane.b32.xlu0 %v9082_v0, %s9910_s22 }
 0x776   : > { %v9796_v60 = vpop.eup %9795 }
 0x777   : > { %v9798_v52 = vpop.eup %9797 }
 0x77a   : > { %v9800_v55 = vpop.eup %9799 }
 0x77c   : > { %v9802_v25 = vpop.eup %9801 }
 0x7ad   : > { %v4410_v6 = vpop.permute.xlu0 %4409 }
 0x7ae   : > { %v15133_v12 = vmul.f32 %v9792_v62, %v4410_v6  ;;  %v15220_v62 = vld [vmem:[#allocation2] sm:$0xff] }
 0x7b0   : > { %4773 = vst.msk [vmem:[#allocation2 + $0x8] sm:$0xff] %vm442_vm9, %v15133_v12  ;;  %7234 = vst.msk [vmem:[%s15131_s20] sm:$0xff] %vm442_vm9, %v15133_v12 }
 0x7b1   : > { %v4412_v11 = vpop.permute.xlu1 %4411 }
 0x7b2   : > { %v15140_v50 = vmul.f32 %v9796_v60, %v4412_v11 }
 0x7b4   : > { %4774 = vst.msk [vmem:[#allocation2 + $0x10] sm:$0xff] %vm442_vm9, %v15140_v50  ;;  %7235 = vst.msk [vmem:[%s15131_s20 + $0x8] sm:$0xff] %vm442_vm9, %v15140_v50 }
 0x7b7   : > { %v15147_v32 = vld [vmem:[#allocation2 + $0x8] sm:$0xff] }
 0x7b8   : > { %v4792_v8 = vrot.slane %v15147_v32, 1  ;;  %v4821_v61 = vrot.slane %v15147_v32, 2  ;;  %v4849_v13 = vrot.slane %v15147_v32, 3  ;;  %v4876_v44 = vrot.slane %v15147_v32, 4 }
 0x7b9   : > { %v4414_v28 = vpop.permute.xlu0 %4413  ;;  %v4904_v34 = vrot.slane %v15147_v32, 5  ;;  %v4933_v23 = vrot.slane %v15147_v32, 6 }
 0x7ba   : > { %v15150_v47 = vmul.f32 %v9798_v52, %v4414_v28  ;;  %v4793_v58 = vsel %vm17879_vm4, %v14771_v17, %v4792_v8  ;;  %v4822_v54 = vsel %vm1070_vm5, %v14781_v21, %v4821_v61  ;;  %vm17883_vm4 = vmmov %vm17882_vm3 }
 0x7bb   : > { %v15152_v15 = vld [vmem:[#allocation2 + $0x10] sm:$0xff] }
 0x7bc   : > { %4775 = vst.msk [vmem:[#allocation2 + $0x18] sm:$0xff] %vm442_vm9, %v15150_v47  ;;  %7236 = vst.msk [vmem:[%s15131_s20 + $0x10] sm:$0xff] %vm442_vm9, %v15150_v47  ;;  %v4794_v30 = vrot.slane %v15152_v15, 1  ;;  %v4823_v19 = vrot.slane %v15152_v15, 2  ;;  %v4850_v7 = vrot.slane %v15152_v15, 3  ;;  %v4877_v46 = vrot.slane %v15152_v15, 4 }
 0x7bd   : > { %v4416_v18 = vpop.permute.xlu1 %4415  ;;  %v4905_v1 = vrot.slane %v15152_v15, 5  ;;  %v4934_v17 = vrot.slane %v15152_v15, 6 }
 0x7be   : > { %v15164_v59 = vmul.f32 %v9800_v55, %v4416_v18  ;;  %v4795_v38 = vsel %vm17880_vm10, %v4792_v8, %v4794_v30  ;;  %v4824_v29 = vsel %vm1070_vm5, %v4821_v61, %v4823_v19  ;;  %v4851_v31 = vsel %vm1317_vm1, %v4849_v13, %v4850_v7  ;;  %vm17884_vm10 = vmmov %vm17882_vm3 }
 0x7bf   : > { %v9087_v10 = vpack.i.bf16 %v4795_v38, %v4793_v58  ;;  %v9092_v45 = vpack.i.bf16 %v4824_v29, %v4822_v54  ;;  %v4878_v9 = vsel %vm1564_vm6, %v4876_v44, %v4877_v46  ;;  %v4906_v4 = vsel %vm1811_vm2, %v4904_v34, %v4905_v1 }
 0x7c0   : > { %4776 = vst.msk [vmem:[#allocation2 + $0x20] sm:$0xff] %vm442_vm9, %v15164_v59  ;;  %7237 = vst.msk [vmem:[%s15131_s20 + $0x18] sm:$0xff] %vm442_vm9, %v15164_v59  ;;  %v4935_v36 = vsel %vm17881_vm8, %v4933_v23, %v4934_v17  ;;  %v9097_v3 = vpack.i.bf16 %v4851_v31, %v4849_v13  ;;  %v9102_v14 = vpack.i.bf16 %v4878_v9, %v4876_v44 }
 0x7c1   : > { %9088 = vrot.lane.b32.xlu1 %v9087_v10, %s9920_s21  ;;  %v8999_v57 = vpop.permute.xlu1 %8998  ;;  %v4418_v48 = vpop.permute.xlu0 %4417  ;;  %v9107_v35 = vpack.i.bf16 %v4906_v4, %v4904_v34  ;;  %v15216_v41 = vpack.i.bf16 %v4935_v36, %v4933_v23 }
 0x7c2   : > { %v15188_v0 = vmul.f32 %v9802_v25, %v4418_v48  ;;  %v9001_v39 = vunpack.i.h.bf16 %v8999_v57  ;;  %v9000_v42 = vunpack.i.l.bf16 %v8999_v57 }
 0x7c3   : > { %v15198_v21 = vld [vmem:[#allocation2 + $0x18] sm:$0xff] }
 0x7c4   : > { %4777 = vst.msk [vmem:[#allocation2 + $0x28] sm:$0x7f] %vm16960_vm0, %v15188_v0  ;;  %7238 = vst.msk [vmem:[%s15131_s20 + $0x20] sm:$0x7f] %vm16960_vm0, %v15188_v0  ;;  %v4796_v33 = vrot.slane %v15198_v21, 1  ;;  %v4639_v2 = vsel %vm442_vm9, %v15017_v51, %v9001_v39  ;;  %v4638_v43 = vsel %vm442_vm9, %v15220_v62, %v9000_v42  ;;  %v4825_v6 = vrot.slane %v15198_v21, 2 }
 0x7c5   : > { %9093 = vrot.lane.b32.xlu1 %v9092_v45, %s9921_s15  ;;  %v9009_v27 = vpop.permute.xlu1 %9008  ;;  %v9004_v40 = vpop.permute.xlu0 %9003  ;;  %v4852_v63 = vrot.slane %v15198_v21, 3  ;;  %v4879_v52 = vrot.slane %v15198_v21, 4  ;;  %v4907_v28 = vrot.slane %v15198_v21, 5  ;;  %v4936_v61 = vrot.slane %v15198_v21, 6 }
 0x7c6   : > { %v9011_v60 = vunpack.i.h.bf16 %v9009_v27  ;;  %v9010_v11 = vunpack.i.l.bf16 %v9009_v27  ;;  %v9006_v8 = vunpack.i.h.bf16 %v9004_v40  ;;  %v9005_v55 = vunpack.i.l.bf16 %v9004_v40 }
 0x7c7   : > { %v15224_v5 = vld [vmem:[#allocation2 + $0x20] sm:$0xff]  ;;  %v4797_v38 = vsel %vm17882_vm3, %v4794_v30, %v4796_v33  ;;  %v4826_v57 = vsel %vm1070_vm5, %v4823_v19, %v4825_v6  ;;  %v4853_v48 = vsel %vm1317_vm1, %v4850_v7, %v4852_v63  ;;  %v15251_v23 = vsel %vm1564_vm6, %v4877_v46, %v4879_v52  ;;  %vm17885_vm3 = vmmov %vm17881_vm8 }
 0x7c8   : > { %v4798_v58 = vrot.slane %v15224_v5, 1  ;;  %v4827_v10 = vrot.slane %v15224_v5, 2  ;;  %v4854_v29 = vrot.slane %v15224_v5, 3  ;;  %v4881_v13 = vrot.slane %v15224_v5, 4 }
 0x7c9   : > { %9098 = vrot.lane.b32.xlu1 %v9097_v3, %s9916_s30  ;;  %v9019_v51 = vpop.permute.xlu1 %9018  ;;  %v9014_v18 = vpop.permute.xlu0 %9013  ;;  %v4644_v54 = vsel %vm4192_vm12, %v4638_v43, %v9010_v11  ;;  %v4645_v30 = vsel %vm4192_vm12, %v4639_v2, %v9011_v60  ;;  %v4641_v31 = vsel %vm442_vm9, %v15023_v24, %v9006_v8  ;;  %v4640_v4 = vsel %vm442_vm9, %v15019_v26, %v9005_v55 }
 0x7ca   : > { %v9020_v44 = vunpack.i.l.bf16 %v9019_v51  ;;  %v4799_v25 = vsel %vm17883_vm4, %v4796_v33, %v4798_v58  ;;  %v9021_v34 = vunpack.i.h.bf16 %v9019_v51  ;;  %v9016_v19 = vunpack.i.h.bf16 %v9014_v18 }
 0x7cb   : > { %v15253_v45 = vld [vmem:[#allocation2 + $0x28] sm:$0xff]  ;;  %v9015_v9 = vunpack.i.l.bf16 %v9014_v18  ;;  %v9117_v39 = vpack.i.bf16 %v4799_v25, %v4797_v38  ;;  %v4828_v46 = vsel %vm1070_vm5, %v4825_v6, %v4827_v10  ;;  %v4855_v36 = vsel %vm1317_vm1, %v4852_v63, %v4854_v29 }
 0x7cc   : > { %v15267_v24 = vsel %vm1564_vm6, %v4879_v52, %v4881_v13  ;;  %v4650_v27 = vsel %vm2848_vm11, %v4644_v54, %v9020_v44  ;;  %v4800_v3 = vrot.slane %v15253_v45, 1  ;;  %v4909_v26 = vrot.slane %v15224_v5, 5 }
 0x7cd   : > { %9103 = vrot.lane.b32.xlu1 %v9102_v14, %s9922_s23  ;;  %v9029_v7 = vpop.permute.xlu1 %9028  ;;  %v9024_v42 = vpop.permute.xlu0 %9023  ;;  %9118 = vrot.lane.b32.xlu0 %v9117_v39, %s9920_s21  ;;  %v4651_v14 = vsel %vm2848_vm11, %v4645_v30, %v9021_v34  ;;  %v4856_v43 = vrot.slane %v15253_v45, 3  ;;  %v4646_v6 = vsel %vm4192_vm12, %v4640_v4, %v9015_v9  ;;  %v4647_v63 = vsel %vm4192_vm12, %v4641_v31, %v9016_v19 }
 0x7ce   : > { %v9030_v40 = vunpack.i.l.bf16 %v9029_v7  ;;  %v9031_v33 = vunpack.i.h.bf16 %v9029_v7  ;;  %v9025_v2 = vunpack.i.l.bf16 %v9024_v42  ;;  %v9026_v60 = vunpack.i.h.bf16 %v9024_v42 }
 0x7cf   : > { %v9122_v52 = vpack.i.bf16 %v4828_v46, %v4826_v57  ;;  %v9127_v55 = vpack.i.bf16 %v4855_v36, %v4853_v48  ;;  %v9132_v51 = vpack.i.bf16 %v15267_v24, %v15251_v23  ;;  %v4801_v18 = vsel %vm17884_vm10, %v4798_v58, %v4800_v3 }
 0x7d0   : > { %v15284_v38 = vsel %vm1811_vm2, %v4905_v1, %v4907_v28  ;;  %v4656_v44 = vsel %vm4205_vm13, %v4650_v27, %v9030_v40  ;;  %v4657_v57 = vsel %vm4205_vm13, %v4651_v14, %v9031_v33  ;;  %v4652_v48 = vsel %vm2848_vm11, %v4646_v6, %v9025_v2 }
 0x7d1   : > { %9108 = vrot.lane.b32.xlu1 %v9107_v35, %s9923_s28  ;;  %v9039_v11 = vpop.permute.xlu1 %9038  ;;  %v9034_v8 = vpop.permute.xlu0 %9033  ;;  %9123 = vrot.lane.b32.xlu0 %v9122_v52, %s9921_s15  ;;  %v4910_v35 = vsel %vm1811_vm2, %v4907_v28, %v4909_v26  ;;  %v4857_v58 = vsel %vm1317_vm1, %v4854_v29, %v4856_v43  ;;  %v4653_v34 = vsel %vm2848_vm11, %v4647_v63, %v9026_v60  ;;  %v4911_v9 = vrot.slane %v15253_v45, 5 }
 0x7d2   : > { %v9041_v25 = vunpack.i.h.bf16 %v9039_v11  ;;  %v9040_v54 = vunpack.i.l.bf16 %v9039_v11  ;;  %v9035_v30 = vunpack.i.l.bf16 %v9034_v8  ;;  %v9036_v23 = vunpack.i.h.bf16 %v9034_v8 }
 0x7d3   : > { %v9147_v19 = vpack.i.bf16 %v4800_v3, %v4801_v18  ;;  %v9137_v42 = vpack.i.bf16 %v4910_v35, %v15284_v38  ;;  %v9157_v36 = vpack.i.bf16 %v4856_v43, %v4857_v58  ;;  %v4938_v40 = vrot.slane %v15224_v5, 6 }
 0x7d4   : > { %v4662_v4 = vsel %vm4212_vm14, %v4656_v44, %v9040_v54  ;;  %v4663_v29 = vsel %vm4212_vm14, %v4657_v57, %v9041_v25  ;;  %v4659_v3 = vsel %vm4205_vm13, %v4653_v34, %v9036_v23  ;;  %v4912_v6 = vsel %vm1811_vm2, %v4909_v26, %v4911_v9 }
 0x7d5   : > { %9113 = vrot.lane.b32.xlu1 %v15216_v41, %s9910_s22  ;;  %v9049_v1 = vpop.permute.xlu1 %9048  ;;  %v9044_v31 = vpop.permute.xlu0 %9043  ;;  %9128 = vrot.lane.b32.xlu0 %v9127_v55, %s9916_s30  ;;  %v4658_v41 = vsel %vm4205_vm13, %v4652_v48, %v9035_v30  ;;  %v4914_v43 = vsel %vm1811_vm2, %v4911_v9, %v15213_v56  ;;  %v4939_v26 = vsel %vm17881_vm8, %v4936_v61, %v4938_v40  ;;  %v4829_v54 = vrot.slane %v15253_v45, 2  ;;  %vm17888_vm8 = vmmov %vm17885_vm3 }
 0x7d6   : > { %v9051_v7 = vunpack.i.h.bf16 %v9049_v1  ;;  %v9050_v28 = vunpack.i.l.bf16 %v9049_v1  ;;  %v9045_v39 = vunpack.i.l.bf16 %v9044_v31  ;;  %v9046_v46 = vunpack.i.h.bf16 %v9044_v31 }
 0x7d7   : > { %vm17886_vm4 = vcmask 457728   ;;  %vm17887_vm10 = vmmov 0  }
 0x7d8   : > { %v4668_v24 = vsel %vm3048_vm15, %v4662_v4, %v9050_v28  ;;  %v4669_v27 = vsel %vm3048_vm15, %v4663_v29, %v9051_v7  ;;  %v4664_v63 = vsel %vm4212_vm14, %v4658_v41, %v9045_v39  ;;  %v4665_v18 = vsel %vm4212_vm14, %v4659_v3, %v9046_v46 }
 0x7d9   : > { %v4674_v14 = vpack.c.bf16 %v4669_v27, %v4668_v24  ;;  %v9059_v33 = vpop.permute.xlu1 %9058  ;;  %v9054_v2 = vpop.permute.xlu0 %9053  ;;  %9148 = vrot.lane.b32.xlu1 %v9147_v19, %s9920_s21  ;;  %9133 = vrot.lane.b32.xlu0 %v9132_v51, %s9922_s23  ;;  %v9167_v51 = vpack.i.bf16 %v4914_v43, %v4912_v6  ;;  %v4937_v4 = vsel %vm17885_vm3, %v4934_v17, %v4936_v61  ;;  %v4883_v29 = vrot.slane %v15253_v45, 4  ;;  %v9651_v27 = vld [vmem:[%s16667_s9 + $0x18] ss:$0 sps:$4 sm:$0xff]  }
 0x7da   : > { %v9061_v60 = vunpack.i.h.bf16 %v9059_v33  ;;  %v9056_v11 = vunpack.i.h.bf16 %v9054_v2  ;;  %v9055_v52 = vunpack.i.l.bf16 %v9054_v2  ;;  %v9060_v38 = vunpack.i.l.bf16 %v9059_v33 }
 0x7db   : > { %v4678_v8 = vshrl.u32 %v4674_v14, 16  ;;  %v4681_v55 = vshll.u32 %v4674_v14, 16  ;;  %v9142_v41 = vpack.i.bf16 %v4939_v26, %v4937_v4 }
 0x7dc   : > { %v4670_v44 = vsel %vm3048_vm15, %v4664_v63, %v9055_v52  ;;  %v4671_v25 = vsel %vm3048_vm15, %v4665_v18, %v9056_v11  ;;  %v4643_v57 = vsel %vm442_vm9, %v15066_v37, %v9061_v60  ;;  %v4642_v19 = vsel %vm442_vm9, %v15027_v53, %v9060_v38 }
 0x7dd   : > { %v4680_v35 = vrot.slane %v4678_v8, 2  ;;  %v4675_v48 = vpack.c.bf16 %v4671_v25, %v4670_v44  ;;  %v9069_v30 = vpop.permute.xlu1 %9068  ;;  %v9064_v58 = vpop.permute.xlu0 %9063  ;;  %9158 = vrot.lane.b32.xlu1 %v9157_v36, %s9916_s30  ;;  %v4683_v34 = vrot.slane %v4681_v55, 3  ;;  %9138 = vrot.lane.b32.xlu0 %v9137_v42, %s9923_s28  ;;  %v4830_v42 = vsel %vm1070_vm5, %v4827_v10, %v4829_v54 }
 0x7de   : > { %v9070_v23 = vunpack.i.l.bf16 %v9069_v30  ;;  %v9066_v1 = vunpack.i.h.bf16 %v9064_v58  ;;  %v9065_v31 = vunpack.i.l.bf16 %v9064_v58  ;;  %v9071_v28 = vunpack.i.h.bf16 %v9069_v30 }
 0x7df   : > { %v4686_v9 = vshrl.u32 %v4675_v48, 16  ;;  %v4689_v7 = vshll.u32 %v4675_v48, 16  ;;  %v4684_v61 = vor.u32 %v4683_v34, %v4680_v35  ;;  %v9152_v11 = vpack.i.bf16 %v4829_v54, %v4830_v42 }
 0x7e0   : > { %v4649_v37 = vsel %vm4192_vm12, %v4643_v57, %v9066_v1  ;;  %v4648_v39 = vsel %vm4192_vm12, %v4642_v19, %v9065_v31  ;;  %v15350_v8 = vrot.slane %v15196_v49, 6  ;;  %v5058_v55 = vsel %vm1564_vm6, %v9651_v27, 0 }
 0x7e1   : > { %v4688_v46 = vrot.slane %v4686_v9, 2  ;;  %v4691_v36 = vrot.slane %v4689_v7, 3  ;;  %v9079_v53 = vpop.permute.xlu1 %9078  ;;  %v9074_v24 = vpop.permute.xlu0 %9073  ;;  %9168 = vrot.lane.b32.xlu1 %v9167_v51, %s9923_s28  ;;  %v4654_v17 = vsel %vm2848_vm11, %v4648_v39, %v9070_v23  ;;  %9143 = vrot.lane.b32.xlu0 %v9142_v41, %s9910_s22  ;;  %v4655_v6 = vsel %vm2848_vm11, %v4649_v37, %v9071_v28  ;;  %v9653_v23 = vld [vmem:[%s16667_s9 + $0x8] sm:$0xff]   ;;  %v9654_v9 = vld [vmem:[%s16667_s9] sm:$0xff]  }
 0x7e2   : > { %v9076_v3 = vunpack.i.h.bf16 %v9074_v24  ;;  %v9075_v14 = vunpack.i.l.bf16 %v9074_v24  ;;  %v9081_v33 = vunpack.i.h.bf16 %v9079_v53  ;;  %v9080_v2 = vunpack.i.l.bf16 %v9079_v53 }
 0x7e3   : > { %v4692_v43 = vor.u32 %v4691_v36, %v4688_v46  ;;  %v4884_v44 = vsel %vm1564_vm6, %v4881_v13, %v4883_v29  ;;  %v4940_v25 = vrot.slane %v15253_v45, 6  ;;  %v9652_v13 = vld [vmem:[%s16667_s9 + $0x10] sm:$0xff]  }
 0x7e4   : > { %v4660_v63 = vsel %vm4205_vm13, %v4654_v17, %v9075_v14  ;;  %v4661_v10 = vsel %vm4205_vm13, %v4655_v6, %v9076_v3  ;;  %v9162_v48 = vpack.i.bf16 %v4883_v29, %v4884_v44 }
 0x7e5   : > { %v9084_v60 = vpop.permute.xlu0 %9083  ;;  %5161 = vrot.lane.b32.xlu1 %v15133_v12, %s9920_s21  ;;  %v4693_v52 = vsel %vm4228_vm7, %v4684_v61, %v4692_v43  ;;  %v4666_v26 = vsel %vm4212_vm14, %v4660_v63, %v9080_v2  ;;  %v4667_v54 = vsel %vm4212_vm14, %v4661_v10, %v9081_v33  ;;  %9153 = vrot.lane.b32.xlu0 %v9152_v11, %s9921_s15 }
 0x7e6   : > { %v9086_v18 = vunpack.i.h.bf16 %v9084_v60  ;;  %v9085_v38 = vunpack.i.l.bf16 %v9084_v60  ;;  %7764 = vmatmul.mubr.msk.bf16.vlgmr.msra.gmra.mxu1 %vm17886_vm4, %v4693_v52  ;;  %v4941_v30 = vsel %vm17888_vm8, %v4938_v40, %v4940_v25  ;;  %v4943_v58 = vsel %vm17885_vm3, %v4940_v25, %v15350_v8  ;;  %vm17889_vm8 = vmmov %vm17886_vm4 }
 0x7e7   : > { %7767 = vmatprep.mubr.msk.bf16.mxu1 %vm17887_vm10, %v17443_v22  ;;  %7776 = vmatpush3.bf16.msra.mxu1 %v5058_v55  ;;  %v9172_v1 = vpack.i.bf16 %v4943_v58, %v4941_v30  ;;  %vm17890_vm3 = vmmov %vm17886_vm4 }
 0x7e8   : > { %v4672_v49 = vsel %vm3048_vm15, %v4666_v26, %v9085_v38  ;;  %v4673_v35 = vsel %vm3048_vm15, %v4667_v54, %v9086_v18  ;;  %7777 = vmatprep.subr.bf16.mxu1 %v17443_v22 }
 0x7e9   : > { %v4676_v57 = vpack.c.bf16 %v4673_v35, %v4672_v49  ;;  %5165 = vrot.lane.b32.xlu1 %v15150_v47, %s9920_s21  ;;  %9163 = vrot.lane.b32.xlu0 %v9162_v48, %s9922_s23 }
 0x7eb   : > { %v4695_v51 = vshrl.u32 %v4676_v57, 16  ;;  %v4698_v34 = vshll.u32 %v4676_v57, 16  ;;  %7778 = vmatpush3.bf16.msra.mxu1 %v9652_v13 }
 0x7ec   : > { %7779 = vmatprep.subr.bf16.mxu1 %v17443_v22 }
 0x7ed   : > { %5169 = vrot.lane.b32.xlu1 %v15188_v0, %s9920_s21  ;;  %v4697_v31 = vrot.slane %v4695_v51, 2  ;;  %v4700_v19 = vrot.slane %v4698_v34, 3  ;;  %9173 = vrot.lane.b32.xlu0 %v9172_v1, %s9910_s22 }
 0x7ef   : > { %v4701_v40 = vor.u32 %v4700_v19, %v4697_v31  ;;  %7780 = vmatpush3.bf16.msra.mxu1 %v9653_v23 }
 0x7f0   : > { %7781 = vmatprep.subr.bf16.mxu1 %v17443_v22 }
 0x7f1   : > { %v4702_v7 = vsel %vm4228_vm7, %v4692_v43, %v4701_v40  ;;  %5163 = vrot.lane.b32.xlu0 %v15140_v50, %s9920_s21 }
 0x7f2   : > { %7768 = vmatmul.mubr.msk.bf16.gmra.mxu1 %vm17886_vm4, %v4702_v7  ;;  %vm17891_vm4 = vmmov %vm17890_vm3 }
 0x7f3   : > { %7771 = vmatprep.mubr.msk.bf16.mxu1 %vm17887_vm10, %v17443_v22  ;;  %7782 = vmatpush3.bf16.msra.mxu1 %v9654_v9 }
 0x7f4   : > { %7795 = vmatprep.subr.bf16.mxu1 %v17443_v22 }
 0x7f5   : > { %5167 = vrot.lane.b32.xlu0 %v15164_v59, %s9920_s21 }
 0x7fa   : > { %7772 = vmatmul.mubr.msk.bf16.gmra.mxu1 %vm17889_vm8, %v4701_v40  ;;  %vm17892_vm8 = vmmov %vm17890_vm3 }
 0x7fb   : > { %7783 = vmatprep.mubr.msk.bf16.mxu1 %vm17887_vm10, %v17443_v22 }
 0x833   : > { %v9089_v28 = vpop.permute.xlu1 %9088 }
 0x834   : > { %v9091_v53 = vunpack.i.h.bf16 %v9089_v28  ;;  %v9090_v41 = vunpack.i.l.bf16 %v9089_v28 }
 0x836   : > { %v4963_v2 = vsel %vm442_vm9, %v15147_v32, %v9091_v53  ;;  %v4962_v6 = vsel %vm442_vm9, %v15220_v62, %v9090_v41 }
 0x837   : > { %v9094_v37 = vpop.permute.xlu1 %9093 }
 0x838   : > { %v9096_v24 = vunpack.i.h.bf16 %v9094_v37  ;;  %v9095_v42 = vunpack.i.l.bf16 %v9094_v37 }
 0x83a   : > { %v4968_v10 = vsel %vm4192_vm12, %v4962_v6, %v9095_v42  ;;  %v4969_v60 = vsel %vm4192_vm12, %v4963_v2, %v9096_v24 }
 0x83b   : > { %v9099_v39 = vpop.permute.xlu1 %9098 }
 0x83c   : > { %v9101_v27 = vunpack.i.h.bf16 %v9099_v39  ;;  %v9100_v3 = vunpack.i.l.bf16 %v9099_v39 }
 0x83e   : > { %v4974_v55 = vsel %vm2848_vm11, %v4968_v10, %v9100_v3  ;;  %v4975_v18 = vsel %vm2848_vm11, %v4969_v60, %v9101_v27 }
 0x83f   : > { %v9104_v4 = vpop.permute.xlu1 %9103  ;;  %v9119_v29 = vpop.permute.xlu0 %9118 }
 0x840   : > { %v9106_v61 = vunpack.i.h.bf16 %v9104_v4  ;;  %v9105_v33 = vunpack.i.l.bf16 %v9104_v4  ;;  %v9121_v25 = vunpack.i.h.bf16 %v9119_v29  ;;  %v9120_v26 = vunpack.i.l.bf16 %v9119_v29 }
 0x842   : > { %v4980_v44 = vsel %vm4205_vm13, %v4974_v55, %v9105_v33  ;;  %v4981_v32 = vsel %vm4205_vm13, %v4975_v18, %v9106_v61  ;;  %v4965_v51 = vsel %vm442_vm9, %v15198_v21, %v9121_v25  ;;  %v4964_v31 = vsel %vm442_vm9, %v15152_v15, %v9120_v26 }
 0x843   : > { %v9109_v46 = vpop.permute.xlu1 %9108  ;;  %v9124_v36 = vpop.permute.xlu0 %9123 }
 0x844   : > { %v9111_v43 = vunpack.i.h.bf16 %v9109_v46  ;;  %v9110_v63 = vunpack.i.l.bf16 %v9109_v46  ;;  %v9126_v49 = vunpack.i.h.bf16 %v9124_v36  ;;  %v9125_v35 = vunpack.i.l.bf16 %v9124_v36 }
 0x846   : > { %v4986_v62 = vsel %vm4212_vm14, %v4980_v44, %v9110_v63  ;;  %v4987_v54 = vsel %vm4212_vm14, %v4981_v32, %v9111_v43  ;;  %v4970_v7 = vsel %vm4192_vm12, %v4964_v31, %v9125_v35  ;;  %v4971_v28 = vsel %vm4192_vm12, %v4965_v51, %v9126_v49 }
 0x847   : > { %v9114_v14 = vpop.permute.xlu1 %9113  ;;  %v9129_v17 = vpop.permute.xlu0 %9128 }
 0x848   : > { %v9116_v11 = vunpack.i.h.bf16 %v9114_v14  ;;  %v9115_v52 = vunpack.i.l.bf16 %v9114_v14  ;;  %v9131_v48 = vunpack.i.h.bf16 %v9129_v17  ;;  %v9130_v30 = vunpack.i.l.bf16 %v9129_v17 }
 0x84a   : > { %v4992_v13 = vsel %vm3048_vm15, %v4986_v62, %v9115_v52  ;;  %v4993_v57 = vsel %vm3048_vm15, %v4987_v54, %v9116_v11  ;;  %v4976_v37 = vsel %vm2848_vm11, %v4970_v7, %v9130_v30  ;;  %v4977_v39 = vsel %vm2848_vm11, %v4971_v28, %v9131_v48 }
 0x84b   : > { %v9134_v38 = vpop.permute.xlu0 %9133  ;;  %v9149_v1 = vpop.permute.xlu1 %9148  ;;  %v4998_v19 = vpack.c.bf16 %v4993_v57, %v4992_v13 }
 0x84c   : > { %v9136_v34 = vunpack.i.h.bf16 %v9134_v38  ;;  %v9135_v23 = vunpack.i.l.bf16 %v9134_v38  ;;  %v9151_v4 = vunpack.i.h.bf16 %v9149_v1  ;;  %v9150_v29 = vunpack.i.l.bf16 %v9149_v1 }
 0x84d   : > { %v5002_v41 = vshrl.u32 %v4998_v19, 16  ;;  %v5005_v24 = vshll.u32 %v4998_v19, 16 }
 0x84e   : > { %v4982_v46 = vsel %vm4205_vm13, %v4976_v37, %v9135_v23  ;;  %v4983_v36 = vsel %vm4205_vm13, %v4977_v39, %v9136_v34  ;;  %v4967_v2 = vsel %vm442_vm9, %v15253_v45, %v9151_v4  ;;  %v4966_v6 = vsel %vm442_vm9, %v15224_v5, %v9150_v29 }
 0x84f   : > { %v9139_v58 = vpop.permute.xlu0 %9138  ;;  %v9159_v3 = vpop.permute.xlu1 %9158  ;;  %v5004_v10 = vrot.slane %v5002_v41, 2  ;;  %v5007_v60 = vrot.slane %v5005_v24, 3 }
 0x850   : > { %v9141_v40 = vunpack.i.h.bf16 %v9139_v58  ;;  %v9140_v9 = vunpack.i.l.bf16 %v9139_v58  ;;  %v9161_v38 = vunpack.i.h.bf16 %v9159_v3  ;;  %v9160_v44 = vunpack.i.l.bf16 %v9159_v3 }
 0x851   : > { %v5008_v35 = vor.u32 %v5007_v60, %v5004_v10 }
 0x852   : > { %v4988_v42 = vsel %vm4212_vm14, %v4982_v46, %v9140_v9  ;;  %v4989_v27 = vsel %vm4212_vm14, %v4983_v36, %v9141_v40 }
 0x853   : > { %v9144_v21 = vpop.permute.xlu0 %9143  ;;  %v9169_v62 = vpop.permute.xlu1 %9168 }
 0x854   : > { %v9146_v53 = vunpack.i.h.bf16 %v9144_v21  ;;  %v9145_v15 = vunpack.i.l.bf16 %v9144_v21  ;;  %v9171_v30 = vunpack.i.h.bf16 %v9169_v62  ;;  %v9170_v58 = vunpack.i.l.bf16 %v9169_v62 }
 0x856   : > { %v4994_v14 = vsel %vm3048_vm15, %v4988_v42, %v9145_v15  ;;  %v4995_v17 = vsel %vm3048_vm15, %v4989_v27, %v9146_v53 }
 0x857   : > { %v4999_v61 = vpack.c.bf16 %v4995_v17, %v4994_v14  ;;  %v9154_v33 = vpop.permute.xlu0 %9153 }
 0x858   : > { %v9156_v43 = vunpack.i.h.bf16 %v9154_v33  ;;  %v9155_v63 = vunpack.i.l.bf16 %v9154_v33 }
 0x859   : > { %v5010_v11 = vshrl.u32 %v4999_v61, 16  ;;  %v5013_v52 = vshll.u32 %v4999_v61, 16 }
 0x85a   : > { %v4972_v55 = vsel %vm4192_vm12, %v4966_v6, %v9155_v63  ;;  %v4973_v18 = vsel %vm4192_vm12, %v4967_v2, %v9156_v43 }
 0x85b   : > { %v5012_v32 = vrot.slane %v5010_v11, 2  ;;  %v5015_v25 = vrot.slane %v5013_v52, 3  ;;  %v9164_v26 = vpop.permute.xlu0 %9163  ;;  %v4978_v5 = vsel %vm2848_vm11, %v4972_v55, %v9160_v44  ;;  %v4979_v49 = vsel %vm2848_vm11, %v4973_v18, %v9161_v38 }
 0x85c   : > { %v9166_v45 = vunpack.i.h.bf16 %v9164_v26  ;;  %v9165_v54 = vunpack.i.l.bf16 %v9164_v26 }
 0x85d   : > { %v5016_v13 = vor.u32 %v5015_v25, %v5012_v32 }
 0x85e   : > { %v4984_v57 = vsel %vm4205_vm13, %v4978_v5, %v9165_v54  ;;  %v4985_v48 = vsel %vm4205_vm13, %v4979_v49, %v9166_v45 }
 0x85f   : > { %v9174_v51 = vpop.permute.xlu0 %9173  ;;  %v5017_v34 = vsel %vm4228_vm7, %v5008_v35, %v5016_v13  ;;  %v4990_v31 = vsel %vm4212_vm14, %v4984_v57, %v9170_v58  ;;  %v4991_v19 = vsel %vm4212_vm14, %v4985_v48, %v9171_v30 }
 0x860   : > { %v9176_v23 = vunpack.i.h.bf16 %v9174_v51  ;;  %v9175_v1 = vunpack.i.l.bf16 %v9174_v51  ;;  %7784 = vmatmul.mubr.msk.bf16.vlgmr.msra.gmra.mxu1 %vm17890_vm3, %v5017_v34  ;;  %vm17893_vm3 = vcmask 1046528  }
 0x861   : > { %7787 = vmatprep.mubr.msk.bf16.mxu1 %vm17887_vm10, %v17443_v22 }
 0x862   : > { %v4996_v40 = vsel %vm3048_vm15, %v4990_v31, %v9175_v1  ;;  %v4997_v9 = vsel %vm3048_vm15, %v4991_v19, %v9176_v23 }
 0x863   : > { %v5000_v7 = vpack.c.bf16 %v4997_v9, %v4996_v40 }
 0x865   : > { %v5019_v28 = vshrl.u32 %v5000_v7, 16  ;;  %v5022_v37 = vshll.u32 %v5000_v7, 16 }
 0x867   : > { %v5021_v39 = vrot.slane %v5019_v28, 2  ;;  %v5024_v4 = vrot.slane %v5022_v37, 3 }
 0x869   : > { %v5025_v29 = vor.u32 %v5024_v4, %v5021_v39  ;;  %v5164_v39 = vpop.permute.xlu0 %5163 }
 0x86b   : > { %v5026_v21 = vsel %vm4228_vm7, %v5016_v13, %v5025_v29 }
 0x86c   : > { %7788 = vmatmul.mubr.msk.bf16.gmra.mxu1 %vm17891_vm4, %v5026_v21  ;;  %vm17894_vm4 = vmmov %vm17893_vm3 }
 0x86d   : > { %7791 = vmatprep.mubr.msk.bf16.mxu1 %vm17887_vm10, %v17443_v22 }
 0x874   : > { %7792 = vmatmul.mubr.msk.bf16.gmra.mxu1 %vm17892_vm8, %v5025_v29  ;;  %vm17895_vm8 = vmmov %vm17893_vm3 }
 0x875   : > { %7803 = vmatprep.mubr.msk.bf16.mxu1 %vm17887_vm10, %v17443_v22 }
 0x8a6   : > { %v15453_v46 = vpop.f32.mrf.mxu1 }
 0x8a7   : > { %v4768_v33 = vadd.f32 %v15115_v16, %v15453_v46 }
 0x8a8   : > { %v7765_v36 = vpop.f32.mrf.mxu1 }
 0x8aa   : > { %v15455_v53 = vpop.f32.mrf.mxu1 }
 0x8ab   : > { %v4769_v63 = vadd.f32 %v15115_v16, %v15455_v53 }
 0x8ac   : > { %v7766_v15 = vpop.f32.mrf.mxu1 }
 0x8b2   : > { %v15457_v41 = vpop.f32.mrf.mxu1 }
 0x8b3   : > { %v4770_v18 = vadd.f32 %v15115_v16, %v15457_v41 }
 0x8b4   : > { %v7769_v24 = vpop.f32.mrf.mxu1 }
 0x8b6   : > { %v15459_v42 = vpop.f32.mrf.mxu1 }
 0x8b7   : > { %v4771_v25 = vadd.f32 %v15115_v16, %v15459_v42 }
 0x8b8   : > { %v7770_v27 = vpop.f32.mrf.mxu1 }
 0x8ba   : > { %v15461_v3 = vpop.f32.mrf.mxu1 }
 0x8bb   : > { %v4772_v49 = vadd.f32 %v15115_v16, %v15461_v3  ;;  %v5162_v16 = vpop.permute.xlu1 %5161 }
 0x8bc   : > { %v7773_v14 = vpop.f32.mrf.mxu1 }
 0x8bd   : > { %v5168_v14 = vpop.permute.xlu0 %5167 }
 0x8be   : > { %v4765_v17 = vpop.f32.mrf.mxu1 }
 0x8bf   : > { %v5166_v15 = vpop.permute.xlu1 %5165 }
 0x8c0   : > { %v7774_v61 = vpop.f32.mrf.mxu1 }
 0x920   : > { %v5094_v2 = vpop.f32.mrf.mxu1 }
 0x921   : > { %v5116_v6 = vadd.f32 %v5094_v2, %v4768_v33  ;;  %v5170_v33 = vpop.permute.xlu1 %5169 }
 0x922   : > { %v7785_v43 = vpop.f32.mrf.mxu1 }
 0x923   : > { %v7435_v10 = vmul.f32 -1.442695, %v5116_v6 }
 0x924   : > { %v5097_v60 = vpop.f32.mrf.mxu1 }
 0x925   : > { %9803 = vpow2.f32 %v7435_v10  ;;  %v5117_v11 = vadd.f32 %v5097_v60, %v4769_v63  ;;  %v15497_v10 = vld [vmem:[#allocation2] sm:$0xff] }
 0x926   : > { %v7786_v52 = vpop.f32.mrf.mxu1  ;;  %v5219_v60 = vrot.slane %v15497_v10, 1 }
 0x927   : > { %v7436_v55 = vmul.f32 -1.442695, %v5117_v11 }
 0x929   : > { %9805 = vpow2.f32 %v7436_v55 }
 0x92c   : > { %v5102_v38 = vpop.f32.mrf.mxu1 }
 0x92d   : > { %v5118_v44 = vadd.f32 %v5102_v38, %v4770_v18 }
 0x92e   : > { %v7789_v32 = vpop.f32.mrf.mxu1 }
 0x92f   : > { %v7437_v26 = vmul.f32 -1.442695, %v5118_v44 }
 0x930   : > { %v5105_v62 = vpop.f32.mrf.mxu1 }
 0x931   : > { %9807 = vpow2.f32 %v7437_v26  ;;  %v5119_v45 = vadd.f32 %v5105_v62, %v4771_v25  ;;  %v5248_v25 = vrot.slane %v15497_v10, 2 }
 0x932   : > { %v9804_v54 = vpop.eup %9803  ;;  %v7790_v5 = vpop.f32.mrf.mxu1 }
 0x933   : > { %v5136_v35 = vadd.f32 1.0, %v9804_v54  ;;  %v7438_v13 = vmul.f32 -1.442695, %v5119_v45 }
 0x934   : > { %v5110_v57 = vpop.f32.mrf.mxu1 }
 0x935   : > { %9809 = vrcp.f32 %v5136_v35  ;;  %v5120_v48 = vadd.f32 %v5110_v57, %v4772_v49 }
 0x936   : > { %v9806_v30 = vpop.eup %9805  ;;  %9811 = vpow2.f32 %v7438_v13  ;;  %v7793_v58 = vpop.f32.mrf.mxu1 }
 0x937   : > { %v5137_v51 = vadd.f32 1.0, %v9806_v30  ;;  %v7439_v34 = vmul.f32 -1.442695, %v5120_v48 }
 0x938   : > { %v5113_v23 = vpop.f32.mrf.mxu1 }
 0x939   : > { %9813 = vrcp.f32 %v5137_v51 }
 0x93a   : > { %9815 = vpow2.f32 %v7439_v34  ;;  %v7794_v1 = vpop.f32.mrf.mxu1 }
 0x93e   : > { %v9808_v31 = vpop.eup %9807 }
 0x93f   : > { %v5138_v19 = vadd.f32 1.0, %v9808_v31 }
 0x941   : > { %9817 = vrcp.f32 %v5138_v19 }
 0x942   : > { %v15473_v40 = vpop.eup %9809 }
 0x943   : > { %v9812_v9 = vpop.eup %9811  ;;  %v5176_v7 = vmul.f32 %v15473_v40, %v5162_v16 }
 0x944   : > { %v5139_v28 = vadd.f32 1.0, %v9812_v9 }
 0x945   : > { %5186 = vrot.lane.b32.xlu0 %v5176_v7, %s9924_s27 }
 0x946   : > { %v15477_v37 = vpop.eup %9813  ;;  %9819 = vrcp.f32 %v5139_v28 }
 0x947   : > { %v9816_v4 = vpop.eup %9815  ;;  %v5177_v29 = vmul.f32 %v15477_v37, %v5164_v39 }
 0x948   : > { %v5140_v21 = vadd.f32 1.0, %v9816_v4 }
 0x949   : > { %5188 = vrot.lane.b32.xlu1 %v5177_v29, %s9924_s27 }
 0x94a   : > { %9821 = vrcp.f32 %v5140_v21 }
 0x94e   : > { %v15481_v36 = vpop.eup %9817 }
 0x94f   : > { %v5178_v24 = vmul.f32 %v15481_v36, %v5166_v15 }
 0x951   : > { %5190 = vrot.lane.b32.xlu0 %v5178_v24, %s9924_s27 }
 0x953   : > { %v15485_v27 = vpop.eup %9819 }
 0x954   : > { %v5179_v17 = vmul.f32 %v15485_v27, %v5168_v14 }
 0x956   : > { %5192 = vrot.lane.b32.xlu1 %v5179_v17, %s9924_s27 }
 0x957   : > { %v15489_v61 = vpop.eup %9821 }
 0x958   : > { %v5180_v2 = vmul.f32 %v15489_v61, %v5170_v33 }
 0x95a   : > { %5194 = vrot.lane.b32.xlu0 %v5180_v2, %s9924_s27 }
 0x9b7   : > { %v5187_v6 = vpop.permute.xlu0 %5186 }
 0x9b8   : > { %5201 = vst.msk [vmem:[#allocation2 + $0x8] sm:$0xff] %vm442_vm9, %v5187_v6 }
 0x9bb   : > { %v5189_v43 = vpop.permute.xlu1 %5188 }
 0x9bc   : > { %5202 = vst.msk [vmem:[#allocation2 + $0x10] sm:$0xff] %vm442_vm9, %v5189_v43 }
 0x9bf   : > { %v15495_v63 = vld [vmem:[#allocation2 + $0x8] sm:$0xff] }
 0x9c0   : > { %5642 = vst.msk [vmem:[#allocation2 + $0x8] sm:$0xff] %vm442_vm9, %v15133_v12  ;;  %v5220_v11 = vrot.slane %v15495_v63, 1  ;;  %v5249_v26 = vrot.slane %v15495_v63, 2  ;;  %v5277_v35 = vrot.slane %v15495_v63, 3  ;;  %v5304_v51 = vrot.slane %v15495_v63, 4 }
 0x9c1   : > { %v5332_v7 = vrot.slane %v15495_v63, 5  ;;  %v5361_v2 = vrot.slane %v15495_v63, 6 }
 0x9c2   : > { %v5221_v44 = vsel %vm17893_vm3, %v5219_v60, %v5220_v11  ;;  %v5250_v49 = vsel %vm1070_vm5, %v5248_v25, %v5249_v26 }
 0x9c3   : > { %v15503_v52 = vld [vmem:[#allocation2 + $0x10] sm:$0xff]  ;;  %v5191_v55 = vpop.permute.xlu0 %5190 }
 0x9c4   : > { %5643 = vst.msk [vmem:[#allocation2 + $0x10] sm:$0xff] %vm442_vm9, %v15140_v50  ;;  %5203 = vst.msk [vmem:[#allocation2 + $0x18] sm:$0xff] %vm442_vm9, %v5191_v55  ;;  %v5222_v18 = vrot.slane %v15503_v52, 1  ;;  %v5251_v38 = vrot.slane %v15503_v52, 2  ;;  %v5278_v5 = vrot.slane %v15503_v52, 3  ;;  %v5305_v58 = vrot.slane %v15503_v52, 4 }
 0x9c5   : > { %v5333_v19 = vrot.slane %v15503_v52, 5  ;;  %v5362_v14 = vrot.slane %v15503_v52, 6 }
 0x9c6   : > { %v5223_v32 = vsel %vm17894_vm4, %v5220_v11, %v5222_v18  ;;  %v5252_v54 = vsel %vm1070_vm5, %v5249_v26, %v5251_v38  ;;  %v5279_v30 = vsel %vm1317_vm1, %v5277_v35, %v5278_v5  ;;  %v5306_v31 = vsel %vm1564_vm6, %v5304_v51, %v5305_v58 }
 0x9c7   : > { %v9177_v62 = vpack.i.bf16 %v5223_v32, %v5221_v44  ;;  %v9182_v57 = vpack.i.bf16 %v5252_v54, %v5250_v49  ;;  %v9187_v34 = vpack.i.bf16 %v5279_v30, %v5277_v35  ;;  %v9192_v28 = vpack.i.bf16 %v5306_v31, %v5304_v51 }
 0x9c8   : > { %v5193_v45 = vpop.permute.xlu1 %5192  ;;  %v5334_v24 = vsel %vm1811_vm2, %v5332_v7, %v5333_v19  ;;  %vm17896_vm4 = vcmask 1041408  }
 0x9c9   : > { %5204 = vst.msk [vmem:[#allocation2 + $0x20] sm:$0xff] %vm442_vm9, %v5193_v45  ;;  %9178 = vrot.lane.b32.xlu1 %v9177_v62, %s9920_s21  ;;  %v9197_v6 = vpack.i.bf16 %v5334_v24, %v5332_v7 }
 0x9cb   : > { %v15524_v13 = vld [vmem:[#allocation2 + $0x18] sm:$0xff] }
 0x9cc   : > { %5644 = vst.msk [vmem:[#allocation2 + $0x18] sm:$0xff] %vm442_vm9, %v15150_v47  ;;  %v5195_v48 = vpop.permute.xlu0 %5194  ;;  %v5224_v23 = vrot.slane %v15524_v13, 1  ;;  %v5253_v29 = vrot.slane %v15524_v13, 2  ;;  %v5280_v11 = vrot.slane %v15524_v13, 3 }
 0x9cd   : > { %5205 = vst.msk [vmem:[#allocation2 + $0x28] sm:$0x7f] %vm16960_vm0, %v5195_v48  ;;  %9183 = vrot.lane.b32.xlu1 %v9182_v57, %s9921_s15 }
 0x9ce   : > { %v5225_v39 = vsel %vm17895_vm8, %v5222_v18, %v5224_v23  ;;  %v5254_v43 = vsel %vm1070_vm5, %v5251_v38, %v5253_v29  ;;  %v5363_v18 = vsel %vm17896_vm4, %v5361_v2, %v5362_v14  ;;  %v5281_v45 = vsel %vm1317_vm1, %v5278_v5, %v5280_v11  ;;  %vm17897_vm8 = vmmov %vm17893_vm3 }
 0x9cf   : > { %v9202_v62 = vpack.i.bf16 %v5363_v18, %v5361_v2  ;;  %v5307_v38 = vrot.slane %v15524_v13, 4  ;;  %v5335_v5 = vrot.slane %v15524_v13, 5 }
 0x9d0   : > { %v15534_v1 = vld [vmem:[#allocation2 + $0x20] sm:$0xff] }
 0x9d1   : > { %5645 = vst.msk [vmem:[#allocation2 + $0x20] sm:$0xff] %vm442_vm9, %v15164_v59  ;;  %9188 = vrot.lane.b32.xlu1 %v9187_v34, %s9916_s30  ;;  %v5226_v16 = vrot.slane %v15534_v1, 1  ;;  %v5255_v9 = vrot.slane %v15534_v1, 2  ;;  %v5282_v33 = vrot.slane %v15534_v1, 3  ;;  %v5309_v26 = vrot.slane %v15534_v1, 4 }
 0x9d2   : > { %v5337_v48 = vrot.slane %v15534_v1, 5  ;;  %v5308_v30 = vsel %vm1564_vm6, %v5305_v58, %v5307_v38  ;;  %v5366_v7 = vrot.slane %v15534_v1, 6  ;;  %v9655_v58 = vld [vmem:[%s16668_s10 + $0x18] ss:$0 sps:$4 sm:$0xff]  }
 0x9d3   : > { %v5227_v4 = vsel %vm17893_vm3, %v5224_v23, %v5226_v16  ;;  %v5256_v17 = vsel %vm1070_vm5, %v5253_v29, %v5255_v9  ;;  %v5283_v32 = vsel %vm1317_vm1, %v5280_v11, %v5282_v33  ;;  %v5310_v57 = vsel %vm1564_vm6, %v5307_v38, %v5309_v26  ;;  %vm17898_vm3 = vmmov %vm17896_vm4 }
 0x9d4   : > { %v15547_v21 = vld [vmem:[#allocation2 + $0x28] sm:$0xff]  ;;  %v9207_v15 = vpack.i.bf16 %v5227_v4, %v5225_v39  ;;  %v9212_v55 = vpack.i.bf16 %v5256_v17, %v5254_v43  ;;  %v9217_v54 = vpack.i.bf16 %v5283_v32, %v5281_v45  ;;  %v9222_v34 = vpack.i.bf16 %v5310_v57, %v5308_v30  ;;  %vm17899_vm4 = vmmov %vm17898_vm3 }
 0x9d5   : > { %5646 = vst.msk [vmem:[#allocation2 + $0x28] sm:$0x7f] %vm16960_vm0, %v15188_v0  ;;  %9193 = vrot.lane.b32.xlu1 %v9192_v28, %s9922_s23  ;;  %v5228_v44 = vrot.slane %v15547_v21, 1  ;;  %v5284_v35 = vrot.slane %v15547_v21, 3  ;;  %v5339_v31 = vrot.slane %v15547_v21, 5  ;;  %v15583_v28 = vld [vmem:[#allocation2 + $0x10] sm:$0xff]  ;;  %v5336_v39 = vsel %vm1811_vm2, %v5333_v19, %v5335_v5 }
 0x9d6   : > { %9208 = vrot.lane.b32.xlu0 %v9207_v15, %s9920_s21  ;;  %v5364_v29 = vrot.slane %v15524_v13, 6  ;;  %v15591_v15 = vld [vmem:[#allocation2 + $0x8] sm:$0xff]  ;;  %v5663_v2 = vrot.slane %v15583_v28, 1  ;;  %v5257_v43 = vrot.slane %v15547_v21, 2  ;;  %v5486_v11 = vsel %vm1564_vm6, %v9655_v58, 0 }
 0x9d7   : > { %v5229_v49 = vsel %vm17897_vm8, %v5226_v16, %v5228_v44  ;;  %v5285_v23 = vsel %vm1317_vm1, %v5282_v33, %v5284_v35  ;;  %v5338_v16 = vsel %vm1811_vm2, %v5335_v5, %v5337_v48  ;;  %v5340_v17 = vsel %vm1811_vm2, %v5337_v48, %v5339_v31  ;;  %7796 = vmatpush3.bf16.msra.mxu1 %v5486_v11  ;;  %v9657_v57 = vld [vmem:[%s16668_s10 + $0x8] sm:$0xff]  }
 0x9d8   : > { %v9237_v51 = vpack.i.bf16 %v5228_v44, %v5229_v49  ;;  %v9247_v4 = vpack.i.bf16 %v5284_v35, %v5285_v23  ;;  %v9227_v24 = vpack.i.bf16 %v5338_v16, %v5336_v39  ;;  %v5342_v33 = vsel %vm1811_vm2, %v5339_v31, %v15213_v56  ;;  %v9656_v44 = vld [vmem:[%s16668_s10 + $0x10] sm:$0xff]   ;;  %7797 = vmatprep.subr.bf16.mxu1 %v17443_v22  ;;  %v15634_v23 = vld [vmem:[#allocation2 + $0x20] sm:$0xff]  ;;  %v15640_v39 = vld [vmem:[#allocation2 + $0x18] sm:$0xff] }
 0x9d9   : > { %9198 = vrot.lane.b32.xlu1 %v9197_v6, %s9923_s28  ;;  %v5367_v6 = vsel %vm17898_vm3, %v5364_v29, %v5366_v7  ;;  %v5661_v19 = vrot.slane %v15591_v15, 1  ;;  %v9257_v18 = vpack.i.bf16 %v5342_v33, %v5340_v17  ;;  %v5692_v45 = vrot.slane %v15583_v28, 2  ;;  %vm17900_vm3 = vmmov %vm17897_vm8  ;;  %v9658_v16 = vld [vmem:[%s16668_s10] sm:$0xff]  }
 0x9da   : > { %9213 = vrot.lane.b32.xlu0 %v9212_v55, %s9921_s15  ;;  %v5365_v55 = vsel %vm17899_vm4, %v5362_v14, %v5364_v29  ;;  %v5258_v38 = vsel %vm1070_vm5, %v5255_v9, %v5257_v43  ;;  %v5311_v14 = vrot.slane %v15547_v21, 4  ;;  %v5690_v49 = vrot.slane %v15591_v15, 2 }
 0x9db   : > { %v9232_v32 = vpack.i.bf16 %v5367_v6, %v5365_v55  ;;  %7798 = vmatpush3.bf16.msra.mxu1 %v9656_v44  ;;  %v9242_v48 = vpack.i.bf16 %v5257_v43, %v5258_v38  ;;  %v5719_v9 = vrot.slane %v15583_v28, 3  ;;  %v5745_v17 = vrot.slane %v15591_v15, 4 }
 0x9dc   : > { %v5693_v30 = vsel %vm1070_vm5, %v5690_v49, %v5692_v45  ;;  %7799 = vmatprep.subr.bf16.mxu1 %v17443_v22  ;;  %v5691_v5 = vsel %vm1070_vm5, %v5248_v25, %v5690_v49  ;;  %v5665_v6 = vrot.slane %v15640_v39, 1  ;;  %v5774_v11 = vrot.slane %v15583_v28, 5 }
 0x9dd   : > { %9203 = vrot.lane.b32.xlu1 %v9202_v62, %s9910_s22  ;;  %v5664_v62 = vsel %vm17897_vm8, %v5661_v19, %v5663_v2  ;;  %v9272_v31 = vpack.i.bf16 %v5693_v30, %v5691_v5  ;;  %vm17901_vm8 = vmmov %vm17899_vm4  ;;  %v5696_v55 = vrot.slane %v15634_v23, 2 }
 0x9de   : > { %9218 = vrot.lane.b32.xlu0 %v9217_v54, %s9916_s30  ;;  %v5662_v54 = vsel %vm17900_vm3, %v5219_v60, %v5661_v19  ;;  %v5368_v60 = vrot.slane %v15547_v21, 6 }
 0x9df   : > { %v9267_v35 = vpack.i.bf16 %v5664_v62, %v5662_v54  ;;  %7800 = vmatpush3.bf16.msra.mxu1 %v9657_v57  ;;  %v5694_v62 = vrot.slane %v15640_v39, 2  ;;  %v5803_v54 = vrot.slane %v15583_v28, 6  ;;  %v15667_v57 = vld [vmem:[#allocation2 + $0x28] sm:$0xff] }
 0x9e0   : > { %7801 = vmatprep.subr.bf16.mxu1 %v17443_v22  ;;  %v5369_v25 = vsel %vm17899_vm4, %v5366_v7, %v5368_v60  ;;  %v5371_v29 = vsel %vm17901_vm8, %v5368_v60, %v15350_v8  ;;  %vm17902_vm4 = vmmov %vm17900_vm3 }
 0x9e1   : > { %9238 = vrot.lane.b32.xlu1 %v9237_v51, %s9920_s21  ;;  %v5312_v51 = vsel %vm1564_vm6, %v5309_v26, %v5311_v14  ;;  %v9262_v43 = vpack.i.bf16 %v5371_v29, %v5369_v25  ;;  %v5666_v44 = vsel %vm17902_vm4, %v5663_v2, %v5665_v6  ;;  %v5697_v49 = vsel %vm1070_vm5, %v5694_v62, %v5696_v55  ;;  %vm17903_vm4 = vmmov %vm17901_vm8 }
 0x9e2   : > { %9223 = vrot.lane.b32.xlu0 %v9222_v34, %s9922_s23  ;;  %v5718_v34 = vrot.slane %v15591_v15, 3  ;;  %v9252_v58 = vpack.i.bf16 %v5311_v14, %v5312_v51  ;;  %v5802_v2 = vrot.slane %v15591_v15, 6  ;;  %v5721_v51 = vrot.slane %v15640_v39, 3 }
 0x9e3   : > { %7802 = vmatpush3.bf16.msra.mxu1 %v9658_v16  ;;  %v5750_v16 = vrot.slane %v15634_v23, 4 }
 0x9e4   : > { %v5720_v26 = vsel %vm1317_vm1, %v5718_v34, %v5719_v9  ;;  %7815 = vmatprep.subr.bf16.mxu1 %v17443_v22  ;;  %v5804_v5 = vsel %vm17901_vm8, %v5802_v2, %v5803_v54  ;;  %vm17904_vm8 = vmmov %vm17903_vm4 }
 0x9e5   : > { %9248 = vrot.lane.b32.xlu1 %v9247_v4, %s9916_s30  ;;  %v5746_v4 = vrot.slane %v15583_v28, 4  ;;  %v9277_v33 = vpack.i.bf16 %v5720_v26, %v5718_v34  ;;  %v5669_v34 = vrot.slane %v15667_v57, 1  ;;  %v9292_v26 = vpack.i.bf16 %v5804_v5, %v5802_v2 }
 0x9e6   : > { %9228 = vrot.lane.b32.xlu0 %v9227_v24, %s9923_s28  ;;  %v5667_v24 = vrot.slane %v15634_v23, 1  ;;  %v5752_v5 = vrot.slane %v15667_v57, 4 }
 0x9e7   : > { %v5747_v19 = vsel %vm1564_vm6, %v5745_v17, %v5746_v4 }
 0x9e8   : > { %v5668_v7 = vsel %vm17900_vm3, %v5665_v6, %v5667_v24  ;;  %v5670_v29 = vsel %vm17900_vm3, %v5667_v24, %v5669_v34  ;;  %v5778_v6 = vrot.slane %v15634_v23, 5  ;;  %v5780_v24 = vrot.slane %v15667_v57, 5  ;;  %vm17905_vm3 = vmmov %vm17903_vm4 }
 0x9e9   : > { %9258 = vrot.lane.b32.xlu1 %v9257_v18, %s9923_s28  ;;  %v5773_v18 = vrot.slane %v15591_v15, 5  ;;  %v9297_v38 = vpack.i.bf16 %v5668_v7, %v5666_v44 }
 0x9ea   : > { %9233 = vrot.lane.b32.xlu0 %v9232_v32, %s9910_s22  ;;  %v9282_v32 = vpack.i.bf16 %v5747_v19, %v5745_v17  ;;  %v5725_v17 = vrot.slane %v15667_v57, 3  ;;  %v9327_v19 = vpack.i.bf16 %v5669_v34, %v5670_v29  ;;  %v5753_v34 = vsel %vm1564_vm6, %v5750_v16, %v5752_v5 }
 0x9eb   : > { %v5775_v14 = vsel %vm1811_vm2, %v5773_v18, %v5774_v11 }
 0x9ec   : > { %v9287_v30 = vpack.i.bf16 %v5775_v14, %v5773_v18 }
 0x9ed   : > { %9268 = vrot.lane.b32.xlu1 %v9267_v35, %s9920_s21  ;;  %v5723_v35 = vrot.slane %v15634_v23, 3 }
 0x9ee   : > { %9243 = vrot.lane.b32.xlu0 %v9242_v48, %s9921_s15  ;;  %v5695_v48 = vsel %vm1070_vm5, %v5692_v45, %v5694_v62  ;;  %v5748_v45 = vrot.slane %v15640_v39, 4 }
 0x9ef   : > { %v9302_v60 = vpack.i.bf16 %v5697_v49, %v5695_v48  ;;  %v5726_v18 = vsel %vm1317_vm1, %v5723_v35, %v5725_v17  ;;  %v5781_v49 = vsel %vm1811_vm2, %v5778_v6, %v5780_v24  ;;  %v5698_v48 = vrot.slane %v15667_v57, 2 }
 0x9f1   : > { %9273 = vrot.lane.b32.xlu1 %v9272_v31, %s9921_s15  ;;  %v5724_v31 = vsel %vm1317_vm1, %v5721_v51, %v5723_v35  ;;  %v5783_v35 = vsel %vm1811_vm2, %v5780_v24, %v15213_v56 }
 0x9f2   : > { %9253 = vrot.lane.b32.xlu0 %v9252_v58, %s9922_s23  ;;  %v5722_v58 = vsel %vm1317_vm1, %v5719_v9, %v5721_v51  ;;  %v5776_v9 = vrot.slane %v15640_v39, 5 }
 0x9f3   : > { %v9307_v25 = vpack.i.bf16 %v5724_v31, %v5722_v58  ;;  %v5809_v31 = vrot.slane %v15667_v57, 6  ;;  %v9342_v58 = vpack.i.bf16 %v5752_v5, %v5753_v34 }
 0x9f4   : > { %v5779_v44 = vsel %vm1811_vm2, %v5776_v9, %v5778_v6  ;;  %v5777_v62 = vsel %vm1811_vm2, %v5774_v11, %v5776_v9  ;;  %v9347_v11 = vpack.i.bf16 %v5783_v35, %v5781_v49 }
 0x9f5   : > { %9278 = vrot.lane.b32.xlu1 %v9277_v33, %s9916_s30  ;;  %v5751_v33 = vsel %vm1564_vm6, %v5748_v45, %v5750_v16  ;;  %v9317_v14 = vpack.i.bf16 %v5779_v44, %v5777_v62 }
 0x9f6   : > { %9263 = vrot.lane.b32.xlu0 %v9262_v43, %s9910_s22  ;;  %v5749_v43 = vsel %vm1564_vm6, %v5746_v4, %v5748_v45  ;;  %v5805_v4 = vrot.slane %v15640_v39, 6 }
 0x9f7   : > { %v9312_v7 = vpack.i.bf16 %v5751_v33, %v5749_v43 }
 0x9f9   : > { %9283 = vrot.lane.b32.xlu1 %v9282_v32, %s9922_s23  ;;  %v5807_v32 = vrot.slane %v15634_v23, 6 }
 0x9fa   : > { %9298 = vrot.lane.b32.xlu0 %v9297_v38, %s9920_s21  ;;  %v9337_v38 = vpack.i.bf16 %v5725_v17, %v5726_v18 }
 0x9fb   : > { %v5808_v2 = vsel %vm17903_vm4, %v5805_v4, %v5807_v32  ;;  %vm17906_vm4 = vmmov %vm17905_vm3 }
 0x9fd   : > { %9288 = vrot.lane.b32.xlu1 %v9287_v30, %s9923_s28  ;;  %v5806_v30 = vsel %vm17904_vm8, %v5803_v54, %v5805_v4  ;;  %v5810_v54 = vsel %vm17905_vm3, %v5807_v32, %v5809_v31  ;;  %vm17907_vm8 = vcmask 457728  }
 0x9fe   : > { %9303 = vrot.lane.b32.xlu0 %v9302_v60, %s9921_s15  ;;  %v9322_v51 = vpack.i.bf16 %v5808_v2, %v5806_v30  ;;  %v5699_v60 = vsel %vm1070_vm5, %v5696_v55, %v5698_v48  ;;  %vm17908_vm3 = vmmov %vm17907_vm8 }
 0x9ff   : > { %v9332_v56 = vpack.i.bf16 %v5698_v48, %v5699_v60 }
 0xa01   : > { %9293 = vrot.lane.b32.xlu1 %v9292_v26, %s9910_s22  ;;  %v5812_v26 = vsel %vm17906_vm4, %v5809_v31, %v15350_v8  ;;  %vm17909_vm4 = vmmov %vm17908_vm3 }
 0xa02   : > { %9308 = vrot.lane.b32.xlu0 %v9307_v25, %s9916_s30  ;;  %v9352_v55 = vpack.i.bf16 %v5812_v26, %v5810_v54 }
 0xa05   : > { %9328 = vrot.lane.b32.xlu1 %v9327_v19, %s9920_s21 }
 0xa06   : > { %9313 = vrot.lane.b32.xlu0 %v9312_v7, %s9922_s23 }
 0xa09   : > { %9338 = vrot.lane.b32.xlu1 %v9337_v38, %s9916_s30 }
 0xa0a   : > { %9318 = vrot.lane.b32.xlu0 %v9317_v14, %s9923_s28 }
 0xa0d   : > { %9348 = vrot.lane.b32.xlu1 %v9347_v11, %s9923_s28 }
 0xa0e   : > { %9323 = vrot.lane.b32.xlu0 %v9322_v51, %s9910_s22 }
 0xa12   : > { %9333 = vrot.lane.b32.xlu0 %v9332_v56, %s9921_s15 }
 0xa16   : > { %9343 = vrot.lane.b32.xlu0 %v9342_v58, %s9922_s23 }
 0xa1a   : > { %9353 = vrot.lane.b32.xlu0 %v9352_v55, %s9910_s22 }
 0xa3b   : > { %v9179_v45 = vpop.permute.xlu1 %9178 }
 0xa3c   : > { %v9181_v43 = vunpack.i.h.bf16 %v9179_v45  ;;  %v9180_v19 = vunpack.i.l.bf16 %v9179_v45 }
 0xa3e   : > { %v5391_v38 = vsel %vm442_vm9, %v15495_v63, %v9181_v43  ;;  %v5390_v4 = vsel %vm442_vm9, %v15497_v10, %v9180_v19 }
 0xa3f   : > { %v9184_v25 = vpop.permute.xlu1 %9183 }
 0xa40   : > { %v9186_v7 = vunpack.i.h.bf16 %v9184_v25  ;;  %v9185_v18 = vunpack.i.l.bf16 %v9184_v25 }
 0xa42   : > { %v5396_v2 = vsel %vm4192_vm12, %v5390_v4, %v9185_v18  ;;  %v5397_v48 = vsel %vm4192_vm12, %v5391_v38, %v9186_v7 }
 0xa43   : > { %v9189_v29 = vpop.permute.xlu1 %9188 }
 0xa44   : > { %v9191_v44 = vunpack.i.h.bf16 %v9189_v29  ;;  %v9190_v8 = vunpack.i.l.bf16 %v9189_v29 }
 0xa46   : > { %v5402_v60 = vsel %vm2848_vm11, %v5396_v2, %v9190_v8  ;;  %v5403_v5 = vsel %vm2848_vm11, %v5397_v48, %v9191_v44 }
 0xa47   : > { %v9194_v17 = vpop.permute.xlu1 %9193 }
 0xa48   : > { %v9209_v16 = vpop.permute.xlu0 %9208  ;;  %v9196_v32 = vunpack.i.h.bf16 %v9194_v17  ;;  %v9195_v62 = vunpack.i.l.bf16 %v9194_v17 }
 0xa49   : > { %v9211_v34 = vunpack.i.h.bf16 %v9209_v16  ;;  %v9210_v31 = vunpack.i.l.bf16 %v9209_v16 }
 0xa4a   : > { %v5408_v56 = vsel %vm4205_vm13, %v5402_v60, %v9195_v62  ;;  %v5409_v63 = vsel %vm4205_vm13, %v5403_v5, %v9196_v32 }
 0xa4b   : > { %v9199_v33 = vpop.permute.xlu1 %9198  ;;  %v5393_v7 = vsel %vm442_vm9, %v15524_v13, %v9211_v34  ;;  %v5392_v16 = vsel %vm442_vm9, %v15503_v52, %v9210_v31 }
 0xa4c   : > { %v9214_v6 = vpop.permute.xlu0 %9213  ;;  %v9201_v14 = vunpack.i.h.bf16 %v9199_v33  ;;  %v9200_v49 = vunpack.i.l.bf16 %v9199_v33 }
 0xa4d   : > { %v9216_v26 = vunpack.i.h.bf16 %v9214_v6  ;;  %v9215_v55 = vunpack.i.l.bf16 %v9214_v6 }
 0xa4e   : > { %v5414_v58 = vsel %vm4212_vm14, %v5408_v56, %v9200_v49  ;;  %v5415_v54 = vsel %vm4212_vm14, %v5409_v63, %v9201_v14 }
 0xa4f   : > { %v9204_v9 = vpop.permute.xlu1 %9203  ;;  %v5398_v6 = vsel %vm4192_vm12, %v5392_v16, %v9215_v55  ;;  %v5399_v8 = vsel %vm4192_vm12, %v5393_v7, %v9216_v26 }
 0xa50   : > { %v9219_v24 = vpop.permute.xlu0 %9218  ;;  %v9206_v30 = vunpack.i.h.bf16 %v9204_v9  ;;  %v9205_v11 = vunpack.i.l.bf16 %v9204_v9 }
 0xa51   : > { %v9221_v17 = vunpack.i.h.bf16 %v9219_v24  ;;  %v9220_v33 = vunpack.i.l.bf16 %v9219_v24 }
 0xa52   : > { %v5420_v25 = vsel %vm3048_vm15, %v5414_v58, %v9205_v11  ;;  %v5421_v29 = vsel %vm3048_vm15, %v5415_v54, %v9206_v30 }
 0xa53   : > { %v9239_v35 = vpop.permute.xlu1 %9238  ;;  %v5426_v32 = vpack.c.bf16 %v5421_v29, %v5420_v25  ;;  %v5404_v38 = vsel %vm2848_vm11, %v5398_v6, %v9220_v33  ;;  %v5405_v24 = vsel %vm2848_vm11, %v5399_v8, %v9221_v17 }
 0xa54   : > { %v9224_v51 = vpop.permute.xlu0 %9223  ;;  %v9241_v52 = vunpack.i.h.bf16 %v9239_v35  ;;  %v9240_v48 = vunpack.i.l.bf16 %v9239_v35 }
 0xa55   : > { %v9226_v19 = vunpack.i.h.bf16 %v9224_v51  ;;  %v9225_v9 = vunpack.i.l.bf16 %v9224_v51  ;;  %v5430_v51 = vshrl.u32 %v5426_v32, 16  ;;  %v5433_v60 = vshll.u32 %v5426_v32, 16 }
 0xa56   : > { %v5395_v26 = vsel %vm442_vm9, %v15547_v21, %v9241_v52  ;;  %v5394_v35 = vsel %vm442_vm9, %v15534_v1, %v9240_v48  ;;  %v9659_v21 = vld [vmem:[%s16666_s8 + $0x34] ss:$0 sps:$4 sm:$0xff]  }
 0xa57   : > { %v9249_v45 = vpop.permute.xlu1 %9248  ;;  %v5410_v14 = vsel %vm4205_vm13, %v5404_v38, %v9225_v9  ;;  %v5411_v13 = vsel %vm4205_vm13, %v5405_v24, %v9226_v19  ;;  %v5432_v29 = vrot.slane %v5430_v51, 2  ;;  %v5435_v17 = vrot.slane %v5433_v60, 3 }
 0xa58   : > { %v9229_v43 = vpop.permute.xlu0 %9228  ;;  %v9251_v9 = vunpack.i.h.bf16 %v9249_v45  ;;  %v9250_v7 = vunpack.i.l.bf16 %v9249_v45  ;;  %v15763_v52 = vsel %vm1564_vm6, %v9659_v21, 0 }
 0xa59   : > { %v9231_v18 = vunpack.i.h.bf16 %v9229_v43  ;;  %v9230_v44 = vunpack.i.l.bf16 %v9229_v43  ;;  %v5436_v45 = vor.u32 %v5435_v17, %v5432_v29 }
 0xa5b   : > { %v9259_v62 = vpop.permute.xlu1 %9258  ;;  %v5416_v30 = vsel %vm4212_vm14, %v5410_v14, %v9230_v44  ;;  %v5417_v11 = vsel %vm4212_vm14, %v5411_v13, %v9231_v18 }
 0xa5c   : > { %v9234_v4 = vpop.permute.xlu0 %9233  ;;  %v9261_v13 = vunpack.i.h.bf16 %v9259_v62 }
 0xa5d   : > { %v9236_v49 = vunpack.i.h.bf16 %v9234_v4  ;;  %v9235_v2 = vunpack.i.l.bf16 %v9234_v4 }
 0xa5f   : > { %v5422_v5 = vsel %vm3048_vm15, %v5416_v30, %v9235_v2  ;;  %v5423_v56 = vsel %vm3048_vm15, %v5417_v11, %v9236_v49  ;;  %v15745_v63 = vpop.permute.xlu1 %9268  ;;  %v9260_v49 = vunpack.i.l.bf16 %v9259_v62  ;;  %v15777_v62 = vld [vmem:[%s16666_s8 + $0x2c] sm:$0xff]  }
 0xa60   : > { %v5427_v34 = vpack.c.bf16 %v5423_v56, %v5422_v5  ;;  %v9244_v31 = vpop.permute.xlu0 %9243 }
 0xa61   : > { %v9246_v58 = vunpack.i.h.bf16 %v9244_v31  ;;  %v9245_v54 = vunpack.i.l.bf16 %v9244_v31 }
 0xa62   : > { %v5438_v55 = vshrl.u32 %v5427_v34, 16  ;;  %v5441_v25 = vshll.u32 %v5427_v34, 16 }
 0xa63   : > { %v5401_v33 = vsel %vm4192_vm12, %v5395_v26, %v9246_v58  ;;  %v5400_v43 = vsel %vm4192_vm12, %v5394_v35, %v9245_v54  ;;  %v15753_v19 = vpop.permute.xlu1 %9273 }
 0xa64   : > { %v5440_v16 = vrot.slane %v5438_v55, 2  ;;  %v5443_v18 = vrot.slane %v5441_v25, 3  ;;  %v9254_v44 = vpop.permute.xlu0 %9253  ;;  %v5406_v8 = vsel %vm2848_vm11, %v5400_v43, %v9250_v7  ;;  %v5407_v32 = vsel %vm2848_vm11, %v5401_v33, %v9251_v9  ;;  %v15784_v55 = vld [vmem:[%s16666_s8 + $0x24] sm:$0xff]  }
 0xa65   : > { %v9256_v1 = vunpack.i.h.bf16 %v9254_v44  ;;  %v9255_v6 = vunpack.i.l.bf16 %v9254_v44  ;;  %v9271_v33 = vunpack.i.h.bf16 %v15745_v63  ;;  %v9270_v43 = vunpack.i.l.bf16 %v15745_v63 }
 0xa66   : > { %v5444_v38 = vor.u32 %v5443_v18, %v5440_v16  ;;  %v9276_v7 = vunpack.i.h.bf16 %v15753_v19  ;;  %v9275_v16 = vunpack.i.l.bf16 %v15753_v19  ;;  %v15795_v18 = vld [vmem:[%s16666_s8 + $0x1c] sm:$0xff]  }
 0xa67   : > { %v5412_v24 = vsel %vm4205_vm13, %v5406_v8, %v9255_v6  ;;  %v5413_v4 = vsel %vm4205_vm13, %v5407_v32, %v9256_v1  ;;  %v9279_v14 = vpop.permute.xlu1 %9278  ;;  %v5832_v19 = vsel %vm442_vm9, %v15591_v15, %v9271_v33 }
 0xa68   : > { %v9264_v2 = vpop.permute.xlu0 %9263  ;;  %v5445_v11 = vsel %vm4228_vm7, %v5436_v45, %v5444_v38  ;;  %v5418_v51 = vsel %vm4212_vm14, %v5412_v24, %v9260_v49  ;;  %v5419_v60 = vsel %vm4212_vm14, %v5413_v4, %v9261_v13  ;;  %v9281_v44 = vunpack.i.h.bf16 %v9279_v14 }
 0xa69   : > { %v9266_v48 = vunpack.i.h.bf16 %v9264_v2  ;;  %v9265_v30 = vunpack.i.l.bf16 %v9264_v2  ;;  %7804 = vmatmul.mubr.msk.bf16.vlgmr.msra.gmra.mxu1 %vm17907_vm8, %v5445_v11  ;;  %v9280_v21 = vunpack.i.l.bf16 %v9279_v14  ;;  %v5831_v24 = vsel %vm442_vm9, %v15497_v10, %v9270_v43  ;;  %vm17910_vm8 = vmmov %vm17908_vm3 }
 0xa6a   : > { %7807 = vmatprep.mubr.msk.bf16.mxu1 %vm17887_vm10, %v17443_v22  ;;  %7816 = vmatpush3.bf16.msra.mxu1 %v15763_v52  ;;  %v5837_v14 = vsel %vm4192_vm12, %v5831_v24, %v9275_v16 }
 0xa6b   : > { %v5424_v5 = vsel %vm3048_vm15, %v5418_v51, %v9265_v30  ;;  %v5425_v56 = vsel %vm3048_vm15, %v5419_v60, %v9266_v48  ;;  %v9284_v34 = vpop.permute.xlu1 %9283  ;;  %7817 = vmatprep.subr.bf16.mxu1 %v17443_v22  ;;  %v5843_v2 = vsel %vm2848_vm11, %v5837_v14, %v9280_v21 }
 0xa6c   : > { %v5428_v31 = vpack.c.bf16 %v5425_v56, %v5424_v5  ;;  %v9299_v58 = vpop.permute.xlu0 %9298  ;;  %v9286_v63 = vunpack.i.h.bf16 %v9284_v34  ;;  %v9285_v32 = vunpack.i.l.bf16 %v9284_v34 }
 0xa6d   : > { %v9301_v11 = vunpack.i.h.bf16 %v9299_v58  ;;  %v9300_v51 = vunpack.i.l.bf16 %v9299_v58 }
 0xa6e   : > { %v5447_v54 = vshrl.u32 %v5428_v31, 16  ;;  %v5450_v26 = vshll.u32 %v5428_v31, 16  ;;  %7818 = vmatpush3.bf16.msra.mxu1 %v15777_v62  ;;  %v5849_v10 = vsel %vm4205_vm13, %v5843_v2, %v9285_v32 }
 0xa6f   : > { %v9289_v35 = vpop.permute.xlu1 %9288  ;;  %7819 = vmatprep.subr.bf16.mxu1 %v17443_v22  ;;  %v5833_v58 = vsel %vm442_vm9, %v15583_v28, %v9300_v51 }
 0xa70   : > { %v9304_v25 = vpop.permute.xlu0 %9303  ;;  %v5449_v29 = vrot.slane %v5447_v54, 2  ;;  %v5452_v17 = vrot.slane %v5450_v26, 3  ;;  %v9291_v4 = vunpack.i.h.bf16 %v9289_v35  ;;  %v9290_v45 = vunpack.i.l.bf16 %v9289_v35 }
 0xa71   : > { %v9306_v56 = vunpack.i.h.bf16 %v9304_v25  ;;  %v9305_v34 = vunpack.i.l.bf16 %v9304_v25 }
 0xa72   : > { %v5453_v9 = vor.u32 %v5452_v17, %v5449_v29  ;;  %7820 = vmatpush3.bf16.msra.mxu1 %v15784_v55  ;;  %v5855_v60 = vsel %vm4212_vm14, %v5849_v10, %v9290_v45  ;;  %v5834_v17 = vsel %vm442_vm9, %v15640_v39, %v9301_v11 }
 0xa73   : > { %v9294_v1 = vpop.permute.xlu1 %9293  ;;  %7821 = vmatprep.subr.bf16.mxu1 %v17443_v22  ;;  %v5839_v21 = vsel %vm4192_vm12, %v5833_v58, %v9305_v34 }
 0xa74   : > { %v9309_v6 = vpop.permute.xlu0 %9308  ;;  %v5454_v8 = vsel %vm4228_vm7, %v5444_v38, %v5453_v9  ;;  %v5838_v38 = vsel %vm4192_vm12, %v5832_v19, %v9276_v7  ;;  %v9296_v13 = vunpack.i.h.bf16 %v9294_v1  ;;  %v9295_v49 = vunpack.i.l.bf16 %v9294_v1 }
 0xa75   : > { %7808 = vmatmul.mubr.msk.bf16.gmra.mxu1 %vm17908_vm3, %v5454_v8  ;;  %v5844_v15 = vsel %vm2848_vm11, %v5838_v38, %v9281_v44  ;;  %v9311_v26 = vunpack.i.h.bf16 %v9309_v6  ;;  %v9310_v35 = vunpack.i.l.bf16 %v9309_v6  ;;  %v5840_v1 = vsel %vm4192_vm12, %v5834_v17, %v9306_v56 }
 0xa76   : > { %7811 = vmatprep.mubr.msk.bf16.mxu1 %vm17887_vm10, %v17443_v22  ;;  %7822 = vmatpush3.bf16.msra.mxu1 %v15795_v18  ;;  %v5850_v30 = vsel %vm4205_vm13, %v5844_v15, %v9286_v63  ;;  %v5861_v31 = vsel %vm3048_vm15, %v5855_v60, %v9295_v49 }
 0xa77   : > { %7835 = vmatprep.subr.bf16.mxu1 %v17443_v22  ;;  %v5856_v5 = vsel %vm4212_vm14, %v5850_v30, %v9291_v4  ;;  %v9329_v33 = vpop.permute.xlu1 %9328  ;;  %v5845_v39 = vsel %vm2848_vm11, %v5839_v21, %v9310_v35  ;;  %v5846_v6 = vsel %vm2848_vm11, %v5840_v1, %v9311_v26 }
 0xa78   : > { %v9314_v48 = vpop.permute.xlu0 %9313  ;;  %v5862_v54 = vsel %vm3048_vm15, %v5856_v5, %v9296_v13  ;;  %v9331_v8 = vunpack.i.h.bf16 %v9329_v33  ;;  %v9330_v63 = vunpack.i.l.bf16 %v9329_v33 }
 0xa79   : > { %v9316_v43 = vunpack.i.h.bf16 %v9314_v48  ;;  %v9315_v7 = vunpack.i.l.bf16 %v9314_v48  ;;  %v5867_v16 = vpack.c.bf16 %v5862_v54, %v5861_v31 }
 0xa7a   : > { %v5836_v10 = vsel %vm442_vm9, %v15667_v57, %v9331_v8  ;;  %v5835_v30 = vsel %vm442_vm9, %v15634_v23, %v9330_v63 }
 0xa7b   : > { %v5851_v32 = vsel %vm4205_vm13, %v5845_v39, %v9315_v7  ;;  %v5852_v28 = vsel %vm4205_vm13, %v5846_v6, %v9316_v43  ;;  %v5871_v4 = vshrl.u32 %v5867_v16, 16  ;;  %v5874_v45 = vshll.u32 %v5867_v16, 16  ;;  %v9339_v13 = vpop.permute.xlu1 %9338 }
 0xa7c   : > { %v9319_v29 = vpop.permute.xlu0 %9318  ;;  %v9341_v26 = vunpack.i.h.bf16 %v9339_v13  ;;  %v9340_v35 = vunpack.i.l.bf16 %v9339_v13 }
 0xa7d   : > { %7812 = vmatmul.mubr.msk.bf16.gmra.mxu1 %vm17909_vm4, %v5453_v9  ;;  %v9321_v25 = vunpack.i.h.bf16 %v9319_v29  ;;  %v9320_v44 = vunpack.i.l.bf16 %v9319_v29  ;;  %v5873_v60 = vrot.slane %v5871_v4, 2  ;;  %v5876_v5 = vrot.slane %v5874_v45, 3  ;;  %vm17911_vm4 = vmmov %vm17908_vm3 }
 0xa7e   : > { %7823 = vmatprep.mubr.msk.bf16.mxu1 %vm17887_vm10, %v17443_v22 }
 0xa7f   : > { %v5857_v14 = vsel %vm4212_vm14, %v5851_v32, %v9320_v44  ;;  %v5858_v38 = vsel %vm4212_vm14, %v5852_v28, %v9321_v25  ;;  %v9349_v43 = vpop.permute.xlu1 %9348  ;;  %v5877_v58 = vor.u32 %v5876_v5, %v5873_v60 }
 0xa80   : > { %v9324_v9 = vpop.permute.xlu0 %9323  ;;  %v9351_v1 = vunpack.i.h.bf16 %v9349_v43  ;;  %v9350_v39 = vunpack.i.l.bf16 %v9349_v43 }
 0xa81   : > { %v9326_v19 = vunpack.i.h.bf16 %v9324_v9  ;;  %v9325_v24 = vunpack.i.l.bf16 %v9324_v9 }
 0xa83   : > { %v5863_v49 = vsel %vm3048_vm15, %v5857_v14, %v9325_v24  ;;  %v5864_v2 = vsel %vm3048_vm15, %v5858_v38, %v9326_v19 }
 0xa84   : > { %v5868_v15 = vpack.c.bf16 %v5864_v2, %v5863_v49  ;;  %v9334_v48 = vpop.permute.xlu0 %9333 }
 0xa85   : > { %v9336_v11 = vunpack.i.h.bf16 %v9334_v48  ;;  %v9335_v51 = vunpack.i.l.bf16 %v9334_v48 }
 0xa86   : > { %v5879_v56 = vshrl.u32 %v5868_v15, 16  ;;  %v5882_v34 = vshll.u32 %v5868_v15, 16 }
 0xa87   : > { %v5842_v31 = vsel %vm4192_vm12, %v5836_v10, %v9336_v11  ;;  %v5841_v54 = vsel %vm4192_vm12, %v5835_v30, %v9335_v51  ;;  %v7483_v11 = vld [vmem:[%s16670_s12 + $0x1] ss:$0 sm:$0xff] }
 0xa88   : > { %v5881_v29 = vrot.slane %v5879_v56, 2  ;;  %v5884_v17 = vrot.slane %v5882_v34, 3  ;;  %v9344_v33 = vpop.permute.xlu0 %9343  ;;  %v5847_v16 = vsel %vm2848_vm11, %v5841_v54, %v9340_v35  ;;  %v5848_v25 = vsel %vm2848_vm11, %v5842_v31, %v9341_v26 }
 0xa89   : > { %v9346_v57 = vunpack.i.h.bf16 %v9344_v33  ;;  %v9345_v7 = vunpack.i.l.bf16 %v9344_v33 }
 0xa8a   : > { %v5885_v23 = vor.u32 %v5884_v17, %v5881_v29 }
 0xa8b   : > { %v5853_v44 = vsel %vm4205_vm13, %v5847_v16, %v9345_v7  ;;  %v5854_v21 = vsel %vm4205_vm13, %v5848_v25, %v9346_v57 }
 0xa8c   : > { %v9354_v6 = vpop.permute.xlu0 %9353  ;;  %v5886_v8 = vsel %vm4228_vm7, %v5877_v58, %v5885_v23  ;;  %v5859_v32 = vsel %vm4212_vm14, %v5853_v44, %v9350_v39  ;;  %v5860_v28 = vsel %vm4212_vm14, %v5854_v21, %v9351_v1  ;;  %v5152_v44 = vadd.f32 %v15455_v53, %v14961_v20 }
 0xa8d   : > { %v9356_v63 = vunpack.i.h.bf16 %v9354_v6  ;;  %v9355_v9 = vunpack.i.l.bf16 %v9354_v6  ;;  %7824 = vmatmul.mubr.msk.bf16.vlgmr.msra.gmra.mxu1 %vm17910_vm8, %v5886_v8  ;;  %v5153_v39 = vadd.f32 %v15457_v41, %v14961_v20  ;;  %vm17912_vm8 = vcmask 1046528  }
 0xa8e   : > { %7827 = vmatprep.mubr.msk.bf16.mxu1 %vm17887_vm10, %v17443_v22  ;;  %7836 = vmatpush3.bf16.msra.mxu1 %v15763_v52 }
 0xa8f   : > { %v5865_v19 = vsel %vm3048_vm15, %v5859_v32, %v9355_v9  ;;  %v5866_v24 = vsel %vm3048_vm15, %v5860_v28, %v9356_v63  ;;  %7837 = vmatprep.subr.bf16.mxu1 %v17443_v22  ;;  %v5154_v63 = vadd.f32 %v15459_v42, %v14961_v20  ;;  %v5155_v42 = vadd.f32 %v15461_v3, %v14961_v20 }
 0xa90   : > { %v5869_v4 = vpack.c.bf16 %v5866_v24, %v5865_v19 }
 0xa92   : > { %v5888_v45 = vshrl.u32 %v5869_v4, 16  ;;  %v5891_v14 = vshll.u32 %v5869_v4, 16  ;;  %7838 = vmatpush3.bf16.msra.mxu1 %v15777_v62 }
 0xa93   : > { %7839 = vmatprep.subr.bf16.mxu1 %v17443_v22 }
 0xa94   : > { %v5890_v38 = vrot.slane %v5888_v45, 2  ;;  %v5893_v13 = vrot.slane %v5891_v14, 3 }
 0xa96   : > { %v5894_v49 = vor.u32 %v5893_v13, %v5890_v38  ;;  %7840 = vmatpush3.bf16.msra.mxu1 %v15784_v55  ;;  %v9663_v38 = vld [vmem:[%s16667_s9 + $0x34] ss:$0 sps:$4 sm:$0xff]  }
 0xa97   : > { %7841 = vmatprep.subr.bf16.mxu1 %v17443_v22  ;;  %v6678_v3 = vsel %vm1564_vm6, %v9663_v38, 0 }
 0xa98   : > { %v5895_v52 = vsel %vm4228_vm7, %v5885_v23, %v5894_v49  ;;  %v5151_v23 = vadd.f32 %v15453_v46, %v14961_v20  ;;  %7856 = vmatpush3.bf16.msra.mxu0 %v6678_v3 }
 0xa99   : > { %7828 = vmatmul.mubr.msk.bf16.gmra.mxu1 %vm17908_vm3, %v5895_v52  ;;  %7857 = vmatprep.subr.bf16.mxu0 %v17443_v22  ;;  %vm17913_vm3 = vmmov %vm17912_vm8 }
 0xa9a   : > { %7831 = vmatprep.mubr.msk.bf16.mxu1 %vm17887_vm10, %v17443_v22  ;;  %7842 = vmatpush3.bf16.msra.mxu1 %v15795_v18 }
 0xa9b   : > { %7895 = vmatprep.subr.bf16.mxu1 %v17443_v22 }
 0xaa1   : > { %7832 = vmatmul.mubr.msk.bf16.gmra.mxu1 %vm17911_vm4, %v5894_v49  ;;  %vm17914_vm4 = vmmov %vm17913_vm3 }
 0xaa2   : > { %7843 = vmatprep.mubr.msk.bf16.mxu1 %vm17887_vm10, %v17443_v22 }
 0xb29   : > { %v5522_v62 = vpop.f32.mrf.mxu1 }
 0xb2a   : > { %5549 = vrot.lane.b32.xlu1 %v5522_v62, %s9921_s15 }
 0xb2b   : > { %v7805_v55 = vpop.f32.mrf.mxu1 }
 0xb2d   : > { %v5525_v2 = vpop.f32.mrf.mxu1 }
 0xb2e   : > { %5551 = vrot.lane.b32.xlu0 %v5525_v2, %s9921_s15 }
 0xb2f   : > { %v7806_v15 = vpop.f32.mrf.mxu1 }
 0xb35   : > { %v5530_v48 = vpop.f32.mrf.mxu1 }
 0xb36   : > { %5553 = vrot.lane.b32.xlu1 %v5530_v48, %s9921_s15 }
 0xb37   : > { %v7809_v10 = vpop.f32.mrf.mxu1 }
 0xb38   : > { %v9664_v10 = vld [vmem:[%s16667_s9 + $0x2c] sm:$0xff]  }
 0xb39   : > { %v5533_v18 = vpop.f32.mrf.mxu1  ;;  %7858 = vmatpush3.bf16.msra.mxu0 %v9664_v10 }
 0xb3a   : > { %5555 = vrot.lane.b32.xlu0 %v5533_v18, %s9921_s15  ;;  %7859 = vmatprep.subr.bf16.mxu0 %v17443_v22  ;;  %v7477_v18 = vld [vmem:[%s16669_s11 + $0x1] ss:$0 sm:$0xff] }
 0xb3b   : > { %v7810_v30 = vpop.f32.mrf.mxu1 }
 0xb3d   : > { %v5538_v51 = vpop.f32.mrf.mxu1 }
 0xb3e   : > { %6031 = vrot.lane.b32.xlu0 %v7483_v11, %s9921_s15  ;;  %5557 = vrot.lane.b32.xlu1 %v5538_v51, %s9921_s15  ;;  %v9665_v51 = vld [vmem:[%s16667_s9 + $0x24] sm:$0xff]  }
 0xb3f   : > { %v7813_v60 = vpop.f32.mrf.mxu1  ;;  %7860 = vmatpush3.bf16.msra.mxu0 %v9665_v51 }
 0xb40   : > { %7861 = vmatprep.subr.bf16.mxu0 %v17443_v22 }
 0xb41   : > { %v5541_v5 = vpop.f32.mrf.mxu1 }
 0xb43   : > { %v7814_v56 = vpop.f32.mrf.mxu1 }
 0xb4d   : > { %v15877_v34 = vpop.f32.mrf.mxu1 }
 0xb4e   : > { %v5991_v30 = vadd.f32 %v7477_v18, %v15877_v34 }
 0xb4f   : > { %v7825_v31 = vpop.f32.mrf.mxu1 }
 0xb50   : > { %v7478_v60 = vmul.f32 -1.442695, %v5991_v30 }
 0xb51   : > { %v15879_v54 = vpop.f32.mrf.mxu1 }
 0xb52   : > { %v5992_v11 = vadd.f32 %v7477_v18, %v15879_v54 }
 0xb53   : > { %v7826_v26 = vpop.f32.mrf.mxu1 }
 0xb54   : > { %v7479_v56 = vmul.f32 -1.442695, %v5992_v11 }
 0xb59   : > { %v15881_v35 = vpop.f32.mrf.mxu1 }
 0xb5a   : > { %v5993_v5 = vadd.f32 %v7477_v18, %v15881_v35 }
 0xb5b   : > { %v7829_v29 = vpop.f32.mrf.mxu1 }
 0xb5c   : > { %v7480_v31 = vmul.f32 -1.442695, %v5993_v5 }
 0xb5d   : > { %v15883_v17 = vpop.f32.mrf.mxu1 }
 0xb5f   : > { %v7830_v33 = vpop.f32.mrf.mxu1 }
 0xb60   : > { %v5574_v33 = vsub.f32 1.0, %v15473_v40 }
 0xb61   : > { %v15885_v43 = vpop.f32.mrf.mxu1 }
 0xb62   : > { %v5995_v26 = vadd.f32 %v7477_v18, %v15885_v43 }
 0xb63   : > { %v7833_v57 = vpop.f32.mrf.mxu1 }
 0xb65   : > { %v5982_v7 = vpop.f32.mrf.mxu1 }
 0xb67   : > { %v7834_v58 = vpop.f32.mrf.mxu1 }
 0xb68   : > { %v5579_v58 = vmul.f32 %v5574_v33, %v15133_v12 }
 0xb9c   : > { %v5550_v16 = vpop.permute.xlu1 %5549 }
 0xb9d   : > { %v5564_v25 = vadd.f32 %v5550_v16, %v5151_v23 }
 0xb9f   : > { %9823 = vtanh.f32 %v5564_v25 }
 0xba0   : > { %v5552_v21 = vpop.permute.xlu0 %5551 }
 0xba1   : > { %v5565_v1 = vadd.f32 %v5552_v21, %v5152_v44 }
 0xba3   : > { %9825 = vtanh.f32 %v5565_v1 }
 0xba8   : > { %v5554_v6 = vpop.permute.xlu1 %5553 }
 0xba9   : > { %v5566_v8 = vadd.f32 %v5554_v6, %v5153_v39 }
 0xbab   : > { %9827 = vtanh.f32 %v5566_v8 }
 0xbac   : > { %v5556_v9 = vpop.permute.xlu0 %5555  ;;  %v9824_v46 = vpop.eup %9823 }
 0xbad   : > { %v5567_v32 = vadd.f32 %v5556_v9, %v5154_v63  ;;  %5589 = vrot.lane.b32.xlu1 %v9824_v46, %s9925_s29  ;;  %v5576_v63 = vsub.f32 1.0, %v15481_v36 }
 0xbaf   : > { %9829 = vtanh.f32 %v5567_v32 }
 0xbb0   : > { %v15896_v53 = vpop.permute.xlu0 %6031  ;;  %v9826_v28 = vpop.eup %9825 }
 0xbb1   : > { %v6034_v19 = vadd.f32 %v15896_v53, %v15877_v34  ;;  %v6035_v41 = vadd.f32 %v15896_v53, %v15879_v54  ;;  %v5558_v24 = vpop.permute.xlu1 %5557  ;;  %5591 = vrot.lane.b32.xlu0 %v9826_v28, %s9925_s29  ;;  %v6036_v4 = vadd.f32 %v15896_v53, %v15881_v35  ;;  %v6038_v14 = vadd.f32 %v15896_v53, %v15885_v43 }
 0xbb2   : > { %v5568_v45 = vadd.f32 %v5558_v24, %v5155_v42  ;;  %v6037_v20 = vadd.f32 %v15896_v53, %v15883_v17  ;;  %v5994_v34 = vadd.f32 %v7477_v18, %v15883_v17  ;;  %v7482_v54 = vmul.f32 -1.442695, %v5995_v26 }
 0xbb3   : > { %9831 = vtanh.f32 %v6034_v19  ;;  %v5575_v43 = vsub.f32 1.0, %v15477_v37  ;;  %v5577_v28 = vsub.f32 1.0, %v15485_v27  ;;  %v5578_v18 = vsub.f32 1.0, %v15489_v61 }
 0xbb4   : > { %9833 = vtanh.f32 %v6035_v41  ;;  %v7481_v29 = vmul.f32 -1.442695, %v5994_v34  ;;  %v15958_v41 = vld [vmem:[#allocation2] sm:$0xff] }
 0xbb5   : > { %9835 = vtanh.f32 %v6036_v4  ;;  %v5580_v1 = vmul.f32 %v5575_v43, %v15140_v50  ;;  %v5581_v50 = vmul.f32 %v5576_v63, %v15150_v47  ;;  %v6087_v4 = vrot.slane %v15958_v41, 1 }
 0xbb6   : > { %9837 = vtanh.f32 %v5568_v45  ;;  %v5582_v47 = vmul.f32 %v5577_v28, %v15164_v59  ;;  %v6116_v59 = vrot.slane %v15958_v41, 2 }
 0xbb7   : > { %9839 = vtanh.f32 %v6038_v14 }
 0xbb8   : > { %v9828_v13 = vpop.eup %9827  ;;  %9841 = vtanh.f32 %v6037_v20 }
 0xbb9   : > { %5593 = vrot.lane.b32.xlu1 %v9828_v13, %s9925_s29  ;;  %9843 = vpow2.f32 %v7478_v60 }
 0xbba   : > { %9845 = vpow2.f32 %v7479_v56 }
 0xbbb   : > { %9847 = vpow2.f32 %v7480_v31 }
 0xbbc   : > { %v9830_v49 = vpop.eup %9829  ;;  %9849 = vpow2.f32 %v7482_v54 }
 0xbbd   : > { %5595 = vrot.lane.b32.xlu0 %v9830_v49, %s9925_s29  ;;  %9851 = vpow2.f32 %v7481_v29  ;;  %v5583_v29 = vmul.f32 %v5578_v18, %v15188_v0 }
 0xbc0   : > { %v9832_v52 = vpop.eup %9831 }
 0xbc1   : > { %v9834_v62 = vpop.eup %9833  ;;  %6049 = vrot.lane.b32.xlu0 %v9832_v52, %s9925_s29 }
 0xbc2   : > { %6051 = vrot.lane.b32.xlu1 %v9834_v62, %s9925_s29  ;;  %v9836_v55 = vpop.eup %9835 }
 0xbc3   : > { %v9838_v2 = vpop.eup %9837 }
 0xbc4   : > { %v9840_v15 = vpop.eup %9839 }
 0xbc5   : > { %6053 = vrot.lane.b32.xlu0 %v9836_v55, %s9925_s29  ;;  %v9842_v48 = vpop.eup %9841 }
 0xbc6   : > { %5597 = vrot.lane.b32.xlu1 %v9838_v2, %s9925_s29  ;;  %v9844_v35 = vpop.eup %9843 }
 0xbc7   : > { %v9846_v57 = vpop.eup %9845  ;;  %v6011_v16 = vadd.f32 1.0, %v9844_v35 }
 0xbc8   : > { %v9848_v25 = vpop.eup %9847  ;;  %v6012_v17 = vadd.f32 1.0, %v9846_v57 }
 0xbc9   : > { %6057 = vrot.lane.b32.xlu0 %v9840_v15, %s9925_s29  ;;  %9853 = vrcp.f32 %v6011_v16  ;;  %v6013_v12 = vadd.f32 1.0, %v9848_v25  ;;  %v9850_v6 = vpop.eup %9849 }
 0xbca   : > { %6055 = vrot.lane.b32.xlu1 %v9842_v48, %s9925_s29  ;;  %9855 = vrcp.f32 %v6012_v17  ;;  %v9852_v8 = vpop.eup %9851  ;;  %v6015_v9 = vadd.f32 1.0, %v9850_v6 }
 0xbcb   : > { %9857 = vrcp.f32 %v6013_v12  ;;  %v6014_v46 = vadd.f32 1.0, %v9852_v8 }
 0xbcc   : > { %9859 = vrcp.f32 %v6015_v9 }
 0xbcd   : > { %9861 = vrcp.f32 %v6014_v46 }
 0xbd6   : > { %v9854_v3 = vpop.eup %9853 }
 0xbd7   : > { %v9856_v55 = vpop.eup %9855 }
 0xbd8   : > { %v9858_v51 = vpop.eup %9857 }
 0xbd9   : > { %v9860_v0 = vpop.eup %9859 }
 0xbda   : > { %v9862_v16 = vpop.eup %9861 }
 0xc1f   : > { %v5590_v7 = vpop.permute.xlu1 %5589 }
 0xc20   : > { %v5604_v23 = vmul.f32 %v15473_v40, %v5590_v7 }
 0xc22   : > { %v5609_v44 = vadd.f32 %v5604_v23, %v5579_v58 }
 0xc23   : > { %v5592_v21 = vpop.permute.xlu0 %5591 }
 0xc24   : > { %6069 = vst.msk [vmem:[#allocation2 + $0x8] sm:$0xff] %vm442_vm9, %v5609_v44  ;;  %7239 = vst.msk [vmem:[%s15131_s20 + $0x28] sm:$0xff] %vm442_vm9, %v5609_v44  ;;  %v5605_v39 = vmul.f32 %v15477_v37, %v5592_v21 }
 0xc26   : > { %v5610_v40 = vadd.f32 %v5605_v39, %v5580_v1 }
 0xc28   : > { %6070 = vst.msk [vmem:[#allocation2 + $0x10] sm:$0xff] %vm442_vm9, %v5610_v40  ;;  %7240 = vst.msk [vmem:[%s15131_s20 + $0x30] sm:$0xff] %vm442_vm9, %v5610_v40 }
 0xc2b   : > { %v5594_v32 = vpop.permute.xlu1 %5593  ;;  %v15956_v19 = vld [vmem:[#allocation2 + $0x8] sm:$0xff] }
 0xc2c   : > { %v5606_v37 = vmul.f32 %v15481_v36, %v5594_v32  ;;  %v6088_v45 = vrot.slane %v15956_v19, 1  ;;  %v6145_v31 = vrot.slane %v15956_v19, 3  ;;  %v6172_v43 = vrot.slane %v15956_v19, 4 }
 0xc2d   : > { %v6200_v46 = vrot.slane %v15956_v19, 5 }
 0xc2e   : > { %v5611_v24 = vadd.f32 %v5606_v37, %v5581_v50  ;;  %v6089_v52 = vsel %vm17912_vm8, %v6087_v4, %v6088_v45  ;;  %vm17915_vm8 = vmmov %vm17913_vm3 }
 0xc2f   : > { %v5596_v42 = vpop.permute.xlu0 %5595  ;;  %v15967_v14 = vld [vmem:[#allocation2 + $0x10] sm:$0xff] }
 0xc30   : > { %6071 = vst.msk [vmem:[#allocation2 + $0x18] sm:$0xff] %vm442_vm9, %v5611_v24  ;;  %7241 = vst.msk [vmem:[%s15131_s20 + $0x38] sm:$0xff] %vm442_vm9, %v5611_v24  ;;  %v5607_v36 = vmul.f32 %v15485_v27, %v5596_v42  ;;  %v6090_v38 = vrot.slane %v15967_v14, 1  ;;  %v6119_v13 = vrot.slane %v15967_v14, 2  ;;  %v6117_v27 = vrot.slane %v15956_v19, 2 }
 0xc31   : > { %v6146_v11 = vrot.slane %v15967_v14, 3  ;;  %v6173_v57 = vrot.slane %v15967_v14, 4  ;;  %v6201_v6 = vrot.slane %v15967_v14, 5  ;;  %v6230_v24 = vrot.slane %v15967_v14, 6 }
 0xc32   : > { %v5612_v20 = vadd.f32 %v5607_v36, %v5582_v47  ;;  %v6091_v62 = vsel %vm17913_vm3, %v6088_v45, %v6090_v38  ;;  %v6120_v30 = vsel %vm1070_vm5, %v6117_v27, %v6119_v13  ;;  %v6118_v56 = vsel %vm1070_vm5, %v6116_v59, %v6117_v27 }
 0xc33   : > { %v6050_v49 = vpop.permute.xlu0 %6049  ;;  %v9357_v48 = vpack.i.bf16 %v6091_v62, %v6089_v52  ;;  %v9362_v54 = vpack.i.bf16 %v6120_v30, %v6118_v56  ;;  %v6147_v35 = vsel %vm1317_vm1, %v6145_v31, %v6146_v11  ;;  %v6174_v12 = vsel %vm1564_vm6, %v6172_v43, %v6173_v57 }
 0xc34   : > { %6072 = vst.msk [vmem:[#allocation2 + $0x20] sm:$0xff] %vm442_vm9, %v5612_v20  ;;  %7242 = vst.msk [vmem:[%s15131_s20 + $0x40] sm:$0xff] %vm442_vm9, %v5612_v20  ;;  %v15980_v2 = vmul.f32 %v9854_v3, %v6050_v49  ;;  %v6052_v15 = vpop.permute.xlu1 %6051  ;;  %v9367_v44 = vpack.i.bf16 %v6147_v35, %v6145_v31  ;;  %v9372_v32 = vpack.i.bf16 %v6174_v12, %v6172_v43  ;;  %v6229_v20 = vrot.slane %v15956_v19, 6 }
 0xc35   : > { %v15982_v10 = vmul.f32 %v9856_v55, %v6052_v15  ;;  %9358 = vrot.lane.b32.xlu1 %v9357_v48, %s9920_s21  ;;  %v6202_v28 = vsel %vm1811_vm2, %v6200_v46, %v6201_v6  ;;  %vm17916_vm3 = vcmask 1041408  }
 0xc36   : > { %6393 = vst.msk [vmem:[#allocation2 + $0x8] sm:$0xff] %vm442_vm9, %v15980_v2  ;;  %7244 = vst.msk [vmem:[%s15131_s20 + $0x50] sm:$0xff] %vm442_vm9, %v15980_v2  ;;  %v9377_v3 = vpack.i.bf16 %v6202_v28, %v6200_v46 }
 0xc37   : > { %6394 = vst.msk [vmem:[#allocation2 + $0x10] sm:$0xff] %vm442_vm9, %v15982_v10  ;;  %7245 = vst.msk [vmem:[%s15131_s20 + $0x58] sm:$0xff] %vm442_vm9, %v15982_v10  ;;  %v16000_v60 = vld [vmem:[#allocation2 + $0x18] sm:$0xff]  ;;  %v6054_v5 = vpop.permute.xlu0 %6053 }
 0xc38   : > { %v5598_v26 = vpop.permute.xlu1 %5597  ;;  %v16006_v34 = vmul.f32 %v9858_v51, %v6054_v5  ;;  %v6092_v7 = vrot.slane %v16000_v60, 1  ;;  %v6121_v63 = vrot.slane %v16000_v60, 2  ;;  %v6148_v45 = vrot.slane %v16000_v60, 3 }
 0xc39   : > { %v5608_v33 = vmul.f32 %v15489_v61, %v5598_v26  ;;  %9363 = vrot.lane.b32.xlu1 %v9362_v54, %s9921_s15  ;;  %v6175_v48 = vrot.slane %v16000_v60, 4 }
 0xc3a   : > { %6395 = vst.msk [vmem:[#allocation2 + $0x18] sm:$0xff] %vm442_vm9, %v16006_v34  ;;  %7246 = vst.msk [vmem:[%s15131_s20 + $0x60] sm:$0xff] %vm442_vm9, %v16006_v34  ;;  %v6093_v40 = vsel %vm17914_vm4, %v6090_v38, %v6092_v7  ;;  %v6122_v42 = vsel %vm1070_vm5, %v6119_v13, %v6121_v63  ;;  %v6231_v13 = vsel %vm17916_vm3, %v6229_v20, %v6230_v24 }
 0xc3b   : > { %v5613_v61 = vadd.f32 %v5608_v33, %v5583_v29  ;;  %v16021_v58 = vld [vmem:[#allocation2 + $0x20] sm:$0xff]  ;;  %v6058_v23 = vpop.permute.xlu0 %6057  ;;  %v6149_v15 = vsel %vm1317_vm1, %v6146_v11, %v6148_v45  ;;  %v9382_v30 = vpack.i.bf16 %v6231_v13, %v6229_v20  ;;  %v6176_v54 = vsel %vm1564_vm6, %v6173_v57, %v6175_v48 }
 0xc3c   : > { %v6056_v25 = vpop.permute.xlu1 %6055  ;;  %v16024_v17 = vmul.f32 %v9860_v0, %v6058_v23  ;;  %v6094_v21 = vrot.slane %v16021_v58, 1  ;;  %v6123_v1 = vrot.slane %v16021_v58, 2  ;;  %v6150_v37 = vrot.slane %v16021_v58, 3 }
 0xc3d   : > { %6073 = vst.msk [vmem:[#allocation2 + $0x28] sm:$0x7f] %vm16960_vm0, %v5613_v61  ;;  %7243 = vst.msk [vmem:[%s15131_s20 + $0x48] sm:$0x7f] %vm16960_vm0, %v5613_v61  ;;  %v16031_v39 = vmul.f32 %v9862_v16, %v6056_v25  ;;  %9368 = vrot.lane.b32.xlu1 %v9367_v44, %s9916_s30  ;;  %v16064_v47 = vld [vmem:[#allocation2 + $0x8] sm:$0xff]  ;;  %v6177_v52 = vrot.slane %v16021_v58, 4 }
 0xc3e   : > { %7248 = vst.msk [vmem:[%s15131_s20 + $0x70] sm:$0x7f] %vm16960_vm0, %v16024_v17  ;;  %v6095_v8 = vsel %vm17915_vm8, %v6092_v7, %v6094_v21  ;;  %v6124_v50 = vsel %vm1070_vm5, %v6121_v63, %v6123_v1  ;;  %v16066_v36 = vld [vmem:[#allocation2 + $0x10] sm:$0xff]  ;;  %v6151_v49 = vsel %vm1317_vm1, %v6148_v45, %v6150_v37  ;;  %v6412_v27 = vrot.slane %v16064_v47, 1  ;;  %vm17917_vm8 = vmmov %vm17914_vm4 }
 0xc3f   : > { %6396 = vst.msk [vmem:[#allocation2 + $0x20] sm:$0xff] %vm442_vm9, %v16031_v39  ;;  %7247 = vst.msk [vmem:[%s15131_s20 + $0x68] sm:$0xff] %vm442_vm9, %v16031_v39  ;;  %v9387_v9 = vpack.i.bf16 %v6095_v8, %v6093_v40  ;;  %v9392_v38 = vpack.i.bf16 %v6124_v50, %v6122_v42  ;;  %v6414_v55 = vrot.slane %v16066_v36, 1  ;;  %v9397_v18 = vpack.i.bf16 %v6151_v49, %v6149_v15 }
 0xc40   : > { %v6178_v51 = vsel %vm1564_vm6, %v6175_v48, %v6177_v52  ;;  %v6205_v5 = vrot.slane %v16021_v58, 5  ;;  %v6413_v56 = vsel %vm17914_vm4, %v6087_v4, %v6412_v27  ;;  %v6441_v31 = vrot.slane %v16064_v47, 2  ;;  %vm17918_vm4 = vmmov %vm17916_vm3 }
 0xc41   : > { %9388 = vrot.lane.b32.xlu0 %v9387_v9, %s9920_s21  ;;  %9373 = vrot.lane.b32.xlu1 %v9372_v32, %s9922_s23  ;;  %v6415_v11 = vsel %vm17917_vm8, %v6412_v27, %v6414_v55  ;;  %v6443_v26 = vrot.slane %v16066_v36, 2  ;;  %v6203_v29 = vrot.slane %v16000_v60, 5  ;;  %v9407_v33 = vpack.i.bf16 %v6178_v51, %v6176_v54  ;;  %v16133_v50 = vld [vmem:[#allocation2 + $0x18] sm:$0xff] }
 0xc42   : > { %v9402_v35 = vpack.i.bf16 %v6415_v11, %v6413_v56  ;;  %v6234_v7 = vrot.slane %v16021_v58, 6  ;;  %v6442_v0 = vsel %vm1070_vm5, %v6116_v59, %v6441_v31  ;;  %v6469_v57 = vrot.slane %v16064_v47, 3 }
 0xc43   : > { %v6206_v4 = vsel %vm1811_vm2, %v6203_v29, %v6205_v5  ;;  %v6444_v61 = vsel %vm1070_vm5, %v6441_v31, %v6443_v26  ;;  %v6470_v23 = vrot.slane %v16066_v36, 3  ;;  %v6204_v43 = vsel %vm1811_vm2, %v6201_v6, %v6203_v29  ;;  %v9666_v6 = vld [vmem:[%s16667_s9 + $0x1c] sm:$0xff]  }
 0xc44   : > { %v16073_v62 = vld [vmem:[#allocation2 + $0x28] sm:$0xff]  ;;  %v6232_v16 = vrot.slane %v16000_v60, 6  ;;  %v9417_v25 = vpack.i.bf16 %v6206_v4, %v6204_v43  ;;  %v9412_v44 = vpack.i.bf16 %v6444_v61, %v6442_v0  ;;  %v6496_v8 = vrot.slane %v16064_v47, 4  ;;  %7862 = vmatpush3.bf16.msra.mxu0 %v9666_v6 }
 0xc45   : > { %9393 = vrot.lane.b32.xlu0 %v9392_v38, %s9921_s15  ;;  %6397 = vst.msk [vmem:[#allocation2 + $0x28] sm:$0x7f] %vm16960_vm0, %v16024_v17  ;;  %9378 = vrot.lane.b32.xlu1 %v9377_v3, %s9923_s28  ;;  %v6125_v59 = vrot.slane %v16073_v62, 2  ;;  %v6471_v40 = vsel %vm1317_vm1, %v6469_v57, %v6470_v23  ;;  %v6497_v63 = vrot.slane %v16066_v36, 4  ;;  %v6524_v20 = vrot.slane %v16064_v47, 5 }
 0xc46   : > { %v6235_v12 = vsel %vm17916_vm3, %v6232_v16, %v6234_v7  ;;  %v16126_v9 = vld [vmem:[#allocation2 + $0x20] sm:$0xff]  ;;  %v6233_v46 = vsel %vm17918_vm4, %v6230_v24, %v6232_v16  ;;  %v9422_v28 = vpack.i.bf16 %v6471_v40, %v6469_v57  ;;  %7875 = vmatprep.subr.bf16.mxu0 %v17443_v22  ;;  %v6525_v24 = vrot.slane %v16066_v36, 5  ;;  %vm17919_vm3 = vmmov %vm17917_vm8 }
 0xc47   : > { %v9427_v32 = vpack.i.bf16 %v6235_v12, %v6233_v46  ;;  %v6126_v42 = vsel %vm1070_vm5, %v6123_v1, %v6125_v59  ;;  %v6418_v45 = vrot.slane %v16126_v9, 1  ;;  %v6498_v38 = vsel %vm1564_vm6, %v6496_v8, %v6497_v63  ;;  %v6080_v46 = vld [vmem:[#allocation2 + $0x30] sm:$0xff] }
 0xc48   : > { %v6416_v3 = vrot.slane %v16133_v50, 1  ;;  %v9452_v49 = vpack.i.bf16 %v6125_v59, %v6126_v42  ;;  %v9432_v13 = vpack.i.bf16 %v6498_v38, %v6496_v8  ;;  %v6447_v27 = vrot.slane %v16126_v9, 2 }
 0xc49   : > { %9398 = vrot.lane.b32.xlu0 %v9397_v18, %s9916_s30  ;;  %9383 = vrot.lane.b32.xlu1 %v9382_v30, %s9910_s22  ;;  %v6526_v15 = vsel %vm1811_vm2, %v6524_v20, %v6525_v24  ;;  %v6553_v48 = vrot.slane %v16064_v47, 6  ;;  %v6554_v18 = vrot.slane %v16066_v36, 6  ;;  %v6445_v51 = vrot.slane %v16133_v50, 2 }
 0xc4a   : > { %v6419_v1 = vsel %vm17917_vm8, %v6416_v3, %v6418_v45  ;;  %v6417_v30 = vsel %vm17919_vm3, %v6414_v55, %v6416_v3  ;;  %v9437_v11 = vpack.i.bf16 %v6526_v15, %v6524_v20  ;;  %v6474_v54 = vrot.slane %v16126_v9, 3  ;;  %vm17920_vm8 = vmmov %vm17919_vm3 }
 0xc4b   : > { %v9477_v56 = vpack.i.bf16 %v6419_v1, %v6417_v30  ;;  %v6448_v31 = vsel %vm1070_vm5, %v6445_v51, %v6447_v27  ;;  %v6555_v29 = vsel %vm17918_vm4, %v6553_v48, %v6554_v18  ;;  %v6446_v55 = vsel %vm1070_vm5, %v6443_v26, %v6445_v51  ;;  %vm17921_vm3 = vmmov %vm17918_vm4 }
 0xc4c   : > { %v9482_v4 = vpack.i.bf16 %v6448_v31, %v6446_v55  ;;  %v9442_v0 = vpack.i.bf16 %v6555_v29, %v6553_v48  ;;  %v6501_v57 = vrot.slane %v16126_v9, 4  ;;  %v6152_v16 = vrot.slane %v16073_v62, 3  ;;  %vm17922_vm4 = vmmov %vm17921_vm3 }
 0xc4d   : > { %9408 = vrot.lane.b32.xlu0 %v9407_v33, %s9922_s23  ;;  %9403 = vrot.lane.b32.xlu1 %v9402_v35, %s9920_s21  ;;  %v6096_v33 = vrot.slane %v16073_v62, 1  ;;  %v6472_v35 = vrot.slane %v16133_v50, 3  ;;  %v6529_v40 = vrot.slane %v16126_v9, 5  ;;  %v6179_v8 = vrot.slane %v16073_v62, 4  ;;  %vm17923_vm0 = vmmov %vm17921_vm3 }
 0xc4e   : > { %v6527_v6 = vrot.slane %v16133_v50, 5  ;;  %v6558_v38 = vrot.slane %v16126_v9, 6  ;;  %v6207_v20 = vrot.slane %v16073_v62, 5  ;;  %v16200_v3 = vrot.slane %v6080_v46, 5 }
 0xc4f   : > { %v6475_v61 = vsel %vm1317_vm1, %v6472_v35, %v6474_v54  ;;  %v6097_v43 = vsel %vm17920_vm8, %v6094_v21, %v6096_v33  ;;  %v6473_v26 = vsel %vm1317_vm1, %v6470_v23, %v6472_v35  ;;  %v6153_v21 = vsel %vm1317_vm1, %v6150_v37, %v6152_v16 }
 0xc50   : > { %v9447_v12 = vpack.i.bf16 %v6096_v33, %v6097_v43  ;;  %v6530_v42 = vsel %vm1811_vm2, %v6527_v6, %v6529_v40  ;;  %v6180_v37 = vsel %vm1564_vm6, %v6177_v52, %v6179_v8  ;;  %v6208_v52 = vsel %vm1811_vm2, %v6205_v5, %v6207_v20 }
 0xc51   : > { %9418 = vrot.lane.b32.xlu0 %v9417_v25, %s9923_s28  ;;  %9413 = vrot.lane.b32.xlu1 %v9412_v44, %s9921_s15  ;;  %v6499_v25 = vrot.slane %v16133_v50, 4  ;;  %v9487_v44 = vpack.i.bf16 %v6475_v61, %v6473_v26  ;;  %v9462_v15 = vpack.i.bf16 %v6179_v8, %v6180_v37  ;;  %v6210_v51 = vsel %vm1811_vm2, %v6207_v20, %v16200_v3 }
 0xc52   : > { %v9467_v29 = vpack.i.bf16 %v6210_v51, %v6208_v52 }
 0xc53   : > { %v6502_v59 = vsel %vm1564_vm6, %v6499_v25, %v6501_v57  ;;  %v6500_v23 = vsel %vm1564_vm6, %v6497_v63, %v6499_v25  ;;  %v16202_v63 = vld [vmem:[#allocation2 + $0x28] sm:$0xff] }
 0xc54   : > { %v6420_v30 = vrot.slane %v16202_v63, 1  ;;  %v6449_v55 = vrot.slane %v16202_v63, 2  ;;  %v6476_v61 = vrot.slane %v16202_v63, 3 }
 0xc55   : > { %9428 = vrot.lane.b32.xlu0 %v9427_v32, %s9910_s22  ;;  %9423 = vrot.lane.b32.xlu1 %v9422_v28, %s9916_s30  ;;  %v9492_v32 = vpack.i.bf16 %v6502_v59, %v6500_v23  ;;  %v9457_v28 = vpack.i.bf16 %v6152_v16, %v6153_v21  ;;  %v6560_v59 = vrot.slane %v16202_v63, 6 }
 0xc56   : > { %v6421_v33 = vsel %vm17920_vm8, %v6418_v45, %v6420_v30  ;;  %v6450_v45 = vsel %vm1070_vm5, %v6447_v27, %v6449_v55  ;;  %v6477_v25 = vsel %vm1317_vm1, %v6474_v54, %v6476_v61  ;;  %vm17925_vm8 = vcmask 457728  }
 0xc57   : > { %v9512_v16 = vpack.i.bf16 %v6449_v55, %v6450_v45  ;;  %v9517_v27 = vpack.i.bf16 %v6476_v61, %v6477_v25  ;;  %v6561_v54 = vsel %vm17923_vm0, %v6558_v38, %v6560_v59 }
 0xc59   : > { %9453 = vrot.lane.b32.xlu0 %v9452_v49, %s9921_s15  ;;  %9433 = vrot.lane.b32.xlu1 %v9432_v13, %s9922_s23  ;;  %v6528_v49 = vsel %vm1811_vm2, %v6525_v24, %v6527_v6  ;;  %v6556_v13 = vrot.slane %v16133_v50, 6  ;;  %v16216_v24 = vrot.slane %v6080_v46, 6 }
 0xc5a   : > { %v9497_v1 = vpack.i.bf16 %v6530_v42, %v6528_v49 }
 0xc5b   : > { %v6559_v48 = vsel %vm17921_vm3, %v6556_v13, %v6558_v38 }
 0xc5d   : > { %9478 = vrot.lane.b32.xlu0 %v9477_v56, %s9920_s21  ;;  %9438 = vrot.lane.b32.xlu1 %v9437_v11, %s9923_s28  ;;  %v6236_v56 = vrot.slane %v16073_v62, 6  ;;  %v6557_v11 = vsel %vm17922_vm4, %v6554_v18, %v6556_v13  ;;  %v9507_v18 = vpack.i.bf16 %v6420_v30, %v6421_v33  ;;  %vm17924_vm4 = vmmov %vm17923_vm0 }
 0xc5e   : > { %v9502_v31 = vpack.i.bf16 %v6559_v48, %v6557_v11  ;;  %v6563_v21 = vsel %vm17924_vm4, %v6560_v59, %v16216_v24 }
 0xc5f   : > { %v6237_v5 = vsel %vm17921_vm3, %v6234_v7, %v6236_v56  ;;  %v6239_v35 = vsel %vm17923_vm0, %v6236_v56, %v16216_v24  ;;  %v9532_v8 = vpack.i.bf16 %v6563_v21, %v6561_v54  ;;  %vm17926_vm3 = vmmov %vm17925_vm8 }
 0xc60   : > { %vm17927_vm0 = vmmov %vm17926_vm3 }
 0xc61   : > { %9483 = vrot.lane.b32.xlu0 %v9482_v4, %s9921_s15  ;;  %9443 = vrot.lane.b32.xlu1 %v9442_v0, %s9910_s22  ;;  %v6531_v4 = vrot.slane %v16202_v63, 5  ;;  %v9472_v0 = vpack.i.bf16 %v6239_v35, %v6237_v5  ;;  %vm17928_vm4 = vmmov %vm17927_vm0 }
 0xc63   : > { %v6532_v43 = vsel %vm1811_vm2, %v6529_v40, %v6531_v4  ;;  %v6534_v7 = vsel %vm1811_vm2, %v6531_v4, %v16200_v3 }
 0xc64   : > { %v9527_v26 = vpack.i.bf16 %v6534_v7, %v6532_v43 }
 0xc65   : > { %9488 = vrot.lane.b32.xlu0 %v9487_v44, %s9916_s30  ;;  %9448 = vrot.lane.b32.xlu1 %v9447_v12, %s9920_s21  ;;  %v6503_v44 = vrot.slane %v16202_v63, 4 }
 0xc67   : > { %v6504_v12 = vsel %vm1564_vm6, %v6501_v57, %v6503_v44 }
 0xc68   : > { %v9522_v40 = vpack.i.bf16 %v6503_v44, %v6504_v12 }
 0xc69   : > { %9493 = vrot.lane.b32.xlu0 %v9492_v32, %s9922_s23  ;;  %9458 = vrot.lane.b32.xlu1 %v9457_v28, %s9916_s30 }
 0xc6d   : > { %9498 = vrot.lane.b32.xlu0 %v9497_v1, %s9923_s28  ;;  %9463 = vrot.lane.b32.xlu1 %v9462_v15, %s9922_s23 }
 0xc71   : > { %9503 = vrot.lane.b32.xlu0 %v9502_v31, %s9910_s22  ;;  %9468 = vrot.lane.b32.xlu1 %v9467_v29, %s9923_s28 }
 0xc75   : > { %9508 = vrot.lane.b32.xlu0 %v9507_v18, %s9920_s21  ;;  %9473 = vrot.lane.b32.xlu1 %v9472_v0, %s9910_s22 }
 0xc79   : > { %9513 = vrot.lane.b32.xlu0 %v9512_v16, %s9921_s15  ;;  %9528 = vrot.lane.b32.xlu1 %v9527_v26, %s9923_s28 }
 0xc7d   : > { %9518 = vrot.lane.b32.xlu0 %v9517_v27, %s9916_s30  ;;  %6783 = vrot.lane.b32.xlu1 %v15982_v10, %s9920_s21 }
 0xc81   : > { %9523 = vrot.lane.b32.xlu0 %v9522_v40, %s9922_s23  ;;  %6787 = vrot.lane.b32.xlu1 %v16031_v39, %s9920_s21 }
 0xc85   : > { %9533 = vrot.lane.b32.xlu0 %v9532_v8, %s9910_s22  ;;  %6781 = vrot.lane.b32.xlu1 %v15980_v2, %s9920_s21 }
 0xc89   : > { %6785 = vrot.lane.b32.xlu0 %v16006_v34, %s9920_s21 }
 0xc8d   : > { %6789 = vrot.lane.b32.xlu0 %v16024_v17, %s9920_s21 }
 0xca7   : > { %v9359_v57 = vpop.permute.xlu1 %9358 }
 0xca8   : > { %v9361_v38 = vunpack.i.h.bf16 %v9359_v57  ;;  %v9360_v37 = vunpack.i.l.bf16 %v9359_v57 }
 0xcaa   : > { %v6259_v51 = vsel %vm442_vm9, %v15956_v19, %v9361_v38  ;;  %v6258_v56 = vsel %vm442_vm9, %v15958_v41, %v9360_v37 }
 0xcab   : > { %v9364_v23 = vpop.permute.xlu1 %9363 }
 0xcac   : > { %v9366_v20 = vunpack.i.h.bf16 %v9364_v23  ;;  %v9365_v49 = vunpack.i.l.bf16 %v9364_v23 }
 0xcae   : > { %v6264_v29 = vsel %vm4192_vm12, %v6258_v56, %v9365_v49  ;;  %v6265_v33 = vsel %vm4192_vm12, %v6259_v51, %v9366_v20 }
 0xcaf   : > { %v9369_v6 = vpop.permute.xlu1 %9368 }
 0xcb0   : > { %v9371_v13 = vunpack.i.h.bf16 %v9369_v6  ;;  %v9370_v1 = vunpack.i.l.bf16 %v9369_v6 }
 0xcb2   : > { %v6270_v35 = vsel %vm2848_vm11, %v6264_v29, %v9370_v1  ;;  %v6271_v4 = vsel %vm2848_vm11, %v6265_v33, %v9371_v13 }
 0xcb3   : > { %v9389_v46 = vpop.permute.xlu0 %9388  ;;  %v9374_v32 = vpop.permute.xlu1 %9373 }
 0xcb4   : > { %v9376_v48 = vunpack.i.h.bf16 %v9374_v32  ;;  %v9375_v30 = vunpack.i.l.bf16 %v9374_v32  ;;  %v9391_v45 = vunpack.i.h.bf16 %v9389_v46  ;;  %v9390_v43 = vunpack.i.l.bf16 %v9389_v46 }
 0xcb6   : > { %v6276_v0 = vsel %vm4205_vm13, %v6270_v35, %v9375_v30  ;;  %v6277_v19 = vsel %vm4205_vm13, %v6271_v4, %v9376_v48  ;;  %v6261_v54 = vsel %vm442_vm9, %v16000_v60, %v9391_v45  ;;  %v6260_v23 = vsel %vm442_vm9, %v15967_v14, %v9390_v43 }
 0xcb7   : > { %v9394_v28 = vpop.permute.xlu0 %9393  ;;  %v9379_v42 = vpop.permute.xlu1 %9378 }
 0xcb8   : > { %v9381_v11 = vunpack.i.h.bf16 %v9379_v42  ;;  %v9380_v31 = vunpack.i.l.bf16 %v9379_v42  ;;  %v9396_v26 = vunpack.i.h.bf16 %v9394_v28  ;;  %v9395_v25 = vunpack.i.l.bf16 %v9394_v28 }
 0xcba   : > { %v6282_v7 = vsel %vm4212_vm14, %v6276_v0, %v9380_v31  ;;  %v6283_v16 = vsel %vm4212_vm14, %v6277_v19, %v9381_v11  ;;  %v6266_v28 = vsel %vm4192_vm12, %v6260_v23, %v9395_v25  ;;  %v6267_v42 = vsel %vm4192_vm12, %v6261_v54, %v9396_v26 }
 0xcbb   : > { %v9399_v15 = vpop.permute.xlu0 %9398  ;;  %v9384_v52 = vpop.permute.xlu1 %9383 }
 0xcbc   : > { %v9386_v55 = vunpack.i.h.bf16 %v9384_v52  ;;  %v9385_v5 = vunpack.i.l.bf16 %v9384_v52  ;;  %v9401_v12 = vunpack.i.h.bf16 %v9399_v15  ;;  %v9400_v59 = vunpack.i.l.bf16 %v9399_v15 }
 0xcbe   : > { %v6288_v44 = vsel %vm3048_vm15, %v6282_v7, %v9385_v5  ;;  %v6289_v27 = vsel %vm3048_vm15, %v6283_v16, %v9386_v55  ;;  %v6272_v38 = vsel %vm2848_vm11, %v6266_v28, %v9400_v59  ;;  %v6273_v37 = vsel %vm2848_vm11, %v6267_v42, %v9401_v12 }
 0xcbf   : > { %v9409_v18 = vpop.permute.xlu0 %9408  ;;  %v16277_v61 = vpop.permute.xlu1 %9403  ;;  %v6294_v6 = vpack.c.bf16 %v6289_v27, %v6288_v44 }
 0xcc0   : > { %v9411_v21 = vunpack.i.h.bf16 %v9409_v18  ;;  %v9410_v8 = vunpack.i.l.bf16 %v9409_v18  ;;  %v9406_v43 = vunpack.i.h.bf16 %v16277_v61  ;;  %v9405_v7 = vunpack.i.l.bf16 %v16277_v61 }
 0xcc1   : > { %v6298_v14 = vshrl.u32 %v6294_v6, 16  ;;  %v6301_v48 = vshll.u32 %v6294_v6, 16 }
 0xcc2   : > { %v6278_v60 = vsel %vm4205_vm13, %v6272_v38, %v9410_v8  ;;  %v6279_v49 = vsel %vm4205_vm13, %v6273_v37, %v9411_v21  ;;  %v6583_v8 = vsel %vm442_vm9, %v16064_v47, %v9406_v43  ;;  %v6582_v61 = vsel %vm442_vm9, %v15958_v41, %v9405_v7 }
 0xcc3   : > { %v9419_v40 = vpop.permute.xlu0 %9418  ;;  %v9414_v57 = vpop.permute.xlu1 %9413  ;;  %v6300_v33 = vrot.slane %v6298_v14, 2  ;;  %v6303_v55 = vrot.slane %v6301_v48, 3 }
 0xcc4   : > { %v9421_v46 = vunpack.i.h.bf16 %v9419_v40  ;;  %v9420_v32 = vunpack.i.l.bf16 %v9419_v40  ;;  %v9416_v26 = vunpack.i.h.bf16 %v9414_v57  ;;  %v9415_v25 = vunpack.i.l.bf16 %v9414_v57 }
 0xcc5   : > { %v6304_v45 = vor.u32 %v6303_v55, %v6300_v33 }
 0xcc6   : > { %v6284_v30 = vsel %vm4212_vm14, %v6278_v60, %v9420_v32  ;;  %v6285_v52 = vsel %vm4212_vm14, %v6279_v49, %v9421_v46  ;;  %v6588_v57 = vsel %vm4192_vm12, %v6582_v61, %v9415_v25  ;;  %v6589_v46 = vsel %vm4192_vm12, %v6583_v8, %v9416_v26 }
 0xcc7   : > { %v9429_v20 = vpop.permute.xlu0 %9428  ;;  %v9424_v13 = vpop.permute.xlu1 %9423 }
 0xcc8   : > { %v9431_v1 = vunpack.i.h.bf16 %v9429_v20  ;;  %v9430_v15 = vunpack.i.l.bf16 %v9429_v20  ;;  %v9426_v44 = vunpack.i.h.bf16 %v9424_v13  ;;  %v9425_v27 = vunpack.i.l.bf16 %v9424_v13 }
 0xcca   : > { %v6290_v51 = vsel %vm3048_vm15, %v6284_v30, %v9430_v15  ;;  %v6291_v56 = vsel %vm3048_vm15, %v6285_v52, %v9431_v1  ;;  %v6594_v42 = vsel %vm2848_vm11, %v6588_v57, %v9425_v27  ;;  %v6595_v38 = vsel %vm2848_vm11, %v6589_v46, %v9426_v44 }
 0xccb   : > { %v6295_v11 = vpack.c.bf16 %v6291_v56, %v6290_v51  ;;  %v16297_v31 = vpop.permute.xlu0 %9453  ;;  %v9434_v29 = vpop.permute.xlu1 %9433 }
 0xccc   : > { %v9436_v40 = vunpack.i.h.bf16 %v9434_v29  ;;  %v9435_v54 = vunpack.i.l.bf16 %v9434_v29 }
 0xccd   : > { %v6306_v5 = vshrl.u32 %v6295_v11, 16  ;;  %v6309_v35 = vshll.u32 %v6295_v11, 16 }
 0xcce   : > { %v6600_v47 = vsel %vm4205_vm13, %v6594_v42, %v9435_v54  ;;  %v6601_v41 = vsel %vm4205_vm13, %v6595_v38, %v9436_v40 }
 0xccf   : > { %v6308_v4 = vrot.slane %v6306_v5, 2  ;;  %v6311_v18 = vrot.slane %v6309_v35, 3  ;;  %v9479_v0 = vpop.permute.xlu0 %9478  ;;  %v9439_v19 = vpop.permute.xlu1 %9438 }
 0xcd0   : > { %v9441_v23 = vunpack.i.h.bf16 %v9439_v19  ;;  %v9440_v6 = vunpack.i.l.bf16 %v9439_v19  ;;  %v9481_v15 = vunpack.i.h.bf16 %v9479_v0  ;;  %v9480_v14 = vunpack.i.l.bf16 %v9479_v0 }
 0xcd1   : > { %v16301_v16 = vor.u32 %v6311_v18, %v6308_v4  ;;  %v9456_v0 = vunpack.i.h.bf16 %v16297_v31 }
 0xcd2   : > { %v6606_v60 = vsel %vm4212_vm14, %v6600_v47, %v9440_v6  ;;  %v6607_v49 = vsel %vm4212_vm14, %v6601_v41, %v9441_v23  ;;  %v6585_v5 = vsel %vm442_vm9, %v16133_v50, %v9481_v15  ;;  %v6584_v35 = vsel %vm442_vm9, %v16066_v36, %v9480_v14 }
 0xcd3   : > { %v9484_v12 = vpop.permute.xlu0 %9483  ;;  %v6313_v59 = vsel %vm4228_vm7, %v6304_v45, %v16301_v16  ;;  %v9444_v21 = vpop.permute.xlu1 %9443  ;;  %v9455_v45 = vunpack.i.l.bf16 %v16297_v31 }
 0xcd4   : > { %7844 = vmatmul.mubr.msk.bf16.vlgmr.msra.gmra.mxu1 %vm17925_vm8, %v6313_v59  ;;  %v9446_v32 = vunpack.i.h.bf16 %v9444_v21  ;;  %v9445_v28 = vunpack.i.l.bf16 %v9444_v21  ;;  %v9486_v30 = vunpack.i.h.bf16 %v9484_v12  ;;  %v9485_v52 = vunpack.i.l.bf16 %v9484_v12  ;;  %vm17929_vm8 = vmmov %vm17927_vm0 }
 0xcd5   : > { %7847 = vmatprep.mubr.msk.bf16.mxu1 %vm17887_vm10, %v17443_v22 }
 0xcd6   : > { %v6612_v13 = vsel %vm3048_vm15, %v6606_v60, %v9445_v28  ;;  %v6613_v1 = vsel %vm3048_vm15, %v6607_v49, %v9446_v32  ;;  %v6590_v43 = vsel %vm4192_vm12, %v6584_v35, %v9485_v52  ;;  %v6591_v7 = vsel %vm4192_vm12, %v6585_v5, %v9486_v30 }
 0xcd7   : > { %v9489_v37 = vpop.permute.xlu0 %9488  ;;  %v9449_v20 = vpop.permute.xlu1 %9448  ;;  %v6618_v56 = vpack.c.bf16 %v6613_v1, %v6612_v13 }
 0xcd8   : > { %v9451_v11 = vunpack.i.h.bf16 %v9449_v20  ;;  %v9450_v29 = vunpack.i.l.bf16 %v9449_v20  ;;  %v9491_v33 = vunpack.i.h.bf16 %v9489_v37  ;;  %v9490_v55 = vunpack.i.l.bf16 %v9489_v37 }
 0xcd9   : > { %v6622_v25 = vshrl.u32 %v6618_v56, 16  ;;  %v6625_v44 = vshll.u32 %v6618_v56, 16 }
 0xcda   : > { %v6263_v50 = vsel %vm442_vm9, %v16073_v62, %v9451_v11  ;;  %v6262_v36 = vsel %vm442_vm9, %v16021_v58, %v9450_v29  ;;  %v6596_v59 = vsel %vm2848_vm11, %v6590_v43, %v9490_v55  ;;  %v6597_v40 = vsel %vm2848_vm11, %v6591_v7, %v9491_v33 }
 0xcdb   : > { %v9494_v48 = vpop.permute.xlu0 %9493  ;;  %v9459_v51 = vpop.permute.xlu1 %9458  ;;  %v6268_v62 = vsel %vm4192_vm12, %v6262_v36, %v9455_v45  ;;  %v6269_v58 = vsel %vm4192_vm12, %v6263_v50, %v9456_v0  ;;  %v6624_v1 = vrot.slane %v6622_v25, 2  ;;  %v6627_v15 = vrot.slane %v6625_v44, 3 }
 0xcdc   : > { %v9496_v4 = vunpack.i.h.bf16 %v9494_v48  ;;  %v9495_v18 = vunpack.i.l.bf16 %v9494_v48  ;;  %v9461_v31 = vunpack.i.h.bf16 %v9459_v51  ;;  %v9460_v54 = vunpack.i.l.bf16 %v9459_v51 }
 0xcdd   : > { %v6628_v0 = vor.u32 %v6627_v15, %v6624_v1 }
 0xcde   : > { %v6602_v21 = vsel %vm4205_vm13, %v6596_v59, %v9495_v18  ;;  %v6603_v8 = vsel %vm4205_vm13, %v6597_v40, %v9496_v4  ;;  %v6274_v20 = vsel %vm2848_vm11, %v6268_v62, %v9460_v54  ;;  %v6275_v60 = vsel %vm2848_vm11, %v6269_v58, %v9461_v31 }
 0xcdf   : > { %v9499_v19 = vpop.permute.xlu0 %9498  ;;  %v9464_v26 = vpop.permute.xlu1 %9463 }
 0xce0   : > { %v9501_v27 = vunpack.i.h.bf16 %v9499_v19  ;;  %v9500_v12 = vunpack.i.l.bf16 %v9499_v19  ;;  %v9466_v23 = vunpack.i.h.bf16 %v9464_v26  ;;  %v9465_v6 = vunpack.i.l.bf16 %v9464_v26 }
 0xce2   : > { %v6608_v28 = vsel %vm4212_vm14, %v6602_v21, %v9500_v12  ;;  %v6609_v42 = vsel %vm4212_vm14, %v6603_v8, %v9501_v27  ;;  %v6280_v14 = vsel %vm4205_vm13, %v6274_v20, %v9465_v6  ;;  %v6281_v48 = vsel %vm4205_vm13, %v6275_v60, %v9466_v23 }
 0xce3   : > { %v9504_v61 = vpop.permute.xlu0 %9503  ;;  %v9469_v57 = vpop.permute.xlu1 %9468 }
 0xce4   : > { %v9506_v46 = vunpack.i.h.bf16 %v9504_v61  ;;  %v9505_v32 = vunpack.i.l.bf16 %v9504_v61  ;;  %v9471_v38 = vunpack.i.h.bf16 %v9469_v57  ;;  %v9470_v37 = vunpack.i.l.bf16 %v9469_v57 }
 0xce6   : > { %v6614_v47 = vsel %vm3048_vm15, %v6608_v28, %v9505_v32  ;;  %v6615_v41 = vsel %vm3048_vm15, %v6609_v42, %v9506_v46  ;;  %v6286_v29 = vsel %vm4212_vm14, %v6280_v14, %v9470_v37  ;;  %v6287_v33 = vsel %vm4212_vm14, %v6281_v48, %v9471_v38 }
 0xce7   : > { %v6619_v49 = vpack.c.bf16 %v6615_v41, %v6614_v47  ;;  %v9509_v13 = vpop.permute.xlu0 %9508  ;;  %v9474_v30 = vpop.permute.xlu1 %9473 }
 0xce8   : > { %v9476_v56 = vunpack.i.h.bf16 %v9474_v30  ;;  %v9475_v11 = vunpack.i.l.bf16 %v9474_v30  ;;  %v9510_v26 = vunpack.i.l.bf16 %v9509_v13  ;;  %v9511_v25 = vunpack.i.h.bf16 %v9509_v13 }
 0xce9   : > { %v6630_v52 = vshrl.u32 %v6619_v49, 16  ;;  %v6633_v51 = vshll.u32 %v6619_v49, 16 }
 0xcea   : > { %v6292_v35 = vsel %vm3048_vm15, %v6286_v29, %v9475_v11  ;;  %v6293_v4 = vsel %vm3048_vm15, %v6287_v33, %v9476_v56  ;;  %v6586_v54 = vsel %vm442_vm9, %v16126_v9, %v9510_v26  ;;  %v6587_v8 = vsel %vm442_vm9, %v16202_v63, %v9511_v25 }
 0xceb   : > { %v6632_v55 = vrot.slane %v6630_v52, 2  ;;  %v6635_v5 = vrot.slane %v6633_v51, 3  ;;  %v9514_v18 = vpop.permute.xlu0 %9513  ;;  %v6296_v19 = vpack.c.bf16 %v6293_v4, %v6292_v35  ;;  %v9529_v6 = vpop.permute.xlu1 %9528 }
 0xcec   : > { %v9515_v44 = vunpack.i.l.bf16 %v9514_v18  ;;  %v9516_v59 = vunpack.i.h.bf16 %v9514_v18  ;;  %v9531_v42 = vunpack.i.h.bf16 %v9529_v6  ;;  %v9530_v38 = vunpack.i.l.bf16 %v9529_v6 }
 0xced   : > { %v6636_v45 = vor.u32 %v6635_v5, %v6632_v55  ;;  %v6315_v43 = vshrl.u32 %v6296_v19, 16  ;;  %v6318_v7 = vshll.u32 %v6296_v19, 16  ;;  %v9895_v5 = vld [vmem:[%s16669_s11 + $0x1] ss:$0 sm:$0xff] }
 0xcee   : > { %v6592_v61 = vsel %vm4192_vm12, %v6586_v54, %v9515_v44  ;;  %v6593_v57 = vsel %vm4192_vm12, %v6587_v8, %v9516_v59 }
 0xcef   : > { %v9519_v27 = vpop.permute.xlu0 %9518  ;;  %v6637_v12 = vsel %vm4228_vm7, %v6628_v0, %v6636_v45  ;;  %v6317_v50 = vrot.slane %v6315_v43, 2  ;;  %v6320_v36 = vrot.slane %v6318_v7, 3 }
 0xcf0   : > { %7864 = vmatmul.mubr.msk.bf16.vlgmr.msra.gmra.mxu0 %vm17926_vm3, %v6637_v12  ;;  %v9521_v40 = vunpack.i.h.bf16 %v9519_v27  ;;  %v9520_v31 = vunpack.i.l.bf16 %v9519_v27  ;;  %vm17930_vm3 = vmmov %vm17927_vm0 }
 0xcf1   : > { %7867 = vmatprep.mubr.msk.bf16.mxu0 %vm17887_vm10, %v17443_v22  ;;  %v6321_v21 = vor.u32 %v6320_v36, %v6317_v50 }
 0xcf2   : > { %v6598_v58 = vsel %vm2848_vm11, %v6592_v61, %v9520_v31  ;;  %v6599_v28 = vsel %vm2848_vm11, %v6593_v57, %v9521_v40 }
 0xcf3   : > { %v9524_v23 = vpop.permute.xlu0 %9523  ;;  %v6322_v62 = vsel %vm4228_vm7, %v16301_v16, %v6321_v21 }
 0xcf4   : > { %v9526_v46 = vunpack.i.h.bf16 %v9524_v23  ;;  %v9525_v32 = vunpack.i.l.bf16 %v9524_v23  ;;  %7848 = vmatmul.mubr.msk.bf16.gmra.mxu1 %vm17927_vm0, %v6322_v62  ;;  %vm17931_vm0 = vcmask 63488  }
 0xcf5   : > { %7851 = vmatprep.mubr.msk.bf16.mxu1 %vm17887_vm10, %v17443_v22 }
 0xcf6   : > { %v6604_v9 = vsel %vm4205_vm13, %v6598_v58, %v9525_v32  ;;  %v6605_v63 = vsel %vm4205_vm13, %v6599_v28, %v9526_v46 }
 0xcf7   : > { %v9534_v37 = vpop.permute.xlu0 %9533  ;;  %v6610_v16 = vsel %vm4212_vm14, %v6604_v9, %v9530_v38  ;;  %v6611_v20 = vsel %vm4212_vm14, %v6605_v63, %v9531_v42 }
 0xcf8   : > { %v9536_v47 = vunpack.i.h.bf16 %v9534_v37  ;;  %v9535_v41 = vunpack.i.l.bf16 %v9534_v37 }
 0xcfa   : > { %v6616_v60 = vsel %vm3048_vm15, %v6610_v16, %v9535_v41  ;;  %v6617_v49 = vsel %vm3048_vm15, %v6611_v20, %v9536_v47  ;;  %v6784_v41 = vpop.permute.xlu1 %6783 }
 0xcfb   : > { %v6620_v13 = vpack.c.bf16 %v6617_v49, %v6616_v60 }
 0xcfc   : > { %7852 = vmatmul.mubr.msk.bf16.gmra.mxu1 %vm17928_vm4, %v6321_v21  ;;  %vm17932_vm4 = vcmask 1046528  }
 0xcfd   : > { %v6639_v1 = vshrl.u32 %v6620_v13, 16  ;;  %v6642_v15 = vshll.u32 %v6620_v13, 16  ;;  %7887 = vmatprep.mubr.msk.bf16.mxu1 %vm17887_vm10, %v17443_v22 }
 0xcff   : > { %v6641_v14 = vrot.slane %v6639_v1, 2  ;;  %v6644_v48 = vrot.slane %v6642_v15, 3 }
 0xd01   : > { %v6645_v30 = vor.u32 %v6644_v48, %v6641_v14 }
 0xd03   : > { %v6646_v52 = vsel %vm4228_vm7, %v6636_v45, %v6645_v30 }
 0xd04   : > { %7868 = vmatmul.mubr.msk.bf16.gmra.mxu0 %vm17929_vm8, %v6646_v52  ;;  %v6786_v52 = vpop.permute.xlu0 %6785  ;;  %vm17933_vm8 = vmmov %vm17932_vm4 }
 0xd05   : > { %7871 = vmatprep.mubr.msk.bf16.mxu0 %vm17887_vm10, %v17443_v22 }
 0xd0c   : > { %7872 = vmatmul.mubr.msk.bf16.gmra.mxu0 %vm17930_vm3, %v6645_v30  ;;  %vm17934_vm3 = vmmov %vm17932_vm4 }
 0xd0d   : > { %7883 = vmatprep.mubr.msk.bf16.mxu0 %vm17887_vm10, %v17443_v22 }
 0xd94   : > { %v16385_v51 = vpop.f32.mrf.mxu1 }
 0xd95   : > { %v6388_v27 = vadd.f32 %v9895_v5, %v16385_v51 }
 0xd96   : > { %v7845_v56 = vpop.f32.mrf.mxu1 }
 0xd97   : > { %v6788_v56 = vpop.permute.xlu1 %6787 }
 0xd98   : > { %v16387_v11 = vpop.f32.mrf.mxu1 }
 0xd99   : > { %v6389_v35 = vadd.f32 %v9895_v5, %v16387_v11 }
 0xd9a   : > { %v7846_v29 = vpop.f32.mrf.mxu1 }
 0xdb0   : > { %v6714_v33 = vpop.f32.mrf.mxu0 }
 0xdb1   : > { %v6736_v50 = vadd.f32 %v6714_v33, %v6388_v27 }
 0xdb2   : > { %v7865_v55 = vpop.f32.mrf.mxu0 }
 0xdb3   : > { %v7494_v8 = vmul.f32 -1.442695, %v6736_v50  ;;  %v16428_v50 = vld [vmem:[#allocation2] sm:$0xff] }
 0xdb4   : > { %v6717_v4 = vpop.f32.mrf.mxu0  ;;  %v16393_v18 = vpop.f32.mrf.mxu1 }
 0xdb5   : > { %v6737_v19 = vadd.f32 %v6717_v4, %v6389_v35  ;;  %v6390_v36 = vadd.f32 %v9895_v5, %v16393_v18  ;;  %v6782_v4 = vpop.permute.xlu1 %6781 }
 0xdb6   : > { %v7866_v0 = vpop.f32.mrf.mxu0  ;;  %v7849_v43 = vpop.f32.mrf.mxu1 }
 0xdb7   : > { %v7495_v45 = vmul.f32 -1.442695, %v6737_v19  ;;  %v6790_v19 = vpop.permute.xlu0 %6789 }
 0xdb8   : > { %v16395_v7 = vpop.f32.mrf.mxu1 }
 0xdb9   : > { %9863 = vpow2.f32 %v7495_v45  ;;  %v6391_v23 = vadd.f32 %v9895_v5, %v16395_v7 }
 0xdba   : > { %v7850_v26 = vpop.f32.mrf.mxu1 }
 0xdbc   : > { %v16397_v25 = vpop.f32.mrf.mxu1 }
 0xdbd   : > { %v6392_v62 = vadd.f32 %v9895_v5, %v16397_v25 }
 0xdbe   : > { %v7853_v44 = vpop.f32.mrf.mxu1 }
 0xdc0   : > { %v6385_v12 = vpop.f32.mrf.mxu1 }
 0xdc2   : > { %v7854_v59 = vpop.f32.mrf.mxu1 }
 0xdc3   : > { %v6868_v59 = vrot.slane %v16428_v50, 2 }
 0xdc4   : > { %v6722_v40 = vpop.f32.mrf.mxu0 }
 0xdc5   : > { %v6738_v31 = vadd.f32 %v6722_v40, %v6390_v36  ;;  %v6839_v40 = vrot.slane %v16428_v50, 1 }
 0xdc6   : > { %v9864_v54 = vpop.eup %9863  ;;  %v7869_v21 = vpop.f32.mrf.mxu0 }
 0xdc7   : > { %v6757_v61 = vadd.f32 1.0, %v9864_v54  ;;  %v7496_v6 = vmul.f32 -1.442695, %v6738_v31 }
 0xdc8   : > { %v6725_v57 = vpop.f32.mrf.mxu0 }
 0xdc9   : > { %9865 = vrcp.f32 %v6757_v61  ;;  %v6739_v46 = vadd.f32 %v6725_v57, %v6391_v23 }
 0xdca   : > { %9867 = vpow2.f32 %v7496_v6  ;;  %v7870_v32 = vpop.f32.mrf.mxu0 }
 0xdcb   : > { %9869 = vpow2.f32 %v7494_v8  ;;  %v7497_v58 = vmul.f32 -1.442695, %v6739_v46 }
 0xdcc   : > { %v6730_v28 = vpop.f32.mrf.mxu0 }
 0xdcd   : > { %9871 = vpow2.f32 %v7497_v58  ;;  %v6740_v9 = vadd.f32 %v6730_v28, %v6392_v62 }
 0xdce   : > { %v7873_v63 = vpop.f32.mrf.mxu0 }
 0xdcf   : > { %v7498_v42 = vmul.f32 -1.442695, %v6740_v9 }
 0xdd0   : > { %v6733_v38 = vpop.f32.mrf.mxu0 }
 0xdd1   : > { %9873 = vpow2.f32 %v7498_v42 }
 0xdd2   : > { %v7874_v37 = vpop.f32.mrf.mxu0 }
 0xdd6   : > { %v16403_v47 = vpop.eup %9865 }
 0xdd7   : > { %v9868_v16 = vpop.eup %9867  ;;  %v6797_v20 = vmul.f32 %v16403_v47, %v6784_v41 }
 0xdd8   : > { %v9870_v60 = vpop.eup %9869  ;;  %v6758_v49 = vadd.f32 1.0, %v9868_v16 }
 0xdd9   : > { %6808 = vrot.lane.b32.xlu0 %v6797_v20, %s9924_s27  ;;  %v6756_v1 = vadd.f32 1.0, %v9870_v60 }
 0xdda   : > { %v9872_v13 = vpop.eup %9871  ;;  %9875 = vrcp.f32 %v6758_v49 }
 0xddb   : > { %v6759_v15 = vadd.f32 1.0, %v9872_v13 }
 0xddd   : > { %9877 = vrcp.f32 %v6759_v15 }
 0xdde   : > { %v9874_v14 = vpop.eup %9873  ;;  %9879 = vrcp.f32 %v6756_v1 }
 0xddf   : > { %v6760_v48 = vadd.f32 1.0, %v9874_v14 }
 0xde1   : > { %9881 = vrcp.f32 %v6760_v48 }
 0xde7   : > { %v16407_v30 = vpop.eup %9875 }
 0xde8   : > { %v6798_v29 = vmul.f32 %v16407_v30, %v6786_v52 }
 0xdea   : > { %v16410_v33 = vpop.eup %9877  ;;  %6810 = vrot.lane.b32.xlu1 %v6798_v29, %s9924_s27 }
 0xdeb   : > { %v6799_v55 = vmul.f32 %v16410_v33, %v6788_v56  ;;  %v16414_v5 = vpop.eup %9879 }
 0xdec   : > { %v6796_v0 = vmul.f32 %v16414_v5, %v6782_v4 }
 0xded   : > { %6812 = vrot.lane.b32.xlu0 %v6799_v55, %s9924_s27 }
 0xdee   : > { %v16417_v35 = vpop.eup %9881 }
 0xdef   : > { %v6800_v45 = vmul.f32 %v16417_v35, %v6790_v19 }
 0xdf1   : > { %6806 = vrot.lane.b32.xlu0 %v6796_v0, %s9924_s27  ;;  %6814 = vrot.lane.b32.xlu1 %v6800_v45, %s9924_s27 }
 0xe4b   : > { %v6809_v43 = vpop.permute.xlu0 %6808 }
 0xe4c   : > { %6822 = vst.msk [vmem:[#allocation2 + $0x10] sm:$0xff] %vm442_vm9, %v6809_v43 }
 0xe53   : > { %v16430_v36 = vld [vmem:[#allocation2 + $0x10] sm:$0xff] }
 0xe54   : > { %v6871_v54 = vrot.slane %v16430_v36, 2  ;;  %v6842_v21 = vrot.slane %v16430_v36, 1  ;;  %v6925_v57 = vrot.slane %v16430_v36, 4  ;;  %v6898_v46 = vrot.slane %v16430_v36, 3 }
 0xe55   : > { %v6953_v14 = vrot.slane %v16430_v36, 5 }
 0xe5c   : > { %v6811_v26 = vpop.permute.xlu1 %6810 }
 0xe5d   : > { %6823 = vst.msk [vmem:[#allocation2 + $0x18] sm:$0xff] %vm442_vm9, %v6811_v26 }
 0xe5f   : > { %v6813_v44 = vpop.permute.xlu0 %6812 }
 0xe60   : > { %6824 = vst.msk [vmem:[#allocation2 + $0x20] sm:$0xff] %vm442_vm9, %v6813_v44 }
 0xe63   : > { %v6807_v27 = vpop.permute.xlu0 %6806  ;;  %v6815_v12 = vpop.permute.xlu1 %6814 }
 0xe64   : > { %6821 = vst.msk [vmem:[#allocation2 + $0x8] sm:$0xff] %vm442_vm9, %v6807_v27  ;;  %v16450_v38 = vld [vmem:[#allocation2 + $0x18] sm:$0xff] }
 0xe65   : > { %6825 = vst.msk [vmem:[#allocation2 + $0x28] sm:$0x7f] %vm17931_vm0, %v6815_v12  ;;  %v6955_v49 = vrot.slane %v16450_v38, 5  ;;  %v6844_v13 = vrot.slane %v16450_v38, 1  ;;  %vm17935_vm0 = vmmov %vm17934_vm3  ;;  %v6873_v19 = vrot.slane %v16450_v38, 2 }
 0xe67   : > { %v16444_v32 = vld [vmem:[#allocation2 + $0x20] sm:$0xff]  ;;  %v6956_v55 = vsel %vm1811_vm2, %v6953_v14, %v6955_v49  ;;  %v6845_v4 = vsel %vm17935_vm0, %v6842_v21, %v6844_v13  ;;  %v6874_v12 = vsel %vm1070_vm5, %v6871_v54, %v6873_v19 }
 0xe68   : > { %v6957_v16 = vrot.slane %v16444_v32, 5  ;;  %v6846_v20 = vrot.slane %v16444_v32, 1  ;;  %v6875_v56 = vrot.slane %v16444_v32, 2  ;;  %v6902_v44 = vrot.slane %v16444_v32, 3 }
 0xe6a   : > { %v6958_v48 = vsel %vm1811_vm2, %v6955_v49, %v6957_v16  ;;  %v6847_v52 = vsel %vm17934_vm3, %v6844_v13, %v6846_v20  ;;  %v6876_v43 = vsel %vm1070_vm5, %v6873_v19, %v6875_v56  ;;  %v6984_v49 = vrot.slane %v16450_v38, 6 }
 0xe6b   : > { %v16434_v31 = vld [vmem:[#allocation2 + $0x8] sm:$0xff]  ;;  %v9577_v0 = vpack.i.bf16 %v6958_v48, %v6956_v55  ;;  %v9557_v45 = vpack.i.bf16 %v6847_v52, %v6845_v4  ;;  %v6982_v48 = vrot.slane %v16430_v36, 6 }
 0xe6c   : > { %v6869_v8 = vrot.slane %v16434_v31, 2  ;;  %v6840_v61 = vrot.slane %v16434_v31, 1  ;;  %v6924_v23 = vrot.slane %v16434_v31, 4  ;;  %v6897_v6 = vrot.slane %v16434_v31, 3  ;;  %v16460_v60 = vld [vmem:[#allocation2 + $0x28] sm:$0xff] }
 0xe6d   : > { %v6848_v29 = vrot.slane %v16460_v60, 1  ;;  %v6877_v27 = vrot.slane %v16460_v60, 2 }
 0xe6e   : > { %v6870_v62 = vsel %vm1070_vm5, %v6868_v59, %v6869_v8  ;;  %v6872_v58 = vsel %vm1070_vm5, %v6869_v8, %v6871_v54  ;;  %v6841_v28 = vsel %vm17932_vm4, %v6839_v40, %v6840_v61  ;;  %v6843_v9 = vsel %vm17933_vm8, %v6840_v61, %v6842_v21  ;;  %vm17936_vm4 = vmmov %vm17935_vm0  ;;  %v9667_v40 = vld [vmem:[%s16668_s10 + $0x34] ss:$0 sps:$4 sm:$0xff]  }
 0xe6f   : > { %v9542_v63 = vpack.i.bf16 %v6872_v58, %v6870_v62  ;;  %v9537_v42 = vpack.i.bf16 %v6843_v9, %v6841_v28  ;;  %v6926_v37 = vsel %vm1564_vm6, %v6924_v23, %v6925_v57  ;;  %v6899_v41 = vsel %vm1317_vm1, %v6897_v6, %v6898_v46 }
 0xe70   : > { %v9552_v1 = vpack.i.bf16 %v6926_v37, %v6924_v23  ;;  %v9547_v15 = vpack.i.bf16 %v6899_v41, %v6897_v6  ;;  %v6849_v26 = vsel %vm17936_vm4, %v6846_v20, %v6848_v29  ;;  %v6900_v59 = vrot.slane %v16450_v38, 3 }
 0xe71   : > { %9543 = vrot.lane.b32.xlu0 %v9542_v63, %s9921_s15  ;;  %9538 = vrot.lane.b32.xlu1 %v9537_v42, %s9920_s21  ;;  %v9562_v21 = vpack.i.bf16 %v6876_v43, %v6874_v12  ;;  %v9587_v8 = vpack.i.bf16 %v6848_v29, %v6849_v26  ;;  %v6929_v61 = vrot.slane %v16444_v32, 4  ;;  %v6878_v6 = vsel %vm1070_vm5, %v6875_v56, %v6877_v27 }
 0xe72   : > { %v6903_v23 = vsel %vm1317_vm1, %v6900_v59, %v6902_v44  ;;  %v6904_v62 = vrot.slane %v16460_v60, 3  ;;  %v7106_v58 = vsel %vm1564_vm6, %v9667_v40, 0  ;;  %v6901_v54 = vsel %vm1317_vm1, %v6898_v46, %v6900_v59 }
 0xe73   : > { %v6927_v28 = vrot.slane %v16450_v38, 4  ;;  %7876 = vmatpush3.bf16.msra.mxu0 %v7106_v58  ;;  %7899 = vmatpush3.bf16.msra.mxu1 %v7106_v58  ;;  %v9567_v9 = vpack.i.bf16 %v6903_v23, %v6901_v54  ;;  %v9592_v63 = vpack.i.bf16 %v6877_v27, %v6878_v6  ;;  %v6986_v41 = vrot.slane %v16444_v32, 6 }
 0xe74   : > { %7877 = vmatprep.subr.bf16.mxu0 %v17443_v22  ;;  %7896 = vmatprep.subr.bf16.mxu1 %v17443_v22  ;;  %v6905_v37 = vsel %vm1317_vm1, %v6902_v44, %v6904_v62  ;;  %v6931_v20 = vrot.slane %v16460_v60, 4  ;;  %vm17937_vm1 = vcmask 1041408   ;;  %v6988_v29 = vrot.slane %v16460_v60, 6 }
 0xe75   : > { %9553 = vrot.lane.b32.xlu0 %v9552_v1, %s9922_s23  ;;  %9548 = vrot.lane.b32.xlu1 %v9547_v15, %s9916_s30  ;;  %v6930_v42 = vsel %vm1564_vm6, %v6927_v28, %v6929_v61  ;;  %v6928_v46 = vsel %vm1564_vm6, %v6925_v57, %v6927_v28  ;;  %v9597_v1 = vpack.i.bf16 %v6904_v62, %v6905_v37  ;;  %v6959_v15 = vrot.slane %v16460_v60, 5  ;;  %v9668_v57 = vld [vmem:[%s16668_s10 + $0x2c] sm:$0xff]   ;;  %vm17938_vm5 = vmmov %vm17937_vm1 }
 0xe76   : > { %v9572_v13 = vpack.i.bf16 %v6930_v42, %v6928_v46  ;;  %v6987_v52 = vsel %vm17937_vm1, %v6984_v49, %v6986_v41  ;;  %v6932_v56 = vsel %vm1564_vm6, %v6929_v61, %v6931_v20  ;;  %v6985_v55 = vsel %vm17938_vm5, %v6982_v48, %v6984_v49  ;;  %vm17939_vm6 = vmmov %vm17937_vm1 }
 0xe77   : > { %v9582_v4 = vpack.i.bf16 %v6987_v52, %v6985_v55  ;;  %v9602_v19 = vpack.i.bf16 %v6931_v20, %v6932_v56  ;;  %7878 = vmatpush3.bf16.msra.mxu0 %v9668_v57  ;;  %7900 = vmatpush3.bf16.msra.mxu1 %v9668_v57  ;;  %v6962_v43 = vsel %vm1811_vm2, %v6959_v15, %v16200_v3  ;;  %vm17940_vm8 = vmmov %vm17937_vm1  ;;  %v6981_v27 = vrot.slane %v16434_v31, 6 }
 0xe78   : > { %v6989_v26 = vsel %vm17939_vm6, %v6986_v41, %v6988_v29  ;;  %v6991_v44 = vsel %vm17940_vm8, %v6988_v29, %v16216_v24  ;;  %7879 = vmatprep.subr.bf16.mxu0 %v17443_v22  ;;  %7897 = vmatprep.subr.bf16.mxu1 %v17443_v22  ;;  %vm17941_vm3 = vmmov %vm17937_vm1 }
 0xe79   : > { %9578 = vrot.lane.b32.xlu0 %v9577_v0, %s9923_s28  ;;  %9558 = vrot.lane.b32.xlu1 %v9557_v45, %s9920_s21  ;;  %v6960_v0 = vsel %vm1811_vm2, %v6957_v16, %v6959_v15  ;;  %v6952_v45 = vrot.slane %v16434_v31, 5  ;;  %v9617_v12 = vpack.i.bf16 %v6991_v44, %v6989_v26  ;;  %v6983_v59 = vsel %vm17941_vm3, %v6981_v27, %v6982_v48 }
 0xe7a   : > { %v9607_v16 = vpack.i.bf16 %v6962_v43, %v6960_v0  ;;  %v9622_v40 = vpack.i.bf16 %v6983_v59, %v6981_v27 }
 0xe7b   : > { %v6954_v3 = vsel %vm1811_vm2, %v6952_v45, %v6953_v14  ;;  %v9670_v14 = vld [vmem:[%s16668_s10 + $0x1c] sm:$0xff]   ;;  %vm17942_vm2 = vcmask 457728  }
 0xe7c   : > { %v9612_v24 = vpack.i.bf16 %v6954_v3, %v6952_v45 }
 0xe7d   : > { %9563 = vrot.lane.b32.xlu1 %v9562_v21, %s9921_s15  ;;  %9588 = vrot.lane.b32.xlu0 %v9587_v8, %s9920_s21  ;;  %v9669_v21 = vld [vmem:[%s16668_s10 + $0x24] sm:$0xff]  }
 0xe7e   : > { %7880 = vmatpush3.bf16.msra.mxu0 %v9669_v21  ;;  %7901 = vmatpush3.bf16.msra.mxu1 %v9669_v21 }
 0xe7f   : > { %7898 = vmatprep.subr.bf16.mxu1 %v17443_v22  ;;  %7881 = vmatprep.subr.bf16.mxu0 %v17443_v22 }
 0xe81   : > { %9568 = vrot.lane.b32.xlu1 %v9567_v9, %s9916_s30  ;;  %9593 = vrot.lane.b32.xlu0 %v9592_v63, %s9921_s15 }
 0xe82   : > { %7902 = vmatpush3.bf16.msra.mxu1 %v9670_v14  ;;  %7882 = vmatpush3.bf16.msra.mxu0 %v9670_v14 }
 0xe85   : > { %9573 = vrot.lane.b32.xlu1 %v9572_v13, %s9922_s23  ;;  %9598 = vrot.lane.b32.xlu0 %v9597_v1, %s9916_s30 }
 0xe89   : > { %9583 = vrot.lane.b32.xlu1 %v9582_v4, %s9910_s22  ;;  %9603 = vrot.lane.b32.xlu0 %v9602_v19, %s9922_s23 }
 0xe8d   : > { %9608 = vrot.lane.b32.xlu1 %v9607_v16, %s9923_s28  ;;  %9618 = vrot.lane.b32.xlu0 %v9617_v12, %s9910_s22 }
 0xe91   : > { %9613 = vrot.lane.b32.xlu1 %v9612_v24, %s9923_s28  ;;  %9623 = vrot.lane.b32.xlu0 %v9622_v40, %s9910_s22 }
 0xee3   : > { %v9544_v8 = vpop.permute.xlu0 %9543  ;;  %v9539_v61 = vpop.permute.xlu1 %9538 }
 0xee4   : > { %v9541_v54 = vunpack.i.h.bf16 %v9539_v61  ;;  %v9540_v28 = vunpack.i.l.bf16 %v9539_v61  ;;  %v9546_v42 = vunpack.i.h.bf16 %v9544_v8  ;;  %v9545_v37 = vunpack.i.l.bf16 %v9544_v8 }
 0xee6   : > { %v7011_v41 = vsel %vm442_vm9, %v16434_v31, %v9541_v54  ;;  %v7010_v20 = vsel %vm442_vm9, %v16428_v50, %v9540_v28 }
 0xee7   : > { %v16551_v23 = vpop.permute.xlu0 %9553  ;;  %v16553_v6 = vpop.permute.xlu1 %9548  ;;  %v7016_v57 = vsel %vm4192_vm12, %v7010_v20, %v9545_v37  ;;  %v7017_v55 = vsel %vm4192_vm12, %v7011_v41, %v9546_v42 }
 0xee8   : > { %v9556_v29 = vunpack.i.h.bf16 %v16551_v23  ;;  %v9551_v16 = vunpack.i.h.bf16 %v16553_v6  ;;  %v9550_v12 = vunpack.i.l.bf16 %v16553_v6 }
 0xeeb   : > { %v9579_v62 = vpop.permute.xlu0 %9578  ;;  %v9559_v58 = vpop.permute.xlu1 %9558 }
 0xeec   : > { %v9561_v46 = vunpack.i.h.bf16 %v9559_v58  ;;  %v9560_v49 = vunpack.i.l.bf16 %v9559_v58  ;;  %v9581_v21 = vunpack.i.h.bf16 %v9579_v62  ;;  %v9580_v14 = vunpack.i.l.bf16 %v9579_v62 }
 0xeee   : > { %v7013_v31 = vsel %vm442_vm9, %v16450_v38, %v9561_v46  ;;  %v7012_v50 = vsel %vm442_vm9, %v16430_v36, %v9560_v49 }
 0xeef   : > { %v9589_v9 = vpop.permute.xlu0 %9588  ;;  %v9564_v63 = vpop.permute.xlu1 %9563 }
 0xef0   : > { %v9566_v15 = vunpack.i.h.bf16 %v9564_v63  ;;  %v9565_v48 = vunpack.i.l.bf16 %v9564_v63  ;;  %v9591_v4 = vunpack.i.h.bf16 %v9589_v9  ;;  %v9590_v19 = vunpack.i.l.bf16 %v9589_v9 }
 0xef2   : > { %v7018_v43 = vsel %vm4192_vm12, %v7012_v50, %v9565_v48  ;;  %v7019_v26 = vsel %vm4192_vm12, %v7013_v31, %v9566_v15  ;;  %v7015_v28 = vsel %vm442_vm9, %v16460_v60, %v9591_v4  ;;  %v7014_v6 = vsel %vm442_vm9, %v16444_v32, %v9590_v19 }
 0xef3   : > { %v9594_v13 = vpop.permute.xlu0 %9593  ;;  %v9569_v1 = vpop.permute.xlu1 %9568  ;;  %v9555_v60 = vunpack.i.l.bf16 %v16551_v23  ;;  %v7022_v19 = vsel %vm2848_vm11, %v7016_v57, %v9550_v12 }
 0xef4   : > { %v9571_v52 = vunpack.i.h.bf16 %v9569_v1  ;;  %v9570_v56 = vunpack.i.l.bf16 %v9569_v1  ;;  %v9596_v59 = vunpack.i.h.bf16 %v9594_v13  ;;  %v9595_v36 = vunpack.i.l.bf16 %v9594_v13 }
 0xef6   : > { %v7024_v3 = vsel %vm2848_vm11, %v7018_v43, %v9570_v56  ;;  %v7025_v38 = vsel %vm2848_vm11, %v7019_v26, %v9571_v52  ;;  %v7020_v62 = vsel %vm4192_vm12, %v7014_v6, %v9595_v36  ;;  %v7021_v46 = vsel %vm4192_vm12, %v7015_v28, %v9596_v59 }
 0xef7   : > { %v9599_v0 = vpop.permute.xlu0 %9598  ;;  %v9574_v45 = vpop.permute.xlu1 %9573  ;;  %v7023_v26 = vsel %vm2848_vm11, %v7017_v55, %v9551_v16  ;;  %vm17945_vm12 = vcmask 63488  }
 0xef8   : > { %v9576_v44 = vunpack.i.h.bf16 %v9574_v45  ;;  %v9575_v27 = vunpack.i.l.bf16 %v9574_v45  ;;  %v9601_v8 = vunpack.i.h.bf16 %v9599_v0  ;;  %v9600_v61 = vunpack.i.l.bf16 %v9599_v0 }
 0xef9   : > { %v7029_v55 = vsel %vm4205_vm13, %v7023_v26, %v9556_v29 }
 0xefa   : > { %v7030_v24 = vsel %vm4205_vm13, %v7024_v3, %v9575_v27  ;;  %v7031_v40 = vsel %vm4205_vm13, %v7025_v38, %v9576_v44  ;;  %v7026_v32 = vsel %vm2848_vm11, %v7020_v62, %v9600_v61  ;;  %v7027_v1 = vsel %vm2848_vm11, %v7021_v46, %v9601_v8  ;;  %vm17943_vm11 = vmmov %vm17942_vm2 }
 0xefb   : > { %v9604_v58 = vpop.permute.xlu0 %9603  ;;  %v9584_v54 = vpop.permute.xlu1 %9583  ;;  %v7036_v41 = vsel %vm4212_vm14, %v7030_v24, %v9580_v14  ;;  %v7037_v20 = vsel %vm4212_vm14, %v7031_v40, %v9581_v21  ;;  %v7028_v61 = vsel %vm4205_vm13, %v7022_v19, %v9555_v60 }
 0xefc   : > { %v9586_v9 = vunpack.i.h.bf16 %v9584_v54  ;;  %v9585_v63 = vunpack.i.l.bf16 %v9584_v54  ;;  %v9606_v42 = vunpack.i.h.bf16 %v9604_v58  ;;  %v9605_v37 = vunpack.i.l.bf16 %v9604_v58 }
 0xefe   : > { %v7042_v49 = vsel %vm3048_vm15, %v7036_v41, %v9585_v63  ;;  %v7043_v13 = vsel %vm3048_vm15, %v7037_v20, %v9586_v9  ;;  %v7032_v0 = vsel %vm4205_vm13, %v7026_v32, %v9605_v37  ;;  %v7033_v45 = vsel %vm4205_vm13, %v7027_v1, %v9606_v42 }
 0xeff   : > { %v7047_v15 = vpack.c.bf16 %v7043_v13, %v7042_v49  ;;  %v9619_v48 = vpop.permute.xlu0 %9618  ;;  %v9609_v52 = vpop.permute.xlu1 %9608 }
 0xf00   : > { %v9621_v56 = vunpack.i.h.bf16 %v9619_v48  ;;  %v9620_v31 = vunpack.i.l.bf16 %v9619_v48  ;;  %v9611_v50 = vunpack.i.h.bf16 %v9609_v52  ;;  %v9610_v4 = vunpack.i.l.bf16 %v9609_v52 }
 0xf01   : > { %v7058_v43 = vshrl.u32 %v7047_v15, 16  ;;  %v7061_v44 = vshll.u32 %v7047_v15, 16 }
 0xf02   : > { %v7039_v27 = vsel %vm4212_vm14, %v7033_v45, %v9611_v50  ;;  %v7038_v3 = vsel %vm4212_vm14, %v7032_v0, %v9610_v4 }
 0xf03   : > { %v7045_v38 = vsel %vm3048_vm15, %v7039_v27, %v9621_v56  ;;  %v7044_v59 = vsel %vm3048_vm15, %v7038_v3, %v9620_v31  ;;  %v9624_v36 = vpop.permute.xlu0 %9623  ;;  %v9614_v24 = vpop.permute.xlu1 %9613  ;;  %v7060_v14 = vrot.slane %v7058_v43, 2  ;;  %v7063_v16 = vrot.slane %v7061_v44, 3 }
 0xf04   : > { %v7048_v40 = vpack.c.bf16 %v7045_v38, %v7044_v59  ;;  %v9626_v57 = vunpack.i.h.bf16 %v9624_v36  ;;  %v9625_v12 = vunpack.i.l.bf16 %v9624_v36  ;;  %v9616_v21 = vunpack.i.h.bf16 %v9614_v24 }
 0xf05   : > { %v9615_v8 = vunpack.i.l.bf16 %v9614_v24  ;;  %v7064_v20 = vor.u32 %v7063_v16, %v7060_v14  ;;  %v6771_v43 = vadd.f32 %v16385_v51, %v15896_v53  ;;  %v6772_v27 = vadd.f32 %v16387_v11, %v15896_v53 }
 0xf06   : > { %v7067_v58 = vshrl.u32 %v7048_v40, 16  ;;  %v7070_v54 = vshll.u32 %v7048_v40, 16  ;;  %v7035_v28 = vsel %vm4212_vm14, %v7029_v55, %v9616_v21  ;;  %v6773_v3 = vadd.f32 %v16393_v18, %v15896_v53 }
 0xf07   : > { %v7034_v6 = vsel %vm4212_vm14, %v7028_v61, %v9615_v8  ;;  %v7041_v9 = vsel %vm3048_vm15, %v7035_v28, %v9626_v57  ;;  %v6774_v40 = vadd.f32 %v16395_v7, %v15896_v53  ;;  %v6775_v57 = vadd.f32 %v16397_v25, %v15896_v53 }
 0xf08   : > { %v7069_v63 = vrot.slane %v7067_v58, 2  ;;  %v7072_v42 = vrot.slane %v7070_v54, 3  ;;  %v7040_v37 = vsel %vm3048_vm15, %v7034_v6, %v9625_v12  ;;  %vm17944_vm15 = vmmov %vm17942_vm2  ;;  %v7194_v25 = vsub.f32 1.0, %v16414_v5 }
 0xf09   : > { %v7046_v41 = vpack.c.bf16 %v7041_v9, %v7040_v37  ;;  %v7196_v58 = vsub.f32 1.0, %v16407_v30  ;;  %v7195_v54 = vsub.f32 1.0, %v16403_v47  ;;  %v7198_v37 = vsub.f32 1.0, %v16417_v35 }
 0xf0a   : > { %v7073_v62 = vor.u32 %v7072_v42, %v7069_v63  ;;  %v7199_v55 = vmul.f32 %v7194_v25, %v15980_v2 }
 0xf0b   : > { %v7050_v46 = vshrl.u32 %v7046_v41, 16  ;;  %v7053_v23 = vshll.u32 %v7046_v41, 16  ;;  %v7201_v63 = vmul.f32 %v7196_v58, %v16006_v34  ;;  %v7200_v2 = vmul.f32 %v7195_v54, %v15982_v10 }
 0xf0c   : > { %v7074_v29 = vsel %vm4228_vm7, %v7064_v20, %v7073_v62  ;;  %v7197_v41 = vsub.f32 1.0, %v16410_v33  ;;  %v7203_v34 = vmul.f32 %v7198_v37, %v16024_v17 }
 0xf0d   : > { %v7052_v49 = vrot.slane %v7050_v46, 2  ;;  %v7055_v13 = vrot.slane %v7053_v23, 3  ;;  %7888 = vmatmul.mubr.msk.bf16.vlgmr.msra.gmra.mxu1 %vm17942_vm2, %v7074_v29 }
 0xf0e   : > { %7891 = vmatprep.mubr.msk.bf16.mxu1 %vm17887_vm10, %v17443_v22  ;;  %v7202_v29 = vmul.f32 %v7197_v41, %v16031_v39 }
 0xf0f   : > { %v7056_v60 = vor.u32 %v7055_v13, %v7052_v49 }
 0xf11   : > { %v7065_v32 = vsel %vm4228_vm7, %v7056_v60, %v7064_v20 }
 0xf12   : > { %7884 = vmatmul.mubr.msk.bf16.vlgmr.msra.gmra.mxu0 %vm17943_vm11, %v7065_v32 }
 0xf15   : > { %7892 = vmatmul.mubr.msk.bf16.gmra.mxu1 %vm17944_vm15, %v7073_v62 }
 0xfcd   : > { %v7150_v1 = vpop.f32.mrf.mxu1 }
 0xfcf   : > { %v7889_v15 = vpop.f32.mrf.mxu1 }
 0xfd1   : > { %v7153_v48 = vpop.f32.mrf.mxu1 }
 0xfd2   : > { %v7142_v52 = vpop.f32.mrf.mxu0 }
 0xfd3   : > { %7169 = vrot.lane.b32.xlu1 %v7142_v52, %s9921_s15  ;;  %v7890_v56 = vpop.f32.mrf.mxu1 }
 0xfd4   : > { %v7885_v31 = vpop.f32.mrf.mxu0 }
 0xfd5   : > { %v7158_v50 = vpop.f32.mrf.mxu1 }
 0xfd6   : > { %v7145_v4 = vpop.f32.mrf.mxu0 }
 0xfd7   : > { %7173 = vrot.lane.b32.xlu1 %v7150_v1, %s9921_s15  ;;  %7171 = vrot.lane.b32.xlu0 %v7145_v4, %s9921_s15  ;;  %v7893_v22 = vpop.f32.mrf.mxu1 }
 0xfd8   : > { %v7886_v19 = vpop.f32.mrf.mxu0 }
 0xfd9   : > { %v7161_v0 = vpop.f32.mrf.mxu1 }
 0xfdb   : > { %7177 = vrot.lane.b32.xlu1 %v7158_v50, %s9921_s15  ;;  %7175 = vrot.lane.b32.xlu0 %v7153_v48, %s9921_s15  ;;  %v7894_v45 = vpop.f32.mrf.mxu1 }
0x1045   : > { %v7170_v26 = vpop.permute.xlu1 %7169 }
0x1046   : > { %v7184_v44 = vadd.f32 %v7170_v26, %v6771_v43 }
0x1048   : > { %9883 = vtanh.f32 %v7184_v44 }
0x1049   : > { %v7174_v38 = vpop.permute.xlu1 %7173  ;;  %v7172_v59 = vpop.permute.xlu0 %7171 }
0x104a   : > { %v7186_v36 = vadd.f32 %v7174_v38, %v6773_v3  ;;  %v7185_v24 = vadd.f32 %v7172_v59, %v6772_v27 }
0x104c   : > { %9885 = vtanh.f32 %v7186_v36 }
0x104d   : > { %9887 = vtanh.f32 %v7185_v24  ;;  %v7178_v51 = vpop.permute.xlu1 %7177  ;;  %v7176_v12 = vpop.permute.xlu0 %7175 }
0x104e   : > { %v7188_v21 = vadd.f32 %v7178_v51, %v6775_v57  ;;  %v7187_v11 = vadd.f32 %v7176_v12, %v6774_v40 }
0x1050   : > { %9889 = vtanh.f32 %v7188_v21 }
0x1051   : > { %9891 = vtanh.f32 %v7187_v11 }
0x1055   : > { %v9884_v18 = vpop.eup %9883 }
0x1056   : > { %7209 = vrot.lane.b32.xlu0 %v9884_v18, %s9925_s29 }
0x1059   : > { %v9886_v14 = vpop.eup %9885 }
0x105a   : > { %v9888_v8 = vpop.eup %9887  ;;  %7213 = vrot.lane.b32.xlu0 %v9886_v14, %s9925_s29 }
0x105b   : > { %7211 = vrot.lane.b32.xlu1 %v9888_v8, %s9925_s29 }
0x105d   : > { %v9890_v7 = vpop.eup %9889 }
0x105e   : > { %v9892_v53 = vpop.eup %9891  ;;  %7217 = vrot.lane.b32.xlu0 %v9890_v7, %s9925_s29 }
0x105f   : > { %7215 = vrot.lane.b32.xlu1 %v9892_v53, %s9925_s29 }
0x10c8   : > { %v7210_v61 = vpop.permute.xlu0 %7209 }
0x10c9   : > { %v7224_v16 = vmul.f32 %v16414_v5, %v7210_v61 }
0x10cb   : > { %v7229_v28 = vadd.f32 %v7224_v16, %v7199_v55 }
0x10cc   : > { %v7214_v6 = vpop.permute.xlu0 %7213 }
0x10cd   : > { %7249 = vst.msk [vmem:[%s15131_s20 + $0x78] sm:$0xff] %vm442_vm9, %v7229_v28  ;;  %v7212_v9 = vpop.permute.xlu1 %7211  ;;  %v7226_v42 = vmul.f32 %v16407_v30, %v7214_v6 }
0x10ce   : > { %v7225_v5 = vmul.f32 %v16403_v47, %v7212_v9 }
0x10cf   : > { %v7231_v20 = vadd.f32 %v7226_v42, %v7201_v63 }
0x10d0   : > { %v7230_v62 = vadd.f32 %v7225_v5, %v7200_v2  ;;  %v7218_v46 = vpop.permute.xlu0 %7217 }
0x10d1   : > { %7251 = vst.msk [vmem:[%s15131_s20 + $0x88] sm:$0xff] %vm442_vm9, %v7231_v20  ;;  %v7216_v23 = vpop.permute.xlu1 %7215  ;;  %v7228_v30 = vmul.f32 %v16417_v35, %v7218_v46 }
0x10d2   : > { %7250 = vst.msk [vmem:[%s15131_s20 + $0x80] sm:$0xff] %vm442_vm9, %v7230_v62  ;;  %v7227_v10 = vmul.f32 %v16410_v33, %v7216_v23 }
0x10d3   : > { %v7233_v49 = vadd.f32 %v7228_v30, %v7203_v34 }
0x10d4   : > { %v7232_v47 = vadd.f32 %v7227_v10, %v7202_v29 }
0x10d5   : > { %7253 = vst.msk [vmem:[%s15131_s20 + $0x98] sm:$0x7f] %vm17945_vm12, %v7233_v49 }
0x10d6   : > { %7252 = vst.msk [vmem:[%s15131_s20 + $0x90] sm:$0xff] %vm442_vm9, %v7232_v47 }
0x10d7 PF: > { %s23_s25 = sadd.s32 1, %s9902_s25  }
0x10d8   : > { %p20_p4 = scmp.ge.s32.totalorder %s23_s25, 4  }
0x10da   :  { %22 = sbr.rel (!%p20_p4) target bundleno = 1 (0x1), region = 107 }

</bundles_post_ra>
